<compile_context>
chip_gen: v6e
topology: v6e:2x2x1
jax: 0.10.0
libtpu: 0.0.40
codegen_flags: <defaults>
</compile_context>

<pallas_src>
import jax
import jax.numpy as jnp
from jax.experimental import pallas as pl
from jax.experimental.pallas import tpu as pltpu

EMB_SIZE = 512
FF_DIM = 2048
LN_EPS = 1e-5


def _round_up(n, m):
    return ((n + m - 1) // m) * m


def ffn_kernel(x_ref, w1_ref, w2_ref, o_ref):
    # x_ref: (TM, EMB) f32, w1_ref: (EMB, FF) bf16, w2_ref: (FF, EMB) bf16
    x = x_ref[...]  # f32, kept for the residual add / LayerNorm

    # Linear(512 -> 2048, bias=False) + ReLU.  bf16 operands -> MXU fast path,
    # f32 accumulation via preferred_element_type.
    h = jnp.dot(x.astype(jnp.bfloat16), w1_ref[...],
                preferred_element_type=jnp.float32)
    h = jnp.maximum(h, 0.0)

    # Linear(2048 -> 512, bias=False) + residual (residual in f32).
    y = jnp.dot(h.astype(jnp.bfloat16), w2_ref[...],
                preferred_element_type=jnp.float32) + x

    # LayerNorm over the last (emb) axis, gamma=1, beta=0, eps=1e-5, in f32.
    # axis=-1 reductions map to the XLU slot and overlap with MXU work.
    mean = jnp.mean(y, axis=-1, keepdims=True)
    centered = y - mean
    var = jnp.mean(centered * centered, axis=-1, keepdims=True)
    o_ref[...] = (centered * jax.lax.rsqrt(var + LN_EPS)).astype(o_ref.dtype)


def _build_ffn_call(padded_tokens, tm, out_dtype, *, single_buffer_weights):
    # Constant-index weight blocks don't need double buffering; Buffered(1)
    # halves their VMEM footprint (most useful on v7x's 64 MiB VMEM).
    w_kwargs = dict(pipeline_mode=pl.Buffered(1)) if single_buffer_weights else {}
    return pl.pallas_call(
        ffn_kernel,
        out_shape=jax.ShapeDtypeStruct((padded_tokens, EMB_SIZE), out_dtype),
        grid_spec=pltpu.PrefetchScalarGridSpec(
            num_scalar_prefetch=0,
            grid=(padded_tokens // tm,),
            in_specs=[
                pl.BlockSpec((tm, EMB_SIZE), lambda i: (i, 0)),                # x rows
                pl.BlockSpec((EMB_SIZE, FF_DIM), lambda i: (0, 0), **w_kwargs),  # W1 resident
                pl.BlockSpec((FF_DIM, EMB_SIZE), lambda i: (0, 0), **w_kwargs),  # W2 resident
            ],
            out_specs=pl.BlockSpec((tm, EMB_SIZE), lambda i: (i, 0)),
        ),
        compiler_params=pltpu.CompilerParams(
            # Row axis is fully parallel -> sharded across v7x's 2 TensorCores
            # whenever the grid has >= 2 steps (any workload >= 2*tm tokens).
            dimension_semantics=("parallel",),
            # Real footprint @ tm=256: ~8 MiB bf16 weights (2-buf), ~2 MiB
            # streamed x/out tiles, ~2 MiB f32 intermediate. 48 MiB leaves
            # headroom below v7x's 64 MiB physical VMEM.
            vmem_limit_bytes=48 << 20,
        ),
    )


def feed_forward_net(x, w1, w2, *, tm=256):
    """x: (batch, seq, EMB_SIZE) float32 -> (batch, seq, EMB_SIZE) float32."""
    batch, seq, emb = x.shape
    assert emb == EMB_SIZE
    tokens = batch * seq
    x2d = x.reshape(tokens, emb)

    # Row tile: multiple of 8 (sublane), never larger than needed for tiny inputs.
    tm_eff = min(tm, _round_up(tokens, 8))
    padded = _round_up(tokens, tm_eff)
    if padded != tokens:
        # Pad token rows up to the tile; LayerNorm on zero rows is finite
        # (var=0 -> rsqrt(eps)) and the padding is sliced off afterwards.
        x2d = jnp.pad(x2d, ((0, padded - tokens), (0, 0)))

    # bf16 weights: MXU-native on v5e/v6e/v7x, halves resident weight VMEM
    # and HBM weight traffic. Accumulation stays f32 inside the kernel.
    w1b = w1.astype(jnp.bfloat16)
    w2b = w2.astype(jnp.bfloat16)

    try:
        out2d = _build_ffn_call(padded, tm_eff, x.dtype,
                                single_buffer_weights=True)(x2d, w1b, w2b)
    except Exception:
        # Fallback if this jax version rejects pipeline_mode=pl.Buffered(1)
        # on a top-level pallas_call BlockSpec (default double buffering).
        out2d = _build_ffn_call(padded, tm_eff, x.dtype,
                                single_buffer_weights=False)(x2d, w1b, w2b)

    return out2d[:tokens].reshape(batch, seq, emb)


def reference(x, w1, w2):
    # Pure-f32 reference matching the PyTorch module semantics.
    h = jnp.maximum(x @ w1, 0.0)
    y = h @ w2 + x
    mean = jnp.mean(y, axis=-1, keepdims=True)
    var = jnp.mean((y - mean) ** 2, axis=-1, keepdims=True)
    return (y - mean) * jax.lax.rsqrt(var + LN_EPS)


if __name__ == "__main__":
    key = jax.random.PRNGKey(0)
    k_x, k_w1, k_w2 = jax.random.split(key, 3)

    # Deterministic init mimicking nn.Linear's uniform(-1/sqrt(fan_in), 1/sqrt(fan_in))
    b1 = 1.0 / (EMB_SIZE ** 0.5)
    b2 = 1.0 / (FF_DIM ** 0.5)
    w1 = jax.random.uniform(k_w1, (EMB_SIZE, FF_DIM), jnp.float32, -b1, b1)
    w2 = jax.random.uniform(k_w2, (FF_DIM, EMB_SIZE), jnp.float32, -b2, b2)

    # Small shape consistent with the module (batch=2, seq=8, emb=512).
    batch, seq = 2, 8
    x = jax.random.normal(k_x, (batch, seq, EMB_SIZE), dtype=jnp.float32)

    out = jax.block_until_ready(feed_forward_net(x, w1, w2))
    ref = reference(x, w1, w2)
    assert out.shape == (batch, seq, EMB_SIZE)
    # bf16 matmul operands (f32 accumulation) -> relaxed tolerance vs f32 reference.
    assert jnp.allclose(out, ref, atol=2e-2, rtol=2e-2), "mismatch vs f32 reference"

    # Second check exercising the multi-step grid + padding path
    # (400 tokens -> tm=256, padded to 512, grid of 2 parallel steps).
    k_x2 = jax.random.split(k_x)[0]
    x_big = jax.random.normal(k_x2, (4, 100, EMB_SIZE), dtype=jnp.float32)
    out_big = jax.block_until_ready(feed_forward_net(x_big, w1, w2))
    ref_big = reference(x_big, w1, w2)
    assert out_big.shape == x_big.shape
    assert jnp.allclose(out_big, ref_big, atol=2e-2, rtol=2e-2), "mismatch (tiled path)"

    print("KERNEL_OK")
</pallas_src>

<mosaic_0001>
module attributes {stable_mosaic.version = 11 : i64} {
  func.func @ffn_kernel(%arg0: i32, %arg1: memref<16x512xf32, #tpu.memory_space<vmem>>, %arg2: memref<512x2048xbf16, #tpu.memory_space<vmem>>, %arg3: memref<2048x512xbf16, #tpu.memory_space<vmem>>, %arg4: memref<16x512xf32, #tpu.memory_space<vmem>>) attributes {dimension_semantics = [#tpu.dimension_semantics<parallel>], iteration_bounds = array<i64: 1>, scalar_prefetch = 0 : i64, scratch_operands = 0 : i64, tpu.core_type = #tpu.core_type<tc>, window_params = [{transform_indices = @transform_0, window_bounds = array<i64: 16, 512>}, {pipeline_mode = #tpu.pipeline_mode<synchronous>, transform_indices = @transform_1, window_bounds = array<i64: 512, 2048>}, {pipeline_mode = #tpu.pipeline_mode<synchronous>, transform_indices = @transform_2, window_bounds = array<i64: 2048, 512>}, {transform_indices = @transform_3, window_bounds = array<i64: 16, 512>}]} {
    %c0 = arith.constant 0 : index
    %c0_0 = arith.constant 0 : index
    %0 = vector.load %arg1[%c0, %c0_0] : memref<16x512xf32, #tpu.memory_space<vmem>>, vector<16x512xf32>
    %1 = arith.truncf %0 : vector<16x512xf32> to vector<16x512xbf16>
    %c0_1 = arith.constant 0 : index
    %c0_2 = arith.constant 0 : index
    %2 = vector.load %arg2[%c0_1, %c0_2] : memref<512x2048xbf16, #tpu.memory_space<vmem>>, vector<512x2048xbf16>
    %cst = arith.constant dense<0.000000e+00> : vector<16x2048xf32>
    %3 = tpu.matmul %1, %2, %cst {dimension_numbers = #tpu.dot_dimension_numbers<[1], [0], [0], [1], [0, 0, 1, 1], [], []>} : vector<16x512xbf16>, vector<512x2048xbf16>, vector<16x2048xf32> -> vector<16x2048xf32>
    %cst_3 = arith.constant 0.000000e+00 : f32
    %4 = vector.broadcast %cst_3 : f32 to vector<16x2048xf32>
    %5 = arith.maximumf %3, %4 : vector<16x2048xf32>
    %6 = arith.truncf %5 : vector<16x2048xf32> to vector<16x2048xbf16>
    %c0_4 = arith.constant 0 : index
    %c0_5 = arith.constant 0 : index
    %7 = vector.load %arg3[%c0_4, %c0_5] : memref<2048x512xbf16, #tpu.memory_space<vmem>>, vector<2048x512xbf16>
    %cst_6 = arith.constant dense<0.000000e+00> : vector<16x512xf32>
    %8 = tpu.matmul %6, %7, %cst_6 {dimension_numbers = #tpu.dot_dimension_numbers<[1], [0], [0], [1], [0, 0, 1, 1], [], []>} : vector<16x2048xbf16>, vector<2048x512xbf16>, vector<16x512xf32> -> vector<16x512xf32>
    %9 = arith.addf %8, %0 : vector<16x512xf32>
    %cst_7 = arith.constant dense<0.000000e+00> : vector<16xf32>
    %10 = vector.multi_reduction <add>, %9, %cst_7 [1] : vector<16x512xf32> to vector<16xf32>
    %11 = vector.shape_cast %10 : vector<16xf32> to vector<16x1xf32>
    %cst_8 = arith.constant 5.120000e+02 : f32
    %12 = vector.broadcast %cst_8 : f32 to vector<16x1xf32>
    %13 = arith.divf %11, %12 : vector<16x1xf32>
    %14 = vector.broadcast %13 : vector<16x1xf32> to vector<16x512xf32>
    %15 = arith.subf %9, %14 : vector<16x512xf32>
    %16 = arith.mulf %15, %15 : vector<16x512xf32>
    %cst_9 = arith.constant dense<0.000000e+00> : vector<16xf32>
    %17 = vector.multi_reduction <add>, %16, %cst_9 [1] : vector<16x512xf32> to vector<16xf32>
    %18 = vector.shape_cast %17 : vector<16xf32> to vector<16x1xf32>
    %cst_10 = arith.constant 5.120000e+02 : f32
    %19 = vector.broadcast %cst_10 : f32 to vector<16x1xf32>
    %20 = arith.divf %18, %19 : vector<16x1xf32>
    %cst_11 = arith.constant 9.99999974E-6 : f32
    %21 = vector.broadcast %cst_11 : f32 to vector<16x1xf32>
    %22 = arith.addf %20, %21 : vector<16x1xf32>
    %23 = math.rsqrt %22 : vector<16x1xf32>
    %24 = vector.broadcast %23 : vector<16x1xf32> to vector<16x512xf32>
    %25 = arith.mulf %15, %24 : vector<16x512xf32>
    %c0_12 = arith.constant 0 : index
    %c0_13 = arith.constant 0 : index
    %26 = vector.load %arg4[%c0_12, %c0_13] : memref<16x512xf32, #tpu.memory_space<vmem>>, vector<16x512xf32>
    tpu.vector_store %arg4[%c0_12, %c0_13], %25 {strides = array<i32>} : memref<16x512xf32, #tpu.memory_space<vmem>>, vector<16x512xf32>,
    return
  }
  func.func @transform_0(%arg0: i32) -> (i32, i32) {
    %c0_i32 = arith.constant 0 : i32
    %c0_i32_0 = arith.constant 0 : i32
    return %arg0, %c0_i32 : i32, i32
  }
  func.func @transform_1(%arg0: i32) -> (i32, i32) {
    %c0_i32 = arith.constant 0 : i32
    %c0_i32_0 = arith.constant 0 : i32
    %c0_i32_1 = arith.constant 0 : i32
    return %c0_i32, %c0_i32_0 : i32, i32
  }
  func.func @transform_2(%arg0: i32) -> (i32, i32) {
    %c0_i32 = arith.constant 0 : i32
    %c0_i32_0 = arith.constant 0 : i32
    %c0_i32_1 = arith.constant 0 : i32
    return %c0_i32, %c0_i32_0 : i32, i32
  }
  func.func @transform_3(%arg0: i32) -> (i32, i32) {
    %c0_i32 = arith.constant 0 : i32
    %c0_i32_0 = arith.constant 0 : i32
    return %arg0, %c0_i32 : i32, i32
  }
}

module attributes {stable_mosaic.version = 11 : i64} {
  func.func @ffn_kernel(%arg0: i32, %arg1: memref<16x512xf32, #tpu.memory_space<vmem>>, %arg2: memref<512x2048xbf16, #tpu.memory_space<vmem>>, %arg3: memref<2048x512xbf16, #tpu.memory_space<vmem>>, %arg4: memref<16x512xf32, #tpu.memory_space<vmem>>) attributes {dimension_semantics = [#tpu.dimension_semantics<parallel>], iteration_bounds = array<i64: 1>, scalar_prefetch = 0 : i64, scratch_operands = 0 : i64, tpu.core_type = #tpu.core_type<tc>, window_params = [{transform_indices = @transform_0, window_bounds = array<i64: 16, 512>}, {pipeline_mode = #tpu.pipeline_mode<synchronous>, transform_indices = @transform_1, window_bounds = array<i64: 512, 2048>}, {pipeline_mode = #tpu.pipeline_mode<synchronous>, transform_indices = @transform_2, window_bounds = array<i64: 2048, 512>}, {transform_indices = @transform_3, window_bounds = array<i64: 16, 512>}]} {
    %c0 = arith.constant 0 : index
    %c0_0 = arith.constant 0 : index
    %0 = vector.load %arg1[%c0, %c0_0] : memref<16x512xf32, #tpu.memory_space<vmem>>, vector<16x512xf32>
    %1 = arith.truncf %0 : vector<16x512xf32> to vector<16x512xbf16>
    %c0_1 = arith.constant 0 : index
    %c0_2 = arith.constant 0 : index
    %2 = vector.load %arg2[%c0_1, %c0_2] : memref<512x2048xbf16, #tpu.memory_space<vmem>>, vector<512x2048xbf16>
    %cst = arith.constant dense<0.000000e+00> : vector<16x2048xf32>
    %3 = tpu.matmul %1, %2, %cst {dimension_numbers = #tpu.dot_dimension_numbers<[1], [0], [0], [1], [0, 0, 1, 1], [], []>} : vector<16x512xbf16>, vector<512x2048xbf16>, vector<16x2048xf32> -> vector<16x2048xf32>
    %cst_3 = arith.constant 0.000000e+00 : f32
    %4 = vector.broadcast %cst_3 : f32 to vector<16x2048xf32>
    %5 = arith.maximumf %3, %4 : vector<16x2048xf32>
    %6 = arith.truncf %5 : vector<16x2048xf32> to vector<16x2048xbf16>
    %c0_4 = arith.constant 0 : index
    %c0_5 = arith.constant 0 : index
    %7 = vector.load %arg3[%c0_4, %c0_5] : memref<2048x512xbf16, #tpu.memory_space<vmem>>, vector<2048x512xbf16>
    %cst_6 = arith.constant dense<0.000000e+00> : vector<16x512xf32>
    %8 = tpu.matmul %6, %7, %cst_6 {dimension_numbers = #tpu.dot_dimension_numbers<[1], [0], [0], [1], [0, 0, 1, 1], [], []>} : vector<16x2048xbf16>, vector<2048x512xbf16>, vector<16x512xf32> -> vector<16x512xf32>
    %9 = arith.addf %8, %0 : vector<16x512xf32>
    %cst_7 = arith.constant dense<0.000000e+00> : vector<16xf32>
    %10 = vector.multi_reduction <add>, %9, %cst_7 [1] : vector<16x512xf32> to vector<16xf32>
    %11 = vector.shape_cast %10 : vector<16xf32> to vector<16x1xf32>
    %cst_8 = arith.constant 5.120000e+02 : f32
    %12 = vector.broadcast %cst_8 : f32 to vector<16x1xf32>
    %13 = arith.divf %11, %12 : vector<16x1xf32>
    %14 = vector.broadcast %13 : vector<16x1xf32> to vector<16x512xf32>
    %15 = arith.subf %9, %14 : vector<16x512xf32>
    %16 = arith.mulf %15, %15 : vector<16x512xf32>
    %cst_9 = arith.constant dense<0.000000e+00> : vector<16xf32>
    %17 = vector.multi_reduction <add>, %16, %cst_9 [1] : vector<16x512xf32> to vector<16xf32>
    %18 = vector.shape_cast %17 : vector<16xf32> to vector<16x1xf32>
    %cst_10 = arith.constant 5.120000e+02 : f32
    %19 = vector.broadcast %cst_10 : f32 to vector<16x1xf32>
    %20 = arith.divf %18, %19 : vector<16x1xf32>
    %cst_11 = arith.constant 9.99999974E-6 : f32
    %21 = vector.broadcast %cst_11 : f32 to vector<16x1xf32>
    %22 = arith.addf %20, %21 : vector<16x1xf32>
    %23 = math.rsqrt %22 : vector<16x1xf32>
    %24 = vector.broadcast %23 : vector<16x1xf32> to vector<16x512xf32>
    %25 = arith.mulf %15, %24 : vector<16x512xf32>
    %c0_12 = arith.constant 0 : index
    %c0_13 = arith.constant 0 : index
    %26 = vector.load %arg4[%c0_12, %c0_13] : memref<16x512xf32, #tpu.memory_space<vmem>>, vector<16x512xf32>
    tpu.vector_store %arg4[%c0_12, %c0_13], %25 {strides = array<i32>} : memref<16x512xf32, #tpu.memory_space<vmem>>, vector<16x512xf32>,
    return
  }
  func.func @transform_0(%arg0: i32) -> (i32, i32) {
    %c0_i32 = arith.constant 0 : i32
    %c0_i32_0 = arith.constant 0 : i32
    return %arg0, %c0_i32 : i32, i32
  }
  func.func @transform_1(%arg0: i32) -> (i32, i32) {
    %c0_i32 = arith.constant 0 : i32
    %c0_i32_0 = arith.constant 0 : i32
    %c0_i32_1 = arith.constant 0 : i32
    return %c0_i32, %c0_i32_0 : i32, i32
  }
  func.func @transform_2(%arg0: i32) -> (i32, i32) {
    %c0_i32 = arith.constant 0 : i32
    %c0_i32_0 = arith.constant 0 : i32
    %c0_i32_1 = arith.constant 0 : i32
    return %c0_i32, %c0_i32_0 : i32, i32
  }
  func.func @transform_3(%arg0: i32) -> (i32, i32) {
    %c0_i32 = arith.constant 0 : i32
    %c0_i32_0 = arith.constant 0 : i32
    return %arg0, %c0_i32 : i32, i32
  }
}

</mosaic_0001>

<bundles_post_ra>
// kernel: tpu_custom_call.1
= control target key start
LH: loop header
LB: loop body
LE: loop exit
PB: predicated region body
PF: predicated region fallthrough
CT: control target
= control target key end

     0   :  { %8 = vsyncpa [#allocation3], 0  ;;  %s9905_s0 = inlined_call_operand.hbm [shape: f32[16,512], index: 0, kind: input, shape index: {}]   ;;  %s9906_s1 = inlined_call_operand.hbm [shape: bf16[512,2048], index: 1, kind: input, shape index: {}]   ;;  %s9907_s2 = inlined_call_operand.hbm [shape: bf16[2048,512], index: 2, kind: input, shape index: {}]   ;;  %s9908_s3 = inlined_call_operand.hbm [shape: f32[16,512], index: 3, kind: output, shape index: {}]  }
   0x1   :  { %9 = vsyncpa [#allocation6], 0 }
   0x2   :  { %10 = vsyncpa [#allocation4], 0  ;;  %s9615_s12 = smov [#allocation5]  }
   0x3   :  { %s28_s13 = sshll.u32 %s9615_s12, 4  ;;  %s29_s13 = int_to_ptr.vmem [resolvable:$true] %s28_s13 }
   0x4   :  { %s9537_s14 = scalar_lea.vmem %s29_s13, 65536  ;;  %p9542_p1 = scmp.lt.s32.totalorder %s29_s13, %s29_s13 }
   0x5   :  { %p9538_p0 = scmp.ne.s32.totalorder %s29_s13, %s9537_s14  ;;  %p9543_p2 = scmp.lt.s32.totalorder %s9537_s14, %s9537_s14 }
   0x7   :  { %p9544_p3 = por %p9543_p2, %p9542_p1 }
   0x9   :  { %p9545_p4 = pnand %p9544_p3, %p9538_p0 }
   0xb   :  { %9548 = shalt.err (!%p9545_p4)
}
   0xc   :  { %s9616_s15 = smov 1024   ;;  %s9617_s16 = smov 64  }
   0xd   :  { %34 = dma.hbm_to_vmem [thread:$0]  %s9906_s1, 65536, %s29_s13, [#allocation6], %s9616_s15, %s9616_s15, %s9617_s16  }
   0xe   :  { %s9618_s19 = smov [#allocation2]  }
   0xf   :  { %s16_s20 = sshll.u32 %s9618_s19, 4  ;;  %s17_s20 = int_to_ptr.vmem [resolvable:$true] %s16_s20 }
  0x10   :  { %s9557_s21 = scalar_lea.vmem %s17_s20, 1024  ;;  %p9562_p6 = scmp.lt.s32.totalorder %s17_s20, %s17_s20 }
  0x11   :  { %p9558_p5 = scmp.ne.s32.totalorder %s17_s20, %s9557_s21  ;;  %p9563_p7 = scmp.lt.s32.totalorder %s9557_s21, %s9557_s21 }
  0x13   :  { %p9564_p8 = por %p9563_p7, %p9562_p6 }
  0x15   :  { %p9565_p9 = pnand %p9564_p8, %p9558_p5 }
  0x17   :  { %9568 = shalt.err (!%p9565_p9)
}
  0x18   :  { %s9619_s22 = smov 512   ;;  %s9620_s23 = smov 32  }
  0x19   :  { %22 = dma.hbm_to_vmem [thread:$0]  %s9905_s0, 1024, %s17_s20, [#allocation3], %s9619_s22, %s9619_s22, %s9620_s23  }
  0x1a   :  { %s9621_s1 = smov [#allocation7]  }
  0x1b   :  { %s40_s26 = sshll.u32 %s9621_s1, 4  ;;  %s41_s26 = int_to_ptr.vmem [resolvable:$true] %s40_s26 }
  0x1c   :  { %s9577_s27 = scalar_lea.vmem %s41_s26, 65536  ;;  %p9582_p11 = scmp.lt.s32.totalorder %s41_s26, %s41_s26 }
  0x1d   :  { %p9578_p10 = scmp.ne.s32.totalorder %s41_s26, %s9577_s27  ;;  %p9583_p12 = scmp.lt.s32.totalorder %s9577_s27, %s9577_s27 }
  0x1f   :  { %p9584_p13 = por %p9583_p12, %p9582_p11 }
  0x21   :  { %p9585_p0 = pnand %p9584_p13, %p9578_p10 }
  0x23   :  { %9588 = shalt.err (!%p9585_p0)
}
  0x24   :  { %s9622_s28 = smov 256   ;;  %s9623_s29 = smov 16  }
  0x25   :  { %46 = dma.hbm_to_vmem [thread:$0]  %s9907_s2, 65536, %s41_s26, [#allocation6], %s9622_s28, %s9622_s28, %s9623_s29  }
  0x26   :  { %9609 = dma.done.wait [#allocation3], 1024  }
  0x27   :  { %9610 = vsyncadd [#allocation3], 4294966272 }
  0x28   :  { %9611 = dma.done.wait [#allocation6], 131072  }
  0x29   :  { %9612 = vsyncadd [#allocation6], 4294836224  ;;  %v180_v0 = vld [vmem:[#allocation5 + $0x380] sm:$0xff]  ;;  %v57_v54 = vld [vmem:[#allocation2 + $0x8] sm:$0xff]  ;;  %s9624_s0 = smov [#allocation8]  }
  0x2a   :  { %v188_v1 = vld [vmem:[#allocation5 + $0x3c0] sm:$0xff]  ;;  %v61_v55 = vld [vmem:[#allocation2 + $0x28] sm:$0xff]  ;;  %v59_v59 = vld [vmem:[#allocation2 + $0x18] sm:$0xff]  ;;  %s7702_s2 = sshll.u32 %s9624_s0, 4  ;;  %s7703_s2 = int_to_ptr.vmem [resolvable:$true] %s7702_s2 }
  0x2b   :  { %v436_v2 = vld [vmem:[#allocation5 + $0xb80] sm:$0xff]  ;;  %v7828_v3 = vcombine.high %v180_v0, %v188_v1  ;;  %v7827_v5 = vcombine.low %v180_v0, %v188_v1  ;;  %v9657_v58 = vpack.c.bf16 %v61_v55, %v57_v54  ;;  %v63_v60 = vld [vmem:[#allocation2 + $0x38] sm:$0xff]  ;;  %s9589_s5 = scalar_lea.vmem %s7703_s2, 1024  ;;  %p9594_p2 = scmp.lt.s32.totalorder %s7703_s2, %s7703_s2 }
  0x2c   :  { %v444_v4 = vld [vmem:[#allocation5 + $0xbc0] sm:$0xff]  ;;  %v9659_v63 = vpack.c.bf16 %v63_v60, %v59_v59  ;;  %p9590_p1 = scmp.ne.s32.totalorder %s7703_s2, %s9589_s5  ;;  %p9595_p3 = scmp.lt.s32.totalorder %s9589_s5, %s9589_s5 }
  0x2d   :  { %v164_v6 = vld [vmem:[#allocation5 + $0x300] sm:$0xff]  ;;  %v8084_v8 = vcombine.high %v436_v2, %v444_v4  ;;  %v8083_v9 = vcombine.low %v436_v2, %v444_v4  ;;  %3140 = vmatprep.subr.bf16.mxu0 %v7828_v3  ;;  %3172 = vmatprep.mubr.bf16.mxu0 %v9657_v58 }
  0x2e   :  { %v172_v7 = vld [vmem:[#allocation5 + $0x340] sm:$0xff]  ;;  %3141 = vmatpush1.bf16.msra.mxu0 %v7827_v5  ;;  %3215 = vmatprep.mubr.bf16.mxu1 %v9659_v63  ;;  %p9596_p4 = por %p9595_p3, %p9594_p2 }
  0x2f   :  { %v7812_v10 = vcombine.high %v164_v6, %v172_v7  ;;  %v420_v11 = vld [vmem:[#allocation5 + $0xb00] sm:$0xff]  ;;  %3183 = vmatprep.subr.bf16.mxu1 %v8084_v8  ;;  %v7811_v18 = vcombine.low %v164_v6, %v172_v7 }
  0x30   :  { %v428_v12 = vld [vmem:[#allocation5 + $0xb40] sm:$0xff]  ;;  %3184 = vmatpush1.bf16.msra.mxu1 %v8083_v9  ;;  %p9597_p5 = pnand %p9596_p4, %p9590_p1 }
  0x31   :  { %v148_v13 = vld [vmem:[#allocation5 + $0x280] sm:$0xff]  ;;  %v8068_v14 = vcombine.high %v420_v11, %v428_v12  ;;  %3142 = vmatprep.subr.bf16.mxu0 %v7812_v10  ;;  %v8067_v19 = vcombine.low %v420_v11, %v428_v12 }
  0x32   :  { %v156_v15 = vld [vmem:[#allocation5 + $0x2c0] sm:$0xff]  ;;  %3143 = vmatpush1.bf16.msra.mxu0 %v7811_v18 }
  0x33   :  { %v404_v16 = vld [vmem:[#allocation5 + $0xa80] sm:$0xff]  ;;  %v7796_v20 = vcombine.high %v148_v13, %v156_v15  ;;  %3185 = vmatprep.subr.bf16.mxu1 %v8068_v14  ;;  %v7795_v26 = vcombine.low %v148_v13, %v156_v15 }
  0x34   :  { %v412_v17 = vld [vmem:[#allocation5 + $0xac0] sm:$0xff]  ;;  %3186 = vmatpush1.bf16.msra.mxu1 %v8067_v19 }
  0x35   :  { %v8052_v21 = vcombine.high %v404_v16, %v412_v17  ;;  %v132_v22 = vld [vmem:[#allocation5 + $0x200] sm:$0xff]  ;;  %3144 = vmatprep.subr.bf16.mxu0 %v7796_v20  ;;  %v8051_v27 = vcombine.low %v404_v16, %v412_v17 }
  0x36   :  { %v140_v23 = vld [vmem:[#allocation5 + $0x240] sm:$0xff]  ;;  %3145 = vmatpush1.bf16.msra.mxu0 %v7795_v26 }
  0x37   :  { %v388_v24 = vld [vmem:[#allocation5 + $0xa00] sm:$0xff]  ;;  %v7780_v28 = vcombine.high %v132_v22, %v140_v23  ;;  %3187 = vmatprep.subr.bf16.mxu1 %v8052_v21  ;;  %v7779_v34 = vcombine.low %v132_v22, %v140_v23 }
  0x38   :  { %v396_v25 = vld [vmem:[#allocation5 + $0xa40] sm:$0xff]  ;;  %3188 = vmatpush1.bf16.msra.mxu1 %v8051_v27 }
  0x39   :  { %v8036_v29 = vcombine.high %v388_v24, %v396_v25  ;;  %v116_v30 = vld [vmem:[#allocation5 + $0x180] sm:$0xff]  ;;  %3146 = vmatprep.subr.bf16.mxu0 %v7780_v28  ;;  %v8035_v35 = vcombine.low %v388_v24, %v396_v25 }
  0x3a   :  { %v124_v31 = vld [vmem:[#allocation5 + $0x1c0] sm:$0xff]  ;;  %3147 = vmatpush1.bf16.msra.mxu0 %v7779_v34 }
  0x3b   :  { %v372_v32 = vld [vmem:[#allocation5 + $0x980] sm:$0xff]  ;;  %v7764_v36 = vcombine.high %v116_v30, %v124_v31  ;;  %3189 = vmatprep.subr.bf16.mxu1 %v8036_v29  ;;  %v7763_v42 = vcombine.low %v116_v30, %v124_v31 }
  0x3c   :  { %v380_v33 = vld [vmem:[#allocation5 + $0x9c0] sm:$0xff]  ;;  %3190 = vmatpush1.bf16.msra.mxu1 %v8035_v35 }
  0x3d   :  { %v8020_v37 = vcombine.high %v372_v32, %v380_v33  ;;  %v100_v38 = vld [vmem:[#allocation5 + $0x100] sm:$0xff]  ;;  %3148 = vmatprep.subr.bf16.mxu0 %v7764_v36  ;;  %v8019_v43 = vcombine.low %v372_v32, %v380_v33 }
  0x3e   :  { %v108_v39 = vld [vmem:[#allocation5 + $0x140] sm:$0xff]  ;;  %3149 = vmatpush1.bf16.msra.mxu0 %v7763_v42 }
  0x3f   :  { %v356_v40 = vld [vmem:[#allocation5 + $0x900] sm:$0xff]  ;;  %v7748_v44 = vcombine.high %v100_v38, %v108_v39  ;;  %3191 = vmatprep.subr.bf16.mxu1 %v8020_v37  ;;  %v7747_v50 = vcombine.low %v100_v38, %v108_v39 }
  0x40   :  { %v364_v41 = vld [vmem:[#allocation5 + $0x940] sm:$0xff]  ;;  %3192 = vmatpush1.bf16.msra.mxu1 %v8019_v43 }
  0x41   :  { %v8004_v45 = vcombine.high %v356_v40, %v364_v41  ;;  %v84_v46 = vld [vmem:[#allocation5 + $0x80] sm:$0xff]  ;;  %3150 = vmatprep.subr.bf16.mxu0 %v7748_v44  ;;  %v8003_v51 = vcombine.low %v356_v40, %v364_v41 }
  0x42   :  { %v92_v47 = vld [vmem:[#allocation5 + $0xc0] sm:$0xff]  ;;  %3151 = vmatpush1.bf16.msra.mxu0 %v7747_v50 }
  0x43   :  { %v340_v48 = vld [vmem:[#allocation5 + $0x880] sm:$0xff]  ;;  %v7732_v52 = vcombine.high %v84_v46, %v92_v47  ;;  %3193 = vmatprep.subr.bf16.mxu1 %v8004_v45  ;;  %v7731_v0 = vcombine.low %v84_v46, %v92_v47 }
  0x44   :  { %v348_v49 = vld [vmem:[#allocation5 + $0x8c0] sm:$0xff]  ;;  %3194 = vmatpush1.bf16.msra.mxu1 %v8003_v51 }
  0x45   :  { %v68_v53 = vld [vmem:[#allocation5] sm:$0xff]  ;;  %v7988_v56 = vcombine.high %v340_v48, %v348_v49  ;;  %3152 = vmatprep.subr.bf16.mxu0 %v7732_v52  ;;  %v7987_v1 = vcombine.low %v340_v48, %v348_v49 }
  0x46   :  { %v76_v57 = vld [vmem:[#allocation5 + $0x40] sm:$0xff]  ;;  %3153 = vmatpush1.bf16.msra.mxu0 %v7731_v0 }
  0x47   :  { %v324_v61 = vld [vmem:[#allocation5 + $0x800] sm:$0xff]  ;;  %v7716_v2 = vcombine.high %v68_v53, %v76_v57  ;;  %3195 = vmatprep.subr.bf16.mxu1 %v7988_v56  ;;  %v7715_v8 = vcombine.low %v68_v53, %v76_v57 }
  0x48   :  { %v332_v62 = vld [vmem:[#allocation5 + $0x840] sm:$0xff]  ;;  %3196 = vmatpush1.bf16.msra.mxu1 %v7987_v1 }
  0x49   :  { %v7972_v3 = vcombine.high %v324_v61, %v332_v62  ;;  %v308_v4 = vld [vmem:[#allocation5 + $0x780] sm:$0xff]  ;;  %3154 = vmatprep.subr.bf16.mxu0 %v7716_v2  ;;  %v7971_v9 = vcombine.low %v324_v61, %v332_v62 }
  0x4a   :  { %v316_v5 = vld [vmem:[#allocation5 + $0x7c0] sm:$0xff]  ;;  %3155 = vmatpush1.bf16.msra.mxu0 %v7715_v8  ;;  %v437_v8 = vld [vmem:[#allocation5 + $0xb88] sm:$0xff] }
  0x4b   :  { %v564_v6 = vld [vmem:[#allocation5 + $0xf80] sm:$0xff]  ;;  %v7956_v10 = vcombine.high %v308_v4, %v316_v5  ;;  %3197 = vmatprep.subr.bf16.mxu1 %v7972_v3  ;;  %v7955_v16 = vcombine.low %v308_v4, %v316_v5 }
  0x4c   :  { %v572_v7 = vld [vmem:[#allocation5 + $0xfc0] sm:$0xff]  ;;  %3198 = vmatpush1.bf16.msra.mxu1 %v7971_v9  ;;  %v445_v9 = vld [vmem:[#allocation5 + $0xbc8] sm:$0xff] }
  0x4d   :  { %v8212_v11 = vcombine.high %v564_v6, %v572_v7  ;;  %v292_v12 = vld [vmem:[#allocation5 + $0x700] sm:$0xff]  ;;  %3156 = vmatprep.subr.bf16.mxu0 %v7956_v10  ;;  %v8211_v17 = vcombine.low %v564_v6, %v572_v7  ;;  %v181_v6 = vld [vmem:[#allocation5 + $0x388] sm:$0xff] }
  0x4e   :  { %v300_v13 = vld [vmem:[#allocation5 + $0x740] sm:$0xff]  ;;  %3157 = vmatpush2.bf16.msra.mxu0 %v7955_v16  ;;  %v189_v7 = vld [vmem:[#allocation5 + $0x3c8] sm:$0xff] }
  0x4f   :  { %v548_v14 = vld [vmem:[#allocation5 + $0xf00] sm:$0xff]  ;;  %v7940_v18 = vcombine.high %v292_v12, %v300_v13  ;;  %3199 = vmatprep.subr.bf16.mxu1 %v8212_v11  ;;  %v7939_v24 = vcombine.low %v292_v12, %v300_v13  ;;  %v7830_v16 = vcombine.high %v181_v6, %v189_v7 }
  0x50   :  { %v556_v15 = vld [vmem:[#allocation5 + $0xf40] sm:$0xff]  ;;  %3200 = vmatpush2.bf16.msra.mxu1 %v8211_v17  ;;  %v8086_v17 = vcombine.high %v437_v8, %v445_v9 }
  0x51   :  { %v8196_v19 = vcombine.high %v548_v14, %v556_v15  ;;  %v276_v20 = vld [vmem:[#allocation5 + $0x680] sm:$0xff]  ;;  %3158 = vmatprep.subr.bf16.mxu0 %v7940_v18  ;;  %v8195_v25 = vcombine.low %v548_v14, %v556_v15  ;;  %v58_v14 = vld [vmem:[#allocation2 + $0x10] sm:$0xff]  ;;  %v165_v18 = vld [vmem:[#allocation5 + $0x308] sm:$0xff] }
  0x52   :  { %v284_v21 = vld [vmem:[#allocation5 + $0x6c0] sm:$0xff]  ;;  %3159 = vmatpush2.bf16.msra.mxu0 %v7939_v24  ;;  %v62_v15 = vld [vmem:[#allocation2 + $0x30] sm:$0xff]  ;;  %v7829_v24 = vcombine.low %v181_v6, %v189_v7  ;;  %v77_v6 = vld [vmem:[#allocation5 + $0x48] sm:$0xff] }
  0x53   :  { %v532_v22 = vld [vmem:[#allocation5 + $0xe80] sm:$0xff]  ;;  %v7924_v26 = vcombine.high %v276_v20, %v284_v21  ;;  %3201 = vmatprep.subr.bf16.mxu1 %v8196_v19  ;;  %v7923_v32 = vcombine.low %v276_v20, %v284_v21  ;;  %v173_v19 = vld [vmem:[#allocation5 + $0x348] sm:$0xff] }
  0x54   :  { %v540_v23 = vld [vmem:[#allocation5 + $0xec0] sm:$0xff]  ;;  %3202 = vmatpush2.bf16.msra.mxu1 %v8195_v25  ;;  %v421_v21 = vld [vmem:[#allocation5 + $0xb08] sm:$0xff]  ;;  %v8085_v25 = vcombine.low %v437_v8, %v445_v9 }
  0x55   :  { %v8180_v27 = vcombine.high %v532_v22, %v540_v23  ;;  %v260_v28 = vld [vmem:[#allocation5 + $0x600] sm:$0xff]  ;;  %3160 = vmatprep.subr.bf16.mxu0 %v7924_v26  ;;  %v8179_v33 = vcombine.low %v532_v22, %v540_v23  ;;  %v429_v22 = vld [vmem:[#allocation5 + $0xb48] sm:$0xff]  ;;  %v9665_v23 = vpack.c.bf16 %v62_v15, %v58_v14  ;;  %v7814_v26 = vcombine.high %v165_v18, %v173_v19 }
  0x56   :  { %v268_v29 = vld [vmem:[#allocation5 + $0x640] sm:$0xff]  ;;  %3161 = vmatpush2.bf16.msra.mxu0 %v7923_v32  ;;  %v7813_v32 = vcombine.low %v165_v18, %v173_v19  ;;  %v325_v7 = vld [vmem:[#allocation5 + $0x808] sm:$0xff] }
  0x57   :  { %v516_v30 = vld [vmem:[#allocation5 + $0xe00] sm:$0xff]  ;;  %v7908_v34 = vcombine.high %v260_v28, %v268_v29  ;;  %3203 = vmatprep.subr.bf16.mxu1 %v8180_v27  ;;  %v7907_v40 = vcombine.low %v260_v28, %v268_v29  ;;  %v8070_v27 = vcombine.high %v421_v21, %v429_v22  ;;  %v149_v28 = vld [vmem:[#allocation5 + $0x288] sm:$0xff] }
  0x58   :  { %v524_v31 = vld [vmem:[#allocation5 + $0xe40] sm:$0xff]  ;;  %3204 = vmatpush2.bf16.msra.mxu1 %v8179_v33  ;;  %v157_v29 = vld [vmem:[#allocation5 + $0x2c8] sm:$0xff]  ;;  %v8069_v33 = vcombine.low %v421_v21, %v429_v22 }
  0x59   :  { %v8164_v35 = vcombine.high %v516_v30, %v524_v31  ;;  %v244_v36 = vld [vmem:[#allocation5 + $0x580] sm:$0xff]  ;;  %3162 = vmatprep.subr.bf16.mxu0 %v7908_v34  ;;  %v8163_v41 = vcombine.low %v516_v30, %v524_v31  ;;  %v405_v30 = vld [vmem:[#allocation5 + $0xa88] sm:$0xff]  ;;  %v7798_v34 = vcombine.high %v149_v28, %v157_v29 }
  0x5a   :  { %v252_v37 = vld [vmem:[#allocation5 + $0x5c0] sm:$0xff]  ;;  %3163 = vmatpush2.bf16.msra.mxu0 %v7907_v40  ;;  %v413_v31 = vld [vmem:[#allocation5 + $0xac8] sm:$0xff]  ;;  %v7797_v40 = vcombine.low %v149_v28, %v157_v29 }
  0x5b   :  { %v500_v38 = vld [vmem:[#allocation5 + $0xd80] sm:$0xff]  ;;  %v7892_v42 = vcombine.high %v244_v36, %v252_v37  ;;  %3205 = vmatprep.subr.bf16.mxu1 %v8164_v35  ;;  %v7891_v48 = vcombine.low %v244_v36, %v252_v37  ;;  %v133_v35 = vld [vmem:[#allocation5 + $0x208] sm:$0xff] }
  0x5c   :  { %v508_v39 = vld [vmem:[#allocation5 + $0xdc0] sm:$0xff]  ;;  %3206 = vmatpush2.bf16.msra.mxu1 %v8163_v41  ;;  %v141_v36 = vld [vmem:[#allocation5 + $0x248] sm:$0xff]  ;;  %v8053_v41 = vcombine.low %v405_v30, %v413_v31 }
  0x5d   :  { %v8148_v43 = vcombine.high %v500_v38, %v508_v39  ;;  %v228_v44 = vld [vmem:[#allocation5 + $0x500] sm:$0xff]  ;;  %3164 = vmatprep.subr.bf16.mxu0 %v7892_v42  ;;  %v8147_v49 = vcombine.low %v500_v38, %v508_v39  ;;  %v389_v37 = vld [vmem:[#allocation5 + $0xa08] sm:$0xff]  ;;  %v8054_v38 = vcombine.high %v405_v30, %v413_v31  ;;  %v7782_v42 = vcombine.high %v133_v35, %v141_v36 }
  0x5e   :  { %v236_v45 = vld [vmem:[#allocation5 + $0x540] sm:$0xff]  ;;  %3165 = vmatpush2.bf16.msra.mxu0 %v7891_v48  ;;  %v397_v39 = vld [vmem:[#allocation5 + $0xa48] sm:$0xff]  ;;  %v7781_v48 = vcombine.low %v133_v35, %v141_v36 }
  0x5f   :  { %v484_v46 = vld [vmem:[#allocation5 + $0xd00] sm:$0xff]  ;;  %v7876_v50 = vcombine.high %v228_v44, %v236_v45  ;;  %3207 = vmatprep.subr.bf16.mxu1 %v8148_v43  ;;  %v7875_v56 = vcombine.low %v228_v44, %v236_v45  ;;  %v117_v43 = vld [vmem:[#allocation5 + $0x188] sm:$0xff] }
  0x60   :  { %v492_v47 = vld [vmem:[#allocation5 + $0xd40] sm:$0xff]  ;;  %3208 = vmatpush2.bf16.msra.mxu1 %v8147_v49  ;;  %v125_v44 = vld [vmem:[#allocation5 + $0x1c8] sm:$0xff]  ;;  %v8037_v49 = vcombine.low %v389_v37, %v397_v39 }
  0x61   :  { %v8132_v51 = vcombine.high %v484_v46, %v492_v47  ;;  %v212_v52 = vld [vmem:[#allocation5 + $0x480] sm:$0xff]  ;;  %3166 = vmatprep.subr.bf16.mxu0 %v7876_v50  ;;  %v8131_v57 = vcombine.low %v484_v46, %v492_v47  ;;  %v373_v45 = vld [vmem:[#allocation5 + $0x988] sm:$0xff]  ;;  %v8038_v46 = vcombine.high %v389_v37, %v397_v39  ;;  %v7766_v50 = vcombine.high %v117_v43, %v125_v44 }
  0x62   :  { %v220_v53 = vld [vmem:[#allocation5 + $0x4c0] sm:$0xff]  ;;  %3167 = vmatpush2.bf16.msra.mxu0 %v7875_v56  ;;  %v381_v47 = vld [vmem:[#allocation5 + $0x9c8] sm:$0xff]  ;;  %v7765_v56 = vcombine.low %v117_v43, %v125_v44 }
  0x63   :  { %v468_v54 = vld [vmem:[#allocation5 + $0xc80] sm:$0xff]  ;;  %v7860_v59 = vcombine.high %v212_v52, %v220_v53  ;;  %3209 = vmatprep.subr.bf16.mxu1 %v8132_v51  ;;  %v7859_v2 = vcombine.low %v212_v52, %v220_v53  ;;  %v101_v51 = vld [vmem:[#allocation5 + $0x108] sm:$0xff] }
  0x64   :  { %v476_v55 = vld [vmem:[#allocation5 + $0xcc0] sm:$0xff]  ;;  %3210 = vmatpush2.bf16.msra.mxu1 %v8131_v57  ;;  %v109_v52 = vld [vmem:[#allocation5 + $0x148] sm:$0xff]  ;;  %v8021_v57 = vcombine.low %v373_v45, %v381_v47 }
  0x65   :  { %v8116_v60 = vcombine.high %v468_v54, %v476_v55  ;;  %v196_v61 = vld [vmem:[#allocation5 + $0x400] sm:$0xff]  ;;  %3168 = vmatprep.subr.bf16.mxu0 %v7860_v59  ;;  %v8115_v3 = vcombine.low %v468_v54, %v476_v55  ;;  %v357_v53 = vld [vmem:[#allocation5 + $0x908] sm:$0xff]  ;;  %v8022_v54 = vcombine.high %v373_v45, %v381_v47  ;;  %v7750_v59 = vcombine.high %v101_v51, %v109_v52 }
  0x66   :  { %v204_v62 = vld [vmem:[#allocation5 + $0x440] sm:$0xff]  ;;  %3169 = vmatpush2.bf16.msra.mxu0 %v7859_v2  ;;  %v365_v55 = vld [vmem:[#allocation5 + $0x948] sm:$0xff]  ;;  %v7749_v2 = vcombine.low %v101_v51, %v109_v52 }
  0x67   :  { %v452_v0 = vld [vmem:[#allocation5 + $0xc00] sm:$0xff]  ;;  %v7844_v4 = vcombine.high %v196_v61, %v204_v62  ;;  %3211 = vmatprep.subr.bf16.mxu1 %v8116_v60  ;;  %v7843_v10 = vcombine.low %v196_v61, %v204_v62  ;;  %v85_v60 = vld [vmem:[#allocation5 + $0x88] sm:$0xff] }
  0x68   :  { %v460_v1 = vld [vmem:[#allocation5 + $0xc40] sm:$0xff]  ;;  %3212 = vmatpush2.bf16.msra.mxu1 %v8115_v3  ;;  %v93_v61 = vld [vmem:[#allocation5 + $0xc8] sm:$0xff]  ;;  %v8005_v3 = vcombine.low %v357_v53, %v365_v55 }
  0x69   :  { %v8100_v5 = vcombine.high %v452_v0, %v460_v1  ;;  %v56_v11 = vld [vmem:[#allocation2] sm:$0xff]  ;;  %3170 = vmatprep.subr.bf16.mxu0 %v7844_v4  ;;  %v8099_v13 = vcombine.low %v452_v0, %v460_v1  ;;  %v341_v62 = vld [vmem:[#allocation5 + $0x888] sm:$0xff]  ;;  %v8006_v0 = vcombine.high %v357_v53, %v365_v55  ;;  %v7734_v4 = vcombine.high %v85_v60, %v93_v61 }
  0x6a   :  { %v60_v12 = vld [vmem:[#allocation2 + $0x20] sm:$0xff]  ;;  %3171 = vmatpush2.bf16.msra.mxu0 %v7843_v10  ;;  %v349_v1 = vld [vmem:[#allocation5 + $0x8c8] sm:$0xff]  ;;  %v7733_v10 = vcombine.low %v85_v60, %v93_v61 }
  0x6b   :  { %3213 = vmatprep.subr.bf16.mxu1 %v8100_v5  ;;  %v9663_v20 = vpack.c.bf16 %v60_v12, %v56_v11  ;;  %3226 = vmatprep.subr.bf16.mxu0 %v7830_v16  ;;  %v69_v5 = vld [vmem:[#allocation5 + $0x8] sm:$0xff]  ;;  %v7990_v8 = vcombine.high %v341_v62, %v349_v1  ;;  %v7989_v11 = vcombine.low %v341_v62, %v349_v1 }
  0x6c   :  { %3214 = vmatpush2.bf16.msra.mxu1 %v8099_v13  ;;  %v333_v9 = vld [vmem:[#allocation5 + $0x848] sm:$0xff]  ;;  %v7718_v12 = vcombine.high %v69_v5, %v77_v6  ;;  %v7717_v18 = vcombine.low %v69_v5, %v77_v6 }
  0x6d   :  { %3269 = vmatprep.subr.bf16.mxu1 %v8086_v17  ;;  %3173 = vmatmul.mubr.bf16.vlgmr.msra.gmra.mxu0 %v9663_v20  ;;  %v309_v13 = vld [vmem:[#allocation5 + $0x788] sm:$0xff]  ;;  %v7974_v16 = vcombine.high %v325_v7, %v333_v9  ;;  %v7973_v19 = vcombine.low %v325_v7, %v333_v9 }
  0x6e   :  { %3227 = vmatpush1.bf16.msra.mxu0 %v7829_v24  ;;  %3258 = vmatprep.mubr.bf16.mxu0 %v9657_v58  ;;  %v317_v14 = vld [vmem:[#allocation5 + $0x7c8] sm:$0xff] }
  0x6f   :  { %3216 = vmatmul.mubr.bf16.vlgmr.msra.gmra.mxu1 %v9665_v23  ;;  %3228 = vmatprep.subr.bf16.mxu0 %v7814_v26  ;;  %v565_v15 = vld [vmem:[#allocation5 + $0xf88] sm:$0xff]  ;;  %v7958_v21 = vcombine.high %v309_v13, %v317_v14  ;;  %v7957_v28 = vcombine.low %v309_v13, %v317_v14 }
  0x70   :  { %3270 = vmatpush1.bf16.msra.mxu1 %v8085_v25  ;;  %3301 = vmatprep.mubr.bf16.mxu1 %v9659_v63  ;;  %v573_v17 = vld [vmem:[#allocation5 + $0xfc8] sm:$0xff] }
  0x71   :  { %3271 = vmatprep.subr.bf16.mxu1 %v8070_v27  ;;  %v293_v22 = vld [vmem:[#allocation5 + $0x708] sm:$0xff]  ;;  %v8214_v26 = vcombine.high %v565_v15, %v573_v17  ;;  %v8213_v29 = vcombine.low %v565_v15, %v573_v17  ;;  %v182_v17 = vld [vmem:[#allocation5 + $0x390] sm:$0xff] }
  0x72   :  { %3229 = vmatpush1.bf16.msra.mxu0 %v7813_v32  ;;  %v301_v24 = vld [vmem:[#allocation5 + $0x748] sm:$0xff] }
  0x73   :  { %3230 = vmatprep.subr.bf16.mxu0 %v7798_v34  ;;  %v549_v25 = vld [vmem:[#allocation5 + $0xf08] sm:$0xff]  ;;  %v7942_v30 = vcombine.high %v293_v22, %v301_v24  ;;  %v7941_v36 = vcombine.low %v293_v22, %v301_v24  ;;  %v446_v22 = vld [vmem:[#allocation5 + $0xbd0] sm:$0xff] }
  0x74   :  { %3272 = vmatpush1.bf16.msra.mxu1 %v8069_v33  ;;  %v557_v27 = vld [vmem:[#allocation5 + $0xf48] sm:$0xff] }
  0x75   :  { %3273 = vmatprep.subr.bf16.mxu1 %v8054_v38  ;;  %v277_v31 = vld [vmem:[#allocation5 + $0x688] sm:$0xff]  ;;  %v8198_v34 = vcombine.high %v549_v25, %v557_v27  ;;  %v8197_v37 = vcombine.low %v549_v25, %v557_v27  ;;  %v166_v27 = vld [vmem:[#allocation5 + $0x310] sm:$0xff] }
  0x76   :  { %3231 = vmatpush1.bf16.msra.mxu0 %v7797_v40  ;;  %v285_v32 = vld [vmem:[#allocation5 + $0x6c8] sm:$0xff] }
  0x77   :  { %3232 = vmatprep.subr.bf16.mxu0 %v7782_v42  ;;  %v533_v33 = vld [vmem:[#allocation5 + $0xe88] sm:$0xff]  ;;  %v7926_v38 = vcombine.high %v277_v31, %v285_v32  ;;  %v7925_v44 = vcombine.low %v277_v31, %v285_v32  ;;  %v430_v31 = vld [vmem:[#allocation5 + $0xb50] sm:$0xff] }
  0x78   :  { %3274 = vmatpush1.bf16.msra.mxu1 %v8053_v41  ;;  %v541_v35 = vld [vmem:[#allocation5 + $0xec8] sm:$0xff] }
  0x79   :  { %3275 = vmatprep.subr.bf16.mxu1 %v8038_v46  ;;  %v261_v39 = vld [vmem:[#allocation5 + $0x608] sm:$0xff]  ;;  %v8182_v42 = vcombine.high %v533_v33, %v541_v35  ;;  %v8181_v45 = vcombine.low %v533_v33, %v541_v35  ;;  %v150_v35 = vld [vmem:[#allocation5 + $0x290] sm:$0xff] }
  0x7a   :  { %3233 = vmatpush1.bf16.msra.mxu0 %v7781_v48  ;;  %v269_v40 = vld [vmem:[#allocation5 + $0x648] sm:$0xff] }
  0x7b   :  { %3234 = vmatprep.subr.bf16.mxu0 %v7766_v50  ;;  %v517_v41 = vld [vmem:[#allocation5 + $0xe08] sm:$0xff]  ;;  %v7910_v46 = vcombine.high %v261_v39, %v269_v40  ;;  %v7909_v52 = vcombine.low %v261_v39, %v269_v40  ;;  %v414_v39 = vld [vmem:[#allocation5 + $0xad0] sm:$0xff] }
  0x7c   :  { %3276 = vmatpush1.bf16.msra.mxu1 %v8037_v49  ;;  %v525_v43 = vld [vmem:[#allocation5 + $0xe48] sm:$0xff] }
  0x7d   :  { %3277 = vmatprep.subr.bf16.mxu1 %v8022_v54  ;;  %v245_v47 = vld [vmem:[#allocation5 + $0x588] sm:$0xff]  ;;  %v8166_v50 = vcombine.high %v517_v41, %v525_v43  ;;  %v8165_v53 = vcombine.low %v517_v41, %v525_v43  ;;  %v134_v43 = vld [vmem:[#allocation5 + $0x210] sm:$0xff] }
  0x7e   :  { %3235 = vmatpush1.bf16.msra.mxu0 %v7765_v56  ;;  %v253_v48 = vld [vmem:[#allocation5 + $0x5c8] sm:$0xff] }
  0x7f   :  { %3236 = vmatprep.subr.bf16.mxu0 %v7750_v59  ;;  %v501_v49 = vld [vmem:[#allocation5 + $0xd88] sm:$0xff]  ;;  %v7894_v54 = vcombine.high %v245_v47, %v253_v48  ;;  %v7893_v61 = vcombine.low %v245_v47, %v253_v48  ;;  %v398_v47 = vld [vmem:[#allocation5 + $0xa50] sm:$0xff] }
  0x80   :  { %3278 = vmatpush1.bf16.msra.mxu1 %v8021_v57  ;;  %v509_v51 = vld [vmem:[#allocation5 + $0xdc8] sm:$0xff] }
  0x81   :  { %3279 = vmatprep.subr.bf16.mxu1 %v8006_v0  ;;  %v229_v55 = vld [vmem:[#allocation5 + $0x508] sm:$0xff]  ;;  %v8150_v59 = vcombine.high %v501_v49, %v509_v51  ;;  %v8149_v62 = vcombine.low %v501_v49, %v509_v51  ;;  %v118_v51 = vld [vmem:[#allocation5 + $0x190] sm:$0xff] }
  0x82   :  { %3237 = vmatpush1.bf16.msra.mxu0 %v7749_v2  ;;  %v237_v56 = vld [vmem:[#allocation5 + $0x548] sm:$0xff] }
  0x83   :  { %3238 = vmatprep.subr.bf16.mxu0 %v7734_v4  ;;  %v485_v57 = vld [vmem:[#allocation5 + $0xd08] sm:$0xff]  ;;  %v7878_v0 = vcombine.high %v229_v55, %v237_v56  ;;  %v7877_v6 = vcombine.low %v229_v55, %v237_v56  ;;  %v382_v55 = vld [vmem:[#allocation5 + $0x9d0] sm:$0xff] }
  0x84   :  { %3280 = vmatpush1.bf16.msra.mxu1 %v8005_v3  ;;  %v493_v60 = vld [vmem:[#allocation5 + $0xd48] sm:$0xff] }
  0x85   :  { %3281 = vmatprep.subr.bf16.mxu1 %v7990_v8  ;;  %v213_v1 = vld [vmem:[#allocation5 + $0x488] sm:$0xff]  ;;  %v8134_v4 = vcombine.high %v485_v57, %v493_v60  ;;  %v8133_v7 = vcombine.low %v485_v57, %v493_v60  ;;  %v102_v60 = vld [vmem:[#allocation5 + $0x110] sm:$0xff] }
  0x86   :  { %3239 = vmatpush1.bf16.msra.mxu0 %v7733_v10  ;;  %v221_v2 = vld [vmem:[#allocation5 + $0x4c8] sm:$0xff] }
  0x87   :  { %3240 = vmatprep.subr.bf16.mxu0 %v7718_v12  ;;  %v469_v3 = vld [vmem:[#allocation5 + $0xc88] sm:$0xff]  ;;  %v7862_v8 = vcombine.high %v213_v1, %v221_v2  ;;  %v7861_v14 = vcombine.low %v213_v1, %v221_v2  ;;  %v366_v1 = vld [vmem:[#allocation5 + $0x950] sm:$0xff] }
  0x88   :  { %3282 = vmatpush1.bf16.msra.mxu1 %v7989_v11  ;;  %v477_v5 = vld [vmem:[#allocation5 + $0xcc8] sm:$0xff] }
  0x89   :  { %3283 = vmatprep.subr.bf16.mxu1 %v7974_v16  ;;  %v197_v9 = vld [vmem:[#allocation5 + $0x408] sm:$0xff]  ;;  %v8118_v12 = vcombine.high %v469_v3, %v477_v5  ;;  %v8117_v15 = vcombine.low %v469_v3, %v477_v5  ;;  %v86_v5 = vld [vmem:[#allocation5 + $0x90] sm:$0xff] }
  0x8a   :  { %3241 = vmatpush1.bf16.msra.mxu0 %v7717_v18  ;;  %v205_v10 = vld [vmem:[#allocation5 + $0x448] sm:$0xff]  ;;  %v190_v18 = vld [vmem:[#allocation5 + $0x3d0] sm:$0xff] }
  0x8b   :  { %3242 = vmatprep.subr.bf16.mxu0 %v7958_v21  ;;  %v453_v11 = vld [vmem:[#allocation5 + $0xc08] sm:$0xff]  ;;  %v7846_v16 = vcombine.high %v197_v9, %v205_v10  ;;  %v7845_v24 = vcombine.low %v197_v9, %v205_v10  ;;  %v7831_v32 = vcombine.low %v182_v17, %v190_v18  ;;  %v350_v9 = vld [vmem:[#allocation5 + $0x8d0] sm:$0xff] }
  0x8c   :  { %3284 = vmatpush1.bf16.msra.mxu1 %v7973_v19  ;;  %v461_v13 = vld [vmem:[#allocation5 + $0xc48] sm:$0xff]  ;;  %v438_v19 = vld [vmem:[#allocation5 + $0xb90] sm:$0xff] }
  0x8d   :  { %3285 = vmatprep.subr.bf16.mxu1 %v8214_v26  ;;  %v8102_v21 = vcombine.high %v453_v11, %v461_v13  ;;  %v8101_v25 = vcombine.low %v453_v11, %v461_v13  ;;  %v7832_v26 = vcombine.high %v182_v17, %v190_v18  ;;  %v8087_v33 = vcombine.low %v438_v19, %v446_v22  ;;  %v70_v13 = vld [vmem:[#allocation5 + $0x10] sm:$0xff] }
  0x8e   :  { %3243 = vmatpush2.bf16.msra.mxu0 %v7957_v28  ;;  %v174_v28 = vld [vmem:[#allocation5 + $0x350] sm:$0xff] }
  0x8f   :  { %3244 = vmatprep.subr.bf16.mxu0 %v7942_v30  ;;  %v8088_v30 = vcombine.high %v438_v19, %v446_v22  ;;  %v7815_v40 = vcombine.low %v166_v27, %v174_v28  ;;  %v334_v17 = vld [vmem:[#allocation5 + $0x850] sm:$0xff] }
  0x90   :  { %3286 = vmatpush2.bf16.msra.mxu1 %v8213_v29  ;;  %v422_v29 = vld [vmem:[#allocation5 + $0xb10] sm:$0xff] }
  0x91   :  { %3287 = vmatprep.subr.bf16.mxu1 %v8198_v34  ;;  %v7816_v34 = vcombine.high %v166_v27, %v174_v28  ;;  %v8071_v41 = vcombine.low %v422_v29, %v430_v31  ;;  %v310_v22 = vld [vmem:[#allocation5 + $0x790] sm:$0xff] }
  0x92   :  { %3245 = vmatpush2.bf16.msra.mxu0 %v7941_v36  ;;  %v158_v36 = vld [vmem:[#allocation5 + $0x2d0] sm:$0xff] }
  0x93   :  { %3246 = vmatprep.subr.bf16.mxu0 %v7926_v38  ;;  %v8072_v38 = vcombine.high %v422_v29, %v430_v31  ;;  %v7799_v48 = vcombine.low %v150_v35, %v158_v36  ;;  %v574_v27 = vld [vmem:[#allocation5 + $0xfd0] sm:$0xff] }
  0x94   :  { %3288 = vmatpush2.bf16.msra.mxu1 %v8197_v37  ;;  %v406_v37 = vld [vmem:[#allocation5 + $0xa90] sm:$0xff] }
  0x95   :  { %3289 = vmatprep.subr.bf16.mxu1 %v8182_v42  ;;  %v7800_v42 = vcombine.high %v150_v35, %v158_v36  ;;  %v8055_v49 = vcombine.low %v406_v37, %v414_v39  ;;  %v294_v31 = vld [vmem:[#allocation5 + $0x710] sm:$0xff] }
  0x96   :  { %3247 = vmatpush2.bf16.msra.mxu0 %v7925_v44  ;;  %v142_v44 = vld [vmem:[#allocation5 + $0x250] sm:$0xff] }
  0x97   :  { %3248 = vmatprep.subr.bf16.mxu0 %v7910_v46  ;;  %v8056_v46 = vcombine.high %v406_v37, %v414_v39  ;;  %v7783_v56 = vcombine.low %v134_v43, %v142_v44  ;;  %v558_v35 = vld [vmem:[#allocation5 + $0xf50] sm:$0xff] }
  0x98   :  { %3290 = vmatpush2.bf16.msra.mxu1 %v8181_v45  ;;  %v390_v45 = vld [vmem:[#allocation5 + $0xa10] sm:$0xff] }
  0x99   :  { %3291 = vmatprep.subr.bf16.mxu1 %v8166_v50  ;;  %v7784_v50 = vcombine.high %v134_v43, %v142_v44  ;;  %v8039_v57 = vcombine.low %v390_v45, %v398_v47  ;;  %v278_v39 = vld [vmem:[#allocation5 + $0x690] sm:$0xff] }
  0x9a   :  { %3249 = vmatpush2.bf16.msra.mxu0 %v7909_v52  ;;  %v126_v52 = vld [vmem:[#allocation5 + $0x1d0] sm:$0xff] }
  0x9b   :  { %3250 = vmatprep.subr.bf16.mxu0 %v7894_v54  ;;  %v8040_v54 = vcombine.high %v390_v45, %v398_v47  ;;  %v7767_v2 = vcombine.low %v118_v51, %v126_v52  ;;  %v542_v43 = vld [vmem:[#allocation5 + $0xed0] sm:$0xff] }
  0x9c   :  { %3292 = vmatpush2.bf16.msra.mxu1 %v8165_v53  ;;  %v374_v53 = vld [vmem:[#allocation5 + $0x990] sm:$0xff] }
  0x9d   :  { %3293 = vmatprep.subr.bf16.mxu1 %v8150_v59  ;;  %v7768_v59 = vcombine.high %v118_v51, %v126_v52  ;;  %v8023_v3 = vcombine.low %v374_v53, %v382_v55  ;;  %v262_v47 = vld [vmem:[#allocation5 + $0x610] sm:$0xff] }
  0x9e   :  { %3251 = vmatpush2.bf16.msra.mxu0 %v7893_v61  ;;  %v110_v61 = vld [vmem:[#allocation5 + $0x150] sm:$0xff] }
  0x9f   :  { %3252 = vmatprep.subr.bf16.mxu0 %v7878_v0  ;;  %v8024_v0 = vcombine.high %v374_v53, %v382_v55  ;;  %v7751_v10 = vcombine.low %v102_v60, %v110_v61  ;;  %v526_v51 = vld [vmem:[#allocation5 + $0xe50] sm:$0xff] }
  0xa0   :  { %3294 = vmatpush2.bf16.msra.mxu1 %v8149_v62  ;;  %v358_v62 = vld [vmem:[#allocation5 + $0x910] sm:$0xff] }
  0xa1   :  { %3295 = vmatprep.subr.bf16.mxu1 %v8134_v4  ;;  %v7752_v4 = vcombine.high %v102_v60, %v110_v61  ;;  %v8007_v11 = vcombine.low %v358_v62, %v366_v1  ;;  %v246_v55 = vld [vmem:[#allocation5 + $0x590] sm:$0xff] }
  0xa2   :  { %3253 = vmatpush2.bf16.msra.mxu0 %v7877_v6  ;;  %v94_v6 = vld [vmem:[#allocation5 + $0xd0] sm:$0xff] }
  0xa3   :  { %3254 = vmatprep.subr.bf16.mxu0 %v7862_v8  ;;  %v8008_v8 = vcombine.high %v358_v62, %v366_v1  ;;  %v7735_v18 = vcombine.low %v86_v5, %v94_v6  ;;  %v510_v60 = vld [vmem:[#allocation5 + $0xdd0] sm:$0xff] }
  0xa4   :  { %3296 = vmatpush2.bf16.msra.mxu1 %v8133_v7  ;;  %v342_v7 = vld [vmem:[#allocation5 + $0x890] sm:$0xff] }
  0xa5   :  { %3297 = vmatprep.subr.bf16.mxu1 %v8118_v12  ;;  %v7736_v12 = vcombine.high %v86_v5, %v94_v6  ;;  %v7991_v19 = vcombine.low %v342_v7, %v350_v9  ;;  %v230_v1 = vld [vmem:[#allocation5 + $0x510] sm:$0xff] }
  0xa6   :  { %3255 = vmatpush2.bf16.msra.mxu0 %v7861_v14  ;;  %v78_v14 = vld [vmem:[#allocation5 + $0x50] sm:$0xff] }
  0xa7   :  { %3256 = vmatprep.subr.bf16.mxu0 %v7846_v16  ;;  %v7992_v16 = vcombine.high %v342_v7, %v350_v9  ;;  %v7719_v28 = vcombine.low %v70_v13, %v78_v14  ;;  %v494_v5 = vld [vmem:[#allocation5 + $0xd50] sm:$0xff] }
  0xa8   :  { %3298 = vmatpush2.bf16.msra.mxu1 %v8117_v15  ;;  %v326_v15 = vld [vmem:[#allocation5 + $0x810] sm:$0xff] }
  0xa9   :  { %3299 = vmatprep.subr.bf16.mxu1 %v8102_v21  ;;  %v7720_v21 = vcombine.high %v70_v13, %v78_v14  ;;  %v7975_v29 = vcombine.low %v326_v15, %v334_v17  ;;  %v214_v9 = vld [vmem:[#allocation5 + $0x490] sm:$0xff] }
  0xaa   :  { %3257 = vmatpush2.bf16.msra.mxu0 %v7845_v24  ;;  %v318_v24 = vld [vmem:[#allocation5 + $0x7d0] sm:$0xff] }
  0xab   :  { %3312 = vmatprep.subr.bf16.mxu0 %v7832_v26  ;;  %v7976_v26 = vcombine.high %v326_v15, %v334_v17  ;;  %v7959_v36 = vcombine.low %v310_v22, %v318_v24  ;;  %v478_v13 = vld [vmem:[#allocation5 + $0xcd0] sm:$0xff] }
  0xac   :  { %3300 = vmatpush2.bf16.msra.mxu1 %v8101_v25  ;;  %v566_v25 = vld [vmem:[#allocation5 + $0xf90] sm:$0xff] }
  0xad   :  { %3355 = vmatprep.subr.bf16.mxu1 %v8088_v30  ;;  %3259 = vmatmul.mubr.bf16.vlgmr.msra.gmra.mxu0 %v9663_v20  ;;  %v7960_v30 = vcombine.high %v310_v22, %v318_v24  ;;  %v8215_v37 = vcombine.low %v566_v25, %v574_v27  ;;  %v198_v17 = vld [vmem:[#allocation5 + $0x410] sm:$0xff] }
  0xae   :  { %3313 = vmatpush1.bf16.msra.mxu0 %v7831_v32  ;;  %3344 = vmatprep.mubr.bf16.mxu0 %v9657_v58  ;;  %v302_v32 = vld [vmem:[#allocation5 + $0x750] sm:$0xff] }
  0xaf   :  { %3302 = vmatmul.mubr.bf16.vlgmr.msra.gmra.mxu1 %v9665_v23  ;;  %3314 = vmatprep.subr.bf16.mxu0 %v7816_v34  ;;  %v8216_v34 = vcombine.high %v566_v25, %v574_v27  ;;  %v7943_v44 = vcombine.low %v294_v31, %v302_v32  ;;  %v462_v22 = vld [vmem:[#allocation5 + $0xc50] sm:$0xff]  ;;  %v183_v27 = vld [vmem:[#allocation5 + $0x398] sm:$0xff] }
  0xb0   :  { %3356 = vmatpush1.bf16.msra.mxu1 %v8087_v33  ;;  %3387 = vmatprep.mubr.bf16.mxu1 %v9659_v63  ;;  %v550_v33 = vld [vmem:[#allocation5 + $0xf10] sm:$0xff] }
  0xb1   :  { %3357 = vmatprep.subr.bf16.mxu1 %v8072_v38  ;;  %v7944_v38 = vcombine.high %v294_v31, %v302_v32  ;;  %v8199_v45 = vcombine.low %v550_v33, %v558_v35  ;;  %v447_v31 = vld [vmem:[#allocation5 + $0xbd8] sm:$0xff] }
  0xb2   :  { %3315 = vmatpush1.bf16.msra.mxu0 %v7815_v40  ;;  %v286_v40 = vld [vmem:[#allocation5 + $0x6d0] sm:$0xff] }
  0xb3   :  { %3316 = vmatprep.subr.bf16.mxu0 %v7800_v42  ;;  %v8200_v42 = vcombine.high %v550_v33, %v558_v35  ;;  %v7927_v52 = vcombine.low %v278_v39, %v286_v40  ;;  %v167_v35 = vld [vmem:[#allocation5 + $0x318] sm:$0xff] }
  0xb4   :  { %3358 = vmatpush1.bf16.msra.mxu1 %v8071_v41  ;;  %v534_v41 = vld [vmem:[#allocation5 + $0xe90] sm:$0xff] }
  0xb5   :  { %3359 = vmatprep.subr.bf16.mxu1 %v8056_v46  ;;  %v7928_v46 = vcombine.high %v278_v39, %v286_v40  ;;  %v8183_v53 = vcombine.low %v534_v41, %v542_v43  ;;  %v431_v39 = vld [vmem:[#allocation5 + $0xb58] sm:$0xff] }
  0xb6   :  { %3317 = vmatpush1.bf16.msra.mxu0 %v7799_v48  ;;  %v270_v48 = vld [vmem:[#allocation5 + $0x650] sm:$0xff] }
  0xb7   :  { %3318 = vmatprep.subr.bf16.mxu0 %v7784_v50  ;;  %v8184_v50 = vcombine.high %v534_v41, %v542_v43  ;;  %v7911_v61 = vcombine.low %v262_v47, %v270_v48  ;;  %v151_v43 = vld [vmem:[#allocation5 + $0x298] sm:$0xff] }
  0xb8   :  { %3360 = vmatpush1.bf16.msra.mxu1 %v8055_v49  ;;  %v518_v49 = vld [vmem:[#allocation5 + $0xe10] sm:$0xff] }
  0xb9   :  { %3361 = vmatprep.subr.bf16.mxu1 %v8040_v54  ;;  %v7912_v54 = vcombine.high %v262_v47, %v270_v48  ;;  %v8167_v62 = vcombine.low %v518_v49, %v526_v51  ;;  %v415_v47 = vld [vmem:[#allocation5 + $0xad8] sm:$0xff] }
  0xba   :  { %3319 = vmatpush1.bf16.msra.mxu0 %v7783_v56  ;;  %v254_v56 = vld [vmem:[#allocation5 + $0x5d0] sm:$0xff] }
  0xbb   :  { %3320 = vmatprep.subr.bf16.mxu0 %v7768_v59  ;;  %v8168_v59 = vcombine.high %v518_v49, %v526_v51  ;;  %v7895_v6 = vcombine.low %v246_v55, %v254_v56  ;;  %v135_v51 = vld [vmem:[#allocation5 + $0x218] sm:$0xff] }
  0xbc   :  { %3362 = vmatpush1.bf16.msra.mxu1 %v8039_v57  ;;  %v502_v57 = vld [vmem:[#allocation5 + $0xd90] sm:$0xff] }
  0xbd   :  { %3363 = vmatprep.subr.bf16.mxu1 %v8024_v0  ;;  %v7896_v0 = vcombine.high %v246_v55, %v254_v56  ;;  %v8151_v7 = vcombine.low %v502_v57, %v510_v60  ;;  %v399_v55 = vld [vmem:[#allocation5 + $0xa58] sm:$0xff] }
  0xbe   :  { %3321 = vmatpush1.bf16.msra.mxu0 %v7767_v2  ;;  %v238_v2 = vld [vmem:[#allocation5 + $0x550] sm:$0xff] }
  0xbf   :  { %3322 = vmatprep.subr.bf16.mxu0 %v7752_v4  ;;  %v8152_v4 = vcombine.high %v502_v57, %v510_v60  ;;  %v7879_v14 = vcombine.low %v230_v1, %v238_v2  ;;  %v119_v60 = vld [vmem:[#allocation5 + $0x198] sm:$0xff] }
  0xc0   :  { %3364 = vmatpush1.bf16.msra.mxu1 %v8023_v3  ;;  %v486_v3 = vld [vmem:[#allocation5 + $0xd10] sm:$0xff] }
  0xc1   :  { %3365 = vmatprep.subr.bf16.mxu1 %v8008_v8  ;;  %v7880_v8 = vcombine.high %v230_v1, %v238_v2  ;;  %v8135_v15 = vcombine.low %v486_v3, %v494_v5  ;;  %v383_v1 = vld [vmem:[#allocation5 + $0x9d8] sm:$0xff] }
  0xc2   :  { %3323 = vmatpush1.bf16.msra.mxu0 %v7751_v10  ;;  %v222_v10 = vld [vmem:[#allocation5 + $0x4d0] sm:$0xff] }
  0xc3   :  { %3324 = vmatprep.subr.bf16.mxu0 %v7736_v12  ;;  %v8136_v12 = vcombine.high %v486_v3, %v494_v5  ;;  %v7863_v24 = vcombine.low %v214_v9, %v222_v10  ;;  %v103_v5 = vld [vmem:[#allocation5 + $0x118] sm:$0xff] }
  0xc4   :  { %3366 = vmatpush1.bf16.msra.mxu1 %v8007_v11  ;;  %v470_v11 = vld [vmem:[#allocation5 + $0xc90] sm:$0xff] }
  0xc5   :  { %3367 = vmatprep.subr.bf16.mxu1 %v7992_v16  ;;  %v7864_v16 = vcombine.high %v214_v9, %v222_v10  ;;  %v8119_v25 = vcombine.low %v470_v11, %v478_v13  ;;  %v367_v9 = vld [vmem:[#allocation5 + $0x958] sm:$0xff] }
  0xc6   :  { %3325 = vmatpush1.bf16.msra.mxu0 %v7735_v18  ;;  %v206_v18 = vld [vmem:[#allocation5 + $0x450] sm:$0xff] }
  0xc7   :  { %3326 = vmatprep.subr.bf16.mxu0 %v7720_v21  ;;  %v8120_v21 = vcombine.high %v470_v11, %v478_v13  ;;  %v7847_v32 = vcombine.low %v198_v17, %v206_v18  ;;  %v87_v13 = vld [vmem:[#allocation5 + $0x98] sm:$0xff] }
  0xc8   :  { %3368 = vmatpush1.bf16.msra.mxu1 %v7991_v19  ;;  %v454_v19 = vld [vmem:[#allocation5 + $0xc10] sm:$0xff] }
  0xc9   :  { %3369 = vmatprep.subr.bf16.mxu1 %v7976_v26  ;;  %v7848_v26 = vcombine.high %v198_v17, %v206_v18  ;;  %v8103_v33 = vcombine.low %v454_v19, %v462_v22  ;;  %v351_v17 = vld [vmem:[#allocation5 + $0x8d8] sm:$0xff] }
  0xca   :  { %3327 = vmatpush1.bf16.msra.mxu0 %v7719_v28  ;;  %v191_v28 = vld [vmem:[#allocation5 + $0x3d8] sm:$0xff] }
  0xcb   :  { %3328 = vmatprep.subr.bf16.mxu0 %v7960_v30  ;;  %v8104_v30 = vcombine.high %v454_v19, %v462_v22  ;;  %v7833_v40 = vcombine.low %v183_v27, %v191_v28  ;;  %v71_v22 = vld [vmem:[#allocation5 + $0x18] sm:$0xff] }
  0xcc   :  { %3370 = vmatpush1.bf16.msra.mxu1 %v7975_v29  ;;  %v439_v29 = vld [vmem:[#allocation5 + $0xb98] sm:$0xff] }
  0xcd   :  { %3371 = vmatprep.subr.bf16.mxu1 %v8216_v34  ;;  %v7834_v34 = vcombine.high %v183_v27, %v191_v28  ;;  %v8089_v41 = vcombine.low %v439_v29, %v447_v31  ;;  %v335_v27 = vld [vmem:[#allocation5 + $0x858] sm:$0xff] }
  0xce   :  { %3329 = vmatpush2.bf16.msra.mxu0 %v7959_v36  ;;  %v175_v36 = vld [vmem:[#allocation5 + $0x358] sm:$0xff] }
  0xcf   :  { %3330 = vmatprep.subr.bf16.mxu0 %v7944_v38  ;;  %v8090_v38 = vcombine.high %v439_v29, %v447_v31  ;;  %v7817_v48 = vcombine.low %v167_v35, %v175_v36  ;;  %v311_v31 = vld [vmem:[#allocation5 + $0x798] sm:$0xff] }
  0xd0   :  { %3372 = vmatpush2.bf16.msra.mxu1 %v8215_v37  ;;  %v423_v37 = vld [vmem:[#allocation5 + $0xb18] sm:$0xff] }
  0xd1   :  { %3373 = vmatprep.subr.bf16.mxu1 %v8200_v42  ;;  %v7818_v42 = vcombine.high %v167_v35, %v175_v36  ;;  %v8073_v49 = vcombine.low %v423_v37, %v431_v39  ;;  %v575_v35 = vld [vmem:[#allocation5 + $0xfd8] sm:$0xff] }
  0xd2   :  { %3331 = vmatpush2.bf16.msra.mxu0 %v7943_v44  ;;  %v159_v44 = vld [vmem:[#allocation5 + $0x2d8] sm:$0xff] }
  0xd3   :  { %3332 = vmatprep.subr.bf16.mxu0 %v7928_v46  ;;  %v8074_v46 = vcombine.high %v423_v37, %v431_v39  ;;  %v7801_v56 = vcombine.low %v151_v43, %v159_v44  ;;  %v295_v39 = vld [vmem:[#allocation5 + $0x718] sm:$0xff] }
  0xd4   :  { %3374 = vmatpush2.bf16.msra.mxu1 %v8199_v45  ;;  %v407_v45 = vld [vmem:[#allocation5 + $0xa98] sm:$0xff] }
  0xd5   :  { %3375 = vmatprep.subr.bf16.mxu1 %v8184_v50  ;;  %v7802_v50 = vcombine.high %v151_v43, %v159_v44  ;;  %v8057_v57 = vcombine.low %v407_v45, %v415_v47  ;;  %v559_v43 = vld [vmem:[#allocation5 + $0xf58] sm:$0xff] }
  0xd6   :  { %3333 = vmatpush2.bf16.msra.mxu0 %v7927_v52  ;;  %v143_v52 = vld [vmem:[#allocation5 + $0x258] sm:$0xff] }
  0xd7   :  { %3334 = vmatprep.subr.bf16.mxu0 %v7912_v54  ;;  %v8058_v54 = vcombine.high %v407_v45, %v415_v47  ;;  %v7785_v2 = vcombine.low %v135_v51, %v143_v52  ;;  %v279_v47 = vld [vmem:[#allocation5 + $0x698] sm:$0xff] }
  0xd8   :  { %3376 = vmatpush2.bf16.msra.mxu1 %v8183_v53  ;;  %v391_v53 = vld [vmem:[#allocation5 + $0xa18] sm:$0xff] }
  0xd9   :  { %3377 = vmatprep.subr.bf16.mxu1 %v8168_v59  ;;  %v7786_v59 = vcombine.high %v135_v51, %v143_v52  ;;  %v8041_v3 = vcombine.low %v391_v53, %v399_v55  ;;  %v543_v51 = vld [vmem:[#allocation5 + $0xed8] sm:$0xff] }
  0xda   :  { %3335 = vmatpush2.bf16.msra.mxu0 %v7911_v61  ;;  %v127_v61 = vld [vmem:[#allocation5 + $0x1d8] sm:$0xff] }
  0xdb   :  { %3336 = vmatprep.subr.bf16.mxu0 %v7896_v0  ;;  %v8042_v0 = vcombine.high %v391_v53, %v399_v55  ;;  %v7769_v10 = vcombine.low %v119_v60, %v127_v61  ;;  %v263_v55 = vld [vmem:[#allocation5 + $0x618] sm:$0xff] }
  0xdc   :  { %3378 = vmatpush2.bf16.msra.mxu1 %v8167_v62  ;;  %v375_v62 = vld [vmem:[#allocation5 + $0x998] sm:$0xff] }
  0xdd   :  { %3379 = vmatprep.subr.bf16.mxu1 %v8152_v4  ;;  %v7770_v4 = vcombine.high %v119_v60, %v127_v61  ;;  %v8025_v11 = vcombine.low %v375_v62, %v383_v1  ;;  %v527_v60 = vld [vmem:[#allocation5 + $0xe58] sm:$0xff] }
  0xde   :  { %3337 = vmatpush2.bf16.msra.mxu0 %v7895_v6  ;;  %v111_v6 = vld [vmem:[#allocation5 + $0x158] sm:$0xff] }
  0xdf   :  { %3338 = vmatprep.subr.bf16.mxu0 %v7880_v8  ;;  %v8026_v8 = vcombine.high %v375_v62, %v383_v1  ;;  %v7753_v18 = vcombine.low %v103_v5, %v111_v6  ;;  %v247_v1 = vld [vmem:[#allocation5 + $0x598] sm:$0xff] }
  0xe0   :  { %3380 = vmatpush2.bf16.msra.mxu1 %v8151_v7  ;;  %v359_v7 = vld [vmem:[#allocation5 + $0x918] sm:$0xff] }
  0xe1   :  { %3381 = vmatprep.subr.bf16.mxu1 %v8136_v12  ;;  %v7754_v12 = vcombine.high %v103_v5, %v111_v6  ;;  %v8009_v19 = vcombine.low %v359_v7, %v367_v9  ;;  %v511_v5 = vld [vmem:[#allocation5 + $0xdd8] sm:$0xff] }
  0xe2   :  { %3339 = vmatpush2.bf16.msra.mxu0 %v7879_v14  ;;  %v95_v14 = vld [vmem:[#allocation5 + $0xd8] sm:$0xff] }
  0xe3   :  { %3340 = vmatprep.subr.bf16.mxu0 %v7864_v16  ;;  %v8010_v16 = vcombine.high %v359_v7, %v367_v9  ;;  %v7737_v28 = vcombine.low %v87_v13, %v95_v14  ;;  %v231_v9 = vld [vmem:[#allocation5 + $0x518] sm:$0xff] }
  0xe4   :  { %3382 = vmatpush2.bf16.msra.mxu1 %v8135_v15  ;;  %v343_v15 = vld [vmem:[#allocation5 + $0x898] sm:$0xff] }
  0xe5   :  { %3383 = vmatprep.subr.bf16.mxu1 %v8120_v21  ;;  %v7738_v21 = vcombine.high %v87_v13, %v95_v14  ;;  %v7993_v29 = vcombine.low %v343_v15, %v351_v17  ;;  %v495_v13 = vld [vmem:[#allocation5 + $0xd58] sm:$0xff] }
  0xe6   :  { %3341 = vmatpush2.bf16.msra.mxu0 %v7863_v24  ;;  %v79_v24 = vld [vmem:[#allocation5 + $0x58] sm:$0xff] }
  0xe7   :  { %3342 = vmatprep.subr.bf16.mxu0 %v7848_v26  ;;  %v7994_v26 = vcombine.high %v343_v15, %v351_v17  ;;  %v7721_v36 = vcombine.low %v71_v22, %v79_v24  ;;  %v215_v17 = vld [vmem:[#allocation5 + $0x498] sm:$0xff] }
  0xe8   :  { %3384 = vmatpush2.bf16.msra.mxu1 %v8119_v25  ;;  %v327_v25 = vld [vmem:[#allocation5 + $0x818] sm:$0xff] }
  0xe9   :  { %3385 = vmatprep.subr.bf16.mxu1 %v8104_v30  ;;  %v7722_v30 = vcombine.high %v71_v22, %v79_v24  ;;  %v7977_v37 = vcombine.low %v327_v25, %v335_v27  ;;  %v479_v22 = vld [vmem:[#allocation5 + $0xcd8] sm:$0xff] }
  0xea   :  { %3343 = vmatpush2.bf16.msra.mxu0 %v7847_v32  ;;  %v319_v32 = vld [vmem:[#allocation5 + $0x7d8] sm:$0xff] }
  0xeb   :  { %3398 = vmatprep.subr.bf16.mxu0 %v7834_v34  ;;  %v7978_v34 = vcombine.high %v327_v25, %v335_v27  ;;  %v7961_v44 = vcombine.low %v311_v31, %v319_v32  ;;  %v199_v27 = vld [vmem:[#allocation5 + $0x418] sm:$0xff] }
  0xec   :  { %3386 = vmatpush2.bf16.msra.mxu1 %v8103_v33  ;;  %v567_v33 = vld [vmem:[#allocation5 + $0xf98] sm:$0xff] }
  0xed   :  { %3441 = vmatprep.subr.bf16.mxu1 %v8090_v38  ;;  %3345 = vmatmul.mubr.bf16.vlgmr.msra.gmra.mxu0 %v9663_v20  ;;  %v7962_v38 = vcombine.high %v311_v31, %v319_v32  ;;  %v8217_v45 = vcombine.low %v567_v33, %v575_v35  ;;  %v463_v31 = vld [vmem:[#allocation5 + $0xc58] sm:$0xff] }
  0xee   :  { %3399 = vmatpush1.bf16.msra.mxu0 %v7833_v40  ;;  %3430 = vmatprep.mubr.bf16.mxu0 %v9657_v58  ;;  %v303_v40 = vld [vmem:[#allocation5 + $0x758] sm:$0xff] }
  0xef   :  { %3388 = vmatmul.mubr.bf16.vlgmr.msra.gmra.mxu1 %v9665_v23  ;;  %3400 = vmatprep.subr.bf16.mxu0 %v7818_v42  ;;  %v8218_v42 = vcombine.high %v567_v33, %v575_v35  ;;  %v7945_v52 = vcombine.low %v295_v39, %v303_v40  ;;  %v184_v35 = vld [vmem:[#allocation5 + $0x3a0] sm:$0xff] }
  0xf0   :  { %3442 = vmatpush1.bf16.msra.mxu1 %v8089_v41  ;;  %3473 = vmatprep.mubr.bf16.mxu1 %v9659_v63  ;;  %v551_v41 = vld [vmem:[#allocation5 + $0xf18] sm:$0xff] }
  0xf1   :  { %3443 = vmatprep.subr.bf16.mxu1 %v8074_v46  ;;  %v7946_v46 = vcombine.high %v295_v39, %v303_v40  ;;  %v8201_v53 = vcombine.low %v551_v41, %v559_v43  ;;  %v448_v39 = vld [vmem:[#allocation5 + $0xbe0] sm:$0xff] }
  0xf2   :  { %3401 = vmatpush1.bf16.msra.mxu0 %v7817_v48  ;;  %v287_v48 = vld [vmem:[#allocation5 + $0x6d8] sm:$0xff] }
  0xf3   :  { %3402 = vmatprep.subr.bf16.mxu0 %v7802_v50  ;;  %v8202_v50 = vcombine.high %v551_v41, %v559_v43  ;;  %v7929_v61 = vcombine.low %v279_v47, %v287_v48  ;;  %v168_v43 = vld [vmem:[#allocation5 + $0x320] sm:$0xff] }
  0xf4   :  { %3444 = vmatpush1.bf16.msra.mxu1 %v8073_v49  ;;  %v535_v49 = vld [vmem:[#allocation5 + $0xe98] sm:$0xff] }
  0xf5   :  { %3445 = vmatprep.subr.bf16.mxu1 %v8058_v54  ;;  %v7930_v54 = vcombine.high %v279_v47, %v287_v48  ;;  %v8185_v62 = vcombine.low %v535_v49, %v543_v51  ;;  %v432_v47 = vld [vmem:[#allocation5 + $0xb60] sm:$0xff] }
  0xf6   :  { %3403 = vmatpush1.bf16.msra.mxu0 %v7801_v56  ;;  %v271_v56 = vld [vmem:[#allocation5 + $0x658] sm:$0xff] }
  0xf7   :  { %3404 = vmatprep.subr.bf16.mxu0 %v7786_v59  ;;  %v8186_v59 = vcombine.high %v535_v49, %v543_v51  ;;  %v7913_v6 = vcombine.low %v263_v55, %v271_v56  ;;  %v152_v51 = vld [vmem:[#allocation5 + $0x2a0] sm:$0xff] }
  0xf8   :  { %3446 = vmatpush1.bf16.msra.mxu1 %v8057_v57  ;;  %v519_v57 = vld [vmem:[#allocation5 + $0xe18] sm:$0xff] }
  0xf9   :  { %3447 = vmatprep.subr.bf16.mxu1 %v8042_v0  ;;  %v7914_v0 = vcombine.high %v263_v55, %v271_v56  ;;  %v8169_v7 = vcombine.low %v519_v57, %v527_v60  ;;  %v416_v55 = vld [vmem:[#allocation5 + $0xae0] sm:$0xff] }
  0xfa   :  { %3405 = vmatpush1.bf16.msra.mxu0 %v7785_v2  ;;  %v255_v2 = vld [vmem:[#allocation5 + $0x5d8] sm:$0xff] }
  0xfb   :  { %3406 = vmatprep.subr.bf16.mxu0 %v7770_v4  ;;  %v8170_v4 = vcombine.high %v519_v57, %v527_v60  ;;  %v7897_v14 = vcombine.low %v247_v1, %v255_v2 }
  0xfc   :  { %3448 = vmatpush1.bf16.msra.mxu1 %v8041_v3  ;;  %v503_v3 = vld [vmem:[#allocation5 + $0xd98] sm:$0xff] }
  0xfd   :  { %3449 = vmatprep.subr.bf16.mxu1 %v8026_v8  ;;  %v7898_v8 = vcombine.high %v247_v1, %v255_v2  ;;  %v8153_v15 = vcombine.low %v503_v3, %v511_v5  ;;  %v136_v1 = vld [vmem:[#allocation5 + $0x220] sm:$0xff] }
  0xfe   :  { %3407 = vmatpush1.bf16.msra.mxu0 %v7769_v10  ;;  %v239_v10 = vld [vmem:[#allocation5 + $0x558] sm:$0xff]  ;;  %v144_v2 = vld [vmem:[#allocation5 + $0x260] sm:$0xff] }
  0xff   :  { %3408 = vmatprep.subr.bf16.mxu0 %v7754_v12  ;;  %v8154_v12 = vcombine.high %v503_v3, %v511_v5  ;;  %v7881_v24 = vcombine.low %v231_v9, %v239_v10  ;;  %v392_v3 = vld [vmem:[#allocation5 + $0xa20] sm:$0xff] }
 0x100   :  { %3450 = vmatpush1.bf16.msra.mxu1 %v8025_v11  ;;  %v487_v11 = vld [vmem:[#allocation5 + $0xd18] sm:$0xff] }
 0x101   :  { %3451 = vmatprep.subr.bf16.mxu1 %v8010_v16  ;;  %v7882_v16 = vcombine.high %v231_v9, %v239_v10  ;;  %v8137_v25 = vcombine.low %v487_v11, %v495_v13 }
 0x102   :  { %3409 = vmatpush1.bf16.msra.mxu0 %v7753_v18  ;;  %v223_v18 = vld [vmem:[#allocation5 + $0x4d8] sm:$0xff] }
 0x103   :  { %3410 = vmatprep.subr.bf16.mxu0 %v7738_v21  ;;  %v8138_v21 = vcombine.high %v487_v11, %v495_v13  ;;  %v7865_v32 = vcombine.low %v215_v17, %v223_v18  ;;  %v120_v13 = vld [vmem:[#allocation5 + $0x1a0] sm:$0xff] }
 0x104   :  { %3452 = vmatpush1.bf16.msra.mxu1 %v8009_v19  ;;  %v471_v19 = vld [vmem:[#allocation5 + $0xc98] sm:$0xff] }
 0x105   :  { %3453 = vmatprep.subr.bf16.mxu1 %v7994_v26  ;;  %v7866_v26 = vcombine.high %v215_v17, %v223_v18  ;;  %v8121_v33 = vcombine.low %v471_v19, %v479_v22  ;;  %v384_v17 = vld [vmem:[#allocation5 + $0x9e0] sm:$0xff] }
 0x106   :  { %3411 = vmatpush1.bf16.msra.mxu0 %v7737_v28  ;;  %v207_v28 = vld [vmem:[#allocation5 + $0x458] sm:$0xff] }
 0x107   :  { %3412 = vmatprep.subr.bf16.mxu0 %v7722_v30  ;;  %v8122_v30 = vcombine.high %v471_v19, %v479_v22  ;;  %v7849_v40 = vcombine.low %v199_v27, %v207_v28 }
 0x108   :  { %3454 = vmatpush1.bf16.msra.mxu1 %v7993_v29  ;;  %v455_v29 = vld [vmem:[#allocation5 + $0xc18] sm:$0xff] }
 0x109   :  { %3455 = vmatprep.subr.bf16.mxu1 %v7978_v34  ;;  %v7850_v34 = vcombine.high %v199_v27, %v207_v28  ;;  %v8105_v41 = vcombine.low %v455_v29, %v463_v31  ;;  %v112_v27 = vld [vmem:[#allocation5 + $0x160] sm:$0xff] }
 0x10a   :  { %3413 = vmatpush1.bf16.msra.mxu0 %v7721_v36  ;;  %v192_v36 = vld [vmem:[#allocation5 + $0x3e0] sm:$0xff] }
 0x10b   :  { %3414 = vmatprep.subr.bf16.mxu0 %v7962_v38  ;;  %v8106_v38 = vcombine.high %v455_v29, %v463_v31  ;;  %v7835_v48 = vcombine.low %v184_v35, %v192_v36  ;;  %v360_v28 = vld [vmem:[#allocation5 + $0x920] sm:$0xff] }
 0x10c   :  { %3456 = vmatpush1.bf16.msra.mxu1 %v7977_v37  ;;  %v440_v37 = vld [vmem:[#allocation5 + $0xba0] sm:$0xff] }
 0x10d   :  { %3457 = vmatprep.subr.bf16.mxu1 %v8218_v42  ;;  %v7836_v42 = vcombine.high %v184_v35, %v192_v36  ;;  %v8091_v49 = vcombine.low %v440_v37, %v448_v39  ;;  %v96_v35 = vld [vmem:[#allocation5 + $0xe0] sm:$0xff] }
 0x10e   :  { %3415 = vmatpush2.bf16.msra.mxu0 %v7961_v44  ;;  %v176_v44 = vld [vmem:[#allocation5 + $0x360] sm:$0xff] }
 0x10f   :  { %3416 = vmatprep.subr.bf16.mxu0 %v7946_v46  ;;  %v8092_v46 = vcombine.high %v440_v37, %v448_v39  ;;  %v344_v36 = vld [vmem:[#allocation5 + $0x8a0] sm:$0xff] }
 0x110   :  { %3458 = vmatpush2.bf16.msra.mxu1 %v8217_v45  ;;  %v424_v45 = vld [vmem:[#allocation5 + $0xb20] sm:$0xff] }
 0x111   :  { %3459 = vmatprep.subr.bf16.mxu1 %v8202_v50  ;;  %v7820_v50 = vcombine.high %v168_v43, %v176_v44 }
 0x112   :  { %3417 = vmatpush2.bf16.msra.mxu0 %v7945_v52  ;;  %v160_v52 = vld [vmem:[#allocation5 + $0x2e0] sm:$0xff] }
 0x113   :  { %3418 = vmatprep.subr.bf16.mxu0 %v7930_v54  ;;  %v8076_v54 = vcombine.high %v424_v45, %v432_v47  ;;  %v7803_v9 = vcombine.low %v152_v51, %v160_v52 }
 0x114   :  { %3460 = vmatpush2.bf16.msra.mxu1 %v8201_v53  ;;  %v408_v53 = vld [vmem:[#allocation5 + $0xaa0] sm:$0xff] }
 0x115   :  { %3461 = vmatprep.subr.bf16.mxu1 %v8186_v59  ;;  %v7819_v59 = vcombine.low %v168_v43, %v176_v44  ;;  %v8060_v5 = vcombine.high %v408_v53, %v416_v55  ;;  %v8059_v11 = vcombine.low %v408_v53, %v416_v55  ;;  %v80_v43 = vld [vmem:[#allocation5 + $0x60] sm:$0xff] }
 0x116   :  { %3419 = vmatpush2.bf16.msra.mxu0 %v7929_v61  ;;  %v328_v44 = vld [vmem:[#allocation5 + $0x820] sm:$0xff] }
 0x117   :  { %3420 = vmatprep.subr.bf16.mxu0 %v7914_v0  ;;  %v7804_v0 = vcombine.high %v152_v51, %v160_v52  ;;  %v320_v51 = vld [vmem:[#allocation5 + $0x7e0] sm:$0xff] }
 0x118   :  { %3462 = vmatpush2.bf16.msra.mxu1 %v8185_v62  ;;  %v8075_v62 = vcombine.low %v424_v45, %v432_v47  ;;  %v568_v52 = vld [vmem:[#allocation5 + $0xfa0] sm:$0xff] }
 0x119   :  { %3463 = vmatprep.subr.bf16.mxu1 %v8170_v4 }
 0x11a   :  { %3421 = vmatpush2.bf16.msra.mxu0 %v7913_v6  ;;  %v400_v6 = vld [vmem:[#allocation5 + $0xa60] sm:$0xff] }
 0x11b   :  { %3422 = vmatprep.subr.bf16.mxu0 %v7898_v8 }
 0x11c   :  { %3464 = vmatpush2.bf16.msra.mxu1 %v8169_v7 }
 0x11d   :  { %3465 = vmatprep.subr.bf16.mxu1 %v8154_v12  ;;  %v7788_v12 = vcombine.high %v136_v1, %v144_v2 }
 0x11e   :  { %3423 = vmatpush2.bf16.msra.mxu0 %v7897_v14  ;;  %v128_v14 = vld [vmem:[#allocation5 + $0x1e0] sm:$0xff] }
 0x11f   :  { %3424 = vmatprep.subr.bf16.mxu0 %v7882_v16  ;;  %v8044_v16 = vcombine.high %v392_v3, %v400_v6  ;;  %v7771_v31 = vcombine.low %v120_v13, %v128_v14 }
 0x120   :  { %3466 = vmatpush2.bf16.msra.mxu1 %v8153_v15  ;;  %v376_v15 = vld [vmem:[#allocation5 + $0x9a0] sm:$0xff] }
 0x121   :  { %3467 = vmatprep.subr.bf16.mxu1 %v8138_v21  ;;  %v7787_v21 = vcombine.low %v136_v1, %v144_v2  ;;  %v8028_v29 = vcombine.high %v376_v15, %v384_v17  ;;  %v560_v1 = vld [vmem:[#allocation5 + $0xf60] sm:$0xff] }
 0x122   :  { %3425 = vmatpush2.bf16.msra.mxu0 %v7881_v24  ;;  %v8043_v24 = vcombine.low %v392_v3, %v400_v6  ;;  %v280_v6 = vld [vmem:[#allocation5 + $0x6a0] sm:$0xff] }
 0x123   :  { %3426 = vmatprep.subr.bf16.mxu0 %v7866_v26  ;;  %v104_v26 = vld [vmem:[#allocation5 + $0x120] sm:$0xff] }
 0x124   :  { %3468 = vmatpush2.bf16.msra.mxu1 %v8137_v25  ;;  %v7772_v25 = vcombine.high %v120_v13, %v128_v14  ;;  %v7755_v39 = vcombine.low %v104_v26, %v112_v27  ;;  %v264_v14 = vld [vmem:[#allocation5 + $0x620] sm:$0xff] }
 0x125   :  { %3469 = vmatprep.subr.bf16.mxu1 %v8122_v30  ;;  %v368_v30 = vld [vmem:[#allocation5 + $0x960] sm:$0xff] }
 0x126   :  { %3427 = vmatpush2.bf16.msra.mxu0 %v7865_v32  ;;  %v8027_v32 = vcombine.low %v376_v15, %v384_v17  ;;  %v8012_v37 = vcombine.high %v360_v28, %v368_v30  ;;  %v272_v15 = vld [vmem:[#allocation5 + $0x660] sm:$0xff] }
 0x127   :  { %3428 = vmatprep.subr.bf16.mxu0 %v7850_v34  ;;  %v88_v34 = vld [vmem:[#allocation5 + $0xa0] sm:$0xff] }
 0x128   :  { %3470 = vmatpush2.bf16.msra.mxu1 %v8121_v33  ;;  %v7756_v33 = vcombine.high %v104_v26, %v112_v27  ;;  %v7739_v47 = vcombine.low %v88_v34, %v96_v35  ;;  %v256_v26 = vld [vmem:[#allocation5 + $0x5e0] sm:$0xff] }
 0x129   :  { %3471 = vmatprep.subr.bf16.mxu1 %v8106_v38  ;;  %v352_v38 = vld [vmem:[#allocation5 + $0x8e0] sm:$0xff] }
 0x12a   :  { %3429 = vmatpush2.bf16.msra.mxu0 %v7849_v40  ;;  %v8011_v40 = vcombine.low %v360_v28, %v368_v30  ;;  %v7996_v45 = vcombine.high %v344_v36, %v352_v38  ;;  %v504_v27 = vld [vmem:[#allocation5 + $0xda0] sm:$0xff]  ;;  %v7915_v30 = vcombine.low %v264_v14, %v272_v15 }
 0x12b   :  { %3484 = vmatprep.subr.bf16.mxu0 %v7836_v42  ;;  %v72_v42 = vld [vmem:[#allocation5 + $0x20] sm:$0xff] }
 0x12c   :  { %3472 = vmatpush2.bf16.msra.mxu1 %v8105_v41  ;;  %v7740_v41 = vcombine.high %v88_v34, %v96_v35  ;;  %v7723_v55 = vcombine.low %v72_v42, %v80_v43  ;;  %v240_v34 = vld [vmem:[#allocation5 + $0x560] sm:$0xff] }
 0x12d   :  { %3527 = vmatprep.subr.bf16.mxu1 %v8092_v46  ;;  %v3174_v56 = vpop.f32.mrf.mxu0  ;;  %3431 = vmatmul.mubr.bf16.vlgmr.msra.gmra.mxu0 %v9663_v20  ;;  %v336_v46 = vld [vmem:[#allocation5 + $0x860] sm:$0xff] }
 0x12e   :  { %3485 = vmatpush1.bf16.msra.mxu0 %v7835_v48  ;;  %3516 = vmatprep.mubr.bf16.mxu0 %v9657_v58  ;;  %v7995_v48 = vcombine.low %v344_v36, %v352_v38  ;;  %v7980_v53 = vcombine.high %v328_v44, %v336_v46  ;;  %v488_v35 = vld [vmem:[#allocation5 + $0xd20] sm:$0xff] }
 0x12f   :  { %v3217_v57 = vpop.f32.mrf.mxu1  ;;  %3474 = vmatmul.mubr.bf16.vlgmr.msra.gmra.mxu1 %v9665_v23  ;;  %v9681_v61 = vpop.f32.mrf.mxu0  ;;  %3486 = vmatprep.subr.bf16.mxu0 %v7820_v50  ;;  %v312_v50 = vld [vmem:[#allocation5 + $0x7a0] sm:$0xff] }
 0x130   :  { %v3218_v60 = vadd.f32 %v3217_v57, %v3174_v56  ;;  %3528 = vmatpush1.bf16.msra.mxu1 %v8091_v49  ;;  %3559 = vmatprep.mubr.bf16.mxu1 %v9659_v63  ;;  %v7724_v49 = vcombine.high %v72_v42, %v80_v43  ;;  %v7979_v56 = vcombine.low %v328_v44, %v336_v46  ;;  %v224_v42 = vld [vmem:[#allocation5 + $0x4e0] sm:$0xff] }
 0x131   :  { %v9683_v4 = vpop.f32.mrf.mxu1  ;;  %3529 = vmatprep.subr.bf16.mxu1 %v8076_v54  ;;  %v3178_v7 = vpop.f32.mrf.mxu0  ;;  %v576_v54 = vld [vmem:[#allocation5 + $0xfe0] sm:$0xff]  ;;  %v7964_v57 = vcombine.high %v312_v50, %v320_v51  ;;  %v7963_v2 = vcombine.low %v312_v50, %v320_v51 }
 0x132   :  { %3487 = vmatpush1.bf16.msra.mxu0 %v7819_v59  ;;  %v3828_v18 = vmax.f32 %v3218_v60, 0.0  ;;  %v296_v59 = vld [vmem:[#allocation5 + $0x720] sm:$0xff]  ;;  %v8219_v3 = vcombine.low %v568_v52, %v576_v54 }
 0x133   :  { %v3221_v8 = vpop.f32.mrf.mxu1  ;;  %3488 = vmatprep.subr.bf16.mxu0 %v7804_v0  ;;  %v304_v60 = vld [vmem:[#allocation5 + $0x760] sm:$0xff]  ;;  %v8220_v0 = vcombine.high %v568_v52, %v576_v54 }
 0x134   :  { %v3222_v10 = vadd.f32 %v3221_v8, %v3178_v7  ;;  %3530 = vmatpush1.bf16.msra.mxu1 %v8075_v62  ;;  %v552_v62 = vld [vmem:[#allocation5 + $0xf20] sm:$0xff] }
 0x135   :  { %3531 = vmatprep.subr.bf16.mxu1 %v8060_v5  ;;  %v7948_v5 = vcombine.high %v296_v59, %v304_v60  ;;  %v288_v7 = vld [vmem:[#allocation5 + $0x6e0] sm:$0xff] }
 0x136   :  { %v3844_v19 = vmax.f32 %v3222_v10, 0.0  ;;  %3489 = vmatpush1.bf16.msra.mxu0 %v7803_v9  ;;  %v536_v8 = vld [vmem:[#allocation5 + $0xea0] sm:$0xff]  ;;  %v8204_v9 = vcombine.high %v552_v62, %v560_v1  ;;  %v7932_v13 = vcombine.high %v280_v6, %v288_v7 }
 0x137   :  { %3490 = vmatprep.subr.bf16.mxu0 %v7788_v12  ;;  %v544_v10 = vld [vmem:[#allocation5 + $0xee0] sm:$0xff]  ;;  %v8203_v12 = vcombine.low %v552_v62, %v560_v1 }
 0x138   :  { %v9687_v22 = vpack.c.bf16 %v3844_v19, %v3828_v18  ;;  %3532 = vmatpush1.bf16.msra.mxu1 %v8059_v11  ;;  %v7947_v11 = vcombine.low %v296_v59, %v304_v60  ;;  %v8188_v17 = vcombine.high %v536_v8, %v544_v10  ;;  %v528_v18 = vld [vmem:[#allocation5 + $0xe60] sm:$0xff]  ;;  %v7931_v19 = vcombine.low %v280_v6, %v288_v7  ;;  %v193_v59 = vld [vmem:[#allocation5 + $0x3e8] sm:$0xff] }
 0x139   :  { %3533 = vmatprep.subr.bf16.mxu1 %v8044_v16  ;;  %v520_v16 = vld [vmem:[#allocation5 + $0xe20] sm:$0xff]  ;;  %v441_v60 = vld [vmem:[#allocation5 + $0xba8] sm:$0xff] }
 0x13a   :  { %3491 = vmatpush1.bf16.msra.mxu0 %v7787_v21  ;;  %v8187_v21 = vcombine.low %v536_v8, %v544_v10  ;;  %v8172_v28 = vcombine.high %v520_v16, %v528_v18  ;;  %v472_v43 = vld [vmem:[#allocation5 + $0xca0] sm:$0xff]  ;;  %v177_v6 = vld [vmem:[#allocation5 + $0x368] sm:$0xff] }
 0x13b   :  { %3492 = vmatprep.subr.bf16.mxu0 %v7772_v25  ;;  %v248_v25 = vld [vmem:[#allocation5 + $0x5a0] sm:$0xff]  ;;  %v425_v7 = vld [vmem:[#allocation5 + $0xb28] sm:$0xff] }
 0x13c   :  { %3534 = vmatpush1.bf16.msra.mxu1 %v8043_v24  ;;  %v7916_v24 = vcombine.high %v264_v14, %v272_v15  ;;  %v7899_v38 = vcombine.low %v248_v25, %v256_v26  ;;  %v208_v50 = vld [vmem:[#allocation5 + $0x460] sm:$0xff]  ;;  %v153_v14 = vld [vmem:[#allocation5 + $0x2a8] sm:$0xff] }
 0x13d   :  { %3535 = vmatprep.subr.bf16.mxu1 %v8028_v29  ;;  %v512_v29 = vld [vmem:[#allocation5 + $0xde0] sm:$0xff]  ;;  %v161_v15 = vld [vmem:[#allocation5 + $0x2e8] sm:$0xff] }
 0x13e   :  { %3493 = vmatpush1.bf16.msra.mxu0 %v7771_v31  ;;  %v8171_v31 = vcombine.low %v520_v16, %v528_v18  ;;  %v8156_v36 = vcombine.high %v504_v27, %v512_v29  ;;  %v456_v51 = vld [vmem:[#allocation5 + $0xc20] sm:$0xff]  ;;  %v409_v16 = vld [vmem:[#allocation5 + $0xaa8] sm:$0xff] }
 0x13f   :  { %3494 = vmatprep.subr.bf16.mxu0 %v7756_v33  ;;  %v232_v33 = vld [vmem:[#allocation5 + $0x520] sm:$0xff] }
 0x140   :  { %3536 = vmatpush1.bf16.msra.mxu1 %v8027_v32  ;;  %v7900_v32 = vcombine.high %v248_v25, %v256_v26  ;;  %v7883_v46 = vcombine.low %v232_v33, %v240_v34 }
 0x141   :  { %3537 = vmatprep.subr.bf16.mxu1 %v8012_v37  ;;  %v496_v37 = vld [vmem:[#allocation5 + $0xd60] sm:$0xff] }
 0x142   :  { %3495 = vmatpush1.bf16.msra.mxu0 %v7755_v39  ;;  %v8155_v39 = vcombine.low %v504_v27, %v512_v29  ;;  %v8140_v44 = vcombine.high %v488_v35, %v496_v37  ;;  %v7806_v29 = vcombine.high %v153_v14, %v161_v15 }
 0x143   :  { %3496 = vmatprep.subr.bf16.mxu0 %v7740_v41  ;;  %v216_v41 = vld [vmem:[#allocation5 + $0x4a0] sm:$0xff] }
 0x144   :  { %3538 = vmatpush1.bf16.msra.mxu1 %v8011_v40  ;;  %v7884_v40 = vcombine.high %v232_v33, %v240_v34  ;;  %v7867_v54 = vcombine.low %v216_v41, %v224_v42  ;;  %v145_v33 = vld [vmem:[#allocation5 + $0x268] sm:$0xff] }
 0x145   :  { %3539 = vmatprep.subr.bf16.mxu1 %v7996_v45  ;;  %v480_v45 = vld [vmem:[#allocation5 + $0xce0] sm:$0xff] }
 0x146   :  { %3497 = vmatpush1.bf16.msra.mxu0 %v7739_v47  ;;  %v8139_v47 = vcombine.low %v488_v35, %v496_v37  ;;  %v8124_v52 = vcombine.high %v472_v43, %v480_v45  ;;  %v393_v35 = vld [vmem:[#allocation5 + $0xa28] sm:$0xff] }
 0x147   :  { %3498 = vmatprep.subr.bf16.mxu0 %v7724_v49  ;;  %v200_v49 = vld [vmem:[#allocation5 + $0x420] sm:$0xff] }
 0x148   :  { %3540 = vmatpush1.bf16.msra.mxu1 %v7995_v48  ;;  %v7868_v48 = vcombine.high %v216_v41, %v224_v42  ;;  %v7851_v1 = vcombine.low %v200_v49, %v208_v50 }
 0x149   :  { %3541 = vmatprep.subr.bf16.mxu1 %v7980_v53  ;;  %v464_v53 = vld [vmem:[#allocation5 + $0xc60] sm:$0xff] }
 0x14a   :  { %3499 = vmatpush1.bf16.msra.mxu0 %v7723_v55  ;;  %v8123_v55 = vcombine.low %v472_v43, %v480_v45  ;;  %v8108_v62 = vcombine.high %v456_v51, %v464_v53  ;;  %v121_v43 = vld [vmem:[#allocation5 + $0x1a8] sm:$0xff] }
 0x14b   :  { %3500 = vmatprep.subr.bf16.mxu0 %v7964_v57  ;;  %v185_v57 = vld [vmem:[#allocation5 + $0x3a8] sm:$0xff] }
 0x14c   :  { %3542 = vmatpush1.bf16.msra.mxu1 %v7979_v56  ;;  %v7852_v56 = vcombine.high %v200_v49, %v208_v50  ;;  %v7837_v10 = vcombine.low %v185_v57, %v193_v59 }
 0x14d   :  { %3543 = vmatprep.subr.bf16.mxu1 %v8220_v0  ;;  %v449_v0 = vld [vmem:[#allocation5 + $0xbe8] sm:$0xff] }
 0x14e   :  { %3501 = vmatpush2.bf16.msra.mxu0 %v7963_v2  ;;  %v8107_v2 = vcombine.low %v456_v51, %v464_v53  ;;  %v8094_v8 = vcombine.high %v441_v60, %v449_v0 }
 0x14f   :  { %3502 = vmatprep.subr.bf16.mxu0 %v7948_v5  ;;  %v169_v5 = vld [vmem:[#allocation5 + $0x328] sm:$0xff] }
 0x150   :  { %3544 = vmatpush2.bf16.msra.mxu1 %v8219_v3  ;;  %v7838_v3 = vcombine.high %v185_v57, %v193_v59  ;;  %v7821_v25 = vcombine.low %v169_v5, %v177_v6  ;;  %v369_v57 = vld [vmem:[#allocation5 + $0x968] sm:$0xff] }
 0x151   :  { %3545 = vmatprep.subr.bf16.mxu1 %v8204_v9  ;;  %v433_v9 = vld [vmem:[#allocation5 + $0xb68] sm:$0xff] }
 0x152   :  { %3503 = vmatpush2.bf16.msra.mxu0 %v7947_v11  ;;  %v9689_v11 = vpop.f32.mrf.mxu0  ;;  %v8078_v18 = vcombine.high %v425_v7, %v433_v9 }
 0x153   :  { %3504 = vmatprep.subr.bf16.mxu0 %v7932_v13  ;;  %v7822_v13 = vcombine.high %v169_v5, %v177_v6  ;;  %v353_v5 = vld [vmem:[#allocation5 + $0x8e8] sm:$0xff] }
 0x154   :  { %3546 = vmatpush2.bf16.msra.mxu1 %v8203_v12  ;;  %v8093_v12 = vcombine.low %v441_v60, %v449_v0 }
 0x155   :  { %3547 = vmatprep.subr.bf16.mxu1 %v8188_v17  ;;  %v9691_v17 = vpop.f32.mrf.mxu1 }
 0x156   :  { %3505 = vmatpush2.bf16.msra.mxu0 %v7931_v19  ;;  %v417_v19 = vld [vmem:[#allocation5 + $0xae8] sm:$0xff] }
 0x157   :  { %3506 = vmatprep.subr.bf16.mxu0 %v7916_v24 }
 0x158   :  { %3548 = vmatpush2.bf16.msra.mxu1 %v8187_v21 }
 0x159   :  { %3549 = vmatprep.subr.bf16.mxu1 %v8172_v28  ;;  %v8077_v28 = vcombine.low %v425_v7, %v433_v9 }
 0x15a   :  { %3507 = vmatpush2.bf16.msra.mxu0 %v7915_v30 }
 0x15b   :  { %3508 = vmatprep.subr.bf16.mxu0 %v7900_v32  ;;  %v137_v32 = vld [vmem:[#allocation5 + $0x228] sm:$0xff] }
 0x15c   :  { %3550 = vmatpush2.bf16.msra.mxu1 %v8171_v31  ;;  %v8062_v31 = vcombine.high %v409_v16, %v417_v19  ;;  %v7790_v41 = vcombine.high %v137_v32, %v145_v33  ;;  %v7789_v49 = vcombine.low %v137_v32, %v145_v33  ;;  %v297_v33 = vld [vmem:[#allocation5 + $0x728] sm:$0xff] }
 0x15d   :  { %3551 = vmatprep.subr.bf16.mxu1 %v8156_v36  ;;  %v401_v36 = vld [vmem:[#allocation5 + $0xa68] sm:$0xff] }
 0x15e   :  { %3509 = vmatpush2.bf16.msra.mxu0 %v7899_v38  ;;  %v7805_v38 = vcombine.low %v153_v14, %v161_v15  ;;  %v8046_v42 = vcombine.high %v393_v35, %v401_v36  ;;  %v8045_v51 = vcombine.low %v393_v35, %v401_v36  ;;  %v337_v14 = vld [vmem:[#allocation5 + $0x868] sm:$0xff] }
 0x15f   :  { %3510 = vmatprep.subr.bf16.mxu0 %v7884_v40  ;;  %v8061_v40 = vcombine.low %v409_v16, %v417_v19  ;;  %v553_v35 = vld [vmem:[#allocation5 + $0xf28] sm:$0xff] }
 0x160   :  { %3552 = vmatpush2.bf16.msra.mxu1 %v8155_v39  ;;  %v561_v36 = vld [vmem:[#allocation5 + $0xf68] sm:$0xff] }
 0x161   :  { %3553 = vmatprep.subr.bf16.mxu1 %v8140_v44  ;;  %v129_v44 = vld [vmem:[#allocation5 + $0x1e8] sm:$0xff] }
 0x162   :  { %3511 = vmatpush2.bf16.msra.mxu0 %v7883_v46  ;;  %v7773_v59 = vcombine.low %v121_v43, %v129_v44 }
 0x163   :  { %3512 = vmatprep.subr.bf16.mxu0 %v7868_v48  ;;  %v385_v48 = vld [vmem:[#allocation5 + $0x9e8] sm:$0xff] }
 0x164   :  { %3554 = vmatpush2.bf16.msra.mxu1 %v8139_v47  ;;  %v377_v47 = vld [vmem:[#allocation5 + $0x9a8] sm:$0xff] }
 0x165   :  { %3555 = vmatprep.subr.bf16.mxu1 %v8124_v52  ;;  %v7774_v52 = vcombine.high %v121_v43, %v129_v44  ;;  %v8030_v53 = vcombine.high %v377_v47, %v385_v48  ;;  %v8029_v60 = vcombine.low %v377_v47, %v385_v48  ;;  %v537_v43 = vld [vmem:[#allocation5 + $0xea8] sm:$0xff] }
 0x166   :  { %3513 = vmatpush2.bf16.msra.mxu0 %v7867_v54  ;;  %v105_v54 = vld [vmem:[#allocation5 + $0x128] sm:$0xff] }
 0x167   :  { %3514 = vmatprep.subr.bf16.mxu0 %v7852_v56  ;;  %v361_v56 = vld [vmem:[#allocation5 + $0x928] sm:$0xff] }
 0x168   :  { %3556 = vmatpush2.bf16.msra.mxu1 %v8123_v55  ;;  %v113_v55 = vld [vmem:[#allocation5 + $0x168] sm:$0xff]  ;;  %v8014_v0 = vcombine.high %v361_v56, %v369_v57  ;;  %v8013_v7 = vcombine.low %v361_v56, %v369_v57 }
 0x169   :  { %3557 = vmatprep.subr.bf16.mxu1 %v8108_v62  ;;  %v7758_v62 = vcombine.high %v105_v54, %v113_v55  ;;  %v7757_v6 = vcombine.low %v105_v54, %v113_v55  ;;  %v545_v44 = vld [vmem:[#allocation5 + $0xee8] sm:$0xff] }
 0x16a   :  { %3515 = vmatpush2.bf16.msra.mxu0 %v7851_v1  ;;  %v89_v1 = vld [vmem:[#allocation5 + $0xa8] sm:$0xff]  ;;  %v8190_v48 = vcombine.high %v537_v43, %v545_v44  ;;  %v8189_v55 = vcombine.low %v537_v43, %v545_v44 }
 0x16b   :  { %3570 = vmatprep.subr.bf16.mxu0 %v7838_v3  ;;  %v345_v3 = vld [vmem:[#allocation5 + $0x8a8] sm:$0xff] }
 0x16c   :  { %3558 = vmatpush2.bf16.msra.mxu1 %v8107_v2  ;;  %v97_v2 = vld [vmem:[#allocation5 + $0xe8] sm:$0xff]  ;;  %v7998_v9 = vcombine.high %v345_v3, %v353_v5  ;;  %v7997_v16 = vcombine.low %v345_v3, %v353_v5 }
 0x16d   :  { %3613 = vmatprep.subr.bf16.mxu1 %v8094_v8  ;;  %v3260_v21 = vpop.f32.mrf.mxu0  ;;  %3517 = vmatmul.mubr.bf16.vlgmr.msra.gmra.mxu0 %v9663_v20  ;;  %v7742_v8 = vcombine.high %v89_v1, %v97_v2  ;;  %v7741_v15 = vcombine.low %v89_v1, %v97_v2 }
 0x16e   :  { %3571 = vmatpush1.bf16.msra.mxu0 %v7837_v10  ;;  %3602 = vmatprep.mubr.bf16.mxu0 %v9657_v58  ;;  %v73_v10 = vld [vmem:[#allocation5 + $0x28] sm:$0xff] }
 0x16f   :  { %v3303_v24 = vpop.f32.mrf.mxu1  ;;  %3560 = vmatmul.mubr.bf16.vlgmr.msra.gmra.mxu1 %v9665_v23  ;;  %v9695_v27 = vpop.f32.mrf.mxu0  ;;  %3572 = vmatprep.subr.bf16.mxu0 %v7822_v13  ;;  %v329_v13 = vld [vmem:[#allocation5 + $0x828] sm:$0xff] }
 0x170   :  { %v3304_v26 = vadd.f32 %v3303_v24, %v3260_v21  ;;  %3614 = vmatpush1.bf16.msra.mxu1 %v8093_v12  ;;  %3645 = vmatprep.mubr.bf16.mxu1 %v9659_v63  ;;  %v81_v12 = vld [vmem:[#allocation5 + $0x68] sm:$0xff]  ;;  %v7982_v19 = vcombine.high %v329_v13, %v337_v14 }
 0x171   :  { %v9697_v30 = vpop.f32.mrf.mxu1  ;;  %3615 = vmatprep.subr.bf16.mxu1 %v8078_v18  ;;  %v3264_v34 = vpop.f32.mrf.mxu0  ;;  %v7726_v18 = vcombine.high %v73_v10, %v81_v12  ;;  %v313_v21 = vld [vmem:[#allocation5 + $0x7a8] sm:$0xff] }
 0x172   :  { %3573 = vmatpush1.bf16.msra.mxu0 %v7821_v25  ;;  %v3830_v45 = vmax.f32 %v3304_v26, 0.0  ;;  %v321_v24 = vld [vmem:[#allocation5 + $0x7e8] sm:$0xff] }
 0x173   :  { %v3307_v37 = vpop.f32.mrf.mxu1  ;;  %3574 = vmatprep.subr.bf16.mxu0 %v7806_v29  ;;  %v569_v25 = vld [vmem:[#allocation5 + $0xfa8] sm:$0xff]  ;;  %v7981_v29 = vcombine.low %v329_v13, %v337_v14 }
 0x174   :  { %v3308_v39 = vadd.f32 %v3307_v37, %v3264_v34  ;;  %3616 = vmatpush1.bf16.msra.mxu1 %v8077_v28  ;;  %v577_v26 = vld [vmem:[#allocation5 + $0xfe8] sm:$0xff]  ;;  %v7725_v28 = vcombine.low %v73_v10, %v81_v12  ;;  %v7965_v37 = vcombine.low %v313_v21, %v321_v24 }
 0x175   :  { %3617 = vmatprep.subr.bf16.mxu1 %v8062_v31  ;;  %v7966_v31 = vcombine.high %v313_v21, %v321_v24  ;;  %v8222_v32 = vcombine.high %v569_v25, %v577_v26  ;;  %v305_v34 = vld [vmem:[#allocation5 + $0x768] sm:$0xff] }
 0x176   :  { %v3846_v46 = vmax.f32 %v3308_v39, 0.0  ;;  %3575 = vmatpush1.bf16.msra.mxu0 %v7805_v38  ;;  %v8221_v38 = vcombine.low %v569_v25, %v577_v26  ;;  %v7950_v39 = vcombine.high %v297_v33, %v305_v34 }
 0x177   :  { %3576 = vmatprep.subr.bf16.mxu0 %v7790_v41  ;;  %v281_v41 = vld [vmem:[#allocation5 + $0x6a8] sm:$0xff] }
 0x178   :  { %v9701_v50 = vpack.c.bf16 %v3846_v46, %v3830_v45  ;;  %3618 = vmatpush1.bf16.msra.mxu1 %v8061_v40  ;;  %v8206_v40 = vcombine.high %v553_v35, %v561_v36  ;;  %v7949_v45 = vcombine.low %v297_v33, %v305_v34  ;;  %v8205_v46 = vcombine.low %v553_v35, %v561_v36 }
 0x179   :  { %3619 = vmatprep.subr.bf16.mxu1 %v8046_v42  ;;  %v289_v42 = vld [vmem:[#allocation5 + $0x6e8] sm:$0xff] }
 0x17a   :  { %3577 = vmatpush1.bf16.msra.mxu0 %v7789_v49  ;;  %v7934_v47 = vcombine.high %v281_v41, %v289_v42  ;;  %v265_v49 = vld [vmem:[#allocation5 + $0x628] sm:$0xff]  ;;  %v7933_v54 = vcombine.low %v281_v41, %v289_v42 }
 0x17b   :  { %3578 = vmatprep.subr.bf16.mxu0 %v7774_v52  ;;  %v521_v52 = vld [vmem:[#allocation5 + $0xe28] sm:$0xff] }
 0x17c   :  { %3620 = vmatpush1.bf16.msra.mxu1 %v8045_v51  ;;  %v273_v51 = vld [vmem:[#allocation5 + $0x668] sm:$0xff] }
 0x17d   :  { %3621 = vmatprep.subr.bf16.mxu1 %v8030_v53  ;;  %v529_v53 = vld [vmem:[#allocation5 + $0xe68] sm:$0xff]  ;;  %v7918_v56 = vcombine.high %v265_v49, %v273_v51  ;;  %v7917_v1 = vcombine.low %v265_v49, %v273_v51  ;;  %v9703_v51 = vpop.f32.mrf.mxu0 }
 0x17e   :  { %3579 = vmatpush1.bf16.msra.mxu0 %v7773_v59  ;;  %v8174_v57 = vcombine.high %v521_v52, %v529_v53  ;;  %v249_v59 = vld [vmem:[#allocation5 + $0x5a8] sm:$0xff]  ;;  %v8173_v2 = vcombine.low %v521_v52, %v529_v53 }
 0x17f   :  { %3580 = vmatprep.subr.bf16.mxu0 %v7758_v62  ;;  %v505_v62 = vld [vmem:[#allocation5 + $0xda8] sm:$0xff] }
 0x180   :  { %3622 = vmatpush1.bf16.msra.mxu1 %v8029_v60  ;;  %v257_v60 = vld [vmem:[#allocation5 + $0x5e8] sm:$0xff] }
 0x181   :  { %3623 = vmatprep.subr.bf16.mxu1 %v8014_v0  ;;  %v513_v0 = vld [vmem:[#allocation5 + $0xde8] sm:$0xff]  ;;  %v7902_v3 = vcombine.high %v249_v59, %v257_v60  ;;  %v7901_v10 = vcombine.low %v249_v59, %v257_v60  ;;  %v410_v60 = vld [vmem:[#allocation5 + $0xab0] sm:$0xff] }
 0x182   :  { %3581 = vmatpush1.bf16.msra.mxu0 %v7757_v6  ;;  %v8158_v5 = vcombine.high %v505_v62, %v513_v0  ;;  %v233_v6 = vld [vmem:[#allocation5 + $0x528] sm:$0xff]  ;;  %v8157_v12 = vcombine.low %v505_v62, %v513_v0  ;;  %v418_v62 = vld [vmem:[#allocation5 + $0xaf0] sm:$0xff] }
 0x183   :  { %3582 = vmatprep.subr.bf16.mxu0 %v7742_v8  ;;  %v489_v8 = vld [vmem:[#allocation5 + $0xd28] sm:$0xff] }
 0x184   :  { %3624 = vmatpush1.bf16.msra.mxu1 %v8013_v7  ;;  %v241_v7 = vld [vmem:[#allocation5 + $0x568] sm:$0xff] }
 0x185   :  { %3625 = vmatprep.subr.bf16.mxu1 %v7998_v9  ;;  %v497_v9 = vld [vmem:[#allocation5 + $0xd68] sm:$0xff]  ;;  %v7886_v13 = vcombine.high %v233_v6, %v241_v7  ;;  %v7885_v21 = vcombine.low %v233_v6, %v241_v7 }
 0x186   :  { %3583 = vmatpush1.bf16.msra.mxu0 %v7741_v15  ;;  %v8142_v14 = vcombine.high %v489_v8, %v497_v9  ;;  %v217_v15 = vld [vmem:[#allocation5 + $0x4a8] sm:$0xff]  ;;  %v8141_v24 = vcombine.low %v489_v8, %v497_v9  ;;  %v8064_v8 = vcombine.high %v410_v60, %v418_v62  ;;  %v138_v9 = vld [vmem:[#allocation5 + $0x230] sm:$0xff] }
 0x187   :  { %3584 = vmatprep.subr.bf16.mxu0 %v7726_v18  ;;  %v473_v18 = vld [vmem:[#allocation5 + $0xca8] sm:$0xff] }
 0x188   :  { %3626 = vmatpush1.bf16.msra.mxu1 %v7997_v16  ;;  %v225_v16 = vld [vmem:[#allocation5 + $0x4e8] sm:$0xff] }
 0x189   :  { %3627 = vmatprep.subr.bf16.mxu1 %v7982_v19  ;;  %v481_v19 = vld [vmem:[#allocation5 + $0xce8] sm:$0xff]  ;;  %v7870_v25 = vcombine.high %v217_v15, %v225_v16  ;;  %v7869_v33 = vcombine.low %v217_v15, %v225_v16 }
 0x18a   :  { %3585 = vmatpush1.bf16.msra.mxu0 %v7725_v28  ;;  %v8126_v26 = vcombine.high %v473_v18, %v481_v19  ;;  %v201_v28 = vld [vmem:[#allocation5 + $0x428] sm:$0xff]  ;;  %v8125_v34 = vcombine.low %v473_v18, %v481_v19  ;;  %v8063_v19 = vcombine.low %v410_v60, %v418_v62  ;;  %v330_v60 = vld [vmem:[#allocation5 + $0x830] sm:$0xff] }
 0x18b   :  { %3586 = vmatprep.subr.bf16.mxu0 %v7966_v31  ;;  %v457_v31 = vld [vmem:[#allocation5 + $0xc28] sm:$0xff]  ;;  %v338_v62 = vld [vmem:[#allocation5 + $0x870] sm:$0xff] }
 0x18c   :  { %3628 = vmatpush1.bf16.msra.mxu1 %v7981_v29  ;;  %v209_v29 = vld [vmem:[#allocation5 + $0x468] sm:$0xff] }
 0x18d   :  { %3629 = vmatprep.subr.bf16.mxu1 %v8222_v32  ;;  %v465_v32 = vld [vmem:[#allocation5 + $0xc68] sm:$0xff]  ;;  %v7854_v35 = vcombine.high %v201_v28, %v209_v29  ;;  %v7853_v41 = vcombine.low %v201_v28, %v209_v29 }
 0x18e   :  { %3587 = vmatpush2.bf16.msra.mxu0 %v7965_v37  ;;  %v8110_v36 = vcombine.high %v457_v31, %v465_v32  ;;  %v186_v37 = vld [vmem:[#allocation5 + $0x3b0] sm:$0xff]  ;;  %v8109_v42 = vcombine.low %v457_v31, %v465_v32 }
 0x18f   :  { %3588 = vmatprep.subr.bf16.mxu0 %v7950_v39  ;;  %v442_v39 = vld [vmem:[#allocation5 + $0xbb0] sm:$0xff] }
 0x190   :  { %3630 = vmatpush2.bf16.msra.mxu1 %v8221_v38  ;;  %v194_v38 = vld [vmem:[#allocation5 + $0x3f0] sm:$0xff] }
 0x191   :  { %3631 = vmatprep.subr.bf16.mxu1 %v8206_v40  ;;  %v450_v40 = vld [vmem:[#allocation5 + $0xbf0] sm:$0xff]  ;;  %v7840_v43 = vcombine.high %v186_v37, %v194_v38  ;;  %v7839_v49 = vcombine.low %v186_v37, %v194_v38 }
 0x192   :  { %3589 = vmatpush2.bf16.msra.mxu0 %v7949_v45  ;;  %v8096_v44 = vcombine.high %v442_v39, %v450_v40  ;;  %v170_v45 = vld [vmem:[#allocation5 + $0x330] sm:$0xff]  ;;  %v8095_v52 = vcombine.low %v442_v39, %v450_v40 }
 0x193   :  { %3590 = vmatprep.subr.bf16.mxu0 %v7934_v47  ;;  %v426_v47 = vld [vmem:[#allocation5 + $0xb30] sm:$0xff] }
 0x194   :  { %3632 = vmatpush2.bf16.msra.mxu1 %v8205_v46  ;;  %v178_v46 = vld [vmem:[#allocation5 + $0x370] sm:$0xff] }
 0x195   :  { %3633 = vmatprep.subr.bf16.mxu1 %v8190_v48  ;;  %v434_v48 = vld [vmem:[#allocation5 + $0xb70] sm:$0xff]  ;;  %v7824_v53 = vcombine.high %v170_v45, %v178_v46 }
 0x196   :  { %3591 = vmatpush2.bf16.msra.mxu0 %v7933_v54  ;;  %v9705_v54 = vpop.f32.mrf.mxu1  ;;  %v378_v31 = vld [vmem:[#allocation5 + $0x9b0] sm:$0xff] }
 0x197   :  { %3592 = vmatprep.subr.bf16.mxu0 %v7918_v56  ;;  %v154_v56 = vld [vmem:[#allocation5 + $0x2b0] sm:$0xff] }
 0x198   :  { %3634 = vmatpush2.bf16.msra.mxu1 %v8189_v55  ;;  %v8080_v55 = vcombine.high %v426_v47, %v434_v48  ;;  %v386_v32 = vld [vmem:[#allocation5 + $0x9f0] sm:$0xff] }
 0x199   :  { %3635 = vmatprep.subr.bf16.mxu1 %v8174_v57  ;;  %v162_v57 = vld [vmem:[#allocation5 + $0x2f0] sm:$0xff]  ;;  %v8032_v37 = vcombine.high %v378_v31, %v386_v32 }
 0x19a   :  { %3593 = vmatpush2.bf16.msra.mxu0 %v7917_v1  ;;  %v7823_v1 = vcombine.low %v170_v45, %v178_v46  ;;  %v7808_v6 = vcombine.high %v154_v56, %v162_v57  ;;  %v7807_v16 = vcombine.low %v154_v56, %v162_v57  ;;  %v106_v38 = vld [vmem:[#allocation5 + $0x130] sm:$0xff] }
 0x19b   :  { %3594 = vmatprep.subr.bf16.mxu0 %v7902_v3  ;;  %v114_v39 = vld [vmem:[#allocation5 + $0x170] sm:$0xff] }
 0x19c   :  { %3636 = vmatpush2.bf16.msra.mxu1 %v8173_v2  ;;  %v362_v40 = vld [vmem:[#allocation5 + $0x930] sm:$0xff] }
 0x19d   :  { %3637 = vmatprep.subr.bf16.mxu1 %v8158_v5  ;;  %v8079_v5 = vcombine.low %v426_v47, %v434_v48  ;;  %v90_v46 = vld [vmem:[#allocation5 + $0xb0] sm:$0xff] }
 0x19e   :  { %3595 = vmatpush2.bf16.msra.mxu0 %v7901_v10  ;;  %v146_v10 = vld [vmem:[#allocation5 + $0x270] sm:$0xff] }
 0x19f   :  { %3596 = vmatprep.subr.bf16.mxu0 %v7886_v13  ;;  %v394_v13 = vld [vmem:[#allocation5 + $0xa30] sm:$0xff] }
 0x1a0   :  { %3638 = vmatpush2.bf16.msra.mxu1 %v8157_v12  ;;  %v98_v47 = vld [vmem:[#allocation5 + $0xf0] sm:$0xff] }
 0x1a1   :  { %3639 = vmatprep.subr.bf16.mxu1 %v8142_v14  ;;  %v402_v14 = vld [vmem:[#allocation5 + $0xa70] sm:$0xff] }
 0x1a2   :  { %3597 = vmatpush2.bf16.msra.mxu0 %v7885_v21  ;;  %v7792_v21 = vcombine.high %v138_v9, %v146_v10  ;;  %v346_v48 = vld [vmem:[#allocation5 + $0x8b0] sm:$0xff] }
 0x1a3   :  { %3598 = vmatprep.subr.bf16.mxu0 %v7870_v25  ;;  %v122_v25 = vld [vmem:[#allocation5 + $0x1b0] sm:$0xff] }
 0x1a4   :  { %3640 = vmatpush2.bf16.msra.mxu1 %v8141_v24  ;;  %v8048_v24 = vcombine.high %v394_v13, %v402_v14  ;;  %v74_v57 = vld [vmem:[#allocation5 + $0x30] sm:$0xff] }
 0x1a5   :  { %3641 = vmatprep.subr.bf16.mxu1 %v8126_v26  ;;  %v130_v26 = vld [vmem:[#allocation5 + $0x1f0] sm:$0xff] }
 0x1a6   :  { %3599 = vmatpush2.bf16.msra.mxu0 %v7869_v33  ;;  %v7791_v33 = vcombine.low %v138_v9, %v146_v10  ;;  %v570_v9 = vld [vmem:[#allocation5 + $0xfb0] sm:$0xff] }
 0x1a7   :  { %3600 = vmatprep.subr.bf16.mxu0 %v7854_v35  ;;  %v8047_v35 = vcombine.low %v394_v13, %v402_v14  ;;  %v578_v10 = vld [vmem:[#allocation5 + $0xff0] sm:$0xff]  ;;  %v7983_v13 = vcombine.low %v330_v60, %v338_v62 }
 0x1a8   :  { %3642 = vmatpush2.bf16.msra.mxu1 %v8125_v34 }
 0x1a9   :  { %3643 = vmatprep.subr.bf16.mxu1 %v8110_v36  ;;  %v7776_v36 = vcombine.high %v122_v25, %v130_v26 }
 0x1aa   :  { %3601 = vmatpush2.bf16.msra.mxu0 %v7853_v41  ;;  %v370_v41 = vld [vmem:[#allocation5 + $0x970] sm:$0xff] }
 0x1ab   :  { %3656 = vmatprep.subr.bf16.mxu0 %v7840_v43  ;;  %v8031_v43 = vcombine.low %v378_v31, %v386_v32  ;;  %v8016_v45 = vcombine.high %v362_v40, %v370_v41  ;;  %v290_v31 = vld [vmem:[#allocation5 + $0x6f0] sm:$0xff] }
 0x1ac   :  { %3644 = vmatpush2.bf16.msra.mxu1 %v8109_v42  ;;  %v7775_v42 = vcombine.low %v122_v25, %v130_v26  ;;  %v8223_v25 = vcombine.low %v570_v9, %v578_v10  ;;  %v538_v32 = vld [vmem:[#allocation5 + $0xeb0] sm:$0xff] }
 0x1ad   :  { %3699 = vmatprep.subr.bf16.mxu1 %v8096_v44  ;;  %v3346_v59 = vpop.f32.mrf.mxu0  ;;  %3603 = vmatmul.mubr.bf16.vlgmr.msra.gmra.mxu0 %v9663_v20  ;;  %v7760_v44 = vcombine.high %v106_v38, %v114_v39 }
 0x1ae   :  { %3657 = vmatpush1.bf16.msra.mxu0 %v7839_v49  ;;  %3688 = vmatprep.mubr.bf16.mxu0 %v9657_v58  ;;  %v354_v49 = vld [vmem:[#allocation5 + $0x8f0] sm:$0xff] }
 0x1af   :  { %v3389_v0 = vpop.f32.mrf.mxu1  ;;  %3646 = vmatmul.mubr.bf16.vlgmr.msra.gmra.mxu1 %v9665_v23  ;;  %v9709_v3 = vpop.f32.mrf.mxu0  ;;  %3658 = vmatprep.subr.bf16.mxu0 %v7824_v53  ;;  %v8015_v53 = vcombine.low %v362_v40, %v370_v41  ;;  %v8000_v56 = vcombine.high %v346_v48, %v354_v49  ;;  %v274_v40 = vld [vmem:[#allocation5 + $0x670] sm:$0xff] }
 0x1b0   :  { %v3390_v2 = vadd.f32 %v3389_v0, %v3346_v59  ;;  %3700 = vmatpush1.bf16.msra.mxu1 %v8095_v52  ;;  %3731 = vmatprep.mubr.bf16.mxu1 %v9659_v63  ;;  %v7759_v52 = vcombine.low %v106_v38, %v114_v39  ;;  %v82_v59 = vld [vmem:[#allocation5 + $0x70] sm:$0xff]  ;;  %v7743_v0 = vcombine.low %v90_v46, %v98_v47 }
 0x1b1   :  { %v9711_v7 = vpop.f32.mrf.mxu1  ;;  %3701 = vmatprep.subr.bf16.mxu1 %v8080_v55  ;;  %v3350_v12 = vpop.f32.mrf.mxu0  ;;  %v7744_v55 = vcombine.high %v90_v46, %v98_v47  ;;  %v266_v39 = vld [vmem:[#allocation5 + $0x630] sm:$0xff] }
 0x1b2   :  { %3659 = vmatpush1.bf16.msra.mxu0 %v7823_v1  ;;  %v3832_v28 = vmax.f32 %v3390_v2, 0.0  ;;  %v7999_v1 = vcombine.low %v346_v48, %v354_v49  ;;  %v7728_v2 = vcombine.high %v74_v57, %v82_v59  ;;  %v522_v41 = vld [vmem:[#allocation5 + $0xe30] sm:$0xff] }
 0x1b3   :  { %v3393_v15 = vpop.f32.mrf.mxu1  ;;  %3660 = vmatprep.subr.bf16.mxu0 %v7808_v6  ;;  %v314_v6 = vld [vmem:[#allocation5 + $0x7b0] sm:$0xff] }
 0x1b4   :  { %v3394_v18 = vadd.f32 %v3393_v15, %v3350_v12  ;;  %3702 = vmatpush1.bf16.msra.mxu1 %v8079_v5  ;;  %v7984_v5 = vcombine.high %v330_v60, %v338_v62  ;;  %v7727_v12 = vcombine.low %v74_v57, %v82_v59  ;;  %v8224_v15 = vcombine.high %v570_v9, %v578_v10  ;;  %v250_v47 = vld [vmem:[#allocation5 + $0x5b0] sm:$0xff] }
 0x1b5   :  { %3703 = vmatprep.subr.bf16.mxu1 %v8064_v8  ;;  %v322_v8 = vld [vmem:[#allocation5 + $0x7f0] sm:$0xff] }
 0x1b6   :  { %v3848_v29 = vmax.f32 %v3394_v18, 0.0  ;;  %3661 = vmatpush1.bf16.msra.mxu0 %v7807_v16  ;;  %v7968_v14 = vcombine.high %v314_v6, %v322_v8  ;;  %v298_v16 = vld [vmem:[#allocation5 + $0x730] sm:$0xff] }
 0x1b7   :  { %3662 = vmatprep.subr.bf16.mxu0 %v7792_v21  ;;  %v306_v18 = vld [vmem:[#allocation5 + $0x770] sm:$0xff] }
 0x1b8   :  { %v9715_v34 = vpack.c.bf16 %v3848_v29, %v3832_v28  ;;  %3704 = vmatpush1.bf16.msra.mxu1 %v8063_v19  ;;  %v554_v19 = vld [vmem:[#allocation5 + $0xf30] sm:$0xff]  ;;  %v7952_v26 = vcombine.high %v298_v16, %v306_v18 }
 0x1b9   :  { %3705 = vmatprep.subr.bf16.mxu1 %v8048_v24  ;;  %v562_v21 = vld [vmem:[#allocation5 + $0xf70] sm:$0xff]  ;;  %v7967_v24 = vcombine.low %v314_v6, %v322_v8 }
 0x1ba   :  { %3663 = vmatpush1.bf16.msra.mxu0 %v7791_v33  ;;  %v8208_v28 = vcombine.high %v554_v19, %v562_v21  ;;  %v282_v29 = vld [vmem:[#allocation5 + $0x6b0] sm:$0xff] }
 0x1bb   :  { %3664 = vmatprep.subr.bf16.mxu0 %v7776_v36  ;;  %v546_v33 = vld [vmem:[#allocation5 + $0xef0] sm:$0xff]  ;;  %v8207_v36 = vcombine.low %v554_v19, %v562_v21 }
 0x1bc   :  { %3706 = vmatpush1.bf16.msra.mxu1 %v8047_v35  ;;  %v7951_v35 = vcombine.low %v298_v16, %v306_v18  ;;  %v8192_v38 = vcombine.high %v538_v32, %v546_v33  ;;  %v258_v48 = vld [vmem:[#allocation5 + $0x5f0] sm:$0xff] }
 0x1bd   :  { %3707 = vmatprep.subr.bf16.mxu1 %v8032_v37  ;;  %v7936_v37 = vcombine.high %v282_v29, %v290_v31  ;;  %v506_v49 = vld [vmem:[#allocation5 + $0xdb0] sm:$0xff] }
 0x1be   :  { %3665 = vmatpush1.bf16.msra.mxu0 %v7775_v42  ;;  %v530_v42 = vld [vmem:[#allocation5 + $0xe70] sm:$0xff] }
 0x1bf   :  { %3666 = vmatprep.subr.bf16.mxu0 %v7760_v44  ;;  %v8191_v44 = vcombine.low %v538_v32, %v546_v33  ;;  %v8176_v46 = vcombine.high %v522_v41, %v530_v42  ;;  %v234_v59 = vld [vmem:[#allocation5 + $0x530] sm:$0xff]  ;;  %v195_v32 = vld [vmem:[#allocation5 + $0x3f8] sm:$0xff] }
 0x1c0   :  { %3708 = vmatpush1.bf16.msra.mxu1 %v8031_v43  ;;  %v7935_v43 = vcombine.low %v282_v29, %v290_v31  ;;  %v242_v60 = vld [vmem:[#allocation5 + $0x570] sm:$0xff]  ;;  %v187_v31 = vld [vmem:[#allocation5 + $0x3b8] sm:$0xff] }
 0x1c1   :  { %3709 = vmatprep.subr.bf16.mxu1 %v8016_v45  ;;  %v7920_v45 = vcombine.high %v266_v39, %v274_v40  ;;  %v490_v62 = vld [vmem:[#allocation5 + $0xd30] sm:$0xff]  ;;  %v443_v33 = vld [vmem:[#allocation5 + $0xbb8] sm:$0xff] }
 0x1c2   :  { %3667 = vmatpush1.bf16.msra.mxu0 %v7759_v52  ;;  %v514_v52 = vld [vmem:[#allocation5 + $0xdf0] sm:$0xff] }
 0x1c3   :  { %3668 = vmatprep.subr.bf16.mxu0 %v7744_v55  ;;  %v8175_v55 = vcombine.low %v522_v41, %v530_v42  ;;  %v8160_v57 = vcombine.high %v506_v49, %v514_v52  ;;  %v218_v8 = vld [vmem:[#allocation5 + $0x4b0] sm:$0xff]  ;;  %v179_v41 = vld [vmem:[#allocation5 + $0x378] sm:$0xff] }
 0x1c4   :  { %3710 = vmatpush1.bf16.msra.mxu1 %v8015_v53  ;;  %v7919_v53 = vcombine.low %v266_v39, %v274_v40  ;;  %v226_v9 = vld [vmem:[#allocation5 + $0x4f0] sm:$0xff]  ;;  %v171_v40 = vld [vmem:[#allocation5 + $0x338] sm:$0xff] }
 0x1c5   :  { %3711 = vmatprep.subr.bf16.mxu1 %v8000_v56  ;;  %v7904_v56 = vcombine.high %v250_v47, %v258_v48  ;;  %v474_v10 = vld [vmem:[#allocation5 + $0xcb0] sm:$0xff]  ;;  %v427_v42 = vld [vmem:[#allocation5 + $0xb38] sm:$0xff] }
 0x1c6   :  { %3669 = vmatpush1.bf16.msra.mxu0 %v7743_v0  ;;  %v498_v0 = vld [vmem:[#allocation5 + $0xd70] sm:$0xff] }
 0x1c7   :  { %3670 = vmatprep.subr.bf16.mxu0 %v7728_v2  ;;  %v8159_v2 = vcombine.low %v506_v49, %v514_v52  ;;  %v8144_v6 = vcombine.high %v490_v62, %v498_v0  ;;  %v202_v18 = vld [vmem:[#allocation5 + $0x430] sm:$0xff]  ;;  %v155_v52 = vld [vmem:[#allocation5 + $0x2b8] sm:$0xff] }
 0x1c8   :  { %3712 = vmatpush1.bf16.msra.mxu1 %v7999_v1  ;;  %v7903_v1 = vcombine.low %v250_v47, %v258_v48  ;;  %v210_v19 = vld [vmem:[#allocation5 + $0x470] sm:$0xff]  ;;  %v7826_v47 = vcombine.high %v171_v40, %v179_v41  ;;  %v9719_v48 = vpop.f32.mrf.mxu1 }
 0x1c9   :  { %3713 = vmatprep.subr.bf16.mxu1 %v7984_v5  ;;  %v7888_v5 = vcombine.high %v234_v59, %v242_v60  ;;  %v458_v21 = vld [vmem:[#allocation5 + $0xc30] sm:$0xff] }
 0x1ca   :  { %3671 = vmatpush1.bf16.msra.mxu0 %v7727_v12  ;;  %v482_v12 = vld [vmem:[#allocation5 + $0xcf0] sm:$0xff] }
 0x1cb   :  { %3672 = vmatprep.subr.bf16.mxu0 %v7968_v14  ;;  %v8143_v14 = vcombine.low %v490_v62, %v498_v0  ;;  %v8128_v16 = vcombine.high %v474_v10, %v482_v12 }
 0x1cc   :  { %3714 = vmatpush1.bf16.msra.mxu1 %v7983_v13  ;;  %v7887_v13 = vcombine.low %v234_v59, %v242_v60  ;;  %v7825_v60 = vcombine.low %v171_v40, %v179_v41 }
 0x1cd   :  { %3715 = vmatprep.subr.bf16.mxu1 %v8224_v15  ;;  %v7872_v15 = vcombine.high %v218_v8, %v226_v9 }
 0x1ce   :  { %3673 = vmatpush2.bf16.msra.mxu0 %v7967_v24  ;;  %v466_v24 = vld [vmem:[#allocation5 + $0xc70] sm:$0xff] }
 0x1cf   :  { %3674 = vmatprep.subr.bf16.mxu0 %v7952_v26  ;;  %v8127_v26 = vcombine.low %v474_v10, %v482_v12  ;;  %v8112_v29 = vcombine.high %v458_v21, %v466_v24  ;;  %v395_v12 = vld [vmem:[#allocation5 + $0xa38] sm:$0xff] }
 0x1d0   :  { %3716 = vmatpush2.bf16.msra.mxu1 %v8223_v25  ;;  %v7871_v25 = vcombine.low %v218_v8, %v226_v9  ;;  %v139_v8 = vld [vmem:[#allocation5 + $0x238] sm:$0xff] }
 0x1d1   :  { %3717 = vmatprep.subr.bf16.mxu1 %v8208_v28  ;;  %v7856_v28 = vcombine.high %v202_v18, %v210_v19  ;;  %v147_v9 = vld [vmem:[#allocation5 + $0x278] sm:$0xff] }
 0x1d2   :  { %3675 = vmatpush2.bf16.msra.mxu0 %v7951_v35  ;;  %v451_v35 = vld [vmem:[#allocation5 + $0xbf8] sm:$0xff] }
 0x1d3   :  { %3676 = vmatprep.subr.bf16.mxu0 %v7936_v37  ;;  %v8111_v37 = vcombine.low %v458_v21, %v466_v24  ;;  %v8098_v39 = vcombine.high %v443_v33, %v451_v35  ;;  %v123_v24 = vld [vmem:[#allocation5 + $0x1b8] sm:$0xff] }
 0x1d4   :  { %3718 = vmatpush2.bf16.msra.mxu1 %v8207_v36  ;;  %v7855_v36 = vcombine.low %v202_v18, %v210_v19  ;;  %v7794_v19 = vcombine.high %v139_v8, %v147_v9 }
 0x1d5   :  { %3719 = vmatprep.subr.bf16.mxu1 %v8192_v38  ;;  %v7842_v38 = vcombine.high %v187_v31, %v195_v32 }
 0x1d6   :  { %3677 = vmatpush2.bf16.msra.mxu0 %v7935_v43  ;;  %v435_v43 = vld [vmem:[#allocation5 + $0xb78] sm:$0xff] }
 0x1d7   :  { %3678 = vmatprep.subr.bf16.mxu0 %v7920_v45  ;;  %v9717_v45 = vpop.f32.mrf.mxu0  ;;  %v8082_v49 = vcombine.high %v427_v42, %v435_v43 }
 0x1d8   :  { %3720 = vmatpush2.bf16.msra.mxu1 %v8191_v44  ;;  %v7841_v44 = vcombine.low %v187_v31, %v195_v32  ;;  %v7793_v31 = vcombine.low %v139_v8, %v147_v9  ;;  %v315_v9 = vld [vmem:[#allocation5 + $0x7b8] sm:$0xff] }
 0x1d9   :  { %3721 = vmatprep.subr.bf16.mxu1 %v8176_v46  ;;  %v8097_v46 = vcombine.low %v443_v33, %v451_v35 }
 0x1da   :  { %3679 = vmatpush2.bf16.msra.mxu0 %v7919_v53  ;;  %v163_v53 = vld [vmem:[#allocation5 + $0x2f8] sm:$0xff] }
 0x1db   :  { %3680 = vmatprep.subr.bf16.mxu0 %v7904_v56  ;;  %v411_v56 = vld [vmem:[#allocation5 + $0xab8] sm:$0xff] }
 0x1dc   :  { %3722 = vmatpush2.bf16.msra.mxu1 %v8175_v55 }
 0x1dd   :  { %3723 = vmatprep.subr.bf16.mxu1 %v8160_v57  ;;  %v419_v57 = vld [vmem:[#allocation5 + $0xaf8] sm:$0xff] }
 0x1de   :  { %3681 = vmatpush2.bf16.msra.mxu0 %v7903_v1  ;;  %v8081_v1 = vcombine.low %v427_v42, %v435_v43  ;;  %v8065_v18 = vcombine.low %v411_v56, %v419_v57 }
 0x1df   :  { %3682 = vmatprep.subr.bf16.mxu0 %v7888_v5 }
 0x1e0   :  { %3724 = vmatpush2.bf16.msra.mxu1 %v8159_v2  ;;  %v7810_v2 = vcombine.high %v155_v52, %v163_v53 }
 0x1e1   :  { %3725 = vmatprep.subr.bf16.mxu1 %v8144_v6  ;;  %v8066_v6 = vcombine.high %v411_v56, %v419_v57  ;;  %v75_v57 = vld [vmem:[#allocation5 + $0x38] sm:$0xff] }
 0x1e2   :  { %3683 = vmatpush2.bf16.msra.mxu0 %v7887_v13  ;;  %v403_v13 = vld [vmem:[#allocation5 + $0xa78] sm:$0xff] }
 0x1e3   :  { %3684 = vmatprep.subr.bf16.mxu0 %v7872_v15  ;;  %v7809_v15 = vcombine.low %v155_v52, %v163_v53  ;;  %v8050_v21 = vcombine.high %v395_v12, %v403_v13 }
 0x1e4   :  { %3726 = vmatpush2.bf16.msra.mxu1 %v8143_v14 }
 0x1e5   :  { %3727 = vmatprep.subr.bf16.mxu1 %v8128_v16 }
 0x1e6   :  { %3685 = vmatpush2.bf16.msra.mxu0 %v7871_v25  ;;  %v131_v25 = vld [vmem:[#allocation5 + $0x1f8] sm:$0xff] }
 0x1e7   :  { %3686 = vmatprep.subr.bf16.mxu0 %v7856_v28  ;;  %v7778_v33 = vcombine.high %v123_v24, %v131_v25  ;;  %v7777_v40 = vcombine.low %v123_v24, %v131_v25  ;;  %v555_v24 = vld [vmem:[#allocation5 + $0xf38] sm:$0xff] }
 0x1e8   :  { %3728 = vmatpush2.bf16.msra.mxu1 %v8127_v26  ;;  %v563_v25 = vld [vmem:[#allocation5 + $0xf78] sm:$0xff] }
 0x1e9   :  { %3729 = vmatprep.subr.bf16.mxu1 %v8112_v29  ;;  %v387_v29 = vld [vmem:[#allocation5 + $0x9f8] sm:$0xff] }
 0x1ea   :  { %3687 = vmatpush2.bf16.msra.mxu0 %v7855_v36  ;;  %v107_v36 = vld [vmem:[#allocation5 + $0x138] sm:$0xff] }
 0x1eb   :  { %3742 = vmatprep.subr.bf16.mxu0 %v7842_v38  ;;  %v363_v38 = vld [vmem:[#allocation5 + $0x938] sm:$0xff] }
 0x1ec   :  { %3730 = vmatpush2.bf16.msra.mxu1 %v8111_v37  ;;  %v115_v37 = vld [vmem:[#allocation5 + $0x178] sm:$0xff] }
 0x1ed   :  { %3785 = vmatprep.subr.bf16.mxu1 %v8098_v39  ;;  %v3432_v55 = vpop.f32.mrf.mxu0  ;;  %3689 = vmatmul.mubr.bf16.vlgmr.msra.gmra.mxu0 %v9663_v20  ;;  %v371_v39 = vld [vmem:[#allocation5 + $0x978] sm:$0xff]  ;;  %v7762_v42 = vcombine.high %v107_v36, %v115_v37  ;;  %v7761_v52 = vcombine.low %v107_v36, %v115_v37  ;;  %v8209_v37 = vcombine.low %v555_v24, %v563_v25 }
 0x1ee   :  { %3743 = vmatpush1.bf16.msra.mxu0 %v7841_v44  ;;  %3774 = vmatprep.mubr.bf16.mxu0 %v9657_v58  ;;  %v379_v58 = vld [vmem:[#allocation5 + $0x9b8] sm:$0xff]  ;;  %v8018_v43 = vcombine.high %v363_v38, %v371_v39  ;;  %v8017_v53 = vcombine.low %v363_v38, %v371_v39 }
 0x1ef   :  { %v3475_v59 = vpop.f32.mrf.mxu1  ;;  %3732 = vmatmul.mubr.bf16.vlgmr.msra.gmra.mxu1 %v9665_v23  ;;  %v9723_v0 = vpop.f32.mrf.mxu0  ;;  %3744 = vmatprep.subr.bf16.mxu0 %v7826_v47  ;;  %v8034_v35 = vcombine.high %v379_v58, %v387_v29  ;;  %v8033_v41 = vcombine.low %v379_v58, %v387_v29  ;;  %v91_v44 = vld [vmem:[#allocation5 + $0xb8] sm:$0xff]  ;;  %v8210_v29 = vcombine.high %v555_v24, %v563_v25 }
 0x1f0   :  { %v3476_v62 = vadd.f32 %v3475_v59, %v3432_v55  ;;  %3786 = vmatpush1.bf16.msra.mxu1 %v8097_v46  ;;  %3817 = vmatprep.mubr.bf16.mxu1 %v9659_v63  ;;  %v8049_v63 = vcombine.low %v395_v12, %v403_v13  ;;  %v99_v46 = vld [vmem:[#allocation5 + $0xf8] sm:$0xff] }
 0x1f1   :  { %v9725_v5 = vpop.f32.mrf.mxu1  ;;  %3787 = vmatprep.subr.bf16.mxu1 %v8082_v49  ;;  %v3436_v10 = vpop.f32.mrf.mxu0  ;;  %v347_v47 = vld [vmem:[#allocation5 + $0x8b8] sm:$0xff]  ;;  %v7746_v55 = vcombine.high %v91_v44, %v99_v46 }
 0x1f2   :  { %3745 = vmatpush1.bf16.msra.mxu0 %v7825_v60  ;;  %v3834_v26 = vmax.f32 %v3476_v62, 0.0  ;;  %v355_v49 = vld [vmem:[#allocation5 + $0x8f8] sm:$0xff] }
 0x1f3   :  { %v3479_v14 = vpop.f32.mrf.mxu1  ;;  %3746 = vmatprep.subr.bf16.mxu0 %v7810_v2  ;;  %v8002_v56 = vcombine.high %v347_v47, %v355_v49  ;;  %v83_v59 = vld [vmem:[#allocation5 + $0x78] sm:$0xff]  ;;  %v8001_v2 = vcombine.low %v347_v47, %v355_v49 }
 0x1f4   :  { %v3480_v16 = vadd.f32 %v3479_v14, %v3436_v10  ;;  %3788 = vmatpush1.bf16.msra.mxu1 %v8081_v1  ;;  %v331_v60 = vld [vmem:[#allocation5 + $0x838] sm:$0xff]  ;;  %v7745_v1 = vcombine.low %v91_v44, %v99_v46  ;;  %v7729_v14 = vcombine.low %v75_v57, %v83_v59 }
 0x1f5   :  { %3789 = vmatprep.subr.bf16.mxu1 %v8066_v6  ;;  %v339_v62 = vld [vmem:[#allocation5 + $0x878] sm:$0xff]  ;;  %v7730_v6 = vcombine.high %v75_v57, %v83_v59 }
 0x1f6   :  { %v3850_v28 = vmax.f32 %v3480_v16, 0.0  ;;  %3747 = vmatpush1.bf16.msra.mxu0 %v7809_v15  ;;  %v7986_v8 = vcombine.high %v331_v60, %v339_v62  ;;  %v323_v10 = vld [vmem:[#allocation5 + $0x7f8] sm:$0xff]  ;;  %v7985_v15 = vcombine.low %v331_v60, %v339_v62 }
 0x1f7   :  { %3748 = vmatprep.subr.bf16.mxu0 %v7794_v19  ;;  %v571_v12 = vld [vmem:[#allocation5 + $0xfb8] sm:$0xff]  ;;  %v7970_v16 = vcombine.high %v315_v9, %v323_v10 }
 0x1f8   :  { %v9729_v32 = vpack.c.bf16 %v3850_v28, %v3834_v26  ;;  %3790 = vmatpush1.bf16.msra.mxu1 %v8065_v18  ;;  %v579_v13 = vld [vmem:[#allocation5 + $0xff8] sm:$0xff]  ;;  %v7969_v26 = vcombine.low %v315_v9, %v323_v10 }
 0x1f9   :  { %3791 = vmatprep.subr.bf16.mxu1 %v8050_v21  ;;  %v8226_v18 = vcombine.high %v571_v12, %v579_v13  ;;  %v299_v19 = vld [vmem:[#allocation5 + $0x738] sm:$0xff]  ;;  %v8225_v28 = vcombine.low %v571_v12, %v579_v13 }
 0x1fa   :  { %3749 = vmatpush1.bf16.msra.mxu0 %v7793_v31  ;;  %v307_v21 = vld [vmem:[#allocation5 + $0x778] sm:$0xff] }
 0x1fb   :  { %3750 = vmatprep.subr.bf16.mxu0 %v7778_v33  ;;  %v7954_v58 = vcombine.high %v299_v19, %v307_v21  ;;  %v283_v31 = vld [vmem:[#allocation5 + $0x6b8] sm:$0xff]  ;;  %v7953_v36 = vcombine.low %v299_v19, %v307_v21 }
 0x1fc   :  { %3792 = vmatpush1.bf16.msra.mxu1 %v8049_v63  ;;  %v291_v63 = vld [vmem:[#allocation5 + $0x6f8] sm:$0xff] }
 0x1fd   :  { %3793 = vmatprep.subr.bf16.mxu1 %v8034_v35  ;;  %v539_v33 = vld [vmem:[#allocation5 + $0xeb8] sm:$0xff]  ;;  %v7938_v38 = vcombine.high %v283_v31, %v291_v63  ;;  %v7937_v44 = vcombine.low %v283_v31, %v291_v63 }
 0x1fe   :  { %3751 = vmatpush1.bf16.msra.mxu0 %v7777_v40  ;;  %v547_v35 = vld [vmem:[#allocation5 + $0xef8] sm:$0xff] }
 0x1ff   :  { %3752 = vmatprep.subr.bf16.mxu0 %v7762_v42  ;;  %v8194_v39 = vcombine.high %v539_v33, %v547_v35  ;;  %v267_v40 = vld [vmem:[#allocation5 + $0x638] sm:$0xff]  ;;  %v8193_v46 = vcombine.low %v539_v33, %v547_v35 }
 0x200   :  { %3794 = vmatpush1.bf16.msra.mxu1 %v8033_v41  ;;  %v275_v41 = vld [vmem:[#allocation5 + $0x678] sm:$0xff] }
 0x201   :  { %3795 = vmatprep.subr.bf16.mxu1 %v8018_v43  ;;  %v523_v42 = vld [vmem:[#allocation5 + $0xe38] sm:$0xff]  ;;  %v7922_v47 = vcombine.high %v267_v40, %v275_v41  ;;  %v7921_v57 = vcombine.low %v267_v40, %v275_v41  ;;  %v8751_v41 = vld [vmem:[#allocation7 + $0xe4] ss:$16 sps:$4 sm:$0xff]  }
 0x202   :  { %3753 = vmatpush1.bf16.msra.mxu0 %v7761_v52  ;;  %v531_v43 = vld [vmem:[#allocation5 + $0xe78] sm:$0xff] }
 0x203   :  { %3754 = vmatprep.subr.bf16.mxu0 %v7746_v55  ;;  %v8178_v49 = vcombine.high %v523_v42, %v531_v43  ;;  %v251_v52 = vld [vmem:[#allocation5 + $0x5b8] sm:$0xff]  ;;  %v8177_v59 = vcombine.low %v523_v42, %v531_v43  ;;  %v3306_v42 = vadd.f32 %v9697_v30, %v9695_v27  ;;  %v8754_v43 = vld [vmem:[#allocation7 + $0x2e4] ss:$16 sps:$4 sm:$0xff]  }
 0x204   :  { %3796 = vmatpush1.bf16.msra.mxu1 %v8017_v53  ;;  %v259_v53 = vld [vmem:[#allocation5 + $0x5f8] sm:$0xff]  ;;  %v8760_v30 = vld [vmem:[#allocation7 + $0x2c4] ss:$16 sps:$4 sm:$0xff]  }
 0x205   :  { %3797 = vmatprep.subr.bf16.mxu1 %v8002_v56  ;;  %v507_v55 = vld [vmem:[#allocation5 + $0xdb8] sm:$0xff]  ;;  %v7906_v60 = vcombine.high %v251_v52, %v259_v53  ;;  %v7905_v9 = vcombine.low %v251_v52, %v259_v53 }
 0x206   :  { %3755 = vmatpush1.bf16.msra.mxu0 %v7745_v1  ;;  %v515_v56 = vld [vmem:[#allocation5 + $0xdf8] sm:$0xff] }
 0x207   :  { %3756 = vmatprep.subr.bf16.mxu0 %v7730_v6  ;;  %v8162_v62 = vcombine.high %v507_v55, %v515_v56  ;;  %v235_v1 = vld [vmem:[#allocation5 + $0x538] sm:$0xff]  ;;  %v8161_v10 = vcombine.low %v507_v55, %v515_v56  ;;  %v8755_v55 = vld [vmem:[#allocation7 + $0xc0] ss:$16 sps:$4 sm:$0xff]  }
 0x208   :  { %3798 = vmatpush1.bf16.msra.mxu1 %v8001_v2  ;;  %v243_v2 = vld [vmem:[#allocation5 + $0x578] sm:$0xff] }
 0x209   :  { %3799 = vmatprep.subr.bf16.mxu1 %v7986_v8  ;;  %v491_v6 = vld [vmem:[#allocation5 + $0xd38] sm:$0xff]  ;;  %v7890_v12 = vcombine.high %v235_v1, %v243_v2  ;;  %v7889_v19 = vcombine.low %v235_v1, %v243_v2 }
 0x20a   :  { %3757 = vmatpush1.bf16.msra.mxu0 %v7729_v14  ;;  %v499_v8 = vld [vmem:[#allocation5 + $0xd78] sm:$0xff] }
 0x20b   :  { %3758 = vmatprep.subr.bf16.mxu0 %v7970_v16  ;;  %v8146_v13 = vcombine.high %v491_v6, %v499_v8  ;;  %v219_v14 = vld [vmem:[#allocation5 + $0x4b8] sm:$0xff]  ;;  %v8145_v21 = vcombine.low %v491_v6, %v499_v8  ;;  %v8764_v8 = vld [vmem:[#allocation7 + $0x2a0] ss:$16 sps:$4 sm:$0xff]  }
 0x20c   :  { %3800 = vmatpush1.bf16.msra.mxu1 %v7985_v15  ;;  %v227_v15 = vld [vmem:[#allocation5 + $0x4f8] sm:$0xff] }
 0x20d   :  { %3801 = vmatprep.subr.bf16.mxu1 %v8226_v18  ;;  %v475_v16 = vld [vmem:[#allocation5 + $0xcb8] sm:$0xff]  ;;  %v7874_v24 = vcombine.high %v219_v14, %v227_v15  ;;  %v7873_v31 = vcombine.low %v219_v14, %v227_v15  ;;  %v8767_v14 = vld [vmem:[#allocation7 + $0x80] ss:$16 sps:$4 sm:$0xff]  }
 0x20e   :  { %3759 = vmatpush2.bf16.msra.mxu0 %v7969_v26  ;;  %v483_v18 = vld [vmem:[#allocation5 + $0xcf8] sm:$0xff] }
 0x20f   :  { %3760 = vmatprep.subr.bf16.mxu0 %v7954_v58  ;;  %v8130_v25 = vcombine.high %v475_v16, %v483_v18  ;;  %v203_v26 = vld [vmem:[#allocation5 + $0x438] sm:$0xff]  ;;  %v8129_v63 = vcombine.low %v475_v16, %v483_v18  ;;  %v8770_v16 = vld [vmem:[#allocation7 + $0x280] ss:$16 sps:$4 sm:$0xff]   ;;  %v8775_v18 = vld [vmem:[#allocation7 + $0x64] ss:$16 sps:$4 sm:$0xff]  }
 0x210   :  { %3802 = vmatpush2.bf16.msra.mxu1 %v8225_v28  ;;  %v211_v28 = vld [vmem:[#allocation5 + $0x478] sm:$0xff] }
 0x211   :  { %3803 = vmatprep.subr.bf16.mxu1 %v8210_v29  ;;  %v459_v58 = vld [vmem:[#allocation5 + $0xc38] sm:$0xff]  ;;  %v7858_v33 = vcombine.high %v203_v26, %v211_v28 }
 0x212   :  { %3761 = vmatpush2.bf16.msra.mxu0 %v7953_v36  ;;  %v467_v29 = vld [vmem:[#allocation5 + $0xc78] sm:$0xff]  ;;  %v3224_v36 = vadd.f32 %v9691_v17, %v9689_v11  ;;  %v8749_v11 = vld [vmem:[#allocation7 + $0xe0] ss:$16 sps:$4 sm:$0xff]  }
 0x213   :  { %3762 = vmatprep.subr.bf16.mxu0 %v7938_v38  ;;  %v8114_v35 = vcombine.high %v459_v58, %v467_v29  ;;  %v7857_v38 = vcombine.low %v203_v26, %v211_v28  ;;  %v8113_v40 = vcombine.low %v459_v58, %v467_v29  ;;  %v8784_v26 = vld [vmem:[#allocation7 + $0x244] ss:$16 sps:$4 sm:$0xff]   ;;  %v8779_v28 = vld [vmem:[#allocation7 + $0x40] ss:$16 sps:$4 sm:$0xff]  }
 0x214   :  { %3804 = vmatpush2.bf16.msra.mxu1 %v8209_v37  ;;  %v3310_v37 = vadd.f32 %v9705_v54, %v9703_v51  ;;  %v9739_v51 = vpop.f32.mrf.mxu0  ;;  %v8752_v54 = vld [vmem:[#allocation7 + $0x2e0] ss:$16 sps:$4 sm:$0xff]   ;;  %v8787_v29 = vld [vmem:[#allocation7 + $0x24] ss:$16 sps:$4 sm:$0xff]  }
 0x215   :  { %3805 = vmatprep.subr.bf16.mxu1 %v8194_v39  ;;  %v3220_v39 = vadd.f32 %v9683_v4, %v9681_v61  ;;  %v3831_v61 = vmax.f32 %v3306_v42, 0.0  ;;  %v9741_v4 = vpop.f32.mrf.mxu1  ;;  %v8782_v58 = vld [vmem:[#allocation7 + $0x240] ss:$16 sps:$4 sm:$0xff]  }
 0x216   :  { %3763 = vmatpush2.bf16.msra.mxu0 %v7937_v44  ;;  %v3845_v44 = vmax.f32 %v3224_v36, 0.0  ;;  %v8796_v36 = vld [vmem:[#allocation7 + $0x204] ss:$16 sps:$4 sm:$0xff]   ;;  %v8800_v42 = vld [vmem:[#allocation7 + $0x3e0] ss:$16 sps:$4 sm:$0xff]  }
 0x217   :  { %3764 = vmatprep.subr.bf16.mxu0 %v7922_v47  ;;  %v3829_v17 = vmax.f32 %v3220_v39, 0.0  ;;  %v8757_v47 = vld [vmem:[#allocation7 + $0xc4] ss:$16 sps:$4 sm:$0xff]  }
 0x218   :  { %3806 = vmatpush2.bf16.msra.mxu1 %v8193_v46  ;;  %v3847_v46 = vmax.f32 %v3310_v37, 0.0  ;;  %v8791_v37 = vld [vmem:[#allocation7] ss:$16 sps:$4 sm:$0xff]   ;;  %v8799_v39 = vld [vmem:[#allocation7 + $0x1e4] ss:$16 sps:$4 sm:$0xff]  }
 0x219   :  { %3807 = vmatprep.subr.bf16.mxu1 %v8178_v49  ;;  %v9743_v49 = vpack.c.bf16 %v3845_v44, %v3829_v17  ;;  %v8808_v44 = vld [vmem:[#allocation7 + $0x3c4] ss:$16 sps:$4 sm:$0xff]  }
 0x21a   :  { %3765 = vmatpush2.bf16.msra.mxu0 %v7921_v57  ;;  %v9746_v52 = vpack.c.bf16 %v3847_v46, %v3831_v61  ;;  %v8803_v46 = vld [vmem:[#allocation7 + $0x1c0] ss:$16 sps:$4 sm:$0xff]   ;;  %v8811_v17 = vld [vmem:[#allocation7 + $0x1a4] ss:$16 sps:$4 sm:$0xff]  }
 0x21b   :  { %3766 = vmatprep.subr.bf16.mxu0 %v7906_v60  ;;  %v8763_v60 = vld [vmem:[#allocation7 + $0xa4] ss:$16 sps:$4 sm:$0xff]   ;;  %v8809_v61 = vld [vmem:[#allocation7 + $0x1a0] ss:$16 sps:$4 sm:$0xff]  }
 0x21c   :  { %3808 = vmatpush2.bf16.msra.mxu1 %v8177_v59  ;;  %v8758_v59 = vld [vmem:[#allocation7 + $0x2c0] ss:$16 sps:$4 sm:$0xff]  }
 0x21d   :  { %3809 = vmatprep.subr.bf16.mxu1 %v8162_v62 }
 0x21e   :  { %3767 = vmatpush2.bf16.msra.mxu0 %v7905_v9  ;;  %v8769_v9 = vld [vmem:[#allocation7 + $0x84] ss:$16 sps:$4 sm:$0xff]  }
 0x21f   :  { %3768 = vmatprep.subr.bf16.mxu0 %v7890_v12 }
 0x220   :  { %3810 = vmatpush2.bf16.msra.mxu1 %v8161_v10  ;;  %v8772_v10 = vld [vmem:[#allocation7 + $0x284] ss:$16 sps:$4 sm:$0xff]  }
 0x221   :  { %3811 = vmatprep.subr.bf16.mxu1 %v8146_v13 }
 0x222   :  { %3769 = vmatpush2.bf16.msra.mxu0 %v7889_v19  ;;  %v8778_v19 = vld [vmem:[#allocation7 + $0x264] ss:$16 sps:$4 sm:$0xff]  }
 0x223   :  { %3770 = vmatprep.subr.bf16.mxu0 %v7874_v24  ;;  %v8776_v24 = vld [vmem:[#allocation7 + $0x260] ss:$16 sps:$4 sm:$0xff]  }
 0x224   :  { %3812 = vmatpush2.bf16.msra.mxu1 %v8145_v21  ;;  %v8773_v21 = vld [vmem:[#allocation7 + $0x60] ss:$16 sps:$4 sm:$0xff]  }
 0x225   :  { %3813 = vmatprep.subr.bf16.mxu1 %v8130_v25  ;;  %v8781_v25 = vld [vmem:[#allocation7 + $0x44] ss:$16 sps:$4 sm:$0xff]  }
 0x226   :  { %3771 = vmatpush2.bf16.msra.mxu0 %v7873_v31  ;;  %v8790_v31 = vld [vmem:[#allocation7 + $0x224] ss:$16 sps:$4 sm:$0xff]  }
 0x227   :  { %3772 = vmatprep.subr.bf16.mxu0 %v7858_v33  ;;  %v8788_v33 = vld [vmem:[#allocation7 + $0x220] ss:$16 sps:$4 sm:$0xff]  }
 0x228   :  { %3814 = vmatpush2.bf16.msra.mxu1 %v8129_v63  ;;  %v8785_v63 = vld [vmem:[#allocation7 + $0x20] ss:$16 sps:$4 sm:$0xff]  }
 0x229   :  { %3815 = vmatprep.subr.bf16.mxu1 %v8114_v35  ;;  %v8793_v35 = vld [vmem:[#allocation7 + $0x4] ss:$16 sps:$4 sm:$0xff]  }
 0x22a   :  { %3773 = vmatpush2.bf16.msra.mxu0 %v7857_v38  ;;  %v8794_v38 = vld [vmem:[#allocation7 + $0x200] ss:$16 sps:$4 sm:$0xff]  }
 0x22b   :  { %6948 = vmatprep.subr.bf16.mxu0 %v8751_v41  ;;  %v8797_v41 = vld [vmem:[#allocation7 + $0x1e0] ss:$16 sps:$4 sm:$0xff]  }
 0x22c   :  { %3816 = vmatpush2.bf16.msra.mxu1 %v8113_v40  ;;  %v8802_v40 = vld [vmem:[#allocation7 + $0x3e4] ss:$16 sps:$4 sm:$0xff]  }
 0x22d   :  { %6991 = vmatprep.subr.bf16.mxu1 %v8754_v43  ;;  %v3518_v27 = vpop.f32.mrf.mxu0  ;;  %3775 = vmatmul.mubr.bf16.vlgmr.msra.gmra.mxu0 %v9663_v20  ;;  %v8766_v20 = vld [vmem:[#allocation7 + $0x2a4] ss:$16 sps:$4 sm:$0xff]  }
 0x22e   :  { %6949 = vmatpush1.bf16.msra.mxu0 %v8749_v11  ;;  %6980 = vmatprep.mubr.bf16.mxu0 %v9743_v49  ;;  %v8805_v43 = vld [vmem:[#allocation7 + $0x1c4] ss:$16 sps:$4 sm:$0xff]   ;;  %v8806_v11 = vld [vmem:[#allocation7 + $0x3c0] ss:$16 sps:$4 sm:$0xff]  }
 0x22f   :  { %v3561_v53 = vpop.f32.mrf.mxu1  ;;  %3818 = vmatmul.mubr.bf16.vlgmr.msra.gmra.mxu1 %v9665_v23  ;;  %v9750_v57 = vpop.f32.mrf.mxu0  ;;  %6950 = vmatprep.subr.bf16.mxu0 %v8757_v47  ;;  %v8761_v23 = vld [vmem:[#allocation7 + $0xa0] ss:$16 sps:$4 sm:$0xff]  }
 0x230   :  { %v3562_v56 = vadd.f32 %v3561_v53, %v3518_v27  ;;  %6992 = vmatpush1.bf16.msra.mxu1 %v8752_v54  ;;  %7023 = vmatprep.mubr.bf16.mxu1 %v9746_v52  ;;  %v8814_v54 = vld [vmem:[#allocation7 + $0x3a4] ss:$16 sps:$4 sm:$0xff]   ;;  %v8812_v47 = vld [vmem:[#allocation7 + $0x3a0] ss:$16 sps:$4 sm:$0xff]  }
 0x231   :  { %v9753_v62 = vpop.f32.mrf.mxu1  ;;  %v3522_v1 = vpop.f32.mrf.mxu0  ;;  %6993 = vmatprep.subr.bf16.mxu1 %v8760_v30  ;;  %v8817_v27 = vld [vmem:[#allocation7 + $0x184] ss:$16 sps:$4 sm:$0xff]   ;;  %v8815_v53 = vld [vmem:[#allocation7 + $0x180] ss:$16 sps:$4 sm:$0xff]  }
 0x232   :  { %6951 = vmatpush1.bf16.msra.mxu0 %v8755_v55  ;;  %v3836_v12 = vmax.f32 %v3562_v56, 0.0  ;;  %v8820_v30 = vld [vmem:[#allocation7 + $0x384] ss:$16 sps:$4 sm:$0xff]   ;;  %v8818_v55 = vld [vmem:[#allocation7 + $0x380] ss:$16 sps:$4 sm:$0xff]  }
 0x233   :  { %v3565_v2 = vpop.f32.mrf.mxu1  ;;  %6952 = vmatprep.subr.bf16.mxu0 %v8763_v60  ;;  %v8823_v56 = vld [vmem:[#allocation7 + $0x164] ss:$16 sps:$4 sm:$0xff]   ;;  %v8821_v60 = vld [vmem:[#allocation7 + $0x160] ss:$16 sps:$4 sm:$0xff]  }
 0x234   :  { %v3566_v6 = vadd.f32 %v3565_v2, %v3522_v1  ;;  %6994 = vmatpush1.bf16.msra.mxu1 %v8758_v59  ;;  %v8826_v59 = vld [vmem:[#allocation7 + $0x364] ss:$16 sps:$4 sm:$0xff]  }
 0x235   :  { %6995 = vmatprep.subr.bf16.mxu1 %v8766_v20  ;;  %v8824_v20 = vld [vmem:[#allocation7 + $0x360] ss:$16 sps:$4 sm:$0xff]   ;;  %v8829_v1 = vld [vmem:[#allocation7 + $0x144] ss:$16 sps:$4 sm:$0xff]  }
 0x236   :  { %v3852_v13 = vmax.f32 %v3566_v6, 0.0  ;;  %6953 = vmatpush1.bf16.msra.mxu0 %v8761_v23  ;;  %v8832_v2 = vld [vmem:[#allocation7 + $0x344] ss:$16 sps:$4 sm:$0xff]   ;;  %v8827_v23 = vld [vmem:[#allocation7 + $0x140] ss:$16 sps:$4 sm:$0xff]  }
 0x237   :  { %6954 = vmatprep.subr.bf16.mxu0 %v8769_v9  ;;  %v8830_v6 = vld [vmem:[#allocation7 + $0x340] ss:$16 sps:$4 sm:$0xff]   ;;  %v8838_v9 = vld [vmem:[#allocation7 + $0x324] ss:$16 sps:$4 sm:$0xff]  }
 0x238   :  { %v9755_v15 = vpack.c.bf16 %v3852_v13, %v3836_v12  ;;  %6996 = vmatpush1.bf16.msra.mxu1 %v8764_v8  ;;  %v8835_v8 = vld [vmem:[#allocation7 + $0x124] ss:$16 sps:$4 sm:$0xff]   ;;  %v8836_v12 = vld [vmem:[#allocation7 + $0x320] ss:$16 sps:$4 sm:$0xff]  }
 0x239   :  { %6997 = vmatprep.subr.bf16.mxu1 %v8772_v10  ;;  %v8833_v10 = vld [vmem:[#allocation7 + $0x120] ss:$16 sps:$4 sm:$0xff]   ;;  %v8841_v13 = vld [vmem:[#allocation7 + $0x104] ss:$16 sps:$4 sm:$0xff]  }
 0x23a   :  { %6955 = vmatpush1.bf16.msra.mxu0 %v8767_v14  ;;  %v8844_v14 = vld [vmem:[#allocation7 + $0x304] ss:$16 sps:$4 sm:$0xff]  }
 0x23b   :  { %6956 = vmatprep.subr.bf16.mxu0 %v8775_v18  ;;  %v3482_v18 = vadd.f32 %v9741_v4, %v9739_v51  ;;  %v9765_v51 = vpop.f32.mrf.mxu0  ;;  %v8848_v4 = vld [vmem:[#allocation7 + $0x6e0] ss:$16 sps:$4 sm:$0xff]  }
 0x23c   :  { %6998 = vmatpush1.bf16.msra.mxu1 %v8770_v16  ;;  %v3396_v16 = vadd.f32 %v9719_v48, %v9717_v45  ;;  %v8845_v45 = vld [vmem:[#allocation7 + $0x4e0] ss:$16 sps:$4 sm:$0xff]  }
 0x23d   :  { %6999 = vmatprep.subr.bf16.mxu1 %v8778_v19  ;;  %v8839_v19 = vld [vmem:[#allocation7 + $0x100] ss:$16 sps:$4 sm:$0xff]  }
 0x23e   :  { %6957 = vmatpush1.bf16.msra.mxu0 %v8773_v21  ;;  %v3392_v21 = vadd.f32 %v9711_v7, %v9709_v3  ;;  %v9767_v7 = vpop.f32.mrf.mxu1 }
 0x23f   :  { %6958 = vmatprep.subr.bf16.mxu0 %v8781_v25  ;;  %v8847_v25 = vld [vmem:[#allocation7 + $0x4e4] ss:$16 sps:$4 sm:$0xff]  }
 0x240   :  { %7000 = vmatpush1.bf16.msra.mxu1 %v8776_v24  ;;  %v8842_v24 = vld [vmem:[#allocation7 + $0x300] ss:$16 sps:$4 sm:$0xff]   ;;  %v3833_v48 = vmax.f32 %v3392_v21, 0.0  ;;  %v8898_v21 = vld [vmem:[#allocation7 + $0x7e4] ss:$16 sps:$4 sm:$0xff]  }
 0x241   :  { %7001 = vmatprep.subr.bf16.mxu1 %v8784_v26  ;;  %v3478_v26 = vadd.f32 %v9725_v5, %v9723_v0  ;;  %v8856_v5 = vld [vmem:[#allocation7 + $0x6c4] ss:$16 sps:$4 sm:$0xff]  }
 0x242   :  { %6959 = vmatpush1.bf16.msra.mxu0 %v8779_v28  ;;  %v8850_v28 = vld [vmem:[#allocation7 + $0x6e4] ss:$16 sps:$4 sm:$0xff]  }
 0x243   :  { %6960 = vmatprep.subr.bf16.mxu0 %v8787_v29  ;;  %v3851_v29 = vmax.f32 %v3482_v18, 0.0  ;;  %v3835_v3 = vmax.f32 %v3478_v26, 0.0  ;;  %v8890_v18 = vld [vmem:[#allocation7 + $0x600] ss:$16 sps:$4 sm:$0xff]   ;;  %v8901_v26 = vld [vmem:[#allocation7 + $0x5c4] ss:$16 sps:$4 sm:$0xff]  }
 0x244   :  { %7002 = vmatpush1.bf16.msra.mxu1 %v8782_v58  ;;  %v3849_v58 = vmax.f32 %v3396_v16, 0.0  ;;  %v8887_v16 = vld [vmem:[#allocation7 + $0x400] ss:$16 sps:$4 sm:$0xff]  }
 0x245   :  { %7003 = vmatprep.subr.bf16.mxu1 %v8790_v31  ;;  %v8853_v31 = vld [vmem:[#allocation7 + $0x4c4] ss:$16 sps:$4 sm:$0xff]  }
 0x246   :  { %6961 = vmatpush1.bf16.msra.mxu0 %v8785_v63  ;;  %v9769_v63 = vpack.c.bf16 %v3849_v58, %v3833_v48  ;;  %v8899_v58 = vld [vmem:[#allocation7 + $0x5c0] ss:$16 sps:$4 sm:$0xff]   ;;  %v8910_v48 = vld [vmem:[#allocation7 + $0x7a4] ss:$16 sps:$4 sm:$0xff]  }
 0x247   :  { %6962 = vmatprep.subr.bf16.mxu0 %v8793_v35 }
 0x248   :  { %7004 = vmatpush1.bf16.msra.mxu1 %v8788_v33  ;;  %v9772_v33 = vpack.c.bf16 %v3851_v29, %v3835_v3  ;;  %v8902_v29 = vld [vmem:[#allocation7 + $0x7c0] ss:$16 sps:$4 sm:$0xff]  }
 0x249   :  { %7005 = vmatprep.subr.bf16.mxu1 %v8796_v36  ;;  %v8851_v36 = vld [vmem:[#allocation7 + $0x4c0] ss:$16 sps:$4 sm:$0xff]  }
 0x24a   :  { %6963 = vmatpush1.bf16.msra.mxu0 %v8791_v37  ;;  %v8908_v3 = vld [vmem:[#allocation7 + $0x7a0] ss:$16 sps:$4 sm:$0xff]  }
 0x24b   :  { %6964 = vmatprep.subr.bf16.mxu0 %v8799_v39  ;;  %v8854_v39 = vld [vmem:[#allocation7 + $0x6c0] ss:$16 sps:$4 sm:$0xff]  }
 0x24c   :  { %7006 = vmatpush1.bf16.msra.mxu1 %v8794_v38 }
 0x24d   :  { %7007 = vmatprep.subr.bf16.mxu1 %v8802_v40  ;;  %v8859_v40 = vld [vmem:[#allocation7 + $0x4a4] ss:$16 sps:$4 sm:$0xff]  }
 0x24e   :  { %6965 = vmatpush2.bf16.msra.mxu0 %v8797_v41 }
 0x24f   :  { %6966 = vmatprep.subr.bf16.mxu0 %v8805_v43 }
 0x250   :  { %7008 = vmatpush2.bf16.msra.mxu1 %v8800_v42  ;;  %v8862_v42 = vld [vmem:[#allocation7 + $0x6a4] ss:$16 sps:$4 sm:$0xff]  }
 0x251   :  { %7009 = vmatprep.subr.bf16.mxu1 %v8808_v44 }
 0x252   :  { %6967 = vmatpush2.bf16.msra.mxu0 %v8803_v46  ;;  %v8857_v46 = vld [vmem:[#allocation7 + $0x4a0] ss:$16 sps:$4 sm:$0xff]  }
 0x253   :  { %6968 = vmatprep.subr.bf16.mxu0 %v8811_v17  ;;  %v8860_v17 = vld [vmem:[#allocation7 + $0x6a0] ss:$16 sps:$4 sm:$0xff]  }
 0x254   :  { %7010 = vmatpush2.bf16.msra.mxu1 %v8806_v11 }
 0x255   :  { %7011 = vmatprep.subr.bf16.mxu1 %v8814_v54  ;;  %v8865_v54 = vld [vmem:[#allocation7 + $0x484] ss:$16 sps:$4 sm:$0xff]  }
 0x256   :  { %6969 = vmatpush2.bf16.msra.mxu0 %v8809_v61  ;;  %v8868_v61 = vld [vmem:[#allocation7 + $0x684] ss:$16 sps:$4 sm:$0xff]  }
 0x257   :  { %6970 = vmatprep.subr.bf16.mxu0 %v8817_v27 }
 0x258   :  { %7012 = vmatpush2.bf16.msra.mxu1 %v8812_v47 }
 0x259   :  { %7013 = vmatprep.subr.bf16.mxu1 %v8820_v30  ;;  %v8863_v30 = vld [vmem:[#allocation7 + $0x480] ss:$16 sps:$4 sm:$0xff]  }
 0x25a   :  { %6971 = vmatpush2.bf16.msra.mxu0 %v8815_v53 }
 0x25b   :  { %6972 = vmatprep.subr.bf16.mxu0 %v8823_v56  ;;  %v8871_v56 = vld [vmem:[#allocation7 + $0x464] ss:$16 sps:$4 sm:$0xff]  }
 0x25c   :  { %7014 = vmatpush2.bf16.msra.mxu1 %v8818_v55  ;;  %v8866_v55 = vld [vmem:[#allocation7 + $0x680] ss:$16 sps:$4 sm:$0xff]  }
 0x25d   :  { %7015 = vmatprep.subr.bf16.mxu1 %v8826_v59  ;;  %v8874_v59 = vld [vmem:[#allocation7 + $0x664] ss:$16 sps:$4 sm:$0xff]  }
 0x25e   :  { %6973 = vmatpush2.bf16.msra.mxu0 %v8821_v60  ;;  %v8869_v60 = vld [vmem:[#allocation7 + $0x460] ss:$16 sps:$4 sm:$0xff]  }
 0x25f   :  { %6974 = vmatprep.subr.bf16.mxu0 %v8829_v1  ;;  %v8877_v1 = vld [vmem:[#allocation7 + $0x444] ss:$16 sps:$4 sm:$0xff]  }
 0x260   :  { %7016 = vmatpush2.bf16.msra.mxu1 %v8824_v20  ;;  %v8872_v20 = vld [vmem:[#allocation7 + $0x660] ss:$16 sps:$4 sm:$0xff]  }
 0x261   :  { %7017 = vmatprep.subr.bf16.mxu1 %v8832_v2  ;;  %v8880_v2 = vld [vmem:[#allocation7 + $0x644] ss:$16 sps:$4 sm:$0xff]  }
 0x262   :  { %6975 = vmatpush2.bf16.msra.mxu0 %v8827_v23  ;;  %v8875_v23 = vld [vmem:[#allocation7 + $0x440] ss:$16 sps:$4 sm:$0xff]  }
 0x263   :  { %6976 = vmatprep.subr.bf16.mxu0 %v8835_v8  ;;  %v8883_v8 = vld [vmem:[#allocation7 + $0x424] ss:$16 sps:$4 sm:$0xff]  }
 0x264   :  { %7018 = vmatpush2.bf16.msra.mxu1 %v8830_v6  ;;  %v8878_v6 = vld [vmem:[#allocation7 + $0x640] ss:$16 sps:$4 sm:$0xff]  }
 0x265   :  { %7019 = vmatprep.subr.bf16.mxu1 %v8838_v9  ;;  %v8886_v9 = vld [vmem:[#allocation7 + $0x624] ss:$16 sps:$4 sm:$0xff]  }
 0x266   :  { %6977 = vmatpush2.bf16.msra.mxu0 %v8833_v10  ;;  %v8881_v10 = vld [vmem:[#allocation7 + $0x420] ss:$16 sps:$4 sm:$0xff]  }
 0x267   :  { %6978 = vmatprep.subr.bf16.mxu0 %v8841_v13  ;;  %v8889_v13 = vld [vmem:[#allocation7 + $0x404] ss:$16 sps:$4 sm:$0xff]  }
 0x268   :  { %7020 = vmatpush2.bf16.msra.mxu1 %v8836_v12  ;;  %v8884_v12 = vld [vmem:[#allocation7 + $0x620] ss:$16 sps:$4 sm:$0xff]  }
 0x269   :  { %7021 = vmatprep.subr.bf16.mxu1 %v8844_v14  ;;  %v8892_v14 = vld [vmem:[#allocation7 + $0x604] ss:$16 sps:$4 sm:$0xff]  }
 0x26a   :  { %6979 = vmatpush2.bf16.msra.mxu0 %v8839_v19  ;;  %v8895_v19 = vld [vmem:[#allocation7 + $0x5e4] ss:$16 sps:$4 sm:$0xff]  }
 0x26b   :  { %7034 = vmatprep.subr.bf16.mxu0 %v8847_v25  ;;  %v8896_v25 = vld [vmem:[#allocation7 + $0x7e0] ss:$16 sps:$4 sm:$0xff]  }
 0x26c   :  { %7022 = vmatpush2.bf16.msra.mxu1 %v8842_v24  ;;  %v8893_v24 = vld [vmem:[#allocation7 + $0x5e0] ss:$16 sps:$4 sm:$0xff]  }
 0x26d   :  { %7077 = vmatprep.subr.bf16.mxu1 %v8850_v28  ;;  %v3604_v0 = vpop.f32.mrf.mxu0  ;;  %6981 = vmatmul.mubr.bf16.vlgmr.msra.gmra.mxu0 %v9687_v22  ;;  %v8904_v28 = vld [vmem:[#allocation7 + $0x7c4] ss:$16 sps:$4 sm:$0xff]  }
 0x26e   :  { %7035 = vmatpush1.bf16.msra.mxu0 %v8845_v45  ;;  %7066 = vmatprep.mubr.bf16.mxu0 %v9769_v63  ;;  %v8907_v45 = vld [vmem:[#allocation7 + $0x5a4] ss:$16 sps:$4 sm:$0xff]  }
 0x26f   :  { %v3647_v35 = vpop.f32.mrf.mxu1  ;;  %7024 = vmatmul.mubr.bf16.vlgmr.msra.gmra.mxu1 %v9701_v50  ;;  %v9776_v38 = vpop.f32.mrf.mxu0  ;;  %7036 = vmatprep.subr.bf16.mxu0 %v8853_v31  ;;  %v8913_v31 = vld [vmem:[#allocation7 + $0x584] ss:$16 sps:$4 sm:$0xff]  }
 0x270   :  { %v3648_v37 = vadd.f32 %v3647_v35, %v3604_v0  ;;  %7078 = vmatpush1.bf16.msra.mxu1 %v8848_v4  ;;  %7109 = vmatprep.mubr.bf16.mxu1 %v9772_v33  ;;  %v8905_v4 = vld [vmem:[#allocation7 + $0x5a0] ss:$16 sps:$4 sm:$0xff]   ;;  %v8916_v0 = vld [vmem:[#allocation7 + $0x784] ss:$16 sps:$4 sm:$0xff]  }
 0x271   :  { %v9779_v41 = vpop.f32.mrf.mxu1  ;;  %v3608_v43 = vpop.f32.mrf.mxu0  ;;  %7079 = vmatprep.subr.bf16.mxu1 %v8856_v5  ;;  %v8911_v5 = vld [vmem:[#allocation7 + $0x580] ss:$16 sps:$4 sm:$0xff]  }
 0x272   :  { %7037 = vmatpush1.bf16.msra.mxu0 %v8851_v36  ;;  %v3838_v47 = vmax.f32 %v3648_v37, 0.0  ;;  %v8914_v35 = vld [vmem:[#allocation7 + $0x780] ss:$16 sps:$4 sm:$0xff]   ;;  %v8919_v36 = vld [vmem:[#allocation7 + $0x564] ss:$16 sps:$4 sm:$0xff]  }
 0x273   :  { %v3651_v44 = vpop.f32.mrf.mxu1  ;;  %7038 = vmatprep.subr.bf16.mxu0 %v8859_v40  ;;  %v8922_v37 = vld [vmem:[#allocation7 + $0x764] ss:$16 sps:$4 sm:$0xff]   ;;  %v8920_v40 = vld [vmem:[#allocation7 + $0x760] ss:$16 sps:$4 sm:$0xff]  }
 0x274   :  { %v3652_v11 = vadd.f32 %v3651_v44, %v3608_v43  ;;  %7080 = vmatpush1.bf16.msra.mxu1 %v8854_v39  ;;  %v8917_v39 = vld [vmem:[#allocation7 + $0x560] ss:$16 sps:$4 sm:$0xff]   ;;  %v8928_v43 = vld [vmem:[#allocation7 + $0x744] ss:$16 sps:$4 sm:$0xff]  }
 0x275   :  { %7081 = vmatprep.subr.bf16.mxu1 %v8862_v42  ;;  %v8925_v42 = vld [vmem:[#allocation7 + $0x544] ss:$16 sps:$4 sm:$0xff]   ;;  %v8923_v44 = vld [vmem:[#allocation7 + $0x540] ss:$16 sps:$4 sm:$0xff]  }
 0x276   :  { %v3854_v27 = vmax.f32 %v3652_v11, 0.0  ;;  %7039 = vmatpush1.bf16.msra.mxu0 %v8857_v46  ;;  %v8926_v46 = vld [vmem:[#allocation7 + $0x740] ss:$16 sps:$4 sm:$0xff]   ;;  %v8931_v11 = vld [vmem:[#allocation7 + $0x524] ss:$16 sps:$4 sm:$0xff]  }
 0x277   :  { %7040 = vmatprep.subr.bf16.mxu0 %v8865_v54  ;;  %v8929_v54 = vld [vmem:[#allocation7 + $0x520] ss:$16 sps:$4 sm:$0xff]  }
 0x278   :  { %v9781_v53 = vpack.c.bf16 %v3854_v27, %v3838_v47  ;;  %7082 = vmatpush1.bf16.msra.mxu1 %v8860_v17  ;;  %v8934_v17 = vld [vmem:[#allocation7 + $0x724] ss:$16 sps:$4 sm:$0xff]   ;;  %v3653_v47 = vpop.f32.mrf.mxu1  ;;  %v8932_v27 = vld [vmem:[#allocation7 + $0x720] ss:$16 sps:$4 sm:$0xff]  }
 0x279   :  { %7083 = vmatprep.subr.bf16.mxu1 %v8868_v61  ;;  %v3610_v61 = vpop.f32.mrf.mxu0 }
 0x27a   :  { %7041 = vmatpush1.bf16.msra.mxu0 %v8863_v30  ;;  %v8937_v30 = vld [vmem:[#allocation7 + $0x504] ss:$16 sps:$4 sm:$0xff]  }
 0x27b   :  { %7042 = vmatprep.subr.bf16.mxu0 %v8871_v56  ;;  %v3568_v56 = vadd.f32 %v9767_v7, %v9765_v51  ;;  %v8944_v7 = vld [vmem:[#allocation7 + $0xae0] ss:$16 sps:$4 sm:$0xff]  }
 0x27c   :  { %7084 = vmatpush1.bf16.msra.mxu1 %v8866_v55  ;;  %v8940_v55 = vld [vmem:[#allocation7 + $0x704] ss:$16 sps:$4 sm:$0xff]  }
 0x27d   :  { %7085 = vmatprep.subr.bf16.mxu1 %v8874_v59  ;;  %v3654_v59 = vadd.f32 %v3653_v47, %v3610_v61  ;;  %v8977_v61 = vld [vmem:[#allocation7 + $0x820] ss:$16 sps:$4 sm:$0xff]  }
 0x27e   :  { %7043 = vmatpush1.bf16.msra.mxu0 %v8869_v60  ;;  %v8935_v60 = vld [vmem:[#allocation7 + $0x500] ss:$16 sps:$4 sm:$0xff]  }
 0x27f   :  { %7044 = vmatprep.subr.bf16.mxu0 %v8877_v1  ;;  %v8938_v1 = vld [vmem:[#allocation7 + $0x700] ss:$16 sps:$4 sm:$0xff]  }
 0x280   :  { %7086 = vmatpush1.bf16.msra.mxu1 %v8872_v20  ;;  %v3564_v20 = vadd.f32 %v9753_v62, %v9750_v57  ;;  %v8949_v57 = vld [vmem:[#allocation7 + $0x8c4] ss:$16 sps:$4 sm:$0xff]   ;;  %v8980_v47 = vld [vmem:[#allocation7 + $0xa20] ss:$16 sps:$4 sm:$0xff]  }
 0x281   :  { %7087 = vmatprep.subr.bf16.mxu1 %v8880_v2  ;;  %v8943_v2 = vld [vmem:[#allocation7 + $0x8e4] ss:$16 sps:$4 sm:$0xff]  }
 0x282   :  { %7045 = vmatpush1.bf16.msra.mxu0 %v8875_v23  ;;  %v3650_v23 = vadd.f32 %v9779_v41, %v9776_v38  ;;  %v3837_v51 = vmax.f32 %v3564_v20, 0.0  ;;  %v8989_v20 = vld [vmem:[#allocation7 + $0x9e0] ss:$16 sps:$4 sm:$0xff]  }
 0x283   :  { %7046 = vmatprep.subr.bf16.mxu0 %v8883_v8  ;;  %v3853_v8 = vmax.f32 %v3568_v56, 0.0  ;;  %v8986_v56 = vld [vmem:[#allocation7 + $0xa00] ss:$16 sps:$4 sm:$0xff]  }
 0x284   :  { %7088 = vmatpush1.bf16.msra.mxu1 %v8878_v6  ;;  %v8946_v6 = vld [vmem:[#allocation7 + $0xae4] ss:$16 sps:$4 sm:$0xff]  }
 0x285   :  { %7089 = vmatprep.subr.bf16.mxu1 %v8886_v9  ;;  %v3855_v9 = vmax.f32 %v3654_v59, 0.0  ;;  %v9789_v62 = vpack.c.bf16 %v3853_v8, %v3837_v51  ;;  %v8991_v59 = vld [vmem:[#allocation7 + $0x9e4] ss:$16 sps:$4 sm:$0xff]   ;;  %v8998_v8 = vld [vmem:[#allocation7 + $0xbc0] ss:$16 sps:$4 sm:$0xff]  }
 0x286   :  { %7047 = vmatpush1.bf16.msra.mxu0 %v8881_v10  ;;  %v8941_v10 = vld [vmem:[#allocation7 + $0x8e0] ss:$16 sps:$4 sm:$0xff]  }
 0x287   :  { %7048 = vmatprep.subr.bf16.mxu0 %v8889_v13  ;;  %v9001_v51 = vld [vmem:[#allocation7 + $0x9a0] ss:$16 sps:$4 sm:$0xff]  }
 0x288   :  { %7090 = vmatpush1.bf16.msra.mxu1 %v8884_v12  ;;  %v3839_v12 = vmax.f32 %v3650_v23, 0.0  ;;  %v9000_v23 = vld [vmem:[#allocation7 + $0xbc4] ss:$16 sps:$4 sm:$0xff]  }
 0x289   :  { %7091 = vmatprep.subr.bf16.mxu1 %v8892_v14  ;;  %v8952_v14 = vld [vmem:[#allocation7 + $0xac4] ss:$16 sps:$4 sm:$0xff]  }
 0x28a   :  { %7049 = vmatpush1.bf16.msra.mxu0 %v8887_v16  ;;  %v9792_v38 = vpack.c.bf16 %v3855_v9, %v3839_v12  ;;  %v8947_v16 = vld [vmem:[#allocation7 + $0x8c0] ss:$16 sps:$4 sm:$0xff]   ;;  %v9003_v9 = vld [vmem:[#allocation7 + $0x9a4] ss:$16 sps:$4 sm:$0xff]  }
 0x28b   :  { %7050 = vmatprep.subr.bf16.mxu0 %v8895_v19  ;;  %v9009_v12 = vld [vmem:[#allocation7 + $0x984] ss:$16 sps:$4 sm:$0xff]  }
 0x28c   :  { %7092 = vmatpush1.bf16.msra.mxu1 %v8890_v18 }
 0x28d   :  { %7093 = vmatprep.subr.bf16.mxu1 %v8898_v21  ;;  %v8950_v21 = vld [vmem:[#allocation7 + $0xac0] ss:$16 sps:$4 sm:$0xff]  }
 0x28e   :  { %7051 = vmatpush2.bf16.msra.mxu0 %v8893_v24  ;;  %v8955_v24 = vld [vmem:[#allocation7 + $0x8a4] ss:$16 sps:$4 sm:$0xff]  }
 0x28f   :  { %7052 = vmatprep.subr.bf16.mxu0 %v8901_v26  ;;  %v8958_v26 = vld [vmem:[#allocation7 + $0xaa4] ss:$16 sps:$4 sm:$0xff]  }
 0x290   :  { %7094 = vmatpush2.bf16.msra.mxu1 %v8896_v25 }
 0x291   :  { %7095 = vmatprep.subr.bf16.mxu1 %v8904_v28 }
 0x292   :  { %7053 = vmatpush2.bf16.msra.mxu0 %v8899_v58 }
 0x293   :  { %7054 = vmatprep.subr.bf16.mxu0 %v8907_v45 }
 0x294   :  { %7096 = vmatpush2.bf16.msra.mxu1 %v8902_v29  ;;  %v8953_v29 = vld [vmem:[#allocation7 + $0x8a0] ss:$16 sps:$4 sm:$0xff]  }
 0x295   :  { %7097 = vmatprep.subr.bf16.mxu1 %v8910_v48  ;;  %v8956_v48 = vld [vmem:[#allocation7 + $0xaa0] ss:$16 sps:$4 sm:$0xff]  }
 0x296   :  { %7055 = vmatpush2.bf16.msra.mxu0 %v8905_v4  ;;  %v8961_v4 = vld [vmem:[#allocation7 + $0x884] ss:$16 sps:$4 sm:$0xff]  }
 0x297   :  { %7056 = vmatprep.subr.bf16.mxu0 %v8913_v31 }
 0x298   :  { %7098 = vmatpush2.bf16.msra.mxu1 %v8908_v3  ;;  %v8964_v3 = vld [vmem:[#allocation7 + $0xa84] ss:$16 sps:$4 sm:$0xff]  }
 0x299   :  { %7099 = vmatprep.subr.bf16.mxu1 %v8916_v0 }
 0x29a   :  { %7057 = vmatpush2.bf16.msra.mxu0 %v8911_v5  ;;  %v8959_v5 = vld [vmem:[#allocation7 + $0x880] ss:$16 sps:$4 sm:$0xff]  }
 0x29b   :  { %7058 = vmatprep.subr.bf16.mxu0 %v8919_v36  ;;  %v8962_v36 = vld [vmem:[#allocation7 + $0xa80] ss:$16 sps:$4 sm:$0xff]  }
 0x29c   :  { %7100 = vmatpush2.bf16.msra.mxu1 %v8914_v35 }
 0x29d   :  { %7101 = vmatprep.subr.bf16.mxu1 %v8922_v37  ;;  %v8967_v37 = vld [vmem:[#allocation7 + $0x864] ss:$16 sps:$4 sm:$0xff]  }
 0x29e   :  { %7059 = vmatpush2.bf16.msra.mxu0 %v8917_v39  ;;  %v8970_v39 = vld [vmem:[#allocation7 + $0xa64] ss:$16 sps:$4 sm:$0xff]  }
 0x29f   :  { %7060 = vmatprep.subr.bf16.mxu0 %v8925_v42  ;;  %v8968_v42 = vld [vmem:[#allocation7 + $0xa60] ss:$16 sps:$4 sm:$0xff]  }
 0x2a0   :  { %7102 = vmatpush2.bf16.msra.mxu1 %v8920_v40  ;;  %v8965_v40 = vld [vmem:[#allocation7 + $0x860] ss:$16 sps:$4 sm:$0xff]  }
 0x2a1   :  { %7103 = vmatprep.subr.bf16.mxu1 %v8928_v43  ;;  %v8973_v43 = vld [vmem:[#allocation7 + $0x844] ss:$16 sps:$4 sm:$0xff]  }
 0x2a2   :  { %7061 = vmatpush2.bf16.msra.mxu0 %v8923_v44  ;;  %v8976_v44 = vld [vmem:[#allocation7 + $0xa44] ss:$16 sps:$4 sm:$0xff]  }
 0x2a3   :  { %7062 = vmatprep.subr.bf16.mxu0 %v8931_v11  ;;  %v8974_v11 = vld [vmem:[#allocation7 + $0xa40] ss:$16 sps:$4 sm:$0xff]  }
 0x2a4   :  { %7104 = vmatpush2.bf16.msra.mxu1 %v8926_v46  ;;  %v8971_v46 = vld [vmem:[#allocation7 + $0x840] ss:$16 sps:$4 sm:$0xff]  }
 0x2a5   :  { %7105 = vmatprep.subr.bf16.mxu1 %v8934_v17  ;;  %v8979_v17 = vld [vmem:[#allocation7 + $0x824] ss:$16 sps:$4 sm:$0xff]  }
 0x2a6   :  { %7063 = vmatpush2.bf16.msra.mxu0 %v8929_v54  ;;  %v8982_v54 = vld [vmem:[#allocation7 + $0xa24] ss:$16 sps:$4 sm:$0xff]  }
 0x2a7   :  { %7064 = vmatprep.subr.bf16.mxu0 %v8937_v30  ;;  %v8988_v30 = vld [vmem:[#allocation7 + $0xa04] ss:$16 sps:$4 sm:$0xff]  }
 0x2a8   :  { %7106 = vmatpush2.bf16.msra.mxu1 %v8932_v27  ;;  %v8985_v27 = vld [vmem:[#allocation7 + $0x804] ss:$16 sps:$4 sm:$0xff]  }
 0x2a9   :  { %7107 = vmatprep.subr.bf16.mxu1 %v8940_v55  ;;  %v8983_v55 = vld [vmem:[#allocation7 + $0x800] ss:$16 sps:$4 sm:$0xff]  }
 0x2aa   :  { %7065 = vmatpush2.bf16.msra.mxu0 %v8935_v60  ;;  %v8994_v60 = vld [vmem:[#allocation7 + $0xbe4] ss:$16 sps:$4 sm:$0xff]  }
 0x2ab   :  { %7120 = vmatprep.subr.bf16.mxu0 %v8943_v2  ;;  %v8997_v2 = vld [vmem:[#allocation7 + $0x9c4] ss:$16 sps:$4 sm:$0xff]  }
 0x2ac   :  { %7108 = vmatpush2.bf16.msra.mxu1 %v8938_v1  ;;  %v8992_v1 = vld [vmem:[#allocation7 + $0xbe0] ss:$16 sps:$4 sm:$0xff]  }
 0x2ad   :  { %7163 = vmatprep.subr.bf16.mxu1 %v8946_v6  ;;  %v3690_v13 = vpop.f32.mrf.mxu0  ;;  %7067 = vmatmul.mubr.bf16.vlgmr.msra.gmra.mxu0 %v9715_v34  ;;  %v8995_v6 = vld [vmem:[#allocation7 + $0x9c0] ss:$16 sps:$4 sm:$0xff]  }
 0x2ae   :  { %7121 = vmatpush1.bf16.msra.mxu0 %v8941_v10  ;;  %7152 = vmatprep.mubr.bf16.mxu0 %v9789_v62  ;;  %v9006_v10 = vld [vmem:[#allocation7 + $0xba4] ss:$16 sps:$4 sm:$0xff]  }
 0x2af   :  { %v3733_v41 = vpop.f32.mrf.mxu1  ;;  %7110 = vmatmul.mubr.bf16.vlgmr.msra.gmra.mxu1 %v9729_v32  ;;  %v9796_v19 = vpop.f32.mrf.mxu0  ;;  %7122 = vmatprep.subr.bf16.mxu0 %v8949_v57  ;;  %v9012_v57 = vld [vmem:[#allocation7 + $0xb84] ss:$16 sps:$4 sm:$0xff]  }
 0x2b0   :  { %v3734_v18 = vadd.f32 %v3733_v41, %v3690_v13  ;;  %7164 = vmatpush1.bf16.msra.mxu1 %v8944_v7  ;;  %7195 = vmatprep.mubr.bf16.mxu1 %v9792_v38  ;;  %v9004_v7 = vld [vmem:[#allocation7 + $0xba0] ss:$16 sps:$4 sm:$0xff]   ;;  %v9015_v41 = vld [vmem:[#allocation7 + $0x964] ss:$16 sps:$4 sm:$0xff]  }
 0x2b1   :  { %v9799_v25 = vpop.f32.mrf.mxu1  ;;  %v3694_v28 = vpop.f32.mrf.mxu0  ;;  %7165 = vmatprep.subr.bf16.mxu1 %v8952_v14  ;;  %v9007_v13 = vld [vmem:[#allocation7 + $0x980] ss:$16 sps:$4 sm:$0xff]  }
 0x2b2   :  { %7123 = vmatpush1.bf16.msra.mxu0 %v8947_v16  ;;  %v3840_v31 = vmax.f32 %v3734_v18, 0.0  ;;  %v9010_v14 = vld [vmem:[#allocation7 + $0xb80] ss:$16 sps:$4 sm:$0xff]   ;;  %v9018_v16 = vld [vmem:[#allocation7 + $0xb64] ss:$16 sps:$4 sm:$0xff]  }
 0x2b3   :  { %v3737_v58 = vpop.f32.mrf.mxu1  ;;  %7124 = vmatprep.subr.bf16.mxu0 %v8955_v24  ;;  %v9013_v18 = vld [vmem:[#allocation7 + $0x960] ss:$16 sps:$4 sm:$0xff]   ;;  %v9021_v24 = vld [vmem:[#allocation7 + $0x944] ss:$16 sps:$4 sm:$0xff]  }
 0x2b4   :  { %v3738_v45 = vadd.f32 %v3737_v58, %v3694_v28  ;;  %7166 = vmatpush1.bf16.msra.mxu1 %v8950_v21  ;;  %v9016_v21 = vld [vmem:[#allocation7 + $0xb60] ss:$16 sps:$4 sm:$0xff]  }
 0x2b5   :  { %7167 = vmatprep.subr.bf16.mxu1 %v8958_v26  ;;  %v9024_v26 = vld [vmem:[#allocation7 + $0xb44] ss:$16 sps:$4 sm:$0xff]   ;;  %v9019_v28 = vld [vmem:[#allocation7 + $0x940] ss:$16 sps:$4 sm:$0xff]  }
 0x2b6   :  { %v3856_v0 = vmax.f32 %v3738_v45, 0.0  ;;  %7125 = vmatpush1.bf16.msra.mxu0 %v8953_v29  ;;  %v9022_v58 = vld [vmem:[#allocation7 + $0xb40] ss:$16 sps:$4 sm:$0xff]   ;;  %v9027_v29 = vld [vmem:[#allocation7 + $0x924] ss:$16 sps:$4 sm:$0xff]  }
 0x2b7   :  { %7126 = vmatprep.subr.bf16.mxu0 %v8961_v4  ;;  %v9030_v45 = vld [vmem:[#allocation7 + $0xb24] ss:$16 sps:$4 sm:$0xff]   ;;  %v3739_v4 = vpop.f32.mrf.mxu1 }
 0x2b8   :  { %v9801_v35 = vpack.c.bf16 %v3856_v0, %v3840_v31  ;;  %7168 = vmatpush1.bf16.msra.mxu1 %v8956_v48  ;;  %v3696_v48 = vpop.f32.mrf.mxu0  ;;  %v9028_v31 = vld [vmem:[#allocation7 + $0xb20] ss:$16 sps:$4 sm:$0xff]   ;;  %v9033_v0 = vld [vmem:[#allocation7 + $0x904] ss:$16 sps:$4 sm:$0xff]  }
 0x2b9   :  { %7169 = vmatprep.subr.bf16.mxu1 %v8964_v3  ;;  %v9025_v3 = vld [vmem:[#allocation7 + $0x920] ss:$16 sps:$4 sm:$0xff]  }
 0x2ba   :  { %7127 = vmatpush1.bf16.msra.mxu0 %v8959_v5  ;;  %v9036_v5 = vld [vmem:[#allocation7 + $0xb04] ss:$16 sps:$4 sm:$0xff]  }
 0x2bb   :  { %7128 = vmatprep.subr.bf16.mxu0 %v8967_v37  ;;  %v9031_v37 = vld [vmem:[#allocation7 + $0x900] ss:$16 sps:$4 sm:$0xff]  }
 0x2bc   :  { %7170 = vmatpush1.bf16.msra.mxu1 %v8962_v36  ;;  %v3740_v36 = vadd.f32 %v3739_v4, %v3696_v48  ;;  %v9078_v48 = vld [vmem:[#allocation7 + $0xe24] ss:$16 sps:$4 sm:$0xff]   ;;  %v9073_v4 = vld [vmem:[#allocation7 + $0xc20] ss:$16 sps:$4 sm:$0xff]  }
 0x2bd   :  { %7171 = vmatprep.subr.bf16.mxu1 %v8970_v39  ;;  %v3736_v39 = vadd.f32 %v9799_v25, %v9796_v19  ;;  %v9043_v25 = vld [vmem:[#allocation7 + $0xcc0] ss:$16 sps:$4 sm:$0xff]  }
 0x2be   :  { %7129 = vmatpush1.bf16.msra.mxu0 %v8965_v40  ;;  %v9034_v40 = vld [vmem:[#allocation7 + $0xb00] ss:$16 sps:$4 sm:$0xff]  }
 0x2bf   :  { %7130 = vmatprep.subr.bf16.mxu0 %v8973_v43  ;;  %v9042_v43 = vld [vmem:[#allocation7 + $0xee4] ss:$16 sps:$4 sm:$0xff]  }
 0x2c0   :  { %7172 = vmatpush1.bf16.msra.mxu1 %v8968_v42  ;;  %v9039_v42 = vld [vmem:[#allocation7 + $0xce4] ss:$16 sps:$4 sm:$0xff]  }
 0x2c1   :  { %7173 = vmatprep.subr.bf16.mxu1 %v8976_v44  ;;  %v3857_v44 = vmax.f32 %v3740_v36, 0.0  ;;  %v9082_v36 = vld [vmem:[#allocation7 + $0xe00] ss:$16 sps:$4 sm:$0xff]  }
 0x2c2   :  { %7131 = vmatpush1.bf16.msra.mxu0 %v8971_v46  ;;  %v9037_v46 = vld [vmem:[#allocation7 + $0xce0] ss:$16 sps:$4 sm:$0xff]  }
 0x2c3   :  { %7132 = vmatprep.subr.bf16.mxu0 %v8979_v17  ;;  %v9040_v17 = vld [vmem:[#allocation7 + $0xee0] ss:$16 sps:$4 sm:$0xff]  }
 0x2c4   :  { %7174 = vmatpush1.bf16.msra.mxu1 %v8974_v11  ;;  %v3841_v11 = vmax.f32 %v3736_v39, 0.0  ;;  %v9090_v39 = vld [vmem:[#allocation7 + $0xfe4] ss:$16 sps:$4 sm:$0xff]  }
 0x2c5   :  { %7175 = vmatprep.subr.bf16.mxu1 %v8982_v54  ;;  %v9045_v54 = vld [vmem:[#allocation7 + $0xcc4] ss:$16 sps:$4 sm:$0xff]  }
 0x2c6   :  { %7133 = vmatpush1.bf16.msra.mxu0 %v8977_v61  ;;  %v9048_v61 = vld [vmem:[#allocation7 + $0xec4] ss:$16 sps:$4 sm:$0xff]  }
 0x2c7   :  { %7134 = vmatprep.subr.bf16.mxu0 %v8985_v27 }
 0x2c8   :  { %7176 = vmatpush1.bf16.msra.mxu1 %v8980_v47  ;;  %v9805_v47 = vpack.c.bf16 %v3857_v44, %v3841_v11  ;;  %v9096_v44 = vld [vmem:[#allocation7 + $0xfc4] ss:$16 sps:$4 sm:$0xff]   ;;  %v9094_v11 = vld [vmem:[#allocation7 + $0xfc0] ss:$16 sps:$4 sm:$0xff]  }
 0x2c9   :  { %7177 = vmatprep.subr.bf16.mxu1 %v8988_v30 }
 0x2ca   :  { %7135 = vmatpush1.bf16.msra.mxu0 %v8983_v55  ;;  %v9046_v55 = vld [vmem:[#allocation7 + $0xec0] ss:$16 sps:$4 sm:$0xff]  }
 0x2cb   :  { %7136 = vmatprep.subr.bf16.mxu0 %v8991_v59 }
 0x2cc   :  { %7178 = vmatpush1.bf16.msra.mxu1 %v8986_v56  ;;  %v9051_v56 = vld [vmem:[#allocation7 + $0xca4] ss:$16 sps:$4 sm:$0xff]  }
 0x2cd   :  { %7179 = vmatprep.subr.bf16.mxu1 %v8994_v60  ;;  %v9054_v60 = vld [vmem:[#allocation7 + $0xea4] ss:$16 sps:$4 sm:$0xff]  }
 0x2ce   :  { %7137 = vmatpush2.bf16.msra.mxu0 %v8989_v20 }
 0x2cf   :  { %7138 = vmatprep.subr.bf16.mxu0 %v8997_v2  ;;  %v9049_v2 = vld [vmem:[#allocation7 + $0xca0] ss:$16 sps:$4 sm:$0xff]  }
 0x2d0   :  { %7180 = vmatpush2.bf16.msra.mxu1 %v8992_v1 }
 0x2d1   :  { %7181 = vmatprep.subr.bf16.mxu1 %v9000_v23 }
 0x2d2   :  { %7139 = vmatpush2.bf16.msra.mxu0 %v8995_v6 }
 0x2d3   :  { %7140 = vmatprep.subr.bf16.mxu0 %v9003_v9  ;;  %v9057_v9 = vld [vmem:[#allocation7 + $0xc84] ss:$16 sps:$4 sm:$0xff]  }
 0x2d4   :  { %7182 = vmatpush2.bf16.msra.mxu1 %v8998_v8  ;;  %v9052_v8 = vld [vmem:[#allocation7 + $0xea0] ss:$16 sps:$4 sm:$0xff]  }
 0x2d5   :  { %7183 = vmatprep.subr.bf16.mxu1 %v9006_v10 }
 0x2d6   :  { %7141 = vmatpush2.bf16.msra.mxu0 %v9001_v51  ;;  %v9060_v51 = vld [vmem:[#allocation7 + $0xe84] ss:$16 sps:$4 sm:$0xff]  }
 0x2d7   :  { %7142 = vmatprep.subr.bf16.mxu0 %v9009_v12  ;;  %v9055_v12 = vld [vmem:[#allocation7 + $0xc80] ss:$16 sps:$4 sm:$0xff]  }
 0x2d8   :  { %7184 = vmatpush2.bf16.msra.mxu1 %v9004_v7 }
 0x2d9   :  { %7185 = vmatprep.subr.bf16.mxu1 %v9012_v57 }
 0x2da   :  { %7143 = vmatpush2.bf16.msra.mxu0 %v9007_v13 }
 0x2db   :  { %7144 = vmatprep.subr.bf16.mxu0 %v9015_v41  ;;  %v9063_v41 = vld [vmem:[#allocation7 + $0xc64] ss:$16 sps:$4 sm:$0xff]  }
 0x2dc   :  { %7186 = vmatpush2.bf16.msra.mxu1 %v9010_v14  ;;  %v9058_v14 = vld [vmem:[#allocation7 + $0xe80] ss:$16 sps:$4 sm:$0xff]  }
 0x2dd   :  { %7187 = vmatprep.subr.bf16.mxu1 %v9018_v16  ;;  %v9066_v16 = vld [vmem:[#allocation7 + $0xe64] ss:$16 sps:$4 sm:$0xff]  }
 0x2de   :  { %7145 = vmatpush2.bf16.msra.mxu0 %v9013_v18 }
 0x2df   :  { %7146 = vmatprep.subr.bf16.mxu0 %v9021_v24  ;;  %v9064_v24 = vld [vmem:[#allocation7 + $0xe60] ss:$16 sps:$4 sm:$0xff]  }
 0x2e0   :  { %7188 = vmatpush2.bf16.msra.mxu1 %v9016_v21  ;;  %v9061_v21 = vld [vmem:[#allocation7 + $0xc60] ss:$16 sps:$4 sm:$0xff]  }
 0x2e1   :  { %7189 = vmatprep.subr.bf16.mxu1 %v9024_v26  ;;  %v9069_v26 = vld [vmem:[#allocation7 + $0xc44] ss:$16 sps:$4 sm:$0xff]  }
 0x2e2   :  { %7147 = vmatpush2.bf16.msra.mxu0 %v9019_v28  ;;  %v9072_v28 = vld [vmem:[#allocation7 + $0xe44] ss:$16 sps:$4 sm:$0xff]  }
 0x2e3   :  { %7148 = vmatprep.subr.bf16.mxu0 %v9027_v29  ;;  %v9070_v29 = vld [vmem:[#allocation7 + $0xe40] ss:$16 sps:$4 sm:$0xff]  }
 0x2e4   :  { %7190 = vmatpush2.bf16.msra.mxu1 %v9022_v58  ;;  %v9067_v58 = vld [vmem:[#allocation7 + $0xc40] ss:$16 sps:$4 sm:$0xff]  }
 0x2e5   :  { %7191 = vmatprep.subr.bf16.mxu1 %v9030_v45  ;;  %v9075_v45 = vld [vmem:[#allocation7 + $0xc24] ss:$16 sps:$4 sm:$0xff]  }
 0x2e6   :  { %7149 = vmatpush2.bf16.msra.mxu0 %v9025_v3  ;;  %v9076_v3 = vld [vmem:[#allocation7 + $0xe20] ss:$16 sps:$4 sm:$0xff]  }
 0x2e7   :  { %7150 = vmatprep.subr.bf16.mxu0 %v9033_v0  ;;  %v9084_v0 = vld [vmem:[#allocation7 + $0xe04] ss:$16 sps:$4 sm:$0xff]  }
 0x2e8   :  { %7192 = vmatpush2.bf16.msra.mxu1 %v9028_v31  ;;  %v9081_v31 = vld [vmem:[#allocation7 + $0xc04] ss:$16 sps:$4 sm:$0xff]  }
 0x2e9   :  { %7193 = vmatprep.subr.bf16.mxu1 %v9036_v5  ;;  %v9079_v5 = vld [vmem:[#allocation7 + $0xc00] ss:$16 sps:$4 sm:$0xff]  }
 0x2ea   :  { %7151 = vmatpush2.bf16.msra.mxu0 %v9031_v37  ;;  %v9087_v37 = vld [vmem:[#allocation7 + $0xde4] ss:$16 sps:$4 sm:$0xff]  }
 0x2eb   :  { %7206 = vmatprep.subr.bf16.mxu0 %v9039_v42  ;;  %v9088_v42 = vld [vmem:[#allocation7 + $0xfe0] ss:$16 sps:$4 sm:$0xff]  }
 0x2ec   :  { %7194 = vmatpush2.bf16.msra.mxu1 %v9034_v40  ;;  %v9085_v40 = vld [vmem:[#allocation7 + $0xde0] ss:$16 sps:$4 sm:$0xff]  }
 0x2ed   :  { %7249 = vmatprep.subr.bf16.mxu1 %v9042_v43  ;;  %v9807_v27 = vpop.f32.mrf.mxu0  ;;  %7153 = vmatmul.mubr.bf16.vlgmr.msra.gmra.mxu0 %v9755_v15  ;;  %v9093_v43 = vld [vmem:[#allocation7 + $0xdc4] ss:$16 sps:$4 sm:$0xff]  }
 0x2ee   :  { %7207 = vmatpush1.bf16.msra.mxu0 %v9037_v46  ;;  %7238 = vmatprep.mubr.bf16.mxu0 %v9805_v47  ;;  %v9091_v46 = vld [vmem:[#allocation7 + $0xdc0] ss:$16 sps:$4 sm:$0xff]  }
 0x2ef   :  { %v9810_v19 = vpop.f32.mrf.mxu1  ;;  %7196 = vmatmul.mubr.bf16.vlgmr.msra.gmra.mxu1 %v9781_v53  ;;  %v3778_v30 = vpop.f32.mrf.mxu0  ;;  %7208 = vmatprep.subr.bf16.mxu0 %v9045_v54  ;;  %v9102_v54 = vld [vmem:[#allocation7 + $0xfa4] ss:$16 sps:$4 sm:$0xff]  }
 0x2f0   :  { %7250 = vmatpush1.bf16.msra.mxu1 %v9040_v17  ;;  %v9099_v17 = vld [vmem:[#allocation7 + $0xda4] ss:$16 sps:$4 sm:$0xff]  }
 0x2f1   :  { %v3821_v59 = vpop.f32.mrf.mxu1  ;;  %7251 = vmatprep.subr.bf16.mxu1 %v9048_v61  ;;  %v9814_v20 = vpop.f32.mrf.mxu0  ;;  %v9097_v61 = vld [vmem:[#allocation7 + $0xda0] ss:$16 sps:$4 sm:$0xff]  }
 0x2f2   :  { %7209 = vmatpush1.bf16.msra.mxu0 %v9043_v25  ;;  %v3822_v23 = vadd.f32 %v3821_v59, %v3778_v30  ;;  %v9100_v25 = vld [vmem:[#allocation7 + $0xfa0] ss:$16 sps:$4 sm:$0xff]   ;;  %v9105_v30 = vld [vmem:[#allocation7 + $0xd84] ss:$16 sps:$4 sm:$0xff]  }
 0x2f3   :  { %v9816_v1 = vpop.f32.mrf.mxu1  ;;  %v3782_v6 = vpop.f32.mrf.mxu0  ;;  %7210 = vmatprep.subr.bf16.mxu0 %v9051_v56  ;;  %v9103_v56 = vld [vmem:[#allocation7 + $0xd80] ss:$16 sps:$4 sm:$0xff]  }
 0x2f4   :  { %7252 = vmatpush1.bf16.msra.mxu1 %v9046_v55  ;;  %v3843_v57 = vmax.f32 %v3822_v23, 0.0  ;;  %v9108_v55 = vld [vmem:[#allocation7 + $0xf84] ss:$16 sps:$4 sm:$0xff]   ;;  %v9106_v59 = vld [vmem:[#allocation7 + $0xf80] ss:$16 sps:$4 sm:$0xff]  }
 0x2f5   :  { %v3825_v10 = vpop.f32.mrf.mxu1  ;;  %7253 = vmatprep.subr.bf16.mxu1 %v9054_v60  ;;  %v9111_v60 = vld [vmem:[#allocation7 + $0xd64] ss:$16 sps:$4 sm:$0xff]   ;;  %v9109_v23 = vld [vmem:[#allocation7 + $0xd60] ss:$16 sps:$4 sm:$0xff]  }
 0x2f6   :  { %v3826_v7 = vadd.f32 %v3825_v10, %v3782_v6  ;;  %7211 = vmatpush1.bf16.msra.mxu0 %v9049_v2  ;;  %v9114_v2 = vld [vmem:[#allocation7 + $0xf64] ss:$16 sps:$4 sm:$0xff]   ;;  %v9112_v6 = vld [vmem:[#allocation7 + $0xf60] ss:$16 sps:$4 sm:$0xff]  }
 0x2f7   :  { %7212 = vmatprep.subr.bf16.mxu0 %v9057_v9  ;;  %v9120_v9 = vld [vmem:[#allocation7 + $0xf44] ss:$16 sps:$4 sm:$0xff]   ;;  %v9115_v10 = vld [vmem:[#allocation7 + $0xd40] ss:$16 sps:$4 sm:$0xff]  }
 0x2f8   :  { %v3859_v13 = vmax.f32 %v3826_v7, 0.0  ;;  %7254 = vmatpush1.bf16.msra.mxu1 %v9052_v8  ;;  %v9117_v8 = vld [vmem:[#allocation7 + $0xd44] ss:$16 sps:$4 sm:$0xff]  }
 0x2f9   :  { %7255 = vmatprep.subr.bf16.mxu1 %v9060_v51  ;;  %v9118_v51 = vld [vmem:[#allocation7 + $0xf40] ss:$16 sps:$4 sm:$0xff]   ;;  %v9123_v7 = vld [vmem:[#allocation7 + $0xd24] ss:$16 sps:$4 sm:$0xff]  }
 0x2fa   :  { %v9818_v18 = vpack.c.bf16 %v3859_v13, %v3843_v57  ;;  %7213 = vmatpush1.bf16.msra.mxu0 %v9055_v12  ;;  %v9126_v12 = vld [vmem:[#allocation7 + $0xf24] ss:$16 sps:$4 sm:$0xff]   ;;  %v9121_v57 = vld [vmem:[#allocation7 + $0xd20] ss:$16 sps:$4 sm:$0xff]  }
 0x2fb   :  { %7214 = vmatprep.subr.bf16.mxu0 %v9063_v41  ;;  %v9124_v13 = vld [vmem:[#allocation7 + $0xf20] ss:$16 sps:$4 sm:$0xff]   ;;  %v3824_v41 = vadd.f32 %v9816_v1, %v9814_v20  ;;  %v9136_v20 = vld [vmem:[#allocation7 + $0x2e8] ss:$16 sps:$4 sm:$0xff]  }
 0x2fc   :  { %7256 = vmatpush1.bf16.msra.mxu1 %v9058_v14  ;;  %7281 = vmatprep.mubr.bf16.mxu1 %v9818_v18  ;;  %v9129_v14 = vld [vmem:[#allocation7 + $0xd04] ss:$16 sps:$4 sm:$0xff]  }
 0x2fd   :  { %7257 = vmatprep.subr.bf16.mxu1 %v9066_v16  ;;  %v9132_v16 = vld [vmem:[#allocation7 + $0xf04] ss:$16 sps:$4 sm:$0xff]  }
 0x2fe   :  { %7215 = vmatpush1.bf16.msra.mxu0 %v9061_v21  ;;  %v3820_v21 = vadd.f32 %v9810_v19, %v9807_v27  ;;  %v9144_v27 = vld [vmem:[#allocation7 + $0x2cc] ss:$16 sps:$4 sm:$0xff]   ;;  %v9139_v19 = vld [vmem:[#allocation7 + $0xc8] ss:$16 sps:$4 sm:$0xff]  }
 0x2ff   :  { %7216 = vmatprep.subr.bf16.mxu0 %v9069_v26  ;;  %v9130_v26 = vld [vmem:[#allocation7 + $0xf00] ss:$16 sps:$4 sm:$0xff]  }
 0x300   :  { %7258 = vmatpush1.bf16.msra.mxu1 %v9064_v24  ;;  %v9127_v24 = vld [vmem:[#allocation7 + $0xd00] ss:$16 sps:$4 sm:$0xff]  }
 0x301   :  { %7259 = vmatprep.subr.bf16.mxu1 %v9072_v28  ;;  %v9135_v28 = vld [vmem:[#allocation7 + $0xec] ss:$16 sps:$4 sm:$0xff]  }
 0x302   :  { %7217 = vmatpush1.bf16.msra.mxu0 %v9067_v58  ;;  %v3858_v58 = vmax.f32 %v3824_v41, 0.0  ;;  %v9196_v41 = vld [vmem:[#allocation7 + $0x3a8] ss:$16 sps:$4 sm:$0xff]  }
 0x303   :  { %7218 = vmatprep.subr.bf16.mxu0 %v9075_v45  ;;  %v3842_v45 = vmax.f32 %v3820_v21, 0.0  ;;  %v9204_v21 = vld [vmem:[#allocation7 + $0x38c] ss:$16 sps:$4 sm:$0xff]  }
 0x304   :  { %7260 = vmatpush1.bf16.msra.mxu1 %v9070_v29  ;;  %v9138_v29 = vld [vmem:[#allocation7 + $0x2ec] ss:$16 sps:$4 sm:$0xff]  }
 0x305   :  { %7261 = vmatprep.subr.bf16.mxu1 %v9078_v48  ;;  %v9133_v48 = vld [vmem:[#allocation7 + $0xe8] ss:$16 sps:$4 sm:$0xff]   ;;  %v9825_v1 = vpack.c.bf16 %v3858_v58, %v3842_v45  ;;  %v9210_v58 = vld [vmem:[#allocation7 + $0x36c] ss:$16 sps:$4 sm:$0xff]  }
 0x306   :  { %7219 = vmatpush1.bf16.msra.mxu0 %v9073_v4  ;;  %v9141_v4 = vld [vmem:[#allocation7 + $0xcc] ss:$16 sps:$4 sm:$0xff]   ;;  %v9208_v45 = vld [vmem:[#allocation7 + $0x368] ss:$16 sps:$4 sm:$0xff]  }
 0x307   :  { %7220 = vmatprep.subr.bf16.mxu0 %v9081_v31  ;;  %v9147_v31 = vld [vmem:[#allocation7 + $0xac] ss:$16 sps:$4 sm:$0xff]  }
 0x308   :  { %7262 = vmatpush1.bf16.msra.mxu1 %v9076_v3  ;;  %v9142_v3 = vld [vmem:[#allocation7 + $0x2c8] ss:$16 sps:$4 sm:$0xff]  }
 0x309   :  { %7263 = vmatprep.subr.bf16.mxu1 %v9084_v0  ;;  %v9150_v0 = vld [vmem:[#allocation7 + $0x2ac] ss:$16 sps:$4 sm:$0xff]  }
 0x30a   :  { %7221 = vmatpush1.bf16.msra.mxu0 %v9079_v5  ;;  %v9145_v5 = vld [vmem:[#allocation7 + $0xa8] ss:$16 sps:$4 sm:$0xff]  }
 0x30b   :  { %7222 = vmatprep.subr.bf16.mxu0 %v9087_v37  ;;  %v9153_v37 = vld [vmem:[#allocation7 + $0x8c] ss:$16 sps:$4 sm:$0xff]  }
 0x30c   :  { %7264 = vmatpush1.bf16.msra.mxu1 %v9082_v36  ;;  %v9148_v36 = vld [vmem:[#allocation7 + $0x2a8] ss:$16 sps:$4 sm:$0xff]  }
 0x30d   :  { %7265 = vmatprep.subr.bf16.mxu1 %v9090_v39  ;;  %v9156_v39 = vld [vmem:[#allocation7 + $0x28c] ss:$16 sps:$4 sm:$0xff]  }
 0x30e   :  { %7223 = vmatpush2.bf16.msra.mxu0 %v9085_v40  ;;  %v9151_v40 = vld [vmem:[#allocation7 + $0x88] ss:$16 sps:$4 sm:$0xff]  }
 0x30f   :  { %7224 = vmatprep.subr.bf16.mxu0 %v9093_v43  ;;  %v9162_v43 = vld [vmem:[#allocation7 + $0x26c] ss:$16 sps:$4 sm:$0xff]  }
 0x310   :  { %7266 = vmatpush2.bf16.msra.mxu1 %v9088_v42  ;;  %v9159_v42 = vld [vmem:[#allocation7 + $0x6c] ss:$16 sps:$4 sm:$0xff]  }
 0x311   :  { %7267 = vmatprep.subr.bf16.mxu1 %v9096_v44  ;;  %v9160_v44 = vld [vmem:[#allocation7 + $0x268] ss:$16 sps:$4 sm:$0xff]  }
 0x312   :  { %7225 = vmatpush2.bf16.msra.mxu0 %v9091_v46  ;;  %v9165_v46 = vld [vmem:[#allocation7 + $0x4c] ss:$16 sps:$4 sm:$0xff]  }
 0x313   :  { %7226 = vmatprep.subr.bf16.mxu0 %v9099_v17  ;;  %v9163_v17 = vld [vmem:[#allocation7 + $0x48] ss:$16 sps:$4 sm:$0xff]  }
 0x314   :  { %7268 = vmatpush2.bf16.msra.mxu1 %v9094_v11  ;;  %v9168_v11 = vld [vmem:[#allocation7 + $0x24c] ss:$16 sps:$4 sm:$0xff]  }
 0x315   :  { %7269 = vmatprep.subr.bf16.mxu1 %v9102_v54  ;;  %v9166_v54 = vld [vmem:[#allocation7 + $0x248] ss:$16 sps:$4 sm:$0xff]  }
 0x316   :  { %7227 = vmatpush2.bf16.msra.mxu0 %v9097_v61  ;;  %v9171_v61 = vld [vmem:[#allocation7 + $0x2c] ss:$16 sps:$4 sm:$0xff]  }
 0x317   :  { %7228 = vmatprep.subr.bf16.mxu0 %v9105_v30  ;;  %v9169_v30 = vld [vmem:[#allocation7 + $0x28] ss:$16 sps:$4 sm:$0xff]  }
 0x318   :  { %7270 = vmatpush2.bf16.msra.mxu1 %v9100_v25  ;;  %v9174_v25 = vld [vmem:[#allocation7 + $0x22c] ss:$16 sps:$4 sm:$0xff]  }
 0x319   :  { %7271 = vmatprep.subr.bf16.mxu1 %v9108_v55  ;;  %v9172_v55 = vld [vmem:[#allocation7 + $0x228] ss:$16 sps:$4 sm:$0xff]  }
 0x31a   :  { %7229 = vmatpush2.bf16.msra.mxu0 %v9103_v56  ;;  %v9177_v56 = vld [vmem:[#allocation7 + $0xc] ss:$16 sps:$4 sm:$0xff]  }
 0x31b   :  { %7230 = vmatprep.subr.bf16.mxu0 %v9111_v60  ;;  %v9175_v60 = vld [vmem:[#allocation7 + $0x8] ss:$16 sps:$4 sm:$0xff]  }
 0x31c   :  { %7272 = vmatpush2.bf16.msra.mxu1 %v9106_v59  ;;  %v9180_v59 = vld [vmem:[#allocation7 + $0x20c] ss:$16 sps:$4 sm:$0xff]  }
 0x31d   :  { %7273 = vmatprep.subr.bf16.mxu1 %v9114_v2  ;;  %v9178_v2 = vld [vmem:[#allocation7 + $0x208] ss:$16 sps:$4 sm:$0xff]  }
 0x31e   :  { %7231 = vmatpush2.bf16.msra.mxu0 %v9109_v23  ;;  %v9183_v23 = vld [vmem:[#allocation7 + $0x1ec] ss:$16 sps:$4 sm:$0xff]  }
 0x31f   :  { %7232 = vmatprep.subr.bf16.mxu0 %v9117_v8  ;;  %v9181_v8 = vld [vmem:[#allocation7 + $0x1e8] ss:$16 sps:$4 sm:$0xff]  }
 0x320   :  { %7274 = vmatpush2.bf16.msra.mxu1 %v9112_v6  ;;  %v9186_v6 = vld [vmem:[#allocation7 + $0x3ec] ss:$16 sps:$4 sm:$0xff]  }
 0x321   :  { %7275 = vmatprep.subr.bf16.mxu1 %v9120_v9  ;;  %v9184_v9 = vld [vmem:[#allocation7 + $0x3e8] ss:$16 sps:$4 sm:$0xff]  }
 0x322   :  { %7233 = vmatpush2.bf16.msra.mxu0 %v9115_v10  ;;  %v9189_v10 = vld [vmem:[#allocation7 + $0x1cc] ss:$16 sps:$4 sm:$0xff]  }
 0x323   :  { %7234 = vmatprep.subr.bf16.mxu0 %v9123_v7  ;;  %v9187_v7 = vld [vmem:[#allocation7 + $0x1c8] ss:$16 sps:$4 sm:$0xff]  }
 0x324   :  { %7276 = vmatpush2.bf16.msra.mxu1 %v9118_v51  ;;  %v9192_v51 = vld [vmem:[#allocation7 + $0x3cc] ss:$16 sps:$4 sm:$0xff]  }
 0x325   :  { %7277 = vmatprep.subr.bf16.mxu1 %v9126_v12  ;;  %v9190_v12 = vld [vmem:[#allocation7 + $0x3c8] ss:$16 sps:$4 sm:$0xff]  }
 0x326   :  { %7235 = vmatpush2.bf16.msra.mxu0 %v9121_v57  ;;  %v9195_v57 = vld [vmem:[#allocation7 + $0x1ac] ss:$16 sps:$4 sm:$0xff]  }
 0x327   :  { %7236 = vmatprep.subr.bf16.mxu0 %v9129_v14  ;;  %v9193_v14 = vld [vmem:[#allocation7 + $0x1a8] ss:$16 sps:$4 sm:$0xff]  }
 0x328   :  { %7278 = vmatpush2.bf16.msra.mxu1 %v9124_v13  ;;  %v9198_v13 = vld [vmem:[#allocation7 + $0x3ac] ss:$16 sps:$4 sm:$0xff]  }
 0x329   :  { %7279 = vmatprep.subr.bf16.mxu1 %v9132_v16  ;;  %v9201_v16 = vld [vmem:[#allocation7 + $0x18c] ss:$16 sps:$4 sm:$0xff]  }
 0x32a   :  { %7237 = vmatpush2.bf16.msra.mxu0 %v9127_v24  ;;  %v9199_v24 = vld [vmem:[#allocation7 + $0x188] ss:$16 sps:$4 sm:$0xff]  }
 0x32b   :  { %7292 = vmatprep.subr.bf16.mxu0 %v9135_v28  ;;  %v9207_v28 = vld [vmem:[#allocation7 + $0x16c] ss:$16 sps:$4 sm:$0xff]  }
 0x32c   :  { %7280 = vmatpush2.bf16.msra.mxu1 %v9130_v26  ;;  %v9202_v26 = vld [vmem:[#allocation7 + $0x388] ss:$16 sps:$4 sm:$0xff]  }
 0x32d   :  { %7335 = vmatprep.subr.bf16.mxu1 %v9138_v29  ;;  %7239 = vmatmul.mubr.bf16.vlgmr.msra.gmra.mxu0 %v9801_v35  ;;  %v9205_v29 = vld [vmem:[#allocation7 + $0x168] ss:$16 sps:$4 sm:$0xff]  }
 0x32e   :  { %7293 = vmatpush1.bf16.msra.mxu0 %v9133_v48  ;;  %7324 = vmatprep.mubr.bf16.mxu0 %v9743_v49  ;;  %v9154_v49 = vld [vmem:[#allocation7 + $0x288] ss:$16 sps:$4 sm:$0xff]   ;;  %v9213_v48 = vld [vmem:[#allocation7 + $0x14c] ss:$16 sps:$4 sm:$0xff]  }
 0x32f   :  { %7282 = vmatmul.mubr.bf16.vlgmr.msra.gmra.mxu1 %v9825_v1  ;;  %7294 = vmatprep.subr.bf16.mxu0 %v9141_v4  ;;  %v9211_v4 = vld [vmem:[#allocation7 + $0x148] ss:$16 sps:$4 sm:$0xff]  }
 0x330   :  { %7336 = vmatpush1.bf16.msra.mxu1 %v9136_v20  ;;  %7367 = vmatprep.mubr.bf16.mxu1 %v9746_v52  ;;  %v9157_v52 = vld [vmem:[#allocation7 + $0x68] ss:$16 sps:$4 sm:$0xff]   ;;  %v9216_v20 = vld [vmem:[#allocation7 + $0x34c] ss:$16 sps:$4 sm:$0xff]  }
 0x331   :  { %7337 = vmatprep.subr.bf16.mxu1 %v9144_v27  ;;  %v9214_v27 = vld [vmem:[#allocation7 + $0x348] ss:$16 sps:$4 sm:$0xff]  }
 0x332   :  { %7295 = vmatpush1.bf16.msra.mxu0 %v9139_v19  ;;  %v9219_v19 = vld [vmem:[#allocation7 + $0x12c] ss:$16 sps:$4 sm:$0xff]  }
 0x333   :  { %7296 = vmatprep.subr.bf16.mxu0 %v9147_v31  ;;  %v9217_v31 = vld [vmem:[#allocation7 + $0x128] ss:$16 sps:$4 sm:$0xff]  }
 0x334   :  { %7338 = vmatpush1.bf16.msra.mxu1 %v9142_v3  ;;  %v9222_v3 = vld [vmem:[#allocation7 + $0x32c] ss:$16 sps:$4 sm:$0xff]  }
 0x335   :  { %7339 = vmatprep.subr.bf16.mxu1 %v9150_v0  ;;  %v9220_v0 = vld [vmem:[#allocation7 + $0x328] ss:$16 sps:$4 sm:$0xff]  }
 0x336   :  { %7297 = vmatpush1.bf16.msra.mxu0 %v9145_v5  ;;  %v9225_v5 = vld [vmem:[#allocation7 + $0x10c] ss:$16 sps:$4 sm:$0xff]  }
 0x337   :  { %7298 = vmatprep.subr.bf16.mxu0 %v9153_v37  ;;  %v9223_v37 = vld [vmem:[#allocation7 + $0x108] ss:$16 sps:$4 sm:$0xff]  }
 0x338   :  { %7340 = vmatpush1.bf16.msra.mxu1 %v9148_v36  ;;  %v9228_v36 = vld [vmem:[#allocation7 + $0x30c] ss:$16 sps:$4 sm:$0xff]  }
 0x339   :  { %7341 = vmatprep.subr.bf16.mxu1 %v9156_v39  ;;  %v9226_v39 = vld [vmem:[#allocation7 + $0x308] ss:$16 sps:$4 sm:$0xff]  }
 0x33a   :  { %7299 = vmatpush1.bf16.msra.mxu0 %v9151_v40  ;;  %v9231_v40 = vld [vmem:[#allocation7 + $0x4ec] ss:$16 sps:$4 sm:$0xff]  }
 0x33b   :  { %7300 = vmatprep.subr.bf16.mxu0 %v9159_v42  ;;  %v9229_v42 = vld [vmem:[#allocation7 + $0x4e8] ss:$16 sps:$4 sm:$0xff]  }
 0x33c   :  { %7342 = vmatpush1.bf16.msra.mxu1 %v9154_v49  ;;  %v9234_v49 = vld [vmem:[#allocation7 + $0x6ec] ss:$16 sps:$4 sm:$0xff]  }
 0x33d   :  { %7343 = vmatprep.subr.bf16.mxu1 %v9162_v43  ;;  %v9232_v43 = vld [vmem:[#allocation7 + $0x6e8] ss:$16 sps:$4 sm:$0xff]  }
 0x33e   :  { %7301 = vmatpush1.bf16.msra.mxu0 %v9157_v52  ;;  %v9237_v52 = vld [vmem:[#allocation7 + $0x4cc] ss:$16 sps:$4 sm:$0xff]  }
 0x33f   :  { %7302 = vmatprep.subr.bf16.mxu0 %v9165_v46  ;;  %v9235_v46 = vld [vmem:[#allocation7 + $0x4c8] ss:$16 sps:$4 sm:$0xff]  }
 0x340   :  { %7344 = vmatpush1.bf16.msra.mxu1 %v9160_v44  ;;  %v9240_v44 = vld [vmem:[#allocation7 + $0x6cc] ss:$16 sps:$4 sm:$0xff]  }
 0x341   :  { %7345 = vmatprep.subr.bf16.mxu1 %v9168_v11  ;;  %v9238_v11 = vld [vmem:[#allocation7 + $0x6c8] ss:$16 sps:$4 sm:$0xff]  }
 0x342   :  { %7303 = vmatpush1.bf16.msra.mxu0 %v9163_v17  ;;  %v9243_v17 = vld [vmem:[#allocation7 + $0x4ac] ss:$16 sps:$4 sm:$0xff]  }
 0x343   :  { %7304 = vmatprep.subr.bf16.mxu0 %v9171_v61  ;;  %v9241_v61 = vld [vmem:[#allocation7 + $0x4a8] ss:$16 sps:$4 sm:$0xff]  }
 0x344   :  { %7346 = vmatpush1.bf16.msra.mxu1 %v9166_v54  ;;  %v9246_v54 = vld [vmem:[#allocation7 + $0x6ac] ss:$16 sps:$4 sm:$0xff]  }
 0x345   :  { %7347 = vmatprep.subr.bf16.mxu1 %v9174_v25  ;;  %v9249_v25 = vld [vmem:[#allocation7 + $0x48c] ss:$16 sps:$4 sm:$0xff]  }
 0x346   :  { %7305 = vmatpush1.bf16.msra.mxu0 %v9169_v30  ;;  %v9247_v30 = vld [vmem:[#allocation7 + $0x488] ss:$16 sps:$4 sm:$0xff]  }
 0x347   :  { %7306 = vmatprep.subr.bf16.mxu0 %v9177_v56  ;;  %v9258_v56 = vld [vmem:[#allocation7 + $0x66c] ss:$16 sps:$4 sm:$0xff]  }
 0x348   :  { %7348 = vmatpush1.bf16.msra.mxu1 %v9172_v55  ;;  %v9255_v55 = vld [vmem:[#allocation7 + $0x46c] ss:$16 sps:$4 sm:$0xff]  }
 0x349   :  { %7349 = vmatprep.subr.bf16.mxu1 %v9180_v59  ;;  %v9256_v59 = vld [vmem:[#allocation7 + $0x668] ss:$16 sps:$4 sm:$0xff]  }
 0x34a   :  { %7307 = vmatpush1.bf16.msra.mxu0 %v9175_v60  ;;  %v9261_v60 = vld [vmem:[#allocation7 + $0x44c] ss:$16 sps:$4 sm:$0xff]  }
 0x34b   :  { %7308 = vmatprep.subr.bf16.mxu0 %v9183_v23  ;;  %v9259_v23 = vld [vmem:[#allocation7 + $0x448] ss:$16 sps:$4 sm:$0xff]  }
 0x34c   :  { %7350 = vmatpush1.bf16.msra.mxu1 %v9178_v2  ;;  %v9264_v2 = vld [vmem:[#allocation7 + $0x64c] ss:$16 sps:$4 sm:$0xff]  }
 0x34d   :  { %7351 = vmatprep.subr.bf16.mxu1 %v9186_v6  ;;  %v9262_v6 = vld [vmem:[#allocation7 + $0x648] ss:$16 sps:$4 sm:$0xff]  }
 0x34e   :  { %7309 = vmatpush2.bf16.msra.mxu0 %v9181_v8  ;;  %v9267_v8 = vld [vmem:[#allocation7 + $0x42c] ss:$16 sps:$4 sm:$0xff]  }
 0x34f   :  { %7310 = vmatprep.subr.bf16.mxu0 %v9189_v10  ;;  %v9265_v10 = vld [vmem:[#allocation7 + $0x428] ss:$16 sps:$4 sm:$0xff]  }
 0x350   :  { %7352 = vmatpush2.bf16.msra.mxu1 %v9184_v9  ;;  %v9270_v9 = vld [vmem:[#allocation7 + $0x62c] ss:$16 sps:$4 sm:$0xff]  }
 0x351   :  { %7353 = vmatprep.subr.bf16.mxu1 %v9192_v51  ;;  %v9268_v51 = vld [vmem:[#allocation7 + $0x628] ss:$16 sps:$4 sm:$0xff]  }
 0x352   :  { %7311 = vmatpush2.bf16.msra.mxu0 %v9187_v7  ;;  %v9273_v7 = vld [vmem:[#allocation7 + $0x40c] ss:$16 sps:$4 sm:$0xff]  }
 0x353   :  { %7312 = vmatprep.subr.bf16.mxu0 %v9195_v57  ;;  %v9271_v57 = vld [vmem:[#allocation7 + $0x408] ss:$16 sps:$4 sm:$0xff]  }
 0x354   :  { %7354 = vmatpush2.bf16.msra.mxu1 %v9190_v12  ;;  %v9276_v12 = vld [vmem:[#allocation7 + $0x60c] ss:$16 sps:$4 sm:$0xff]  }
 0x355   :  { %7355 = vmatprep.subr.bf16.mxu1 %v9198_v13  ;;  %v9274_v13 = vld [vmem:[#allocation7 + $0x608] ss:$16 sps:$4 sm:$0xff]  }
 0x356   :  { %7313 = vmatpush2.bf16.msra.mxu0 %v9193_v14  ;;  %v9279_v14 = vld [vmem:[#allocation7 + $0x5ec] ss:$16 sps:$4 sm:$0xff]  }
 0x357   :  { %7314 = vmatprep.subr.bf16.mxu0 %v9201_v16  ;;  %v9277_v16 = vld [vmem:[#allocation7 + $0x5e8] ss:$16 sps:$4 sm:$0xff]  }
 0x358   :  { %7356 = vmatpush2.bf16.msra.mxu1 %v9196_v41  ;;  %v9282_v41 = vld [vmem:[#allocation7 + $0x7ec] ss:$16 sps:$4 sm:$0xff]  }
 0x359   :  { %7357 = vmatprep.subr.bf16.mxu1 %v9204_v21  ;;  %v9280_v21 = vld [vmem:[#allocation7 + $0x7e8] ss:$16 sps:$4 sm:$0xff]  }
 0x35a   :  { %7315 = vmatpush2.bf16.msra.mxu0 %v9199_v24  ;;  %v9285_v24 = vld [vmem:[#allocation7 + $0x5cc] ss:$16 sps:$4 sm:$0xff]  }
 0x35b   :  { %7316 = vmatprep.subr.bf16.mxu0 %v9207_v28  ;;  %v9283_v28 = vld [vmem:[#allocation7 + $0x5c8] ss:$16 sps:$4 sm:$0xff]  }
 0x35c   :  { %7358 = vmatpush2.bf16.msra.mxu1 %v9202_v26  ;;  %v9288_v26 = vld [vmem:[#allocation7 + $0x7cc] ss:$16 sps:$4 sm:$0xff]  }
 0x35d   :  { %7359 = vmatprep.subr.bf16.mxu1 %v9210_v58  ;;  %v9286_v58 = vld [vmem:[#allocation7 + $0x7c8] ss:$16 sps:$4 sm:$0xff]  }
 0x35e   :  { %7317 = vmatpush2.bf16.msra.mxu0 %v9205_v29  ;;  %v9291_v29 = vld [vmem:[#allocation7 + $0x5ac] ss:$16 sps:$4 sm:$0xff]  }
 0x35f   :  { %7318 = vmatprep.subr.bf16.mxu0 %v9213_v48  ;;  %v9289_v48 = vld [vmem:[#allocation7 + $0x5a8] ss:$16 sps:$4 sm:$0xff]  }
 0x360   :  { %7360 = vmatpush2.bf16.msra.mxu1 %v9208_v45  ;;  %v9294_v45 = vld [vmem:[#allocation7 + $0x7ac] ss:$16 sps:$4 sm:$0xff]  }
 0x361   :  { %7361 = vmatprep.subr.bf16.mxu1 %v9216_v20  ;;  %v9292_v20 = vld [vmem:[#allocation7 + $0x7a8] ss:$16 sps:$4 sm:$0xff]  }
 0x362   :  { %7319 = vmatpush2.bf16.msra.mxu0 %v9211_v4  ;;  %v9297_v4 = vld [vmem:[#allocation7 + $0x58c] ss:$16 sps:$4 sm:$0xff]  }
 0x363   :  { %7320 = vmatprep.subr.bf16.mxu0 %v9219_v19  ;;  %v9295_v19 = vld [vmem:[#allocation7 + $0x588] ss:$16 sps:$4 sm:$0xff]  }
 0x364   :  { %7362 = vmatpush2.bf16.msra.mxu1 %v9214_v27  ;;  %v9300_v27 = vld [vmem:[#allocation7 + $0x78c] ss:$16 sps:$4 sm:$0xff]  }
 0x365   :  { %7363 = vmatprep.subr.bf16.mxu1 %v9222_v3  ;;  %v9298_v3 = vld [vmem:[#allocation7 + $0x788] ss:$16 sps:$4 sm:$0xff]  }
 0x366   :  { %7321 = vmatpush2.bf16.msra.mxu0 %v9217_v31  ;;  %v9303_v31 = vld [vmem:[#allocation7 + $0x56c] ss:$16 sps:$4 sm:$0xff]  }
 0x367   :  { %7322 = vmatprep.subr.bf16.mxu0 %v9225_v5  ;;  %v9301_v5 = vld [vmem:[#allocation7 + $0x568] ss:$16 sps:$4 sm:$0xff]  }
 0x368   :  { %7364 = vmatpush2.bf16.msra.mxu1 %v9220_v0  ;;  %v9306_v0 = vld [vmem:[#allocation7 + $0x76c] ss:$16 sps:$4 sm:$0xff]  }
 0x369   :  { %7365 = vmatprep.subr.bf16.mxu1 %v9228_v36  ;;  %v9304_v36 = vld [vmem:[#allocation7 + $0x768] ss:$16 sps:$4 sm:$0xff]  }
 0x36a   :  { %7323 = vmatpush2.bf16.msra.mxu0 %v9223_v37  ;;  %v9309_v37 = vld [vmem:[#allocation7 + $0x54c] ss:$16 sps:$4 sm:$0xff]  }
 0x36b   :  { %7378 = vmatprep.subr.bf16.mxu0 %v9231_v40  ;;  %v9307_v40 = vld [vmem:[#allocation7 + $0x548] ss:$16 sps:$4 sm:$0xff]  }
 0x36c   :  { %7366 = vmatpush2.bf16.msra.mxu1 %v9226_v39  ;;  %v9312_v39 = vld [vmem:[#allocation7 + $0x74c] ss:$16 sps:$4 sm:$0xff]  }
 0x36d   :  { %7421 = vmatprep.subr.bf16.mxu1 %v9234_v49  ;;  %7325 = vmatmul.mubr.bf16.vlgmr.msra.gmra.mxu0 %v9687_v22  ;;  %v9244_v22 = vld [vmem:[#allocation7 + $0x6a8] ss:$16 sps:$4 sm:$0xff]  }
 0x36e   :  { %7379 = vmatpush1.bf16.msra.mxu0 %v9229_v42  ;;  %7410 = vmatprep.mubr.bf16.mxu0 %v9769_v63  ;;  %v9250_v63 = vld [vmem:[#allocation7 + $0x688] ss:$16 sps:$4 sm:$0xff]   ;;  %v9315_v42 = vld [vmem:[#allocation7 + $0x52c] ss:$16 sps:$4 sm:$0xff]  }
 0x36f   :  { %7368 = vmatmul.mubr.bf16.vlgmr.msra.gmra.mxu1 %v9701_v50  ;;  %7380 = vmatprep.subr.bf16.mxu0 %v9237_v52  ;;  %v9252_v50 = vld [vmem:[#allocation7 + $0x68c] ss:$16 sps:$4 sm:$0xff]   ;;  %v9310_v49 = vld [vmem:[#allocation7 + $0x748] ss:$16 sps:$4 sm:$0xff]  }
 0x370   :  { %7422 = vmatpush1.bf16.msra.mxu1 %v9232_v43  ;;  %7453 = vmatprep.mubr.bf16.mxu1 %v9772_v33  ;;  %v9253_v33 = vld [vmem:[#allocation7 + $0x468] ss:$16 sps:$4 sm:$0xff]   ;;  %v9318_v43 = vld [vmem:[#allocation7 + $0x72c] ss:$16 sps:$4 sm:$0xff]  }
 0x371   :  { %7423 = vmatprep.subr.bf16.mxu1 %v9240_v44  ;;  %v9313_v52 = vld [vmem:[#allocation7 + $0x528] ss:$16 sps:$4 sm:$0xff]  }
 0x372   :  { %7381 = vmatpush1.bf16.msra.mxu0 %v9235_v46  ;;  %v9316_v44 = vld [vmem:[#allocation7 + $0x728] ss:$16 sps:$4 sm:$0xff]   ;;  %v9321_v46 = vld [vmem:[#allocation7 + $0x50c] ss:$16 sps:$4 sm:$0xff]  }
 0x373   :  { %7382 = vmatprep.subr.bf16.mxu0 %v9243_v17  ;;  %v9319_v17 = vld [vmem:[#allocation7 + $0x508] ss:$16 sps:$4 sm:$0xff]  }
 0x374   :  { %7424 = vmatpush1.bf16.msra.mxu1 %v9238_v11  ;;  %v9324_v11 = vld [vmem:[#allocation7 + $0x70c] ss:$16 sps:$4 sm:$0xff]  }
 0x375   :  { %7425 = vmatprep.subr.bf16.mxu1 %v9246_v54  ;;  %v9322_v54 = vld [vmem:[#allocation7 + $0x708] ss:$16 sps:$4 sm:$0xff]  }
 0x376   :  { %7383 = vmatpush1.bf16.msra.mxu0 %v9241_v61  ;;  %v9327_v61 = vld [vmem:[#allocation7 + $0x8ec] ss:$16 sps:$4 sm:$0xff]  }
 0x377   :  { %7384 = vmatprep.subr.bf16.mxu0 %v9249_v25  ;;  %v9325_v25 = vld [vmem:[#allocation7 + $0x8e8] ss:$16 sps:$4 sm:$0xff]  }
 0x378   :  { %7426 = vmatpush1.bf16.msra.mxu1 %v9244_v22  ;;  %v9330_v22 = vld [vmem:[#allocation7 + $0xaec] ss:$16 sps:$4 sm:$0xff]  }
 0x379   :  { %7427 = vmatprep.subr.bf16.mxu1 %v9252_v50  ;;  %v9328_v50 = vld [vmem:[#allocation7 + $0xae8] ss:$16 sps:$4 sm:$0xff]  }
 0x37a   :  { %7385 = vmatpush1.bf16.msra.mxu0 %v9247_v30  ;;  %v9333_v30 = vld [vmem:[#allocation7 + $0x8cc] ss:$16 sps:$4 sm:$0xff]  }
 0x37b   :  { %7386 = vmatprep.subr.bf16.mxu0 %v9255_v55  ;;  %v9331_v55 = vld [vmem:[#allocation7 + $0x8c8] ss:$16 sps:$4 sm:$0xff]  }
 0x37c   :  { %7428 = vmatpush1.bf16.msra.mxu1 %v9250_v63  ;;  %v9336_v63 = vld [vmem:[#allocation7 + $0xacc] ss:$16 sps:$4 sm:$0xff]  }
 0x37d   :  { %7429 = vmatprep.subr.bf16.mxu1 %v9258_v56  ;;  %v9334_v56 = vld [vmem:[#allocation7 + $0xac8] ss:$16 sps:$4 sm:$0xff]  }
 0x37e   :  { %7387 = vmatpush1.bf16.msra.mxu0 %v9253_v33  ;;  %v9339_v33 = vld [vmem:[#allocation7 + $0x8ac] ss:$16 sps:$4 sm:$0xff]  }
 0x37f   :  { %7388 = vmatprep.subr.bf16.mxu0 %v9261_v60  ;;  %v9337_v60 = vld [vmem:[#allocation7 + $0x8a8] ss:$16 sps:$4 sm:$0xff]  }
 0x380   :  { %7430 = vmatpush1.bf16.msra.mxu1 %v9256_v59  ;;  %v9342_v59 = vld [vmem:[#allocation7 + $0xaac] ss:$16 sps:$4 sm:$0xff]  }
 0x381   :  { %7431 = vmatprep.subr.bf16.mxu1 %v9264_v2  ;;  %v9345_v2 = vld [vmem:[#allocation7 + $0x88c] ss:$16 sps:$4 sm:$0xff]  }
 0x382   :  { %7389 = vmatpush1.bf16.msra.mxu0 %v9259_v23  ;;  %v9343_v23 = vld [vmem:[#allocation7 + $0x888] ss:$16 sps:$4 sm:$0xff]  }
 0x383   :  { %7390 = vmatprep.subr.bf16.mxu0 %v9267_v8  ;;  %v9354_v8 = vld [vmem:[#allocation7 + $0xa6c] ss:$16 sps:$4 sm:$0xff]  }
 0x384   :  { %7432 = vmatpush1.bf16.msra.mxu1 %v9262_v6  ;;  %v9351_v6 = vld [vmem:[#allocation7 + $0x86c] ss:$16 sps:$4 sm:$0xff]  }
 0x385   :  { %7433 = vmatprep.subr.bf16.mxu1 %v9270_v9  ;;  %v9352_v9 = vld [vmem:[#allocation7 + $0xa68] ss:$16 sps:$4 sm:$0xff]  }
 0x386   :  { %7391 = vmatpush1.bf16.msra.mxu0 %v9265_v10  ;;  %v9357_v10 = vld [vmem:[#allocation7 + $0x84c] ss:$16 sps:$4 sm:$0xff]  }
 0x387   :  { %7392 = vmatprep.subr.bf16.mxu0 %v9273_v7  ;;  %v9355_v7 = vld [vmem:[#allocation7 + $0x848] ss:$16 sps:$4 sm:$0xff]  }
 0x388   :  { %7434 = vmatpush1.bf16.msra.mxu1 %v9268_v51  ;;  %v9360_v51 = vld [vmem:[#allocation7 + $0xa4c] ss:$16 sps:$4 sm:$0xff]  }
 0x389   :  { %7435 = vmatprep.subr.bf16.mxu1 %v9276_v12  ;;  %v9358_v12 = vld [vmem:[#allocation7 + $0xa48] ss:$16 sps:$4 sm:$0xff]  }
 0x38a   :  { %7393 = vmatpush1.bf16.msra.mxu0 %v9271_v57  ;;  %v9363_v57 = vld [vmem:[#allocation7 + $0x82c] ss:$16 sps:$4 sm:$0xff]  }
 0x38b   :  { %7394 = vmatprep.subr.bf16.mxu0 %v9279_v14  ;;  %v9361_v14 = vld [vmem:[#allocation7 + $0x828] ss:$16 sps:$4 sm:$0xff]  }
 0x38c   :  { %7436 = vmatpush1.bf16.msra.mxu1 %v9274_v13  ;;  %v9366_v13 = vld [vmem:[#allocation7 + $0xa2c] ss:$16 sps:$4 sm:$0xff]  }
 0x38d   :  { %7437 = vmatprep.subr.bf16.mxu1 %v9282_v41  ;;  %v9364_v41 = vld [vmem:[#allocation7 + $0xa28] ss:$16 sps:$4 sm:$0xff]  }
 0x38e   :  { %7395 = vmatpush2.bf16.msra.mxu0 %v9277_v16  ;;  %v9369_v16 = vld [vmem:[#allocation7 + $0x80c] ss:$16 sps:$4 sm:$0xff]  }
 0x38f   :  { %7396 = vmatprep.subr.bf16.mxu0 %v9285_v24  ;;  %v9367_v24 = vld [vmem:[#allocation7 + $0x808] ss:$16 sps:$4 sm:$0xff]  }
 0x390   :  { %7438 = vmatpush2.bf16.msra.mxu1 %v9280_v21  ;;  %v9372_v21 = vld [vmem:[#allocation7 + $0xa0c] ss:$16 sps:$4 sm:$0xff]  }
 0x391   :  { %7439 = vmatprep.subr.bf16.mxu1 %v9288_v26  ;;  %v9370_v26 = vld [vmem:[#allocation7 + $0xa08] ss:$16 sps:$4 sm:$0xff]  }
 0x392   :  { %7397 = vmatpush2.bf16.msra.mxu0 %v9283_v28  ;;  %v9375_v28 = vld [vmem:[#allocation7 + $0x9ec] ss:$16 sps:$4 sm:$0xff]  }
 0x393   :  { %7398 = vmatprep.subr.bf16.mxu0 %v9291_v29  ;;  %v9373_v29 = vld [vmem:[#allocation7 + $0x9e8] ss:$16 sps:$4 sm:$0xff]  }
 0x394   :  { %7440 = vmatpush2.bf16.msra.mxu1 %v9286_v58  ;;  %v9378_v58 = vld [vmem:[#allocation7 + $0xbec] ss:$16 sps:$4 sm:$0xff]  }
 0x395   :  { %7441 = vmatprep.subr.bf16.mxu1 %v9294_v45  ;;  %v9376_v45 = vld [vmem:[#allocation7 + $0xbe8] ss:$16 sps:$4 sm:$0xff]  }
 0x396   :  { %7399 = vmatpush2.bf16.msra.mxu0 %v9289_v48  ;;  %v9381_v48 = vld [vmem:[#allocation7 + $0x9cc] ss:$16 sps:$4 sm:$0xff]  }
 0x397   :  { %7400 = vmatprep.subr.bf16.mxu0 %v9297_v4  ;;  %v9379_v4 = vld [vmem:[#allocation7 + $0x9c8] ss:$16 sps:$4 sm:$0xff]  }
 0x398   :  { %7442 = vmatpush2.bf16.msra.mxu1 %v9292_v20  ;;  %v9384_v20 = vld [vmem:[#allocation7 + $0xbcc] ss:$16 sps:$4 sm:$0xff]  }
 0x399   :  { %7443 = vmatprep.subr.bf16.mxu1 %v9300_v27  ;;  %v9382_v27 = vld [vmem:[#allocation7 + $0xbc8] ss:$16 sps:$4 sm:$0xff]  }
 0x39a   :  { %7401 = vmatpush2.bf16.msra.mxu0 %v9295_v19  ;;  %v9387_v19 = vld [vmem:[#allocation7 + $0x9ac] ss:$16 sps:$4 sm:$0xff]  }
 0x39b   :  { %7402 = vmatprep.subr.bf16.mxu0 %v9303_v31  ;;  %v9385_v31 = vld [vmem:[#allocation7 + $0x9a8] ss:$16 sps:$4 sm:$0xff]  }
 0x39c   :  { %7444 = vmatpush2.bf16.msra.mxu1 %v9298_v3  ;;  %v9390_v3 = vld [vmem:[#allocation7 + $0xbac] ss:$16 sps:$4 sm:$0xff]  }
 0x39d   :  { %7445 = vmatprep.subr.bf16.mxu1 %v9306_v0  ;;  %v9388_v0 = vld [vmem:[#allocation7 + $0xba8] ss:$16 sps:$4 sm:$0xff]  }
 0x39e   :  { %7403 = vmatpush2.bf16.msra.mxu0 %v9301_v5  ;;  %v9393_v5 = vld [vmem:[#allocation7 + $0x98c] ss:$16 sps:$4 sm:$0xff]  }
 0x39f   :  { %7404 = vmatprep.subr.bf16.mxu0 %v9309_v37  ;;  %v9391_v37 = vld [vmem:[#allocation7 + $0x988] ss:$16 sps:$4 sm:$0xff]  }
 0x3a0   :  { %7446 = vmatpush2.bf16.msra.mxu1 %v9304_v36  ;;  %v9396_v36 = vld [vmem:[#allocation7 + $0xb8c] ss:$16 sps:$4 sm:$0xff]  }
 0x3a1   :  { %7447 = vmatprep.subr.bf16.mxu1 %v9312_v39  ;;  %v9394_v39 = vld [vmem:[#allocation7 + $0xb88] ss:$16 sps:$4 sm:$0xff]  }
 0x3a2   :  { %7405 = vmatpush2.bf16.msra.mxu0 %v9307_v40  ;;  %v9399_v40 = vld [vmem:[#allocation7 + $0x96c] ss:$16 sps:$4 sm:$0xff]  }
 0x3a3   :  { %7406 = vmatprep.subr.bf16.mxu0 %v9315_v42  ;;  %v9397_v42 = vld [vmem:[#allocation7 + $0x968] ss:$16 sps:$4 sm:$0xff]  }
 0x3a4   :  { %7448 = vmatpush2.bf16.msra.mxu1 %v9310_v49  ;;  %v9402_v49 = vld [vmem:[#allocation7 + $0xb6c] ss:$16 sps:$4 sm:$0xff]  }
 0x3a5   :  { %7449 = vmatprep.subr.bf16.mxu1 %v9318_v43  ;;  %v9400_v43 = vld [vmem:[#allocation7 + $0xb68] ss:$16 sps:$4 sm:$0xff]  }
 0x3a6   :  { %7407 = vmatpush2.bf16.msra.mxu0 %v9313_v52  ;;  %v9405_v52 = vld [vmem:[#allocation7 + $0x94c] ss:$16 sps:$4 sm:$0xff]  }
 0x3a7   :  { %7408 = vmatprep.subr.bf16.mxu0 %v9321_v46  ;;  %v9403_v46 = vld [vmem:[#allocation7 + $0x948] ss:$16 sps:$4 sm:$0xff]  }
 0x3a8   :  { %7450 = vmatpush2.bf16.msra.mxu1 %v9316_v44  ;;  %v9408_v44 = vld [vmem:[#allocation7 + $0xb4c] ss:$16 sps:$4 sm:$0xff]  }
 0x3a9   :  { %7451 = vmatprep.subr.bf16.mxu1 %v9324_v11  ;;  %v9406_v11 = vld [vmem:[#allocation7 + $0xb48] ss:$16 sps:$4 sm:$0xff]  }
 0x3aa   :  { %7409 = vmatpush2.bf16.msra.mxu0 %v9319_v17  ;;  %v9411_v17 = vld [vmem:[#allocation7 + $0x92c] ss:$16 sps:$4 sm:$0xff]  }
 0x3ab   :  { %7464 = vmatprep.subr.bf16.mxu0 %v9327_v61  ;;  %v9409_v61 = vld [vmem:[#allocation7 + $0x928] ss:$16 sps:$4 sm:$0xff]  }
 0x3ac   :  { %7452 = vmatpush2.bf16.msra.mxu1 %v9322_v54  ;;  %v9414_v54 = vld [vmem:[#allocation7 + $0xb2c] ss:$16 sps:$4 sm:$0xff]  }
 0x3ad   :  { %7507 = vmatprep.subr.bf16.mxu1 %v9330_v22  ;;  %7411 = vmatmul.mubr.bf16.vlgmr.msra.gmra.mxu0 %v9715_v34  ;;  %v9340_v34 = vld [vmem:[#allocation7 + $0xaa8] ss:$16 sps:$4 sm:$0xff]  }
 0x3ae   :  { %7465 = vmatpush1.bf16.msra.mxu0 %v9325_v25  ;;  %7496 = vmatprep.mubr.bf16.mxu0 %v9789_v62  ;;  %v9346_v62 = vld [vmem:[#allocation7 + $0xa88] ss:$16 sps:$4 sm:$0xff]   ;;  %v9417_v25 = vld [vmem:[#allocation7 + $0x90c] ss:$16 sps:$4 sm:$0xff]  }
 0x3af   :  { %7454 = vmatmul.mubr.bf16.vlgmr.msra.gmra.mxu1 %v9729_v32  ;;  %7466 = vmatprep.subr.bf16.mxu0 %v9333_v30  ;;  %v9348_v32 = vld [vmem:[#allocation7 + $0xa8c] ss:$16 sps:$4 sm:$0xff]   ;;  %v9412_v22 = vld [vmem:[#allocation7 + $0xb28] ss:$16 sps:$4 sm:$0xff]  }
 0x3b0   :  { %7508 = vmatpush1.bf16.msra.mxu1 %v9328_v50  ;;  %7539 = vmatprep.mubr.bf16.mxu1 %v9792_v38  ;;  %v9349_v38 = vld [vmem:[#allocation7 + $0x868] ss:$16 sps:$4 sm:$0xff]   ;;  %v9420_v50 = vld [vmem:[#allocation7 + $0xb0c] ss:$16 sps:$4 sm:$0xff]  }
 0x3b1   :  { %7509 = vmatprep.subr.bf16.mxu1 %v9336_v63  ;;  %v9415_v30 = vld [vmem:[#allocation7 + $0x908] ss:$16 sps:$4 sm:$0xff]  }
 0x3b2   :  { %7467 = vmatpush1.bf16.msra.mxu0 %v9331_v55  ;;  %v9418_v63 = vld [vmem:[#allocation7 + $0xb08] ss:$16 sps:$4 sm:$0xff]   ;;  %v9423_v55 = vld [vmem:[#allocation7 + $0xcec] ss:$16 sps:$4 sm:$0xff]  }
 0x3b3   :  { %7468 = vmatprep.subr.bf16.mxu0 %v9339_v33  ;;  %v9421_v33 = vld [vmem:[#allocation7 + $0xce8] ss:$16 sps:$4 sm:$0xff]  }
 0x3b4   :  { %7510 = vmatpush1.bf16.msra.mxu1 %v9334_v56  ;;  %v9426_v56 = vld [vmem:[#allocation7 + $0xeec] ss:$16 sps:$4 sm:$0xff]  }
 0x3b5   :  { %7511 = vmatprep.subr.bf16.mxu1 %v9342_v59  ;;  %v9424_v59 = vld [vmem:[#allocation7 + $0xee8] ss:$16 sps:$4 sm:$0xff]  }
 0x3b6   :  { %7469 = vmatpush1.bf16.msra.mxu0 %v9337_v60  ;;  %v9429_v60 = vld [vmem:[#allocation7 + $0xccc] ss:$16 sps:$4 sm:$0xff]  }
 0x3b7   :  { %7470 = vmatprep.subr.bf16.mxu0 %v9345_v2  ;;  %v9427_v2 = vld [vmem:[#allocation7 + $0xcc8] ss:$16 sps:$4 sm:$0xff]  }
 0x3b8   :  { %7512 = vmatpush1.bf16.msra.mxu1 %v9340_v34  ;;  %v9432_v34 = vld [vmem:[#allocation7 + $0xecc] ss:$16 sps:$4 sm:$0xff]  }
 0x3b9   :  { %7513 = vmatprep.subr.bf16.mxu1 %v9348_v32  ;;  %v9430_v32 = vld [vmem:[#allocation7 + $0xec8] ss:$16 sps:$4 sm:$0xff]  }
 0x3ba   :  { %7471 = vmatpush1.bf16.msra.mxu0 %v9343_v23  ;;  %v9435_v23 = vld [vmem:[#allocation7 + $0xcac] ss:$16 sps:$4 sm:$0xff]  }
 0x3bb   :  { %7472 = vmatprep.subr.bf16.mxu0 %v9351_v6  ;;  %v9433_v6 = vld [vmem:[#allocation7 + $0xca8] ss:$16 sps:$4 sm:$0xff]  }
 0x3bc   :  { %7514 = vmatpush1.bf16.msra.mxu1 %v9346_v62  ;;  %v9438_v62 = vld [vmem:[#allocation7 + $0xeac] ss:$16 sps:$4 sm:$0xff]  }
 0x3bd   :  { %7515 = vmatprep.subr.bf16.mxu1 %v9354_v8  ;;  %v9441_v8 = vld [vmem:[#allocation7 + $0xc8c] ss:$16 sps:$4 sm:$0xff]  }
 0x3be   :  { %7473 = vmatpush1.bf16.msra.mxu0 %v9349_v38  ;;  %v9439_v38 = vld [vmem:[#allocation7 + $0xc88] ss:$16 sps:$4 sm:$0xff]  }
 0x3bf   :  { %7474 = vmatprep.subr.bf16.mxu0 %v9357_v10  ;;  %v9450_v10 = vld [vmem:[#allocation7 + $0xe6c] ss:$16 sps:$4 sm:$0xff]  }
 0x3c0   :  { %7516 = vmatpush1.bf16.msra.mxu1 %v9352_v9  ;;  %v9447_v9 = vld [vmem:[#allocation7 + $0xc6c] ss:$16 sps:$4 sm:$0xff]  }
 0x3c1   :  { %7517 = vmatprep.subr.bf16.mxu1 %v9360_v51  ;;  %v9448_v51 = vld [vmem:[#allocation7 + $0xe68] ss:$16 sps:$4 sm:$0xff]  }
 0x3c2   :  { %7475 = vmatpush1.bf16.msra.mxu0 %v9355_v7  ;;  %v9453_v7 = vld [vmem:[#allocation7 + $0xc4c] ss:$16 sps:$4 sm:$0xff]  }
 0x3c3   :  { %7476 = vmatprep.subr.bf16.mxu0 %v9363_v57  ;;  %v9451_v57 = vld [vmem:[#allocation7 + $0xc48] ss:$16 sps:$4 sm:$0xff]  }
 0x3c4   :  { %7518 = vmatpush1.bf16.msra.mxu1 %v9358_v12  ;;  %v9456_v12 = vld [vmem:[#allocation7 + $0xe4c] ss:$16 sps:$4 sm:$0xff]  }
 0x3c5   :  { %7519 = vmatprep.subr.bf16.mxu1 %v9366_v13  ;;  %v9454_v13 = vld [vmem:[#allocation7 + $0xe48] ss:$16 sps:$4 sm:$0xff]  }
 0x3c6   :  { %7477 = vmatpush1.bf16.msra.mxu0 %v9361_v14  ;;  %v9459_v14 = vld [vmem:[#allocation7 + $0xc2c] ss:$16 sps:$4 sm:$0xff]  }
 0x3c7   :  { %7478 = vmatprep.subr.bf16.mxu0 %v9369_v16  ;;  %v9457_v16 = vld [vmem:[#allocation7 + $0xc28] ss:$16 sps:$4 sm:$0xff]  }
 0x3c8   :  { %7520 = vmatpush1.bf16.msra.mxu1 %v9364_v41  ;;  %v9462_v41 = vld [vmem:[#allocation7 + $0xe2c] ss:$16 sps:$4 sm:$0xff]  }
 0x3c9   :  { %7521 = vmatprep.subr.bf16.mxu1 %v9372_v21  ;;  %v9460_v21 = vld [vmem:[#allocation7 + $0xe28] ss:$16 sps:$4 sm:$0xff]  }
 0x3ca   :  { %7479 = vmatpush1.bf16.msra.mxu0 %v9367_v24  ;;  %v9465_v24 = vld [vmem:[#allocation7 + $0xc0c] ss:$16 sps:$4 sm:$0xff]  }
 0x3cb   :  { %7480 = vmatprep.subr.bf16.mxu0 %v9375_v28  ;;  %v9463_v28 = vld [vmem:[#allocation7 + $0xc08] ss:$16 sps:$4 sm:$0xff]  }
 0x3cc   :  { %7522 = vmatpush1.bf16.msra.mxu1 %v9370_v26  ;;  %v9468_v26 = vld [vmem:[#allocation7 + $0xe0c] ss:$16 sps:$4 sm:$0xff]  }
 0x3cd   :  { %7523 = vmatprep.subr.bf16.mxu1 %v9378_v58  ;;  %v9466_v58 = vld [vmem:[#allocation7 + $0xe08] ss:$16 sps:$4 sm:$0xff]  }
 0x3ce   :  { %7481 = vmatpush2.bf16.msra.mxu0 %v9373_v29  ;;  %v9471_v29 = vld [vmem:[#allocation7 + $0xdec] ss:$16 sps:$4 sm:$0xff]  }
 0x3cf   :  { %7482 = vmatprep.subr.bf16.mxu0 %v9381_v48  ;;  %v9469_v48 = vld [vmem:[#allocation7 + $0xde8] ss:$16 sps:$4 sm:$0xff]  }
 0x3d0   :  { %7524 = vmatpush2.bf16.msra.mxu1 %v9376_v45  ;;  %v9474_v45 = vld [vmem:[#allocation7 + $0xfec] ss:$16 sps:$4 sm:$0xff]  }
 0x3d1   :  { %7525 = vmatprep.subr.bf16.mxu1 %v9384_v20  ;;  %v9472_v20 = vld [vmem:[#allocation7 + $0xfe8] ss:$16 sps:$4 sm:$0xff]  }
 0x3d2   :  { %7483 = vmatpush2.bf16.msra.mxu0 %v9379_v4  ;;  %v9477_v4 = vld [vmem:[#allocation7 + $0xdcc] ss:$16 sps:$4 sm:$0xff]  }
 0x3d3   :  { %7484 = vmatprep.subr.bf16.mxu0 %v9387_v19  ;;  %v9475_v19 = vld [vmem:[#allocation7 + $0xdc8] ss:$16 sps:$4 sm:$0xff]  }
 0x3d4   :  { %7526 = vmatpush2.bf16.msra.mxu1 %v9382_v27  ;;  %v9480_v27 = vld [vmem:[#allocation7 + $0xfcc] ss:$16 sps:$4 sm:$0xff]  }
 0x3d5   :  { %7527 = vmatprep.subr.bf16.mxu1 %v9390_v3  ;;  %v9478_v3 = vld [vmem:[#allocation7 + $0xfc8] ss:$16 sps:$4 sm:$0xff]  }
 0x3d6   :  { %7485 = vmatpush2.bf16.msra.mxu0 %v9385_v31  ;;  %v9483_v31 = vld [vmem:[#allocation7 + $0xdac] ss:$16 sps:$4 sm:$0xff]  }
 0x3d7   :  { %7486 = vmatprep.subr.bf16.mxu0 %v9393_v5  ;;  %v9481_v5 = vld [vmem:[#allocation7 + $0xda8] ss:$16 sps:$4 sm:$0xff]  }
 0x3d8   :  { %7528 = vmatpush2.bf16.msra.mxu1 %v9388_v0  ;;  %v9486_v0 = vld [vmem:[#allocation7 + $0xfac] ss:$16 sps:$4 sm:$0xff]  }
 0x3d9   :  { %7529 = vmatprep.subr.bf16.mxu1 %v9396_v36  ;;  %v9484_v36 = vld [vmem:[#allocation7 + $0xfa8] ss:$16 sps:$4 sm:$0xff]  }
 0x3da   :  { %7487 = vmatpush2.bf16.msra.mxu0 %v9391_v37  ;;  %v9489_v37 = vld [vmem:[#allocation7 + $0xd8c] ss:$16 sps:$4 sm:$0xff]  }
 0x3db   :  { %7488 = vmatprep.subr.bf16.mxu0 %v9399_v40  ;;  %v9487_v40 = vld [vmem:[#allocation7 + $0xd88] ss:$16 sps:$4 sm:$0xff]  }
 0x3dc   :  { %7530 = vmatpush2.bf16.msra.mxu1 %v9394_v39  ;;  %v9492_v39 = vld [vmem:[#allocation7 + $0xf8c] ss:$16 sps:$4 sm:$0xff]  }
 0x3dd   :  { %7531 = vmatprep.subr.bf16.mxu1 %v9402_v49  ;;  %v9490_v49 = vld [vmem:[#allocation7 + $0xf88] ss:$16 sps:$4 sm:$0xff]  }
 0x3de   :  { %7489 = vmatpush2.bf16.msra.mxu0 %v9397_v42  ;;  %v9495_v42 = vld [vmem:[#allocation7 + $0xd6c] ss:$16 sps:$4 sm:$0xff]  }
 0x3df   :  { %7490 = vmatprep.subr.bf16.mxu0 %v9405_v52  ;;  %v9493_v52 = vld [vmem:[#allocation7 + $0xd68] ss:$16 sps:$4 sm:$0xff]  }
 0x3e0   :  { %7532 = vmatpush2.bf16.msra.mxu1 %v9400_v43  ;;  %v9498_v43 = vld [vmem:[#allocation7 + $0xf6c] ss:$16 sps:$4 sm:$0xff]  }
 0x3e1   :  { %7533 = vmatprep.subr.bf16.mxu1 %v9408_v44  ;;  %v9496_v44 = vld [vmem:[#allocation7 + $0xf68] ss:$16 sps:$4 sm:$0xff]  }
 0x3e2   :  { %7491 = vmatpush2.bf16.msra.mxu0 %v9403_v46  ;;  %v9501_v46 = vld [vmem:[#allocation7 + $0xd4c] ss:$16 sps:$4 sm:$0xff]  }
 0x3e3   :  { %7492 = vmatprep.subr.bf16.mxu0 %v9411_v17  ;;  %v9499_v17 = vld [vmem:[#allocation7 + $0xd48] ss:$16 sps:$4 sm:$0xff]  }
 0x3e4   :  { %7534 = vmatpush2.bf16.msra.mxu1 %v9406_v11  ;;  %v9504_v11 = vld [vmem:[#allocation7 + $0xf4c] ss:$16 sps:$4 sm:$0xff]  }
 0x3e5   :  { %7535 = vmatprep.subr.bf16.mxu1 %v9414_v54  ;;  %v9502_v54 = vld [vmem:[#allocation7 + $0xf48] ss:$16 sps:$4 sm:$0xff]  }
 0x3e6   :  { %7493 = vmatpush2.bf16.msra.mxu0 %v9409_v61  ;;  %v9507_v61 = vld [vmem:[#allocation7 + $0xd2c] ss:$16 sps:$4 sm:$0xff]  }
 0x3e7   :  { %7494 = vmatprep.subr.bf16.mxu0 %v9417_v25  ;;  %v9505_v25 = vld [vmem:[#allocation7 + $0xd28] ss:$16 sps:$4 sm:$0xff]  }
 0x3e8   :  { %7536 = vmatpush2.bf16.msra.mxu1 %v9412_v22  ;;  %v9510_v22 = vld [vmem:[#allocation7 + $0xf2c] ss:$16 sps:$4 sm:$0xff]  }
 0x3e9   :  { %7537 = vmatprep.subr.bf16.mxu1 %v9420_v50  ;;  %v9508_v50 = vld [vmem:[#allocation7 + $0xf28] ss:$16 sps:$4 sm:$0xff]  }
 0x3ea   :  { %7495 = vmatpush2.bf16.msra.mxu0 %v9415_v30  ;;  %v9513_v30 = vld [vmem:[#allocation7 + $0xd0c] ss:$16 sps:$4 sm:$0xff]  }
 0x3eb   :  { %7550 = vmatprep.subr.bf16.mxu0 %v9423_v55  ;;  %v9511_v55 = vld [vmem:[#allocation7 + $0xd08] ss:$16 sps:$4 sm:$0xff]  }
 0x3ec   :  { %7538 = vmatpush2.bf16.msra.mxu1 %v9418_v63  ;;  %v9516_v63 = vld [vmem:[#allocation7 + $0xf0c] ss:$16 sps:$4 sm:$0xff]  }
 0x3ed   :  { %7593 = vmatprep.subr.bf16.mxu1 %v9426_v56  ;;  %7497 = vmatmul.mubr.bf16.vlgmr.msra.gmra.mxu0 %v9755_v15  ;;  %v9436_v15 = vld [vmem:[#allocation7 + $0xea8] ss:$16 sps:$4 sm:$0xff]  }
 0x3ee   :  { %7551 = vmatpush1.bf16.msra.mxu0 %v9421_v33  ;;  %7582 = vmatprep.mubr.bf16.mxu0 %v9805_v47  ;;  %v9442_v47 = vld [vmem:[#allocation7 + $0xe88] ss:$16 sps:$4 sm:$0xff]   ;;  %v6982_v33 = vpop.f32.mrf.mxu0 }
 0x3ef   :  { %7540 = vmatmul.mubr.bf16.vlgmr.msra.gmra.mxu1 %v9781_v53  ;;  %7552 = vmatprep.subr.bf16.mxu0 %v9429_v60  ;;  %v9444_v53 = vld [vmem:[#allocation7 + $0xe8c] ss:$16 sps:$4 sm:$0xff]   ;;  %v9514_v56 = vld [vmem:[#allocation7 + $0xf08] ss:$16 sps:$4 sm:$0xff]  }
 0x3f0   :  { %7594 = vmatpush1.bf16.msra.mxu1 %v9424_v59  ;;  %7625 = vmatprep.mubr.bf16.mxu1 %v9818_v18  ;;  %v9445_v18 = vld [vmem:[#allocation7 + $0xc68] ss:$16 sps:$4 sm:$0xff]   ;;  %v7025_v59 = vpop.f32.mrf.mxu1  ;;  %v6984_v60 = vpop.f32.mrf.mxu0 }
 0x3f1   :  { %7595 = vmatprep.subr.bf16.mxu1 %v9432_v34 }
 0x3f2   :  { %7553 = vmatpush1.bf16.msra.mxu0 %v9427_v2  ;;  %v7027_v34 = vpop.f32.mrf.mxu1  ;;  %v6986_v2 = vpop.f32.mrf.mxu0 }
 0x3f3   :  { %7554 = vmatprep.subr.bf16.mxu0 %v9435_v23 }
 0x3f4   :  { %7596 = vmatpush1.bf16.msra.mxu1 %v9430_v32  ;;  %v7029_v32 = vpop.f32.mrf.mxu1  ;;  %v6988_v23 = vpop.f32.mrf.mxu0 }
 0x3f5   :  { %7597 = vmatprep.subr.bf16.mxu1 %v9438_v62 }
 0x3f6   :  { %7555 = vmatpush1.bf16.msra.mxu0 %v9433_v6  ;;  %v7031_v62 = vpop.f32.mrf.mxu1  ;;  %v7068_v6 = vpop.f32.mrf.mxu0 }
 0x3f7   :  { %7556 = vmatprep.subr.bf16.mxu0 %v9441_v8 }
 0x3f8   :  { %7598 = vmatpush1.bf16.msra.mxu1 %v9436_v15  ;;  %v9845_v15 = vpop.f32.mrf.mxu1  ;;  %v7070_v8 = vpop.f32.mrf.mxu0 }
 0x3f9   :  { %7599 = vmatprep.subr.bf16.mxu1 %v9444_v53 }
 0x3fa   :  { %7557 = vmatpush1.bf16.msra.mxu0 %v9439_v38  ;;  %v7113_v53 = vpop.f32.mrf.mxu1  ;;  %v7072_v38 = vpop.f32.mrf.mxu0 }
 0x3fb   :  { %7558 = vmatprep.subr.bf16.mxu0 %v9447_v9 }
 0x3fc   :  { %7600 = vmatpush1.bf16.msra.mxu1 %v9442_v47  ;;  %v9847_v47 = vpop.f32.mrf.mxu1  ;;  %v7074_v9 = vpop.f32.mrf.mxu0 }
 0x3fd   :  { %7601 = vmatprep.subr.bf16.mxu1 %v9450_v10 }
 0x3fe   :  { %7559 = vmatpush1.bf16.msra.mxu0 %v9445_v18 }
 0x3ff   :  { %7560 = vmatprep.subr.bf16.mxu0 %v9453_v7 }
 0x400   :  { %7602 = vmatpush1.bf16.msra.mxu1 %v9448_v51 }
 0x401   :  { %7603 = vmatprep.subr.bf16.mxu1 %v9456_v12 }
 0x402   :  { %7561 = vmatpush1.bf16.msra.mxu0 %v9451_v57 }
 0x403   :  { %7562 = vmatprep.subr.bf16.mxu0 %v9459_v14 }
 0x404   :  { %7604 = vmatpush1.bf16.msra.mxu1 %v9454_v13 }
 0x405   :  { %7605 = vmatprep.subr.bf16.mxu1 %v9462_v41 }
 0x406   :  { %7563 = vmatpush1.bf16.msra.mxu0 %v9457_v16 }
 0x407   :  { %7564 = vmatprep.subr.bf16.mxu0 %v9465_v24 }
 0x408   :  { %7606 = vmatpush1.bf16.msra.mxu1 %v9460_v21 }
 0x409   :  { %7607 = vmatprep.subr.bf16.mxu1 %v9468_v26 }
 0x40a   :  { %7565 = vmatpush1.bf16.msra.mxu0 %v9463_v28 }
 0x40b   :  { %7566 = vmatprep.subr.bf16.mxu0 %v9471_v29 }
 0x40c   :  { %7608 = vmatpush1.bf16.msra.mxu1 %v9466_v58 }
 0x40d   :  { %7609 = vmatprep.subr.bf16.mxu1 %v9474_v45 }
 0x40e   :  { %7567 = vmatpush2.bf16.msra.mxu0 %v9469_v48 }
 0x40f   :  { %7568 = vmatprep.subr.bf16.mxu0 %v9477_v4 }
 0x410   :  { %7610 = vmatpush2.bf16.msra.mxu1 %v9472_v20 }
 0x411   :  { %7611 = vmatprep.subr.bf16.mxu1 %v9480_v27 }
 0x412   :  { %7569 = vmatpush2.bf16.msra.mxu0 %v9475_v19 }
 0x413   :  { %7570 = vmatprep.subr.bf16.mxu0 %v9483_v31 }
 0x414   :  { %7612 = vmatpush2.bf16.msra.mxu1 %v9478_v3 }
 0x415   :  { %7613 = vmatprep.subr.bf16.mxu1 %v9486_v0 }
 0x416   :  { %7571 = vmatpush2.bf16.msra.mxu0 %v9481_v5  ;;  %v9521_v5 = vld [vmem:[#allocation2 + $0x8] sm:$0xff] }
 0x417   :  { %7572 = vmatprep.subr.bf16.mxu0 %v9489_v37 }
 0x418   :  { %7614 = vmatpush2.bf16.msra.mxu1 %v9484_v36  ;;  %v6985_v36 = vadd.f32 %v9521_v5, %v6984_v60 }
 0x419   :  { %7615 = vmatprep.subr.bf16.mxu1 %v9492_v39 }
 0x41a   :  { %7573 = vmatpush2.bf16.msra.mxu0 %v9487_v40  ;;  %v9522_v40 = vld [vmem:[#allocation2] sm:$0xff] }
 0x41b   :  { %7574 = vmatprep.subr.bf16.mxu0 %v9495_v42  ;;  %v7028_v42 = vadd.f32 %v7027_v34, %v6985_v36 }
 0x41c   :  { %7616 = vmatpush2.bf16.msra.mxu1 %v9490_v49  ;;  %v6983_v49 = vadd.f32 %v9522_v40, %v6982_v33  ;;  %v9527_v40 = vld [vmem:[#allocation2 + $0x30] sm:$0xff] }
 0x41d   :  { %7617 = vmatprep.subr.bf16.mxu1 %v9498_v43 }
 0x41e   :  { %7575 = vmatpush2.bf16.msra.mxu0 %v9493_v52  ;;  %v9523_v52 = vld [vmem:[#allocation2 + $0x28] sm:$0xff] }
 0x41f   :  { %7576 = vmatprep.subr.bf16.mxu0 %v9501_v46 }
 0x420   :  { %7618 = vmatpush2.bf16.msra.mxu1 %v9496_v44  ;;  %v6989_v44 = vadd.f32 %v9523_v52, %v6988_v23 }
 0x421   :  { %7619 = vmatprep.subr.bf16.mxu1 %v9504_v11  ;;  %v7026_v11 = vadd.f32 %v7025_v59, %v6983_v49 }
 0x422   :  { %7577 = vmatpush2.bf16.msra.mxu0 %v9499_v17  ;;  %v9524_v17 = vld [vmem:[#allocation2 + $0x20] sm:$0xff] }
 0x423   :  { %7578 = vmatprep.subr.bf16.mxu0 %v9507_v61  ;;  %v7071_v61 = vadd.f32 %v7070_v8, %v7028_v42 }
 0x424   :  { %7620 = vmatpush2.bf16.msra.mxu1 %v9502_v54  ;;  %v6987_v54 = vadd.f32 %v9524_v17, %v6986_v2 }
 0x425   :  { %7621 = vmatprep.subr.bf16.mxu1 %v9510_v22  ;;  %v9525_v22 = vld [vmem:[#allocation2 + $0x10] sm:$0xff] }
 0x426   :  { %7579 = vmatpush2.bf16.msra.mxu0 %v9505_v25  ;;  %v7030_v5 = vadd.f32 %v7029_v32, %v6987_v54 }
 0x427   :  { %7580 = vmatprep.subr.bf16.mxu0 %v9513_v30 }
 0x428   :  { %7622 = vmatpush2.bf16.msra.mxu1 %v9508_v50  ;;  %v7069_v50 = vadd.f32 %v7068_v6, %v7026_v11  ;;  %v7073_v2 = vadd.f32 %v7072_v38, %v7030_v5 }
 0x429   :  { %7623 = vmatprep.subr.bf16.mxu1 %v9516_v63  ;;  %v7032_v63 = vadd.f32 %v7031_v62, %v6989_v44 }
 0x42a   :  { %7581 = vmatpush2.bf16.msra.mxu0 %v9511_v55  ;;  %v9526_v55 = vld [vmem:[#allocation2 + $0x18] sm:$0xff]  ;;  %v7112_v59 = vadd.f32 %v9845_v15, %v7069_v50 }
 0x42b   :  { %v7075_v34 = vadd.f32 %v7074_v9, %v7032_v63 }
 0x42c   :  { %7624 = vmatpush2.bf16.msra.mxu1 %v9514_v56 }
 0x42d   :  { %7583 = vmatmul.mubr.bf16.vlgmr.msra.gmra.mxu0 %v9801_v35  ;;  %v9849_v35 = vpop.f32.mrf.mxu1 }
 0x42e   :  { %v7118_v32 = vadd.f32 %v9849_v35, %v7075_v34 }
 0x42f   :  { %7626 = vmatmul.mubr.bf16.vlgmr.msra.gmra.mxu1 %v9825_v1  ;;  %v9851_v1 = vpop.f32.mrf.mxu0  ;;  %v9853_v10 = vpop.f32.mrf.mxu1 }
 0x430   :  { %v7155_v62 = vadd.f32 %v9851_v1, %v7112_v59 }
 0x431   :  { %v7156_v18 = vpop.f32.mrf.mxu0  ;;  %v9855_v51 = vpop.f32.mrf.mxu1 }
 0x433   :  { %v9857_v7 = vpop.f32.mrf.mxu0  ;;  %v9859_v12 = vpop.f32.mrf.mxu1 }
 0x435   :  { %v9861_v57 = vpop.f32.mrf.mxu0  ;;  %v9863_v13 = vpop.f32.mrf.mxu1 }
 0x436   :  { %v7161_v15 = vadd.f32 %v9861_v57, %v7118_v32 }
 0x437   :  { %v9865_v14 = vpop.f32.mrf.mxu0  ;;  %v9867_v41 = vpop.f32.mrf.mxu1 }
 0x439   :  { %v9869_v16 = vpop.f32.mrf.mxu0  ;;  %v9871_v21 = vpop.f32.mrf.mxu1 }
 0x43b   :  { %v9873_v24 = vpop.f32.mrf.mxu0  ;;  %v9875_v26 = vpop.f32.mrf.mxu1 }
 0x43c   :  { %9909 = vst [vmem:[#allocation12_spill] sm:$0xff] %v9875_v26  ;;  %v7114_v26 = vadd.f32 %v7113_v53, %v7071_v61 }
 0x43d   :  { %v9877_v28 = vpop.f32.mrf.mxu0  ;;  %v9879_v58 = vpop.f32.mrf.mxu1 }
 0x43e   :  { %v7157_v8 = vadd.f32 %v7156_v18, %v7114_v26 }
 0x43f   :  { %v7326_v29 = vpop.f32.mrf.mxu0  ;;  %v7369_v45 = vpop.f32.mrf.mxu1 }
 0x440   :  { %v7327_v25 = vadd.f32 %v9525_v22, %v7326_v29  ;;  %v9528_v29 = vld [vmem:[#allocation2 + $0x38] sm:$0xff] }
 0x441   :  { %v7328_v48 = vpop.f32.mrf.mxu0  ;;  %v7371_v20 = vpop.f32.mrf.mxu1 }
 0x442   :  { %v7329_v56 = vadd.f32 %v9526_v55, %v7328_v48  ;;  %v7370_v36 = vadd.f32 %v7369_v45, %v7327_v25  ;;  %v7116_v45 = vadd.f32 %v9847_v47, %v7073_v2 }
 0x443   :  { %v7330_v4 = vpop.f32.mrf.mxu0  ;;  %v7373_v27 = vpop.f32.mrf.mxu1 }
 0x444   :  { %v7331_v23 = vadd.f32 %v9527_v40, %v7330_v4  ;;  %v7372_v49 = vadd.f32 %v7371_v20, %v7329_v56  ;;  %v7200_v4 = vadd.f32 %v9855_v51, %v7157_v8  ;;  %v7198_v20 = vadd.f32 %v9853_v10, %v7155_v62 }
 0x445   :  { %v7332_v19 = vpop.f32.mrf.mxu0  ;;  %v7375_v3 = vpop.f32.mrf.mxu1  ;;  %v7204_v51 = vadd.f32 %v9863_v13, %v7161_v15 }
 0x446   :  { %v7333_v6 = vadd.f32 %v9528_v29, %v7332_v19  ;;  %v7374_v53 = vadd.f32 %v7373_v27, %v7331_v23  ;;  %v7159_v19 = vadd.f32 %v9857_v7, %v7116_v45  ;;  %v7243_v1 = vadd.f32 %v9869_v16, %v7200_v4 }
 0x447   :  { %v7241_v47 = vadd.f32 %v9865_v14, %v7198_v20  ;;  %v7247_v7 = vadd.f32 %v9877_v28, %v7204_v51 }
 0x448   :  { %v7376_v38 = vadd.f32 %v7375_v3, %v7333_v6  ;;  %v7202_v3 = vadd.f32 %v9859_v12, %v7159_v19 }
 0x449   :  { %v7284_v61 = vadd.f32 %v9867_v41, %v7241_v47 }
 0x44a   :  { %v7245_v22 = vadd.f32 %v9873_v24, %v7202_v3 }
 0x46d   :  { %v7412_v31 = vpop.f32.mrf.mxu0 }
 0x46e   :  { %v7413_v42 = vadd.f32 %v7412_v31, %v7370_v36 }
 0x46f   :  { %v7455_v0 = vpop.f32.mrf.mxu1  ;;  %v7414_v37 = vpop.f32.mrf.mxu0 }
 0x470   :  { %v7415_v44 = vadd.f32 %v7414_v37, %v7372_v49  ;;  %v7456_v18 = vadd.f32 %v7455_v0, %v7413_v42  ;;  %v7286_v0 = vadd.f32 %v9871_v21, %v7243_v1  ;;  %v7290_v21 = vadd.f32 %v9879_v58, %v7247_v7 }
 0x471   :  { %v7457_v39 = vpop.f32.mrf.mxu1  ;;  %v7416_v43 = vpop.f32.mrf.mxu0 }
 0x472   :  { %v7417_v26 = vadd.f32 %v7416_v43, %v7374_v53  ;;  %v7458_v35 = vadd.f32 %v7457_v39, %v7415_v44 }
 0x473   :  { %v7459_v46 = vpop.f32.mrf.mxu1  ;;  %v7418_v30 = vpop.f32.mrf.mxu0 }
 0x474   :  { %v7419_v27 = vadd.f32 %v7418_v30, %v7376_v38  ;;  %v7460_v17 = vadd.f32 %v7459_v46, %v7417_v26  ;;  %v7636_v30 = vadd.f32 %v7286_v0, %v7284_v61 }
 0x475   :  { %v7461_v60 = vpop.f32.mrf.mxu1 }
 0x476   :  { %v7462_v43 = vadd.f32 %v7461_v60, %v7419_v27  ;;  %v9910_v60 = vld [vmem:[#allocation12_spill] sm:$0xff] }
 0x477   :  { %v7288_v5 = vadd.f32 %v9910_v60, %v7245_v22 }
 0x4ad   :  { %v7498_v33 = vpop.f32.mrf.mxu0 }
 0x4ae   :  { %v7499_v37 = vadd.f32 %v7498_v33, %v7456_v18 }
 0x4af   :  { %v7541_v52 = vpop.f32.mrf.mxu1  ;;  %v7500_v48 = vpop.f32.mrf.mxu0 }
 0x4b0   :  { %v7501_v57 = vadd.f32 %v7500_v48, %v7458_v35  ;;  %v7542_v16 = vadd.f32 %v7541_v52, %v7499_v37  ;;  %v7641_v52 = vadd.f32 %v7290_v21, %v7288_v5 }
 0x4b1   :  { %v7543_v9 = vpop.f32.mrf.mxu1  ;;  %v7502_v31 = vpop.f32.mrf.mxu0 }
 0x4b2   :  { %v7503_v54 = vadd.f32 %v7502_v31, %v7460_v17  ;;  %v7544_v25 = vadd.f32 %v7543_v9, %v7501_v57 }
 0x4b3   :  { %v7545_v11 = vpop.f32.mrf.mxu1  ;;  %v7504_v10 = vpop.f32.mrf.mxu0 }
 0x4b4   :  { %v7505_v13 = vadd.f32 %v7504_v10, %v7462_v43  ;;  %v7546_v63 = vadd.f32 %v7545_v11, %v7503_v54 }
 0x4b5   :  { %v7547_v39 = vpop.f32.mrf.mxu1 }
 0x4b6   :  { %v7548_v34 = vadd.f32 %v7547_v39, %v7505_v13 }
 0x4ed   :  { %v7584_v14 = vpop.f32.mrf.mxu0 }
 0x4ee   :  { %v7585_v46 = vadd.f32 %v7584_v14, %v7542_v16 }
 0x4ef   :  { %v7627_v50 = vpop.f32.mrf.mxu1  ;;  %v7586_v12 = vpop.f32.mrf.mxu0 }
 0x4f0   :  { %v7628_v55 = vadd.f32 %v7627_v50, %v7585_v46  ;;  %v7587_v28 = vadd.f32 %v7586_v12, %v7544_v25 }
 0x4f1   :  { %v7629_v56 = vpop.f32.mrf.mxu1  ;;  %v7588_v33 = vpop.f32.mrf.mxu0 }
 0x4f2   :  { %v7630_v41 = vadd.f32 %v7629_v56, %v7587_v28  ;;  %v7589_v36 = vadd.f32 %v7588_v33, %v7546_v63  ;;  %v7637_v40 = vadd.f32 %v7636_v30, %v7628_v55 }
 0x4f3   :  { %v7631_v24 = vpop.f32.mrf.mxu1  ;;  %v7590_v23 = vpop.f32.mrf.mxu0 }
 0x4f4   :  { %v7632_v59 = vadd.f32 %v7631_v24, %v7589_v36  ;;  %v7591_v2 = vadd.f32 %v7590_v23, %v7548_v34  ;;  %v7638_v8 = vadd.f32 %v7637_v40, %v7630_v41 }
 0x4f5   :  { %v7633_v49 = vpop.f32.mrf.mxu1 }
 0x4f6   :  { %v7642_v29 = vadd.f32 %v7641_v52, %v7632_v59  ;;  %v7634_v58 = vadd.f32 %v7633_v49, %v7591_v2  ;;  %7639 = vadd.xlane.f32.xlu0 %v7638_v8 }
 0x4f8   :  { %v7643_v6 = vadd.f32 %v7642_v29, %v7634_v58 }
 0x4fa   :  { %7644 = vadd.xlane.f32.xlu0 %v7643_v6 }
 0x57f   :  { %v7640_v42 = vpop.xlane.xlu0 %7639 }
 0x580   :  { %v7647_v62 = vmul.f32 0.001953125, %v7640_v42 }
 0x582   :  { %v7649_v48 = vsub.f32 %v7284_v61, %v7647_v62  ;;  %v7650_v32 = vsub.f32 %v7286_v0, %v7647_v62  ;;  %v7651_v53 = vsub.f32 %v7628_v55, %v7647_v62  ;;  %v7652_v9 = vsub.f32 %v7630_v41, %v7647_v62 }
 0x583   :  { %v7645_v44 = vpop.xlane.xlu0 %7644 }
 0x584   :  { %v7648_v45 = vmul.f32 0.001953125, %v7645_v44  ;;  %v7657_v4 = vmul.f32 %v7649_v48, %v7649_v48  ;;  %v7658_v15 = vmul.f32 %v7650_v32, %v7650_v32  ;;  %v7659_v38 = vmul.f32 %v7651_v53, %v7651_v53 }
 0x585   :  { %v7660_v1 = vmul.f32 %v7652_v9, %v7652_v9 }
 0x586   :  { %v7653_v18 = vsub.f32 %v7288_v5, %v7648_v45  ;;  %v7654_v26 = vsub.f32 %v7290_v21, %v7648_v45  ;;  %v7665_v20 = vadd.f32 %v7658_v15, %v7657_v4  ;;  %v7655_v19 = vsub.f32 %v7632_v59, %v7648_v45 }
 0x587   :  { %v7656_v35 = vsub.f32 %v7634_v58, %v7648_v45 }
 0x588   :  { %v7666_v31 = vadd.f32 %v7665_v20, %v7659_v38  ;;  %v7661_v27 = vmul.f32 %v7653_v18, %v7653_v18  ;;  %v7662_v37 = vmul.f32 %v7654_v26, %v7654_v26  ;;  %v7663_v47 = vmul.f32 %v7655_v19, %v7655_v19 }
 0x589   :  { %v7664_v17 = vmul.f32 %v7656_v35, %v7656_v35 }
 0x58a   :  { %v7667_v11 = vadd.f32 %v7666_v31, %v7660_v1  ;;  %v7670_v51 = vadd.f32 %v7662_v37, %v7661_v27 }
 0x58c   :  { %7668 = vadd.xlane.f32.xlu1 %v7667_v11  ;;  %v7671_v57 = vadd.f32 %v7670_v51, %v7663_v47 }
 0x58e   :  { %v7672_v3 = vadd.f32 %v7671_v57, %v7664_v17 }
 0x590   :  { %7673 = vadd.xlane.f32.xlu1 %v7672_v3 }
 0x615   :  { %v7669_v0 = vpop.xlane.xlu1 %7668 }
 0x616   :  { %v7675_v10 = vmul.f32 0.001953125, %v7669_v0 }
 0x618   :  { %v7677_v7 = vadd.f32 1e-05, %v7675_v10 }
 0x619   :  { %v7674_v43 = vpop.xlane.xlu1 %7673 }
 0x61a   :  { %9517 = vrsqrt.f32 %v7677_v7  ;;  %v7676_v16 = vmul.f32 0.001953125, %v7674_v43 }
 0x61c   :  { %v7678_v54 = vadd.f32 1e-05, %v7676_v16 }
 0x61e   :  { %9519 = vrsqrt.f32 %v7678_v54 }
 0x627   :  { %v9518_v39 = vpop.eup %9517 }
 0x628   :  { %v7681_v61 = vmul.f32 %v9518_v39, %v7649_v48  ;;  %v7682_v22 = vmul.f32 %v9518_v39, %v7650_v32  ;;  %v7683_v14 = vmul.f32 %v9518_v39, %v7651_v53  ;;  %v7684_v25 = vmul.f32 %v9518_v39, %v7652_v9 }
 0x62a   :  { %7689 = vst [vmem:[#allocation8] sm:$0xff] %v7681_v61  ;;  %7690 = vst [vmem:[#allocation8 + $0x8] sm:$0xff] %v7682_v22 }
 0x62b   :  { %7691 = vst [vmem:[#allocation8 + $0x10] sm:$0xff] %v7683_v14  ;;  %7692 = vst [vmem:[#allocation8 + $0x18] sm:$0xff] %v7684_v25  ;;  %v9520_v13 = vpop.eup %9519 }
 0x62c   :  { %v7685_v46 = vmul.f32 %v9520_v13, %v7653_v18  ;;  %v7686_v50 = vmul.f32 %v9520_v13, %v7654_v26  ;;  %v7687_v30 = vmul.f32 %v9520_v13, %v7655_v19  ;;  %v7688_v12 = vmul.f32 %v9520_v13, %v7656_v35 }
 0x62e   :  { %7693 = vst [vmem:[#allocation8 + $0x20] sm:$0xff] %v7685_v46  ;;  %7694 = vst [vmem:[#allocation8 + $0x28] sm:$0xff] %v7686_v50 }
 0x62f   :  { %7695 = vst [vmem:[#allocation8 + $0x30] sm:$0xff] %v7687_v30  ;;  %7696 = vst [vmem:[#allocation8 + $0x38] sm:$0xff] %v7688_v12 }
 0x630   :  { %9600 = shalt.err (!%p9597_p5)
}
 0x631   :  { %7708 = dma.vmem_to_hbm [thread:$0]  %s7703_s2, 1024, %s9908_s3, [#allocation4], %s9619_s22, %s9619_s22, %s9620_s23  }
 0x632   :  { %9613 = dma.done.wait [#allocation4], 1024  }
 0x633   :  { %9614 = vsyncadd [#allocation4], 4294966272 }
 0x634   :  { %7712 = vsyncpa [#allocation3], 1 }
 0x635   :  { %7713 = vsyncpa [#allocation6], 1 }
 0x636   :  { %7714 = vsyncpa [#allocation4], 1 }

// kernel: tpu_custom_call.1
= control target key start
LH: loop header
LB: loop body
LE: loop exit
PB: predicated region body
PF: predicated region fallthrough
CT: control target
= control target key end

     0   :  { %8 = vsyncpa [#allocation3], 0  ;;  %s9905_s0 = inlined_call_operand.hbm [shape: f32[16,512], index: 0, kind: input, shape index: {}]   ;;  %s9906_s1 = inlined_call_operand.hbm [shape: bf16[512,2048], index: 1, kind: input, shape index: {}]   ;;  %s9907_s2 = inlined_call_operand.hbm [shape: bf16[2048,512], index: 2, kind: input, shape index: {}]   ;;  %s9908_s3 = inlined_call_operand.hbm [shape: f32[16,512], index: 3, kind: output, shape index: {}]  }
   0x1   :  { %9 = vsyncpa [#allocation6], 0 }
   0x2   :  { %10 = vsyncpa [#allocation4], 0  ;;  %s9615_s12 = smov [#allocation5]  }
   0x3   :  { %s28_s13 = sshll.u32 %s9615_s12, 4  ;;  %s29_s13 = int_to_ptr.vmem [resolvable:$true] %s28_s13 }
   0x4   :  { %s9537_s14 = scalar_lea.vmem %s29_s13, 65536  ;;  %p9542_p1 = scmp.lt.s32.totalorder %s29_s13, %s29_s13 }
   0x5   :  { %p9538_p0 = scmp.ne.s32.totalorder %s29_s13, %s9537_s14  ;;  %p9543_p2 = scmp.lt.s32.totalorder %s9537_s14, %s9537_s14 }
   0x7   :  { %p9544_p3 = por %p9543_p2, %p9542_p1 }
   0x9   :  { %p9545_p4 = pnand %p9544_p3, %p9538_p0 }
   0xb   :  { %9548 = shalt.err (!%p9545_p4)
}
   0xc   :  { %s9616_s15 = smov 1024   ;;  %s9617_s16 = smov 64  }
   0xd   :  { %34 = dma.hbm_to_vmem [thread:$0]  %s9906_s1, 65536, %s29_s13, [#allocation6], %s9616_s15, %s9616_s15, %s9617_s16  }
   0xe   :  { %s9618_s19 = smov [#allocation2]  }
   0xf   :  { %s16_s20 = sshll.u32 %s9618_s19, 4  ;;  %s17_s20 = int_to_ptr.vmem [resolvable:$true] %s16_s20 }
  0x10   :  { %s9557_s21 = scalar_lea.vmem %s17_s20, 1024  ;;  %p9562_p6 = scmp.lt.s32.totalorder %s17_s20, %s17_s20 }
  0x11   :  { %p9558_p5 = scmp.ne.s32.totalorder %s17_s20, %s9557_s21  ;;  %p9563_p7 = scmp.lt.s32.totalorder %s9557_s21, %s9557_s21 }
  0x13   :  { %p9564_p8 = por %p9563_p7, %p9562_p6 }
  0x15   :  { %p9565_p9 = pnand %p9564_p8, %p9558_p5 }
  0x17   :  { %9568 = shalt.err (!%p9565_p9)
}
  0x18   :  { %s9619_s22 = smov 512   ;;  %s9620_s23 = smov 32  }
  0x19   :  { %22 = dma.hbm_to_vmem [thread:$0]  %s9905_s0, 1024, %s17_s20, [#allocation3], %s9619_s22, %s9619_s22, %s9620_s23  }
  0x1a   :  { %s9621_s1 = smov [#allocation7]  }
  0x1b   :  { %s40_s26 = sshll.u32 %s9621_s1, 4  ;;  %s41_s26 = int_to_ptr.vmem [resolvable:$true] %s40_s26 }
  0x1c   :  { %s9577_s27 = scalar_lea.vmem %s41_s26, 65536  ;;  %p9582_p11 = scmp.lt.s32.totalorder %s41_s26, %s41_s26 }
  0x1d   :  { %p9578_p10 = scmp.ne.s32.totalorder %s41_s26, %s9577_s27  ;;  %p9583_p12 = scmp.lt.s32.totalorder %s9577_s27, %s9577_s27 }
  0x1f   :  { %p9584_p13 = por %p9583_p12, %p9582_p11 }
  0x21   :  { %p9585_p0 = pnand %p9584_p13, %p9578_p10 }
  0x23   :  { %9588 = shalt.err (!%p9585_p0)
}
  0x24   :  { %s9622_s28 = smov 256   ;;  %s9623_s29 = smov 16  }
  0x25   :  { %46 = dma.hbm_to_vmem [thread:$0]  %s9907_s2, 65536, %s41_s26, [#allocation6], %s9622_s28, %s9622_s28, %s9623_s29  }
  0x26   :  { %9609 = dma.done.wait [#allocation3], 1024  }
  0x27   :  { %9610 = vsyncadd [#allocation3], 4294966272 }
  0x28   :  { %9611 = dma.done.wait [#allocation6], 131072  }
  0x29   :  { %9612 = vsyncadd [#allocation6], 4294836224  ;;  %v180_v0 = vld [vmem:[#allocation5 + $0x380] sm:$0xff]  ;;  %v57_v54 = vld [vmem:[#allocation2 + $0x8] sm:$0xff]  ;;  %s9624_s0 = smov [#allocation8]  }
  0x2a   :  { %v188_v1 = vld [vmem:[#allocation5 + $0x3c0] sm:$0xff]  ;;  %v61_v55 = vld [vmem:[#allocation2 + $0x28] sm:$0xff]  ;;  %v59_v59 = vld [vmem:[#allocation2 + $0x18] sm:$0xff]  ;;  %s7702_s2 = sshll.u32 %s9624_s0, 4  ;;  %s7703_s2 = int_to_ptr.vmem [resolvable:$true] %s7702_s2 }
  0x2b   :  { %v436_v2 = vld [vmem:[#allocation5 + $0xb80] sm:$0xff]  ;;  %v7828_v3 = vcombine.high %v180_v0, %v188_v1  ;;  %v7827_v5 = vcombine.low %v180_v0, %v188_v1  ;;  %v9657_v58 = vpack.c.bf16 %v61_v55, %v57_v54  ;;  %v63_v60 = vld [vmem:[#allocation2 + $0x38] sm:$0xff]  ;;  %s9589_s5 = scalar_lea.vmem %s7703_s2, 1024  ;;  %p9594_p2 = scmp.lt.s32.totalorder %s7703_s2, %s7703_s2 }
  0x2c   :  { %v444_v4 = vld [vmem:[#allocation5 + $0xbc0] sm:$0xff]  ;;  %v9659_v63 = vpack.c.bf16 %v63_v60, %v59_v59  ;;  %p9590_p1 = scmp.ne.s32.totalorder %s7703_s2, %s9589_s5  ;;  %p9595_p3 = scmp.lt.s32.totalorder %s9589_s5, %s9589_s5 }
  0x2d   :  { %v164_v6 = vld [vmem:[#allocation5 + $0x300] sm:$0xff]  ;;  %v8084_v8 = vcombine.high %v436_v2, %v444_v4  ;;  %v8083_v9 = vcombine.low %v436_v2, %v444_v4  ;;  %3140 = vmatprep.subr.bf16.mxu0 %v7828_v3  ;;  %3172 = vmatprep.mubr.bf16.mxu0 %v9657_v58 }
  0x2e   :  { %v172_v7 = vld [vmem:[#allocation5 + $0x340] sm:$0xff]  ;;  %3141 = vmatpush1.bf16.msra.mxu0 %v7827_v5  ;;  %3215 = vmatprep.mubr.bf16.mxu1 %v9659_v63  ;;  %p9596_p4 = por %p9595_p3, %p9594_p2 }
  0x2f   :  { %v7812_v10 = vcombine.high %v164_v6, %v172_v7  ;;  %v420_v11 = vld [vmem:[#allocation5 + $0xb00] sm:$0xff]  ;;  %3183 = vmatprep.subr.bf16.mxu1 %v8084_v8  ;;  %v7811_v18 = vcombine.low %v164_v6, %v172_v7 }
  0x30   :  { %v428_v12 = vld [vmem:[#allocation5 + $0xb40] sm:$0xff]  ;;  %3184 = vmatpush1.bf16.msra.mxu1 %v8083_v9  ;;  %p9597_p5 = pnand %p9596_p4, %p9590_p1 }
  0x31   :  { %v148_v13 = vld [vmem:[#allocation5 + $0x280] sm:$0xff]  ;;  %v8068_v14 = vcombine.high %v420_v11, %v428_v12  ;;  %3142 = vmatprep.subr.bf16.mxu0 %v7812_v10  ;;  %v8067_v19 = vcombine.low %v420_v11, %v428_v12 }
  0x32   :  { %v156_v15 = vld [vmem:[#allocation5 + $0x2c0] sm:$0xff]  ;;  %3143 = vmatpush1.bf16.msra.mxu0 %v7811_v18 }
  0x33   :  { %v404_v16 = vld [vmem:[#allocation5 + $0xa80] sm:$0xff]  ;;  %v7796_v20 = vcombine.high %v148_v13, %v156_v15  ;;  %3185 = vmatprep.subr.bf16.mxu1 %v8068_v14  ;;  %v7795_v26 = vcombine.low %v148_v13, %v156_v15 }
  0x34   :  { %v412_v17 = vld [vmem:[#allocation5 + $0xac0] sm:$0xff]  ;;  %3186 = vmatpush1.bf16.msra.mxu1 %v8067_v19 }
  0x35   :  { %v8052_v21 = vcombine.high %v404_v16, %v412_v17  ;;  %v132_v22 = vld [vmem:[#allocation5 + $0x200] sm:$0xff]  ;;  %3144 = vmatprep.subr.bf16.mxu0 %v7796_v20  ;;  %v8051_v27 = vcombine.low %v404_v16, %v412_v17 }
  0x36   :  { %v140_v23 = vld [vmem:[#allocation5 + $0x240] sm:$0xff]  ;;  %3145 = vmatpush1.bf16.msra.mxu0 %v7795_v26 }
  0x37   :  { %v388_v24 = vld [vmem:[#allocation5 + $0xa00] sm:$0xff]  ;;  %v7780_v28 = vcombine.high %v132_v22, %v140_v23  ;;  %3187 = vmatprep.subr.bf16.mxu1 %v8052_v21  ;;  %v7779_v34 = vcombine.low %v132_v22, %v140_v23 }
  0x38   :  { %v396_v25 = vld [vmem:[#allocation5 + $0xa40] sm:$0xff]  ;;  %3188 = vmatpush1.bf16.msra.mxu1 %v8051_v27 }
  0x39   :  { %v8036_v29 = vcombine.high %v388_v24, %v396_v25  ;;  %v116_v30 = vld [vmem:[#allocation5 + $0x180] sm:$0xff]  ;;  %3146 = vmatprep.subr.bf16.mxu0 %v7780_v28  ;;  %v8035_v35 = vcombine.low %v388_v24, %v396_v25 }
  0x3a   :  { %v124_v31 = vld [vmem:[#allocation5 + $0x1c0] sm:$0xff]  ;;  %3147 = vmatpush1.bf16.msra.mxu0 %v7779_v34 }
  0x3b   :  { %v372_v32 = vld [vmem:[#allocation5 + $0x980] sm:$0xff]  ;;  %v7764_v36 = vcombine.high %v116_v30, %v124_v31  ;;  %3189 = vmatprep.subr.bf16.mxu1 %v8036_v29  ;;  %v7763_v42 = vcombine.low %v116_v30, %v124_v31 }
  0x3c   :  { %v380_v33 = vld [vmem:[#allocation5 + $0x9c0] sm:$0xff]  ;;  %3190 = vmatpush1.bf16.msra.mxu1 %v8035_v35 }
  0x3d   :  { %v8020_v37 = vcombine.high %v372_v32, %v380_v33  ;;  %v100_v38 = vld [vmem:[#allocation5 + $0x100] sm:$0xff]  ;;  %3148 = vmatprep.subr.bf16.mxu0 %v7764_v36  ;;  %v8019_v43 = vcombine.low %v372_v32, %v380_v33 }
  0x3e   :  { %v108_v39 = vld [vmem:[#allocation5 + $0x140] sm:$0xff]  ;;  %3149 = vmatpush1.bf16.msra.mxu0 %v7763_v42 }
  0x3f   :  { %v356_v40 = vld [vmem:[#allocation5 + $0x900] sm:$0xff]  ;;  %v7748_v44 = vcombine.high %v100_v38, %v108_v39  ;;  %3191 = vmatprep.subr.bf16.mxu1 %v8020_v37  ;;  %v7747_v50 = vcombine.low %v100_v38, %v108_v39 }
  0x40   :  { %v364_v41 = vld [vmem:[#allocation5 + $0x940] sm:$0xff]  ;;  %3192 = vmatpush1.bf16.msra.mxu1 %v8019_v43 }
  0x41   :  { %v8004_v45 = vcombine.high %v356_v40, %v364_v41  ;;  %v84_v46 = vld [vmem:[#allocation5 + $0x80] sm:$0xff]  ;;  %3150 = vmatprep.subr.bf16.mxu0 %v7748_v44  ;;  %v8003_v51 = vcombine.low %v356_v40, %v364_v41 }
  0x42   :  { %v92_v47 = vld [vmem:[#allocation5 + $0xc0] sm:$0xff]  ;;  %3151 = vmatpush1.bf16.msra.mxu0 %v7747_v50 }
  0x43   :  { %v340_v48 = vld [vmem:[#allocation5 + $0x880] sm:$0xff]  ;;  %v7732_v52 = vcombine.high %v84_v46, %v92_v47  ;;  %3193 = vmatprep.subr.bf16.mxu1 %v8004_v45  ;;  %v7731_v0 = vcombine.low %v84_v46, %v92_v47 }
  0x44   :  { %v348_v49 = vld [vmem:[#allocation5 + $0x8c0] sm:$0xff]  ;;  %3194 = vmatpush1.bf16.msra.mxu1 %v8003_v51 }
  0x45   :  { %v68_v53 = vld [vmem:[#allocation5] sm:$0xff]  ;;  %v7988_v56 = vcombine.high %v340_v48, %v348_v49  ;;  %3152 = vmatprep.subr.bf16.mxu0 %v7732_v52  ;;  %v7987_v1 = vcombine.low %v340_v48, %v348_v49 }
  0x46   :  { %v76_v57 = vld [vmem:[#allocation5 + $0x40] sm:$0xff]  ;;  %3153 = vmatpush1.bf16.msra.mxu0 %v7731_v0 }
  0x47   :  { %v324_v61 = vld [vmem:[#allocation5 + $0x800] sm:$0xff]  ;;  %v7716_v2 = vcombine.high %v68_v53, %v76_v57  ;;  %3195 = vmatprep.subr.bf16.mxu1 %v7988_v56  ;;  %v7715_v8 = vcombine.low %v68_v53, %v76_v57 }
  0x48   :  { %v332_v62 = vld [vmem:[#allocation5 + $0x840] sm:$0xff]  ;;  %3196 = vmatpush1.bf16.msra.mxu1 %v7987_v1 }
  0x49   :  { %v7972_v3 = vcombine.high %v324_v61, %v332_v62  ;;  %v308_v4 = vld [vmem:[#allocation5 + $0x780] sm:$0xff]  ;;  %3154 = vmatprep.subr.bf16.mxu0 %v7716_v2  ;;  %v7971_v9 = vcombine.low %v324_v61, %v332_v62 }
  0x4a   :  { %v316_v5 = vld [vmem:[#allocation5 + $0x7c0] sm:$0xff]  ;;  %3155 = vmatpush1.bf16.msra.mxu0 %v7715_v8  ;;  %v437_v8 = vld [vmem:[#allocation5 + $0xb88] sm:$0xff] }
  0x4b   :  { %v564_v6 = vld [vmem:[#allocation5 + $0xf80] sm:$0xff]  ;;  %v7956_v10 = vcombine.high %v308_v4, %v316_v5  ;;  %3197 = vmatprep.subr.bf16.mxu1 %v7972_v3  ;;  %v7955_v16 = vcombine.low %v308_v4, %v316_v5 }
  0x4c   :  { %v572_v7 = vld [vmem:[#allocation5 + $0xfc0] sm:$0xff]  ;;  %3198 = vmatpush1.bf16.msra.mxu1 %v7971_v9  ;;  %v445_v9 = vld [vmem:[#allocation5 + $0xbc8] sm:$0xff] }
  0x4d   :  { %v8212_v11 = vcombine.high %v564_v6, %v572_v7  ;;  %v292_v12 = vld [vmem:[#allocation5 + $0x700] sm:$0xff]  ;;  %3156 = vmatprep.subr.bf16.mxu0 %v7956_v10  ;;  %v8211_v17 = vcombine.low %v564_v6, %v572_v7  ;;  %v181_v6 = vld [vmem:[#allocation5 + $0x388] sm:$0xff] }
  0x4e   :  { %v300_v13 = vld [vmem:[#allocation5 + $0x740] sm:$0xff]  ;;  %3157 = vmatpush2.bf16.msra.mxu0 %v7955_v16  ;;  %v189_v7 = vld [vmem:[#allocation5 + $0x3c8] sm:$0xff] }
  0x4f   :  { %v548_v14 = vld [vmem:[#allocation5 + $0xf00] sm:$0xff]  ;;  %v7940_v18 = vcombine.high %v292_v12, %v300_v13  ;;  %3199 = vmatprep.subr.bf16.mxu1 %v8212_v11  ;;  %v7939_v24 = vcombine.low %v292_v12, %v300_v13  ;;  %v7830_v16 = vcombine.high %v181_v6, %v189_v7 }
  0x50   :  { %v556_v15 = vld [vmem:[#allocation5 + $0xf40] sm:$0xff]  ;;  %3200 = vmatpush2.bf16.msra.mxu1 %v8211_v17  ;;  %v8086_v17 = vcombine.high %v437_v8, %v445_v9 }
  0x51   :  { %v8196_v19 = vcombine.high %v548_v14, %v556_v15  ;;  %v276_v20 = vld [vmem:[#allocation5 + $0x680] sm:$0xff]  ;;  %3158 = vmatprep.subr.bf16.mxu0 %v7940_v18  ;;  %v8195_v25 = vcombine.low %v548_v14, %v556_v15  ;;  %v58_v14 = vld [vmem:[#allocation2 + $0x10] sm:$0xff]  ;;  %v165_v18 = vld [vmem:[#allocation5 + $0x308] sm:$0xff] }
  0x52   :  { %v284_v21 = vld [vmem:[#allocation5 + $0x6c0] sm:$0xff]  ;;  %3159 = vmatpush2.bf16.msra.mxu0 %v7939_v24  ;;  %v62_v15 = vld [vmem:[#allocation2 + $0x30] sm:$0xff]  ;;  %v7829_v24 = vcombine.low %v181_v6, %v189_v7  ;;  %v77_v6 = vld [vmem:[#allocation5 + $0x48] sm:$0xff] }
  0x53   :  { %v532_v22 = vld [vmem:[#allocation5 + $0xe80] sm:$0xff]  ;;  %v7924_v26 = vcombine.high %v276_v20, %v284_v21  ;;  %3201 = vmatprep.subr.bf16.mxu1 %v8196_v19  ;;  %v7923_v32 = vcombine.low %v276_v20, %v284_v21  ;;  %v173_v19 = vld [vmem:[#allocation5 + $0x348] sm:$0xff] }
  0x54   :  { %v540_v23 = vld [vmem:[#allocation5 + $0xec0] sm:$0xff]  ;;  %3202 = vmatpush2.bf16.msra.mxu1 %v8195_v25  ;;  %v421_v21 = vld [vmem:[#allocation5 + $0xb08] sm:$0xff]  ;;  %v8085_v25 = vcombine.low %v437_v8, %v445_v9 }
  0x55   :  { %v8180_v27 = vcombine.high %v532_v22, %v540_v23  ;;  %v260_v28 = vld [vmem:[#allocation5 + $0x600] sm:$0xff]  ;;  %3160 = vmatprep.subr.bf16.mxu0 %v7924_v26  ;;  %v8179_v33 = vcombine.low %v532_v22, %v540_v23  ;;  %v429_v22 = vld [vmem:[#allocation5 + $0xb48] sm:$0xff]  ;;  %v9665_v23 = vpack.c.bf16 %v62_v15, %v58_v14  ;;  %v7814_v26 = vcombine.high %v165_v18, %v173_v19 }
  0x56   :  { %v268_v29 = vld [vmem:[#allocation5 + $0x640] sm:$0xff]  ;;  %3161 = vmatpush2.bf16.msra.mxu0 %v7923_v32  ;;  %v7813_v32 = vcombine.low %v165_v18, %v173_v19  ;;  %v325_v7 = vld [vmem:[#allocation5 + $0x808] sm:$0xff] }
  0x57   :  { %v516_v30 = vld [vmem:[#allocation5 + $0xe00] sm:$0xff]  ;;  %v7908_v34 = vcombine.high %v260_v28, %v268_v29  ;;  %3203 = vmatprep.subr.bf16.mxu1 %v8180_v27  ;;  %v7907_v40 = vcombine.low %v260_v28, %v268_v29  ;;  %v8070_v27 = vcombine.high %v421_v21, %v429_v22  ;;  %v149_v28 = vld [vmem:[#allocation5 + $0x288] sm:$0xff] }
  0x58   :  { %v524_v31 = vld [vmem:[#allocation5 + $0xe40] sm:$0xff]  ;;  %3204 = vmatpush2.bf16.msra.mxu1 %v8179_v33  ;;  %v157_v29 = vld [vmem:[#allocation5 + $0x2c8] sm:$0xff]  ;;  %v8069_v33 = vcombine.low %v421_v21, %v429_v22 }
  0x59   :  { %v8164_v35 = vcombine.high %v516_v30, %v524_v31  ;;  %v244_v36 = vld [vmem:[#allocation5 + $0x580] sm:$0xff]  ;;  %3162 = vmatprep.subr.bf16.mxu0 %v7908_v34  ;;  %v8163_v41 = vcombine.low %v516_v30, %v524_v31  ;;  %v405_v30 = vld [vmem:[#allocation5 + $0xa88] sm:$0xff]  ;;  %v7798_v34 = vcombine.high %v149_v28, %v157_v29 }
  0x5a   :  { %v252_v37 = vld [vmem:[#allocation5 + $0x5c0] sm:$0xff]  ;;  %3163 = vmatpush2.bf16.msra.mxu0 %v7907_v40  ;;  %v413_v31 = vld [vmem:[#allocation5 + $0xac8] sm:$0xff]  ;;  %v7797_v40 = vcombine.low %v149_v28, %v157_v29 }
  0x5b   :  { %v500_v38 = vld [vmem:[#allocation5 + $0xd80] sm:$0xff]  ;;  %v7892_v42 = vcombine.high %v244_v36, %v252_v37  ;;  %3205 = vmatprep.subr.bf16.mxu1 %v8164_v35  ;;  %v7891_v48 = vcombine.low %v244_v36, %v252_v37  ;;  %v133_v35 = vld [vmem:[#allocation5 + $0x208] sm:$0xff] }
  0x5c   :  { %v508_v39 = vld [vmem:[#allocation5 + $0xdc0] sm:$0xff]  ;;  %3206 = vmatpush2.bf16.msra.mxu1 %v8163_v41  ;;  %v141_v36 = vld [vmem:[#allocation5 + $0x248] sm:$0xff]  ;;  %v8053_v41 = vcombine.low %v405_v30, %v413_v31 }
  0x5d   :  { %v8148_v43 = vcombine.high %v500_v38, %v508_v39  ;;  %v228_v44 = vld [vmem:[#allocation5 + $0x500] sm:$0xff]  ;;  %3164 = vmatprep.subr.bf16.mxu0 %v7892_v42  ;;  %v8147_v49 = vcombine.low %v500_v38, %v508_v39  ;;  %v389_v37 = vld [vmem:[#allocation5 + $0xa08] sm:$0xff]  ;;  %v8054_v38 = vcombine.high %v405_v30, %v413_v31  ;;  %v7782_v42 = vcombine.high %v133_v35, %v141_v36 }
  0x5e   :  { %v236_v45 = vld [vmem:[#allocation5 + $0x540] sm:$0xff]  ;;  %3165 = vmatpush2.bf16.msra.mxu0 %v7891_v48  ;;  %v397_v39 = vld [vmem:[#allocation5 + $0xa48] sm:$0xff]  ;;  %v7781_v48 = vcombine.low %v133_v35, %v141_v36 }
  0x5f   :  { %v484_v46 = vld [vmem:[#allocation5 + $0xd00] sm:$0xff]  ;;  %v7876_v50 = vcombine.high %v228_v44, %v236_v45  ;;  %3207 = vmatprep.subr.bf16.mxu1 %v8148_v43  ;;  %v7875_v56 = vcombine.low %v228_v44, %v236_v45  ;;  %v117_v43 = vld [vmem:[#allocation5 + $0x188] sm:$0xff] }
  0x60   :  { %v492_v47 = vld [vmem:[#allocation5 + $0xd40] sm:$0xff]  ;;  %3208 = vmatpush2.bf16.msra.mxu1 %v8147_v49  ;;  %v125_v44 = vld [vmem:[#allocation5 + $0x1c8] sm:$0xff]  ;;  %v8037_v49 = vcombine.low %v389_v37, %v397_v39 }
  0x61   :  { %v8132_v51 = vcombine.high %v484_v46, %v492_v47  ;;  %v212_v52 = vld [vmem:[#allocation5 + $0x480] sm:$0xff]  ;;  %3166 = vmatprep.subr.bf16.mxu0 %v7876_v50  ;;  %v8131_v57 = vcombine.low %v484_v46, %v492_v47  ;;  %v373_v45 = vld [vmem:[#allocation5 + $0x988] sm:$0xff]  ;;  %v8038_v46 = vcombine.high %v389_v37, %v397_v39  ;;  %v7766_v50 = vcombine.high %v117_v43, %v125_v44 }
  0x62   :  { %v220_v53 = vld [vmem:[#allocation5 + $0x4c0] sm:$0xff]  ;;  %3167 = vmatpush2.bf16.msra.mxu0 %v7875_v56  ;;  %v381_v47 = vld [vmem:[#allocation5 + $0x9c8] sm:$0xff]  ;;  %v7765_v56 = vcombine.low %v117_v43, %v125_v44 }
  0x63   :  { %v468_v54 = vld [vmem:[#allocation5 + $0xc80] sm:$0xff]  ;;  %v7860_v59 = vcombine.high %v212_v52, %v220_v53  ;;  %3209 = vmatprep.subr.bf16.mxu1 %v8132_v51  ;;  %v7859_v2 = vcombine.low %v212_v52, %v220_v53  ;;  %v101_v51 = vld [vmem:[#allocation5 + $0x108] sm:$0xff] }
  0x64   :  { %v476_v55 = vld [vmem:[#allocation5 + $0xcc0] sm:$0xff]  ;;  %3210 = vmatpush2.bf16.msra.mxu1 %v8131_v57  ;;  %v109_v52 = vld [vmem:[#allocation5 + $0x148] sm:$0xff]  ;;  %v8021_v57 = vcombine.low %v373_v45, %v381_v47 }
  0x65   :  { %v8116_v60 = vcombine.high %v468_v54, %v476_v55  ;;  %v196_v61 = vld [vmem:[#allocation5 + $0x400] sm:$0xff]  ;;  %3168 = vmatprep.subr.bf16.mxu0 %v7860_v59  ;;  %v8115_v3 = vcombine.low %v468_v54, %v476_v55  ;;  %v357_v53 = vld [vmem:[#allocation5 + $0x908] sm:$0xff]  ;;  %v8022_v54 = vcombine.high %v373_v45, %v381_v47  ;;  %v7750_v59 = vcombine.high %v101_v51, %v109_v52 }
  0x66   :  { %v204_v62 = vld [vmem:[#allocation5 + $0x440] sm:$0xff]  ;;  %3169 = vmatpush2.bf16.msra.mxu0 %v7859_v2  ;;  %v365_v55 = vld [vmem:[#allocation5 + $0x948] sm:$0xff]  ;;  %v7749_v2 = vcombine.low %v101_v51, %v109_v52 }
  0x67   :  { %v452_v0 = vld [vmem:[#allocation5 + $0xc00] sm:$0xff]  ;;  %v7844_v4 = vcombine.high %v196_v61, %v204_v62  ;;  %3211 = vmatprep.subr.bf16.mxu1 %v8116_v60  ;;  %v7843_v10 = vcombine.low %v196_v61, %v204_v62  ;;  %v85_v60 = vld [vmem:[#allocation5 + $0x88] sm:$0xff] }
  0x68   :  { %v460_v1 = vld [vmem:[#allocation5 + $0xc40] sm:$0xff]  ;;  %3212 = vmatpush2.bf16.msra.mxu1 %v8115_v3  ;;  %v93_v61 = vld [vmem:[#allocation5 + $0xc8] sm:$0xff]  ;;  %v8005_v3 = vcombine.low %v357_v53, %v365_v55 }
  0x69   :  { %v8100_v5 = vcombine.high %v452_v0, %v460_v1  ;;  %v56_v11 = vld [vmem:[#allocation2] sm:$0xff]  ;;  %3170 = vmatprep.subr.bf16.mxu0 %v7844_v4  ;;  %v8099_v13 = vcombine.low %v452_v0, %v460_v1  ;;  %v341_v62 = vld [vmem:[#allocation5 + $0x888] sm:$0xff]  ;;  %v8006_v0 = vcombine.high %v357_v53, %v365_v55  ;;  %v7734_v4 = vcombine.high %v85_v60, %v93_v61 }
  0x6a   :  { %v60_v12 = vld [vmem:[#allocation2 + $0x20] sm:$0xff]  ;;  %3171 = vmatpush2.bf16.msra.mxu0 %v7843_v10  ;;  %v349_v1 = vld [vmem:[#allocation5 + $0x8c8] sm:$0xff]  ;;  %v7733_v10 = vcombine.low %v85_v60, %v93_v61 }
  0x6b   :  { %3213 = vmatprep.subr.bf16.mxu1 %v8100_v5  ;;  %v9663_v20 = vpack.c.bf16 %v60_v12, %v56_v11  ;;  %3226 = vmatprep.subr.bf16.mxu0 %v7830_v16  ;;  %v69_v5 = vld [vmem:[#allocation5 + $0x8] sm:$0xff]  ;;  %v7990_v8 = vcombine.high %v341_v62, %v349_v1  ;;  %v7989_v11 = vcombine.low %v341_v62, %v349_v1 }
  0x6c   :  { %3214 = vmatpush2.bf16.msra.mxu1 %v8099_v13  ;;  %v333_v9 = vld [vmem:[#allocation5 + $0x848] sm:$0xff]  ;;  %v7718_v12 = vcombine.high %v69_v5, %v77_v6  ;;  %v7717_v18 = vcombine.low %v69_v5, %v77_v6 }
  0x6d   :  { %3269 = vmatprep.subr.bf16.mxu1 %v8086_v17  ;;  %3173 = vmatmul.mubr.bf16.vlgmr.msra.gmra.mxu0 %v9663_v20  ;;  %v309_v13 = vld [vmem:[#allocation5 + $0x788] sm:$0xff]  ;;  %v7974_v16 = vcombine.high %v325_v7, %v333_v9  ;;  %v7973_v19 = vcombine.low %v325_v7, %v333_v9 }
  0x6e   :  { %3227 = vmatpush1.bf16.msra.mxu0 %v7829_v24  ;;  %3258 = vmatprep.mubr.bf16.mxu0 %v9657_v58  ;;  %v317_v14 = vld [vmem:[#allocation5 + $0x7c8] sm:$0xff] }
  0x6f   :  { %3216 = vmatmul.mubr.bf16.vlgmr.msra.gmra.mxu1 %v9665_v23  ;;  %3228 = vmatprep.subr.bf16.mxu0 %v7814_v26  ;;  %v565_v15 = vld [vmem:[#allocation5 + $0xf88] sm:$0xff]  ;;  %v7958_v21 = vcombine.high %v309_v13, %v317_v14  ;;  %v7957_v28 = vcombine.low %v309_v13, %v317_v14 }
  0x70   :  { %3270 = vmatpush1.bf16.msra.mxu1 %v8085_v25  ;;  %3301 = vmatprep.mubr.bf16.mxu1 %v9659_v63  ;;  %v573_v17 = vld [vmem:[#allocation5 + $0xfc8] sm:$0xff] }
  0x71   :  { %3271 = vmatprep.subr.bf16.mxu1 %v8070_v27  ;;  %v293_v22 = vld [vmem:[#allocation5 + $0x708] sm:$0xff]  ;;  %v8214_v26 = vcombine.high %v565_v15, %v573_v17  ;;  %v8213_v29 = vcombine.low %v565_v15, %v573_v17  ;;  %v182_v17 = vld [vmem:[#allocation5 + $0x390] sm:$0xff] }
  0x72   :  { %3229 = vmatpush1.bf16.msra.mxu0 %v7813_v32  ;;  %v301_v24 = vld [vmem:[#allocation5 + $0x748] sm:$0xff] }
  0x73   :  { %3230 = vmatprep.subr.bf16.mxu0 %v7798_v34  ;;  %v549_v25 = vld [vmem:[#allocation5 + $0xf08] sm:$0xff]  ;;  %v7942_v30 = vcombine.high %v293_v22, %v301_v24  ;;  %v7941_v36 = vcombine.low %v293_v22, %v301_v24  ;;  %v446_v22 = vld [vmem:[#allocation5 + $0xbd0] sm:$0xff] }
  0x74   :  { %3272 = vmatpush1.bf16.msra.mxu1 %v8069_v33  ;;  %v557_v27 = vld [vmem:[#allocation5 + $0xf48] sm:$0xff] }
  0x75   :  { %3273 = vmatprep.subr.bf16.mxu1 %v8054_v38  ;;  %v277_v31 = vld [vmem:[#allocation5 + $0x688] sm:$0xff]  ;;  %v8198_v34 = vcombine.high %v549_v25, %v557_v27  ;;  %v8197_v37 = vcombine.low %v549_v25, %v557_v27  ;;  %v166_v27 = vld [vmem:[#allocation5 + $0x310] sm:$0xff] }
  0x76   :  { %3231 = vmatpush1.bf16.msra.mxu0 %v7797_v40  ;;  %v285_v32 = vld [vmem:[#allocation5 + $0x6c8] sm:$0xff] }
  0x77   :  { %3232 = vmatprep.subr.bf16.mxu0 %v7782_v42  ;;  %v533_v33 = vld [vmem:[#allocation5 + $0xe88] sm:$0xff]  ;;  %v7926_v38 = vcombine.high %v277_v31, %v285_v32  ;;  %v7925_v44 = vcombine.low %v277_v31, %v285_v32  ;;  %v430_v31 = vld [vmem:[#allocation5 + $0xb50] sm:$0xff] }
  0x78   :  { %3274 = vmatpush1.bf16.msra.mxu1 %v8053_v41  ;;  %v541_v35 = vld [vmem:[#allocation5 + $0xec8] sm:$0xff] }
  0x79   :  { %3275 = vmatprep.subr.bf16.mxu1 %v8038_v46  ;;  %v261_v39 = vld [vmem:[#allocation5 + $0x608] sm:$0xff]  ;;  %v8182_v42 = vcombine.high %v533_v33, %v541_v35  ;;  %v8181_v45 = vcombine.low %v533_v33, %v541_v35  ;;  %v150_v35 = vld [vmem:[#allocation5 + $0x290] sm:$0xff] }
  0x7a   :  { %3233 = vmatpush1.bf16.msra.mxu0 %v7781_v48  ;;  %v269_v40 = vld [vmem:[#allocation5 + $0x648] sm:$0xff] }
  0x7b   :  { %3234 = vmatprep.subr.bf16.mxu0 %v7766_v50  ;;  %v517_v41 = vld [vmem:[#allocation5 + $0xe08] sm:$0xff]  ;;  %v7910_v46 = vcombine.high %v261_v39, %v269_v40  ;;  %v7909_v52 = vcombine.low %v261_v39, %v269_v40  ;;  %v414_v39 = vld [vmem:[#allocation5 + $0xad0] sm:$0xff] }
  0x7c   :  { %3276 = vmatpush1.bf16.msra.mxu1 %v8037_v49  ;;  %v525_v43 = vld [vmem:[#allocation5 + $0xe48] sm:$0xff] }
  0x7d   :  { %3277 = vmatprep.subr.bf16.mxu1 %v8022_v54  ;;  %v245_v47 = vld [vmem:[#allocation5 + $0x588] sm:$0xff]  ;;  %v8166_v50 = vcombine.high %v517_v41, %v525_v43  ;;  %v8165_v53 = vcombine.low %v517_v41, %v525_v43  ;;  %v134_v43 = vld [vmem:[#allocation5 + $0x210] sm:$0xff] }
  0x7e   :  { %3235 = vmatpush1.bf16.msra.mxu0 %v7765_v56  ;;  %v253_v48 = vld [vmem:[#allocation5 + $0x5c8] sm:$0xff] }
  0x7f   :  { %3236 = vmatprep.subr.bf16.mxu0 %v7750_v59  ;;  %v501_v49 = vld [vmem:[#allocation5 + $0xd88] sm:$0xff]  ;;  %v7894_v54 = vcombine.high %v245_v47, %v253_v48  ;;  %v7893_v61 = vcombine.low %v245_v47, %v253_v48  ;;  %v398_v47 = vld [vmem:[#allocation5 + $0xa50] sm:$0xff] }
  0x80   :  { %3278 = vmatpush1.bf16.msra.mxu1 %v8021_v57  ;;  %v509_v51 = vld [vmem:[#allocation5 + $0xdc8] sm:$0xff] }
  0x81   :  { %3279 = vmatprep.subr.bf16.mxu1 %v8006_v0  ;;  %v229_v55 = vld [vmem:[#allocation5 + $0x508] sm:$0xff]  ;;  %v8150_v59 = vcombine.high %v501_v49, %v509_v51  ;;  %v8149_v62 = vcombine.low %v501_v49, %v509_v51  ;;  %v118_v51 = vld [vmem:[#allocation5 + $0x190] sm:$0xff] }
  0x82   :  { %3237 = vmatpush1.bf16.msra.mxu0 %v7749_v2  ;;  %v237_v56 = vld [vmem:[#allocation5 + $0x548] sm:$0xff] }
  0x83   :  { %3238 = vmatprep.subr.bf16.mxu0 %v7734_v4  ;;  %v485_v57 = vld [vmem:[#allocation5 + $0xd08] sm:$0xff]  ;;  %v7878_v0 = vcombine.high %v229_v55, %v237_v56  ;;  %v7877_v6 = vcombine.low %v229_v55, %v237_v56  ;;  %v382_v55 = vld [vmem:[#allocation5 + $0x9d0] sm:$0xff] }
  0x84   :  { %3280 = vmatpush1.bf16.msra.mxu1 %v8005_v3  ;;  %v493_v60 = vld [vmem:[#allocation5 + $0xd48] sm:$0xff] }
  0x85   :  { %3281 = vmatprep.subr.bf16.mxu1 %v7990_v8  ;;  %v213_v1 = vld [vmem:[#allocation5 + $0x488] sm:$0xff]  ;;  %v8134_v4 = vcombine.high %v485_v57, %v493_v60  ;;  %v8133_v7 = vcombine.low %v485_v57, %v493_v60  ;;  %v102_v60 = vld [vmem:[#allocation5 + $0x110] sm:$0xff] }
  0x86   :  { %3239 = vmatpush1.bf16.msra.mxu0 %v7733_v10  ;;  %v221_v2 = vld [vmem:[#allocation5 + $0x4c8] sm:$0xff] }
  0x87   :  { %3240 = vmatprep.subr.bf16.mxu0 %v7718_v12  ;;  %v469_v3 = vld [vmem:[#allocation5 + $0xc88] sm:$0xff]  ;;  %v7862_v8 = vcombine.high %v213_v1, %v221_v2  ;;  %v7861_v14 = vcombine.low %v213_v1, %v221_v2  ;;  %v366_v1 = vld [vmem:[#allocation5 + $0x950] sm:$0xff] }
  0x88   :  { %3282 = vmatpush1.bf16.msra.mxu1 %v7989_v11  ;;  %v477_v5 = vld [vmem:[#allocation5 + $0xcc8] sm:$0xff] }
  0x89   :  { %3283 = vmatprep.subr.bf16.mxu1 %v7974_v16  ;;  %v197_v9 = vld [vmem:[#allocation5 + $0x408] sm:$0xff]  ;;  %v8118_v12 = vcombine.high %v469_v3, %v477_v5  ;;  %v8117_v15 = vcombine.low %v469_v3, %v477_v5  ;;  %v86_v5 = vld [vmem:[#allocation5 + $0x90] sm:$0xff] }
  0x8a   :  { %3241 = vmatpush1.bf16.msra.mxu0 %v7717_v18  ;;  %v205_v10 = vld [vmem:[#allocation5 + $0x448] sm:$0xff]  ;;  %v190_v18 = vld [vmem:[#allocation5 + $0x3d0] sm:$0xff] }
  0x8b   :  { %3242 = vmatprep.subr.bf16.mxu0 %v7958_v21  ;;  %v453_v11 = vld [vmem:[#allocation5 + $0xc08] sm:$0xff]  ;;  %v7846_v16 = vcombine.high %v197_v9, %v205_v10  ;;  %v7845_v24 = vcombine.low %v197_v9, %v205_v10  ;;  %v7831_v32 = vcombine.low %v182_v17, %v190_v18  ;;  %v350_v9 = vld [vmem:[#allocation5 + $0x8d0] sm:$0xff] }
  0x8c   :  { %3284 = vmatpush1.bf16.msra.mxu1 %v7973_v19  ;;  %v461_v13 = vld [vmem:[#allocation5 + $0xc48] sm:$0xff]  ;;  %v438_v19 = vld [vmem:[#allocation5 + $0xb90] sm:$0xff] }
  0x8d   :  { %3285 = vmatprep.subr.bf16.mxu1 %v8214_v26  ;;  %v8102_v21 = vcombine.high %v453_v11, %v461_v13  ;;  %v8101_v25 = vcombine.low %v453_v11, %v461_v13  ;;  %v7832_v26 = vcombine.high %v182_v17, %v190_v18  ;;  %v8087_v33 = vcombine.low %v438_v19, %v446_v22  ;;  %v70_v13 = vld [vmem:[#allocation5 + $0x10] sm:$0xff] }
  0x8e   :  { %3243 = vmatpush2.bf16.msra.mxu0 %v7957_v28  ;;  %v174_v28 = vld [vmem:[#allocation5 + $0x350] sm:$0xff] }
  0x8f   :  { %3244 = vmatprep.subr.bf16.mxu0 %v7942_v30  ;;  %v8088_v30 = vcombine.high %v438_v19, %v446_v22  ;;  %v7815_v40 = vcombine.low %v166_v27, %v174_v28  ;;  %v334_v17 = vld [vmem:[#allocation5 + $0x850] sm:$0xff] }
  0x90   :  { %3286 = vmatpush2.bf16.msra.mxu1 %v8213_v29  ;;  %v422_v29 = vld [vmem:[#allocation5 + $0xb10] sm:$0xff] }
  0x91   :  { %3287 = vmatprep.subr.bf16.mxu1 %v8198_v34  ;;  %v7816_v34 = vcombine.high %v166_v27, %v174_v28  ;;  %v8071_v41 = vcombine.low %v422_v29, %v430_v31  ;;  %v310_v22 = vld [vmem:[#allocation5 + $0x790] sm:$0xff] }
  0x92   :  { %3245 = vmatpush2.bf16.msra.mxu0 %v7941_v36  ;;  %v158_v36 = vld [vmem:[#allocation5 + $0x2d0] sm:$0xff] }
  0x93   :  { %3246 = vmatprep.subr.bf16.mxu0 %v7926_v38  ;;  %v8072_v38 = vcombine.high %v422_v29, %v430_v31  ;;  %v7799_v48 = vcombine.low %v150_v35, %v158_v36  ;;  %v574_v27 = vld [vmem:[#allocation5 + $0xfd0] sm:$0xff] }
  0x94   :  { %3288 = vmatpush2.bf16.msra.mxu1 %v8197_v37  ;;  %v406_v37 = vld [vmem:[#allocation5 + $0xa90] sm:$0xff] }
  0x95   :  { %3289 = vmatprep.subr.bf16.mxu1 %v8182_v42  ;;  %v7800_v42 = vcombine.high %v150_v35, %v158_v36  ;;  %v8055_v49 = vcombine.low %v406_v37, %v414_v39  ;;  %v294_v31 = vld [vmem:[#allocation5 + $0x710] sm:$0xff] }
  0x96   :  { %3247 = vmatpush2.bf16.msra.mxu0 %v7925_v44  ;;  %v142_v44 = vld [vmem:[#allocation5 + $0x250] sm:$0xff] }
  0x97   :  { %3248 = vmatprep.subr.bf16.mxu0 %v7910_v46  ;;  %v8056_v46 = vcombine.high %v406_v37, %v414_v39  ;;  %v7783_v56 = vcombine.low %v134_v43, %v142_v44  ;;  %v558_v35 = vld [vmem:[#allocation5 + $0xf50] sm:$0xff] }
  0x98   :  { %3290 = vmatpush2.bf16.msra.mxu1 %v8181_v45  ;;  %v390_v45 = vld [vmem:[#allocation5 + $0xa10] sm:$0xff] }
  0x99   :  { %3291 = vmatprep.subr.bf16.mxu1 %v8166_v50  ;;  %v7784_v50 = vcombine.high %v134_v43, %v142_v44  ;;  %v8039_v57 = vcombine.low %v390_v45, %v398_v47  ;;  %v278_v39 = vld [vmem:[#allocation5 + $0x690] sm:$0xff] }
  0x9a   :  { %3249 = vmatpush2.bf16.msra.mxu0 %v7909_v52  ;;  %v126_v52 = vld [vmem:[#allocation5 + $0x1d0] sm:$0xff] }
  0x9b   :  { %3250 = vmatprep.subr.bf16.mxu0 %v7894_v54  ;;  %v8040_v54 = vcombine.high %v390_v45, %v398_v47  ;;  %v7767_v2 = vcombine.low %v118_v51, %v126_v52  ;;  %v542_v43 = vld [vmem:[#allocation5 + $0xed0] sm:$0xff] }
  0x9c   :  { %3292 = vmatpush2.bf16.msra.mxu1 %v8165_v53  ;;  %v374_v53 = vld [vmem:[#allocation5 + $0x990] sm:$0xff] }
  0x9d   :  { %3293 = vmatprep.subr.bf16.mxu1 %v8150_v59  ;;  %v7768_v59 = vcombine.high %v118_v51, %v126_v52  ;;  %v8023_v3 = vcombine.low %v374_v53, %v382_v55  ;;  %v262_v47 = vld [vmem:[#allocation5 + $0x610] sm:$0xff] }
  0x9e   :  { %3251 = vmatpush2.bf16.msra.mxu0 %v7893_v61  ;;  %v110_v61 = vld [vmem:[#allocation5 + $0x150] sm:$0xff] }
  0x9f   :  { %3252 = vmatprep.subr.bf16.mxu0 %v7878_v0  ;;  %v8024_v0 = vcombine.high %v374_v53, %v382_v55  ;;  %v7751_v10 = vcombine.low %v102_v60, %v110_v61  ;;  %v526_v51 = vld [vmem:[#allocation5 + $0xe50] sm:$0xff] }
  0xa0   :  { %3294 = vmatpush2.bf16.msra.mxu1 %v8149_v62  ;;  %v358_v62 = vld [vmem:[#allocation5 + $0x910] sm:$0xff] }
  0xa1   :  { %3295 = vmatprep.subr.bf16.mxu1 %v8134_v4  ;;  %v7752_v4 = vcombine.high %v102_v60, %v110_v61  ;;  %v8007_v11 = vcombine.low %v358_v62, %v366_v1  ;;  %v246_v55 = vld [vmem:[#allocation5 + $0x590] sm:$0xff] }
  0xa2   :  { %3253 = vmatpush2.bf16.msra.mxu0 %v7877_v6  ;;  %v94_v6 = vld [vmem:[#allocation5 + $0xd0] sm:$0xff] }
  0xa3   :  { %3254 = vmatprep.subr.bf16.mxu0 %v7862_v8  ;;  %v8008_v8 = vcombine.high %v358_v62, %v366_v1  ;;  %v7735_v18 = vcombine.low %v86_v5, %v94_v6  ;;  %v510_v60 = vld [vmem:[#allocation5 + $0xdd0] sm:$0xff] }
  0xa4   :  { %3296 = vmatpush2.bf16.msra.mxu1 %v8133_v7  ;;  %v342_v7 = vld [vmem:[#allocation5 + $0x890] sm:$0xff] }
  0xa5   :  { %3297 = vmatprep.subr.bf16.mxu1 %v8118_v12  ;;  %v7736_v12 = vcombine.high %v86_v5, %v94_v6  ;;  %v7991_v19 = vcombine.low %v342_v7, %v350_v9  ;;  %v230_v1 = vld [vmem:[#allocation5 + $0x510] sm:$0xff] }
  0xa6   :  { %3255 = vmatpush2.bf16.msra.mxu0 %v7861_v14  ;;  %v78_v14 = vld [vmem:[#allocation5 + $0x50] sm:$0xff] }
  0xa7   :  { %3256 = vmatprep.subr.bf16.mxu0 %v7846_v16  ;;  %v7992_v16 = vcombine.high %v342_v7, %v350_v9  ;;  %v7719_v28 = vcombine.low %v70_v13, %v78_v14  ;;  %v494_v5 = vld [vmem:[#allocation5 + $0xd50] sm:$0xff] }
  0xa8   :  { %3298 = vmatpush2.bf16.msra.mxu1 %v8117_v15  ;;  %v326_v15 = vld [vmem:[#allocation5 + $0x810] sm:$0xff] }
  0xa9   :  { %3299 = vmatprep.subr.bf16.mxu1 %v8102_v21  ;;  %v7720_v21 = vcombine.high %v70_v13, %v78_v14  ;;  %v7975_v29 = vcombine.low %v326_v15, %v334_v17  ;;  %v214_v9 = vld [vmem:[#allocation5 + $0x490] sm:$0xff] }
  0xaa   :  { %3257 = vmatpush2.bf16.msra.mxu0 %v7845_v24  ;;  %v318_v24 = vld [vmem:[#allocation5 + $0x7d0] sm:$0xff] }
  0xab   :  { %3312 = vmatprep.subr.bf16.mxu0 %v7832_v26  ;;  %v7976_v26 = vcombine.high %v326_v15, %v334_v17  ;;  %v7959_v36 = vcombine.low %v310_v22, %v318_v24  ;;  %v478_v13 = vld [vmem:[#allocation5 + $0xcd0] sm:$0xff] }
  0xac   :  { %3300 = vmatpush2.bf16.msra.mxu1 %v8101_v25  ;;  %v566_v25 = vld [vmem:[#allocation5 + $0xf90] sm:$0xff] }
  0xad   :  { %3355 = vmatprep.subr.bf16.mxu1 %v8088_v30  ;;  %3259 = vmatmul.mubr.bf16.vlgmr.msra.gmra.mxu0 %v9663_v20  ;;  %v7960_v30 = vcombine.high %v310_v22, %v318_v24  ;;  %v8215_v37 = vcombine.low %v566_v25, %v574_v27  ;;  %v198_v17 = vld [vmem:[#allocation5 + $0x410] sm:$0xff] }
  0xae   :  { %3313 = vmatpush1.bf16.msra.mxu0 %v7831_v32  ;;  %3344 = vmatprep.mubr.bf16.mxu0 %v9657_v58  ;;  %v302_v32 = vld [vmem:[#allocation5 + $0x750] sm:$0xff] }
  0xaf   :  { %3302 = vmatmul.mubr.bf16.vlgmr.msra.gmra.mxu1 %v9665_v23  ;;  %3314 = vmatprep.subr.bf16.mxu0 %v7816_v34  ;;  %v8216_v34 = vcombine.high %v566_v25, %v574_v27  ;;  %v7943_v44 = vcombine.low %v294_v31, %v302_v32  ;;  %v462_v22 = vld [vmem:[#allocation5 + $0xc50] sm:$0xff]  ;;  %v183_v27 = vld [vmem:[#allocation5 + $0x398] sm:$0xff] }
  0xb0   :  { %3356 = vmatpush1.bf16.msra.mxu1 %v8087_v33  ;;  %3387 = vmatprep.mubr.bf16.mxu1 %v9659_v63  ;;  %v550_v33 = vld [vmem:[#allocation5 + $0xf10] sm:$0xff] }
  0xb1   :  { %3357 = vmatprep.subr.bf16.mxu1 %v8072_v38  ;;  %v7944_v38 = vcombine.high %v294_v31, %v302_v32  ;;  %v8199_v45 = vcombine.low %v550_v33, %v558_v35  ;;  %v447_v31 = vld [vmem:[#allocation5 + $0xbd8] sm:$0xff] }
  0xb2   :  { %3315 = vmatpush1.bf16.msra.mxu0 %v7815_v40  ;;  %v286_v40 = vld [vmem:[#allocation5 + $0x6d0] sm:$0xff] }
  0xb3   :  { %3316 = vmatprep.subr.bf16.mxu0 %v7800_v42  ;;  %v8200_v42 = vcombine.high %v550_v33, %v558_v35  ;;  %v7927_v52 = vcombine.low %v278_v39, %v286_v40  ;;  %v167_v35 = vld [vmem:[#allocation5 + $0x318] sm:$0xff] }
  0xb4   :  { %3358 = vmatpush1.bf16.msra.mxu1 %v8071_v41  ;;  %v534_v41 = vld [vmem:[#allocation5 + $0xe90] sm:$0xff] }
  0xb5   :  { %3359 = vmatprep.subr.bf16.mxu1 %v8056_v46  ;;  %v7928_v46 = vcombine.high %v278_v39, %v286_v40  ;;  %v8183_v53 = vcombine.low %v534_v41, %v542_v43  ;;  %v431_v39 = vld [vmem:[#allocation5 + $0xb58] sm:$0xff] }
  0xb6   :  { %3317 = vmatpush1.bf16.msra.mxu0 %v7799_v48  ;;  %v270_v48 = vld [vmem:[#allocation5 + $0x650] sm:$0xff] }
  0xb7   :  { %3318 = vmatprep.subr.bf16.mxu0 %v7784_v50  ;;  %v8184_v50 = vcombine.high %v534_v41, %v542_v43  ;;  %v7911_v61 = vcombine.low %v262_v47, %v270_v48  ;;  %v151_v43 = vld [vmem:[#allocation5 + $0x298] sm:$0xff] }
  0xb8   :  { %3360 = vmatpush1.bf16.msra.mxu1 %v8055_v49  ;;  %v518_v49 = vld [vmem:[#allocation5 + $0xe10] sm:$0xff] }
  0xb9   :  { %3361 = vmatprep.subr.bf16.mxu1 %v8040_v54  ;;  %v7912_v54 = vcombine.high %v262_v47, %v270_v48  ;;  %v8167_v62 = vcombine.low %v518_v49, %v526_v51  ;;  %v415_v47 = vld [vmem:[#allocation5 + $0xad8] sm:$0xff] }
  0xba   :  { %3319 = vmatpush1.bf16.msra.mxu0 %v7783_v56  ;;  %v254_v56 = vld [vmem:[#allocation5 + $0x5d0] sm:$0xff] }
  0xbb   :  { %3320 = vmatprep.subr.bf16.mxu0 %v7768_v59  ;;  %v8168_v59 = vcombine.high %v518_v49, %v526_v51  ;;  %v7895_v6 = vcombine.low %v246_v55, %v254_v56  ;;  %v135_v51 = vld [vmem:[#allocation5 + $0x218] sm:$0xff] }
  0xbc   :  { %3362 = vmatpush1.bf16.msra.mxu1 %v8039_v57  ;;  %v502_v57 = vld [vmem:[#allocation5 + $0xd90] sm:$0xff] }
  0xbd   :  { %3363 = vmatprep.subr.bf16.mxu1 %v8024_v0  ;;  %v7896_v0 = vcombine.high %v246_v55, %v254_v56  ;;  %v8151_v7 = vcombine.low %v502_v57, %v510_v60  ;;  %v399_v55 = vld [vmem:[#allocation5 + $0xa58] sm:$0xff] }
  0xbe   :  { %3321 = vmatpush1.bf16.msra.mxu0 %v7767_v2  ;;  %v238_v2 = vld [vmem:[#allocation5 + $0x550] sm:$0xff] }
  0xbf   :  { %3322 = vmatprep.subr.bf16.mxu0 %v7752_v4  ;;  %v8152_v4 = vcombine.high %v502_v57, %v510_v60  ;;  %v7879_v14 = vcombine.low %v230_v1, %v238_v2  ;;  %v119_v60 = vld [vmem:[#allocation5 + $0x198] sm:$0xff] }
  0xc0   :  { %3364 = vmatpush1.bf16.msra.mxu1 %v8023_v3  ;;  %v486_v3 = vld [vmem:[#allocation5 + $0xd10] sm:$0xff] }
  0xc1   :  { %3365 = vmatprep.subr.bf16.mxu1 %v8008_v8  ;;  %v7880_v8 = vcombine.high %v230_v1, %v238_v2  ;;  %v8135_v15 = vcombine.low %v486_v3, %v494_v5  ;;  %v383_v1 = vld [vmem:[#allocation5 + $0x9d8] sm:$0xff] }
  0xc2   :  { %3323 = vmatpush1.bf16.msra.mxu0 %v7751_v10  ;;  %v222_v10 = vld [vmem:[#allocation5 + $0x4d0] sm:$0xff] }
  0xc3   :  { %3324 = vmatprep.subr.bf16.mxu0 %v7736_v12  ;;  %v8136_v12 = vcombine.high %v486_v3, %v494_v5  ;;  %v7863_v24 = vcombine.low %v214_v9, %v222_v10  ;;  %v103_v5 = vld [vmem:[#allocation5 + $0x118] sm:$0xff] }
  0xc4   :  { %3366 = vmatpush1.bf16.msra.mxu1 %v8007_v11  ;;  %v470_v11 = vld [vmem:[#allocation5 + $0xc90] sm:$0xff] }
  0xc5   :  { %3367 = vmatprep.subr.bf16.mxu1 %v7992_v16  ;;  %v7864_v16 = vcombine.high %v214_v9, %v222_v10  ;;  %v8119_v25 = vcombine.low %v470_v11, %v478_v13  ;;  %v367_v9 = vld [vmem:[#allocation5 + $0x958] sm:$0xff] }
  0xc6   :  { %3325 = vmatpush1.bf16.msra.mxu0 %v7735_v18  ;;  %v206_v18 = vld [vmem:[#allocation5 + $0x450] sm:$0xff] }
  0xc7   :  { %3326 = vmatprep.subr.bf16.mxu0 %v7720_v21  ;;  %v8120_v21 = vcombine.high %v470_v11, %v478_v13  ;;  %v7847_v32 = vcombine.low %v198_v17, %v206_v18  ;;  %v87_v13 = vld [vmem:[#allocation5 + $0x98] sm:$0xff] }
  0xc8   :  { %3368 = vmatpush1.bf16.msra.mxu1 %v7991_v19  ;;  %v454_v19 = vld [vmem:[#allocation5 + $0xc10] sm:$0xff] }
  0xc9   :  { %3369 = vmatprep.subr.bf16.mxu1 %v7976_v26  ;;  %v7848_v26 = vcombine.high %v198_v17, %v206_v18  ;;  %v8103_v33 = vcombine.low %v454_v19, %v462_v22  ;;  %v351_v17 = vld [vmem:[#allocation5 + $0x8d8] sm:$0xff] }
  0xca   :  { %3327 = vmatpush1.bf16.msra.mxu0 %v7719_v28  ;;  %v191_v28 = vld [vmem:[#allocation5 + $0x3d8] sm:$0xff] }
  0xcb   :  { %3328 = vmatprep.subr.bf16.mxu0 %v7960_v30  ;;  %v8104_v30 = vcombine.high %v454_v19, %v462_v22  ;;  %v7833_v40 = vcombine.low %v183_v27, %v191_v28  ;;  %v71_v22 = vld [vmem:[#allocation5 + $0x18] sm:$0xff] }
  0xcc   :  { %3370 = vmatpush1.bf16.msra.mxu1 %v7975_v29  ;;  %v439_v29 = vld [vmem:[#allocation5 + $0xb98] sm:$0xff] }
  0xcd   :  { %3371 = vmatprep.subr.bf16.mxu1 %v8216_v34  ;;  %v7834_v34 = vcombine.high %v183_v27, %v191_v28  ;;  %v8089_v41 = vcombine.low %v439_v29, %v447_v31  ;;  %v335_v27 = vld [vmem:[#allocation5 + $0x858] sm:$0xff] }
  0xce   :  { %3329 = vmatpush2.bf16.msra.mxu0 %v7959_v36  ;;  %v175_v36 = vld [vmem:[#allocation5 + $0x358] sm:$0xff] }
  0xcf   :  { %3330 = vmatprep.subr.bf16.mxu0 %v7944_v38  ;;  %v8090_v38 = vcombine.high %v439_v29, %v447_v31  ;;  %v7817_v48 = vcombine.low %v167_v35, %v175_v36  ;;  %v311_v31 = vld [vmem:[#allocation5 + $0x798] sm:$0xff] }
  0xd0   :  { %3372 = vmatpush2.bf16.msra.mxu1 %v8215_v37  ;;  %v423_v37 = vld [vmem:[#allocation5 + $0xb18] sm:$0xff] }
  0xd1   :  { %3373 = vmatprep.subr.bf16.mxu1 %v8200_v42  ;;  %v7818_v42 = vcombine.high %v167_v35, %v175_v36  ;;  %v8073_v49 = vcombine.low %v423_v37, %v431_v39  ;;  %v575_v35 = vld [vmem:[#allocation5 + $0xfd8] sm:$0xff] }
  0xd2   :  { %3331 = vmatpush2.bf16.msra.mxu0 %v7943_v44  ;;  %v159_v44 = vld [vmem:[#allocation5 + $0x2d8] sm:$0xff] }
  0xd3   :  { %3332 = vmatprep.subr.bf16.mxu0 %v7928_v46  ;;  %v8074_v46 = vcombine.high %v423_v37, %v431_v39  ;;  %v7801_v56 = vcombine.low %v151_v43, %v159_v44  ;;  %v295_v39 = vld [vmem:[#allocation5 + $0x718] sm:$0xff] }
  0xd4   :  { %3374 = vmatpush2.bf16.msra.mxu1 %v8199_v45  ;;  %v407_v45 = vld [vmem:[#allocation5 + $0xa98] sm:$0xff] }
  0xd5   :  { %3375 = vmatprep.subr.bf16.mxu1 %v8184_v50  ;;  %v7802_v50 = vcombine.high %v151_v43, %v159_v44  ;;  %v8057_v57 = vcombine.low %v407_v45, %v415_v47  ;;  %v559_v43 = vld [vmem:[#allocation5 + $0xf58] sm:$0xff] }
  0xd6   :  { %3333 = vmatpush2.bf16.msra.mxu0 %v7927_v52  ;;  %v143_v52 = vld [vmem:[#allocation5 + $0x258] sm:$0xff] }
  0xd7   :  { %3334 = vmatprep.subr.bf16.mxu0 %v7912_v54  ;;  %v8058_v54 = vcombine.high %v407_v45, %v415_v47  ;;  %v7785_v2 = vcombine.low %v135_v51, %v143_v52  ;;  %v279_v47 = vld [vmem:[#allocation5 + $0x698] sm:$0xff] }
  0xd8   :  { %3376 = vmatpush2.bf16.msra.mxu1 %v8183_v53  ;;  %v391_v53 = vld [vmem:[#allocation5 + $0xa18] sm:$0xff] }
  0xd9   :  { %3377 = vmatprep.subr.bf16.mxu1 %v8168_v59  ;;  %v7786_v59 = vcombine.high %v135_v51, %v143_v52  ;;  %v8041_v3 = vcombine.low %v391_v53, %v399_v55  ;;  %v543_v51 = vld [vmem:[#allocation5 + $0xed8] sm:$0xff] }
  0xda   :  { %3335 = vmatpush2.bf16.msra.mxu0 %v7911_v61  ;;  %v127_v61 = vld [vmem:[#allocation5 + $0x1d8] sm:$0xff] }
  0xdb   :  { %3336 = vmatprep.subr.bf16.mxu0 %v7896_v0  ;;  %v8042_v0 = vcombine.high %v391_v53, %v399_v55  ;;  %v7769_v10 = vcombine.low %v119_v60, %v127_v61  ;;  %v263_v55 = vld [vmem:[#allocation5 + $0x618] sm:$0xff] }
  0xdc   :  { %3378 = vmatpush2.bf16.msra.mxu1 %v8167_v62  ;;  %v375_v62 = vld [vmem:[#allocation5 + $0x998] sm:$0xff] }
  0xdd   :  { %3379 = vmatprep.subr.bf16.mxu1 %v8152_v4  ;;  %v7770_v4 = vcombine.high %v119_v60, %v127_v61  ;;  %v8025_v11 = vcombine.low %v375_v62, %v383_v1  ;;  %v527_v60 = vld [vmem:[#allocation5 + $0xe58] sm:$0xff] }
  0xde   :  { %3337 = vmatpush2.bf16.msra.mxu0 %v7895_v6  ;;  %v111_v6 = vld [vmem:[#allocation5 + $0x158] sm:$0xff] }
  0xdf   :  { %3338 = vmatprep.subr.bf16.mxu0 %v7880_v8  ;;  %v8026_v8 = vcombine.high %v375_v62, %v383_v1  ;;  %v7753_v18 = vcombine.low %v103_v5, %v111_v6  ;;  %v247_v1 = vld [vmem:[#allocation5 + $0x598] sm:$0xff] }
  0xe0   :  { %3380 = vmatpush2.bf16.msra.mxu1 %v8151_v7  ;;  %v359_v7 = vld [vmem:[#allocation5 + $0x918] sm:$0xff] }
  0xe1   :  { %3381 = vmatprep.subr.bf16.mxu1 %v8136_v12  ;;  %v7754_v12 = vcombine.high %v103_v5, %v111_v6  ;;  %v8009_v19 = vcombine.low %v359_v7, %v367_v9  ;;  %v511_v5 = vld [vmem:[#allocation5 + $0xdd8] sm:$0xff] }
  0xe2   :  { %3339 = vmatpush2.bf16.msra.mxu0 %v7879_v14  ;;  %v95_v14 = vld [vmem:[#allocation5 + $0xd8] sm:$0xff] }
  0xe3   :  { %3340 = vmatprep.subr.bf16.mxu0 %v7864_v16  ;;  %v8010_v16 = vcombine.high %v359_v7, %v367_v9  ;;  %v7737_v28 = vcombine.low %v87_v13, %v95_v14  ;;  %v231_v9 = vld [vmem:[#allocation5 + $0x518] sm:$0xff] }
  0xe4   :  { %3382 = vmatpush2.bf16.msra.mxu1 %v8135_v15  ;;  %v343_v15 = vld [vmem:[#allocation5 + $0x898] sm:$0xff] }
  0xe5   :  { %3383 = vmatprep.subr.bf16.mxu1 %v8120_v21  ;;  %v7738_v21 = vcombine.high %v87_v13, %v95_v14  ;;  %v7993_v29 = vcombine.low %v343_v15, %v351_v17  ;;  %v495_v13 = vld [vmem:[#allocation5 + $0xd58] sm:$0xff] }
  0xe6   :  { %3341 = vmatpush2.bf16.msra.mxu0 %v7863_v24  ;;  %v79_v24 = vld [vmem:[#allocation5 + $0x58] sm:$0xff] }
  0xe7   :  { %3342 = vmatprep.subr.bf16.mxu0 %v7848_v26  ;;  %v7994_v26 = vcombine.high %v343_v15, %v351_v17  ;;  %v7721_v36 = vcombine.low %v71_v22, %v79_v24  ;;  %v215_v17 = vld [vmem:[#allocation5 + $0x498] sm:$0xff] }
  0xe8   :  { %3384 = vmatpush2.bf16.msra.mxu1 %v8119_v25  ;;  %v327_v25 = vld [vmem:[#allocation5 + $0x818] sm:$0xff] }
  0xe9   :  { %3385 = vmatprep.subr.bf16.mxu1 %v8104_v30  ;;  %v7722_v30 = vcombine.high %v71_v22, %v79_v24  ;;  %v7977_v37 = vcombine.low %v327_v25, %v335_v27  ;;  %v479_v22 = vld [vmem:[#allocation5 + $0xcd8] sm:$0xff] }
  0xea   :  { %3343 = vmatpush2.bf16.msra.mxu0 %v7847_v32  ;;  %v319_v32 = vld [vmem:[#allocation5 + $0x7d8] sm:$0xff] }
  0xeb   :  { %3398 = vmatprep.subr.bf16.mxu0 %v7834_v34  ;;  %v7978_v34 = vcombine.high %v327_v25, %v335_v27  ;;  %v7961_v44 = vcombine.low %v311_v31, %v319_v32  ;;  %v199_v27 = vld [vmem:[#allocation5 + $0x418] sm:$0xff] }
  0xec   :  { %3386 = vmatpush2.bf16.msra.mxu1 %v8103_v33  ;;  %v567_v33 = vld [vmem:[#allocation5 + $0xf98] sm:$0xff] }
  0xed   :  { %3441 = vmatprep.subr.bf16.mxu1 %v8090_v38  ;;  %3345 = vmatmul.mubr.bf16.vlgmr.msra.gmra.mxu0 %v9663_v20  ;;  %v7962_v38 = vcombine.high %v311_v31, %v319_v32  ;;  %v8217_v45 = vcombine.low %v567_v33, %v575_v35  ;;  %v463_v31 = vld [vmem:[#allocation5 + $0xc58] sm:$0xff] }
  0xee   :  { %3399 = vmatpush1.bf16.msra.mxu0 %v7833_v40  ;;  %3430 = vmatprep.mubr.bf16.mxu0 %v9657_v58  ;;  %v303_v40 = vld [vmem:[#allocation5 + $0x758] sm:$0xff] }
  0xef   :  { %3388 = vmatmul.mubr.bf16.vlgmr.msra.gmra.mxu1 %v9665_v23  ;;  %3400 = vmatprep.subr.bf16.mxu0 %v7818_v42  ;;  %v8218_v42 = vcombine.high %v567_v33, %v575_v35  ;;  %v7945_v52 = vcombine.low %v295_v39, %v303_v40  ;;  %v184_v35 = vld [vmem:[#allocation5 + $0x3a0] sm:$0xff] }
  0xf0   :  { %3442 = vmatpush1.bf16.msra.mxu1 %v8089_v41  ;;  %3473 = vmatprep.mubr.bf16.mxu1 %v9659_v63  ;;  %v551_v41 = vld [vmem:[#allocation5 + $0xf18] sm:$0xff] }
  0xf1   :  { %3443 = vmatprep.subr.bf16.mxu1 %v8074_v46  ;;  %v7946_v46 = vcombine.high %v295_v39, %v303_v40  ;;  %v8201_v53 = vcombine.low %v551_v41, %v559_v43  ;;  %v448_v39 = vld [vmem:[#allocation5 + $0xbe0] sm:$0xff] }
  0xf2   :  { %3401 = vmatpush1.bf16.msra.mxu0 %v7817_v48  ;;  %v287_v48 = vld [vmem:[#allocation5 + $0x6d8] sm:$0xff] }
  0xf3   :  { %3402 = vmatprep.subr.bf16.mxu0 %v7802_v50  ;;  %v8202_v50 = vcombine.high %v551_v41, %v559_v43  ;;  %v7929_v61 = vcombine.low %v279_v47, %v287_v48  ;;  %v168_v43 = vld [vmem:[#allocation5 + $0x320] sm:$0xff] }
  0xf4   :  { %3444 = vmatpush1.bf16.msra.mxu1 %v8073_v49  ;;  %v535_v49 = vld [vmem:[#allocation5 + $0xe98] sm:$0xff] }
  0xf5   :  { %3445 = vmatprep.subr.bf16.mxu1 %v8058_v54  ;;  %v7930_v54 = vcombine.high %v279_v47, %v287_v48  ;;  %v8185_v62 = vcombine.low %v535_v49, %v543_v51  ;;  %v432_v47 = vld [vmem:[#allocation5 + $0xb60] sm:$0xff] }
  0xf6   :  { %3403 = vmatpush1.bf16.msra.mxu0 %v7801_v56  ;;  %v271_v56 = vld [vmem:[#allocation5 + $0x658] sm:$0xff] }
  0xf7   :  { %3404 = vmatprep.subr.bf16.mxu0 %v7786_v59  ;;  %v8186_v59 = vcombine.high %v535_v49, %v543_v51  ;;  %v7913_v6 = vcombine.low %v263_v55, %v271_v56  ;;  %v152_v51 = vld [vmem:[#allocation5 + $0x2a0] sm:$0xff] }
  0xf8   :  { %3446 = vmatpush1.bf16.msra.mxu1 %v8057_v57  ;;  %v519_v57 = vld [vmem:[#allocation5 + $0xe18] sm:$0xff] }
  0xf9   :  { %3447 = vmatprep.subr.bf16.mxu1 %v8042_v0  ;;  %v7914_v0 = vcombine.high %v263_v55, %v271_v56  ;;  %v8169_v7 = vcombine.low %v519_v57, %v527_v60  ;;  %v416_v55 = vld [vmem:[#allocation5 + $0xae0] sm:$0xff] }
  0xfa   :  { %3405 = vmatpush1.bf16.msra.mxu0 %v7785_v2  ;;  %v255_v2 = vld [vmem:[#allocation5 + $0x5d8] sm:$0xff] }
  0xfb   :  { %3406 = vmatprep.subr.bf16.mxu0 %v7770_v4  ;;  %v8170_v4 = vcombine.high %v519_v57, %v527_v60  ;;  %v7897_v14 = vcombine.low %v247_v1, %v255_v2 }
  0xfc   :  { %3448 = vmatpush1.bf16.msra.mxu1 %v8041_v3  ;;  %v503_v3 = vld [vmem:[#allocation5 + $0xd98] sm:$0xff] }
  0xfd   :  { %3449 = vmatprep.subr.bf16.mxu1 %v8026_v8  ;;  %v7898_v8 = vcombine.high %v247_v1, %v255_v2  ;;  %v8153_v15 = vcombine.low %v503_v3, %v511_v5  ;;  %v136_v1 = vld [vmem:[#allocation5 + $0x220] sm:$0xff] }
  0xfe   :  { %3407 = vmatpush1.bf16.msra.mxu0 %v7769_v10  ;;  %v239_v10 = vld [vmem:[#allocation5 + $0x558] sm:$0xff]  ;;  %v144_v2 = vld [vmem:[#allocation5 + $0x260] sm:$0xff] }
  0xff   :  { %3408 = vmatprep.subr.bf16.mxu0 %v7754_v12  ;;  %v8154_v12 = vcombine.high %v503_v3, %v511_v5  ;;  %v7881_v24 = vcombine.low %v231_v9, %v239_v10  ;;  %v392_v3 = vld [vmem:[#allocation5 + $0xa20] sm:$0xff] }
 0x100   :  { %3450 = vmatpush1.bf16.msra.mxu1 %v8025_v11  ;;  %v487_v11 = vld [vmem:[#allocation5 + $0xd18] sm:$0xff] }
 0x101   :  { %3451 = vmatprep.subr.bf16.mxu1 %v8010_v16  ;;  %v7882_v16 = vcombine.high %v231_v9, %v239_v10  ;;  %v8137_v25 = vcombine.low %v487_v11, %v495_v13 }
 0x102   :  { %3409 = vmatpush1.bf16.msra.mxu0 %v7753_v18  ;;  %v223_v18 = vld [vmem:[#allocation5 + $0x4d8] sm:$0xff] }
 0x103   :  { %3410 = vmatprep.subr.bf16.mxu0 %v7738_v21  ;;  %v8138_v21 = vcombine.high %v487_v11, %v495_v13  ;;  %v7865_v32 = vcombine.low %v215_v17, %v223_v18  ;;  %v120_v13 = vld [vmem:[#allocation5 + $0x1a0] sm:$0xff] }
 0x104   :  { %3452 = vmatpush1.bf16.msra.mxu1 %v8009_v19  ;;  %v471_v19 = vld [vmem:[#allocation5 + $0xc98] sm:$0xff] }
 0x105   :  { %3453 = vmatprep.subr.bf16.mxu1 %v7994_v26  ;;  %v7866_v26 = vcombine.high %v215_v17, %v223_v18  ;;  %v8121_v33 = vcombine.low %v471_v19, %v479_v22  ;;  %v384_v17 = vld [vmem:[#allocation5 + $0x9e0] sm:$0xff] }
 0x106   :  { %3411 = vmatpush1.bf16.msra.mxu0 %v7737_v28  ;;  %v207_v28 = vld [vmem:[#allocation5 + $0x458] sm:$0xff] }
 0x107   :  { %3412 = vmatprep.subr.bf16.mxu0 %v7722_v30  ;;  %v8122_v30 = vcombine.high %v471_v19, %v479_v22  ;;  %v7849_v40 = vcombine.low %v199_v27, %v207_v28 }
 0x108   :  { %3454 = vmatpush1.bf16.msra.mxu1 %v7993_v29  ;;  %v455_v29 = vld [vmem:[#allocation5 + $0xc18] sm:$0xff] }
 0x109   :  { %3455 = vmatprep.subr.bf16.mxu1 %v7978_v34  ;;  %v7850_v34 = vcombine.high %v199_v27, %v207_v28  ;;  %v8105_v41 = vcombine.low %v455_v29, %v463_v31  ;;  %v112_v27 = vld [vmem:[#allocation5 + $0x160] sm:$0xff] }
 0x10a   :  { %3413 = vmatpush1.bf16.msra.mxu0 %v7721_v36  ;;  %v192_v36 = vld [vmem:[#allocation5 + $0x3e0] sm:$0xff] }
 0x10b   :  { %3414 = vmatprep.subr.bf16.mxu0 %v7962_v38  ;;  %v8106_v38 = vcombine.high %v455_v29, %v463_v31  ;;  %v7835_v48 = vcombine.low %v184_v35, %v192_v36  ;;  %v360_v28 = vld [vmem:[#allocation5 + $0x920] sm:$0xff] }
 0x10c   :  { %3456 = vmatpush1.bf16.msra.mxu1 %v7977_v37  ;;  %v440_v37 = vld [vmem:[#allocation5 + $0xba0] sm:$0xff] }
 0x10d   :  { %3457 = vmatprep.subr.bf16.mxu1 %v8218_v42  ;;  %v7836_v42 = vcombine.high %v184_v35, %v192_v36  ;;  %v8091_v49 = vcombine.low %v440_v37, %v448_v39  ;;  %v96_v35 = vld [vmem:[#allocation5 + $0xe0] sm:$0xff] }
 0x10e   :  { %3415 = vmatpush2.bf16.msra.mxu0 %v7961_v44  ;;  %v176_v44 = vld [vmem:[#allocation5 + $0x360] sm:$0xff] }
 0x10f   :  { %3416 = vmatprep.subr.bf16.mxu0 %v7946_v46  ;;  %v8092_v46 = vcombine.high %v440_v37, %v448_v39  ;;  %v344_v36 = vld [vmem:[#allocation5 + $0x8a0] sm:$0xff] }
 0x110   :  { %3458 = vmatpush2.bf16.msra.mxu1 %v8217_v45  ;;  %v424_v45 = vld [vmem:[#allocation5 + $0xb20] sm:$0xff] }
 0x111   :  { %3459 = vmatprep.subr.bf16.mxu1 %v8202_v50  ;;  %v7820_v50 = vcombine.high %v168_v43, %v176_v44 }
 0x112   :  { %3417 = vmatpush2.bf16.msra.mxu0 %v7945_v52  ;;  %v160_v52 = vld [vmem:[#allocation5 + $0x2e0] sm:$0xff] }
 0x113   :  { %3418 = vmatprep.subr.bf16.mxu0 %v7930_v54  ;;  %v8076_v54 = vcombine.high %v424_v45, %v432_v47  ;;  %v7803_v9 = vcombine.low %v152_v51, %v160_v52 }
 0x114   :  { %3460 = vmatpush2.bf16.msra.mxu1 %v8201_v53  ;;  %v408_v53 = vld [vmem:[#allocation5 + $0xaa0] sm:$0xff] }
 0x115   :  { %3461 = vmatprep.subr.bf16.mxu1 %v8186_v59  ;;  %v7819_v59 = vcombine.low %v168_v43, %v176_v44  ;;  %v8060_v5 = vcombine.high %v408_v53, %v416_v55  ;;  %v8059_v11 = vcombine.low %v408_v53, %v416_v55  ;;  %v80_v43 = vld [vmem:[#allocation5 + $0x60] sm:$0xff] }
 0x116   :  { %3419 = vmatpush2.bf16.msra.mxu0 %v7929_v61  ;;  %v328_v44 = vld [vmem:[#allocation5 + $0x820] sm:$0xff] }
 0x117   :  { %3420 = vmatprep.subr.bf16.mxu0 %v7914_v0  ;;  %v7804_v0 = vcombine.high %v152_v51, %v160_v52  ;;  %v320_v51 = vld [vmem:[#allocation5 + $0x7e0] sm:$0xff] }
 0x118   :  { %3462 = vmatpush2.bf16.msra.mxu1 %v8185_v62  ;;  %v8075_v62 = vcombine.low %v424_v45, %v432_v47  ;;  %v568_v52 = vld [vmem:[#allocation5 + $0xfa0] sm:$0xff] }
 0x119   :  { %3463 = vmatprep.subr.bf16.mxu1 %v8170_v4 }
 0x11a   :  { %3421 = vmatpush2.bf16.msra.mxu0 %v7913_v6  ;;  %v400_v6 = vld [vmem:[#allocation5 + $0xa60] sm:$0xff] }
 0x11b   :  { %3422 = vmatprep.subr.bf16.mxu0 %v7898_v8 }
 0x11c   :  { %3464 = vmatpush2.bf16.msra.mxu1 %v8169_v7 }
 0x11d   :  { %3465 = vmatprep.subr.bf16.mxu1 %v8154_v12  ;;  %v7788_v12 = vcombine.high %v136_v1, %v144_v2 }
 0x11e   :  { %3423 = vmatpush2.bf16.msra.mxu0 %v7897_v14  ;;  %v128_v14 = vld [vmem:[#allocation5 + $0x1e0] sm:$0xff] }
 0x11f   :  { %3424 = vmatprep.subr.bf16.mxu0 %v7882_v16  ;;  %v8044_v16 = vcombine.high %v392_v3, %v400_v6  ;;  %v7771_v31 = vcombine.low %v120_v13, %v128_v14 }
 0x120   :  { %3466 = vmatpush2.bf16.msra.mxu1 %v8153_v15  ;;  %v376_v15 = vld [vmem:[#allocation5 + $0x9a0] sm:$0xff] }
 0x121   :  { %3467 = vmatprep.subr.bf16.mxu1 %v8138_v21  ;;  %v7787_v21 = vcombine.low %v136_v1, %v144_v2  ;;  %v8028_v29 = vcombine.high %v376_v15, %v384_v17  ;;  %v560_v1 = vld [vmem:[#allocation5 + $0xf60] sm:$0xff] }
 0x122   :  { %3425 = vmatpush2.bf16.msra.mxu0 %v7881_v24  ;;  %v8043_v24 = vcombine.low %v392_v3, %v400_v6  ;;  %v280_v6 = vld [vmem:[#allocation5 + $0x6a0] sm:$0xff] }
 0x123   :  { %3426 = vmatprep.subr.bf16.mxu0 %v7866_v26  ;;  %v104_v26 = vld [vmem:[#allocation5 + $0x120] sm:$0xff] }
 0x124   :  { %3468 = vmatpush2.bf16.msra.mxu1 %v8137_v25  ;;  %v7772_v25 = vcombine.high %v120_v13, %v128_v14  ;;  %v7755_v39 = vcombine.low %v104_v26, %v112_v27  ;;  %v264_v14 = vld [vmem:[#allocation5 + $0x620] sm:$0xff] }
 0x125   :  { %3469 = vmatprep.subr.bf16.mxu1 %v8122_v30  ;;  %v368_v30 = vld [vmem:[#allocation5 + $0x960] sm:$0xff] }
 0x126   :  { %3427 = vmatpush2.bf16.msra.mxu0 %v7865_v32  ;;  %v8027_v32 = vcombine.low %v376_v15, %v384_v17  ;;  %v8012_v37 = vcombine.high %v360_v28, %v368_v30  ;;  %v272_v15 = vld [vmem:[#allocation5 + $0x660] sm:$0xff] }
 0x127   :  { %3428 = vmatprep.subr.bf16.mxu0 %v7850_v34  ;;  %v88_v34 = vld [vmem:[#allocation5 + $0xa0] sm:$0xff] }
 0x128   :  { %3470 = vmatpush2.bf16.msra.mxu1 %v8121_v33  ;;  %v7756_v33 = vcombine.high %v104_v26, %v112_v27  ;;  %v7739_v47 = vcombine.low %v88_v34, %v96_v35  ;;  %v256_v26 = vld [vmem:[#allocation5 + $0x5e0] sm:$0xff] }
 0x129   :  { %3471 = vmatprep.subr.bf16.mxu1 %v8106_v38  ;;  %v352_v38 = vld [vmem:[#allocation5 + $0x8e0] sm:$0xff] }
 0x12a   :  { %3429 = vmatpush2.bf16.msra.mxu0 %v7849_v40  ;;  %v8011_v40 = vcombine.low %v360_v28, %v368_v30  ;;  %v7996_v45 = vcombine.high %v344_v36, %v352_v38  ;;  %v504_v27 = vld [vmem:[#allocation5 + $0xda0] sm:$0xff]  ;;  %v7915_v30 = vcombine.low %v264_v14, %v272_v15 }
 0x12b   :  { %3484 = vmatprep.subr.bf16.mxu0 %v7836_v42  ;;  %v72_v42 = vld [vmem:[#allocation5 + $0x20] sm:$0xff] }
 0x12c   :  { %3472 = vmatpush2.bf16.msra.mxu1 %v8105_v41  ;;  %v7740_v41 = vcombine.high %v88_v34, %v96_v35  ;;  %v7723_v55 = vcombine.low %v72_v42, %v80_v43  ;;  %v240_v34 = vld [vmem:[#allocation5 + $0x560] sm:$0xff] }
 0x12d   :  { %3527 = vmatprep.subr.bf16.mxu1 %v8092_v46  ;;  %v3174_v56 = vpop.f32.mrf.mxu0  ;;  %3431 = vmatmul.mubr.bf16.vlgmr.msra.gmra.mxu0 %v9663_v20  ;;  %v336_v46 = vld [vmem:[#allocation5 + $0x860] sm:$0xff] }
 0x12e   :  { %3485 = vmatpush1.bf16.msra.mxu0 %v7835_v48  ;;  %3516 = vmatprep.mubr.bf16.mxu0 %v9657_v58  ;;  %v7995_v48 = vcombine.low %v344_v36, %v352_v38  ;;  %v7980_v53 = vcombine.high %v328_v44, %v336_v46  ;;  %v488_v35 = vld [vmem:[#allocation5 + $0xd20] sm:$0xff] }
 0x12f   :  { %v3217_v57 = vpop.f32.mrf.mxu1  ;;  %3474 = vmatmul.mubr.bf16.vlgmr.msra.gmra.mxu1 %v9665_v23  ;;  %v9681_v61 = vpop.f32.mrf.mxu0  ;;  %3486 = vmatprep.subr.bf16.mxu0 %v7820_v50  ;;  %v312_v50 = vld [vmem:[#allocation5 + $0x7a0] sm:$0xff] }
 0x130   :  { %v3218_v60 = vadd.f32 %v3217_v57, %v3174_v56  ;;  %3528 = vmatpush1.bf16.msra.mxu1 %v8091_v49  ;;  %3559 = vmatprep.mubr.bf16.mxu1 %v9659_v63  ;;  %v7724_v49 = vcombine.high %v72_v42, %v80_v43  ;;  %v7979_v56 = vcombine.low %v328_v44, %v336_v46  ;;  %v224_v42 = vld [vmem:[#allocation5 + $0x4e0] sm:$0xff] }
 0x131   :  { %v9683_v4 = vpop.f32.mrf.mxu1  ;;  %3529 = vmatprep.subr.bf16.mxu1 %v8076_v54  ;;  %v3178_v7 = vpop.f32.mrf.mxu0  ;;  %v576_v54 = vld [vmem:[#allocation5 + $0xfe0] sm:$0xff]  ;;  %v7964_v57 = vcombine.high %v312_v50, %v320_v51  ;;  %v7963_v2 = vcombine.low %v312_v50, %v320_v51 }
 0x132   :  { %3487 = vmatpush1.bf16.msra.mxu0 %v7819_v59  ;;  %v3828_v18 = vmax.f32 %v3218_v60, 0.0  ;;  %v296_v59 = vld [vmem:[#allocation5 + $0x720] sm:$0xff]  ;;  %v8219_v3 = vcombine.low %v568_v52, %v576_v54 }
 0x133   :  { %v3221_v8 = vpop.f32.mrf.mxu1  ;;  %3488 = vmatprep.subr.bf16.mxu0 %v7804_v0  ;;  %v304_v60 = vld [vmem:[#allocation5 + $0x760] sm:$0xff]  ;;  %v8220_v0 = vcombine.high %v568_v52, %v576_v54 }
 0x134   :  { %v3222_v10 = vadd.f32 %v3221_v8, %v3178_v7  ;;  %3530 = vmatpush1.bf16.msra.mxu1 %v8075_v62  ;;  %v552_v62 = vld [vmem:[#allocation5 + $0xf20] sm:$0xff] }
 0x135   :  { %3531 = vmatprep.subr.bf16.mxu1 %v8060_v5  ;;  %v7948_v5 = vcombine.high %v296_v59, %v304_v60  ;;  %v288_v7 = vld [vmem:[#allocation5 + $0x6e0] sm:$0xff] }
 0x136   :  { %v3844_v19 = vmax.f32 %v3222_v10, 0.0  ;;  %3489 = vmatpush1.bf16.msra.mxu0 %v7803_v9  ;;  %v536_v8 = vld [vmem:[#allocation5 + $0xea0] sm:$0xff]  ;;  %v8204_v9 = vcombine.high %v552_v62, %v560_v1  ;;  %v7932_v13 = vcombine.high %v280_v6, %v288_v7 }
 0x137   :  { %3490 = vmatprep.subr.bf16.mxu0 %v7788_v12  ;;  %v544_v10 = vld [vmem:[#allocation5 + $0xee0] sm:$0xff]  ;;  %v8203_v12 = vcombine.low %v552_v62, %v560_v1 }
 0x138   :  { %v9687_v22 = vpack.c.bf16 %v3844_v19, %v3828_v18  ;;  %3532 = vmatpush1.bf16.msra.mxu1 %v8059_v11  ;;  %v7947_v11 = vcombine.low %v296_v59, %v304_v60  ;;  %v8188_v17 = vcombine.high %v536_v8, %v544_v10  ;;  %v528_v18 = vld [vmem:[#allocation5 + $0xe60] sm:$0xff]  ;;  %v7931_v19 = vcombine.low %v280_v6, %v288_v7  ;;  %v193_v59 = vld [vmem:[#allocation5 + $0x3e8] sm:$0xff] }
 0x139   :  { %3533 = vmatprep.subr.bf16.mxu1 %v8044_v16  ;;  %v520_v16 = vld [vmem:[#allocation5 + $0xe20] sm:$0xff]  ;;  %v441_v60 = vld [vmem:[#allocation5 + $0xba8] sm:$0xff] }
 0x13a   :  { %3491 = vmatpush1.bf16.msra.mxu0 %v7787_v21  ;;  %v8187_v21 = vcombine.low %v536_v8, %v544_v10  ;;  %v8172_v28 = vcombine.high %v520_v16, %v528_v18  ;;  %v472_v43 = vld [vmem:[#allocation5 + $0xca0] sm:$0xff]  ;;  %v177_v6 = vld [vmem:[#allocation5 + $0x368] sm:$0xff] }
 0x13b   :  { %3492 = vmatprep.subr.bf16.mxu0 %v7772_v25  ;;  %v248_v25 = vld [vmem:[#allocation5 + $0x5a0] sm:$0xff]  ;;  %v425_v7 = vld [vmem:[#allocation5 + $0xb28] sm:$0xff] }
 0x13c   :  { %3534 = vmatpush1.bf16.msra.mxu1 %v8043_v24  ;;  %v7916_v24 = vcombine.high %v264_v14, %v272_v15  ;;  %v7899_v38 = vcombine.low %v248_v25, %v256_v26  ;;  %v208_v50 = vld [vmem:[#allocation5 + $0x460] sm:$0xff]  ;;  %v153_v14 = vld [vmem:[#allocation5 + $0x2a8] sm:$0xff] }
 0x13d   :  { %3535 = vmatprep.subr.bf16.mxu1 %v8028_v29  ;;  %v512_v29 = vld [vmem:[#allocation5 + $0xde0] sm:$0xff]  ;;  %v161_v15 = vld [vmem:[#allocation5 + $0x2e8] sm:$0xff] }
 0x13e   :  { %3493 = vmatpush1.bf16.msra.mxu0 %v7771_v31  ;;  %v8171_v31 = vcombine.low %v520_v16, %v528_v18  ;;  %v8156_v36 = vcombine.high %v504_v27, %v512_v29  ;;  %v456_v51 = vld [vmem:[#allocation5 + $0xc20] sm:$0xff]  ;;  %v409_v16 = vld [vmem:[#allocation5 + $0xaa8] sm:$0xff] }
 0x13f   :  { %3494 = vmatprep.subr.bf16.mxu0 %v7756_v33  ;;  %v232_v33 = vld [vmem:[#allocation5 + $0x520] sm:$0xff] }
 0x140   :  { %3536 = vmatpush1.bf16.msra.mxu1 %v8027_v32  ;;  %v7900_v32 = vcombine.high %v248_v25, %v256_v26  ;;  %v7883_v46 = vcombine.low %v232_v33, %v240_v34 }
 0x141   :  { %3537 = vmatprep.subr.bf16.mxu1 %v8012_v37  ;;  %v496_v37 = vld [vmem:[#allocation5 + $0xd60] sm:$0xff] }
 0x142   :  { %3495 = vmatpush1.bf16.msra.mxu0 %v7755_v39  ;;  %v8155_v39 = vcombine.low %v504_v27, %v512_v29  ;;  %v8140_v44 = vcombine.high %v488_v35, %v496_v37  ;;  %v7806_v29 = vcombine.high %v153_v14, %v161_v15 }
 0x143   :  { %3496 = vmatprep.subr.bf16.mxu0 %v7740_v41  ;;  %v216_v41 = vld [vmem:[#allocation5 + $0x4a0] sm:$0xff] }
 0x144   :  { %3538 = vmatpush1.bf16.msra.mxu1 %v8011_v40  ;;  %v7884_v40 = vcombine.high %v232_v33, %v240_v34  ;;  %v7867_v54 = vcombine.low %v216_v41, %v224_v42  ;;  %v145_v33 = vld [vmem:[#allocation5 + $0x268] sm:$0xff] }
 0x145   :  { %3539 = vmatprep.subr.bf16.mxu1 %v7996_v45  ;;  %v480_v45 = vld [vmem:[#allocation5 + $0xce0] sm:$0xff] }
 0x146   :  { %3497 = vmatpush1.bf16.msra.mxu0 %v7739_v47  ;;  %v8139_v47 = vcombine.low %v488_v35, %v496_v37  ;;  %v8124_v52 = vcombine.high %v472_v43, %v480_v45  ;;  %v393_v35 = vld [vmem:[#allocation5 + $0xa28] sm:$0xff] }
 0x147   :  { %3498 = vmatprep.subr.bf16.mxu0 %v7724_v49  ;;  %v200_v49 = vld [vmem:[#allocation5 + $0x420] sm:$0xff] }
 0x148   :  { %3540 = vmatpush1.bf16.msra.mxu1 %v7995_v48  ;;  %v7868_v48 = vcombine.high %v216_v41, %v224_v42  ;;  %v7851_v1 = vcombine.low %v200_v49, %v208_v50 }
 0x149   :  { %3541 = vmatprep.subr.bf16.mxu1 %v7980_v53  ;;  %v464_v53 = vld [vmem:[#allocation5 + $0xc60] sm:$0xff] }
 0x14a   :  { %3499 = vmatpush1.bf16.msra.mxu0 %v7723_v55  ;;  %v8123_v55 = vcombine.low %v472_v43, %v480_v45  ;;  %v8108_v62 = vcombine.high %v456_v51, %v464_v53  ;;  %v121_v43 = vld [vmem:[#allocation5 + $0x1a8] sm:$0xff] }
 0x14b   :  { %3500 = vmatprep.subr.bf16.mxu0 %v7964_v57  ;;  %v185_v57 = vld [vmem:[#allocation5 + $0x3a8] sm:$0xff] }
 0x14c   :  { %3542 = vmatpush1.bf16.msra.mxu1 %v7979_v56  ;;  %v7852_v56 = vcombine.high %v200_v49, %v208_v50  ;;  %v7837_v10 = vcombine.low %v185_v57, %v193_v59 }
 0x14d   :  { %3543 = vmatprep.subr.bf16.mxu1 %v8220_v0  ;;  %v449_v0 = vld [vmem:[#allocation5 + $0xbe8] sm:$0xff] }
 0x14e   :  { %3501 = vmatpush2.bf16.msra.mxu0 %v7963_v2  ;;  %v8107_v2 = vcombine.low %v456_v51, %v464_v53  ;;  %v8094_v8 = vcombine.high %v441_v60, %v449_v0 }
 0x14f   :  { %3502 = vmatprep.subr.bf16.mxu0 %v7948_v5  ;;  %v169_v5 = vld [vmem:[#allocation5 + $0x328] sm:$0xff] }
 0x150   :  { %3544 = vmatpush2.bf16.msra.mxu1 %v8219_v3  ;;  %v7838_v3 = vcombine.high %v185_v57, %v193_v59  ;;  %v7821_v25 = vcombine.low %v169_v5, %v177_v6  ;;  %v369_v57 = vld [vmem:[#allocation5 + $0x968] sm:$0xff] }
 0x151   :  { %3545 = vmatprep.subr.bf16.mxu1 %v8204_v9  ;;  %v433_v9 = vld [vmem:[#allocation5 + $0xb68] sm:$0xff] }
 0x152   :  { %3503 = vmatpush2.bf16.msra.mxu0 %v7947_v11  ;;  %v9689_v11 = vpop.f32.mrf.mxu0  ;;  %v8078_v18 = vcombine.high %v425_v7, %v433_v9 }
 0x153   :  { %3504 = vmatprep.subr.bf16.mxu0 %v7932_v13  ;;  %v7822_v13 = vcombine.high %v169_v5, %v177_v6  ;;  %v353_v5 = vld [vmem:[#allocation5 + $0x8e8] sm:$0xff] }
 0x154   :  { %3546 = vmatpush2.bf16.msra.mxu1 %v8203_v12  ;;  %v8093_v12 = vcombine.low %v441_v60, %v449_v0 }
 0x155   :  { %3547 = vmatprep.subr.bf16.mxu1 %v8188_v17  ;;  %v9691_v17 = vpop.f32.mrf.mxu1 }
 0x156   :  { %3505 = vmatpush2.bf16.msra.mxu0 %v7931_v19  ;;  %v417_v19 = vld [vmem:[#allocation5 + $0xae8] sm:$0xff] }
 0x157   :  { %3506 = vmatprep.subr.bf16.mxu0 %v7916_v24 }
 0x158   :  { %3548 = vmatpush2.bf16.msra.mxu1 %v8187_v21 }
 0x159   :  { %3549 = vmatprep.subr.bf16.mxu1 %v8172_v28  ;;  %v8077_v28 = vcombine.low %v425_v7, %v433_v9 }
 0x15a   :  { %3507 = vmatpush2.bf16.msra.mxu0 %v7915_v30 }
 0x15b   :  { %3508 = vmatprep.subr.bf16.mxu0 %v7900_v32  ;;  %v137_v32 = vld [vmem:[#allocation5 + $0x228] sm:$0xff] }
 0x15c   :  { %3550 = vmatpush2.bf16.msra.mxu1 %v8171_v31  ;;  %v8062_v31 = vcombine.high %v409_v16, %v417_v19  ;;  %v7790_v41 = vcombine.high %v137_v32, %v145_v33  ;;  %v7789_v49 = vcombine.low %v137_v32, %v145_v33  ;;  %v297_v33 = vld [vmem:[#allocation5 + $0x728] sm:$0xff] }
 0x15d   :  { %3551 = vmatprep.subr.bf16.mxu1 %v8156_v36  ;;  %v401_v36 = vld [vmem:[#allocation5 + $0xa68] sm:$0xff] }
 0x15e   :  { %3509 = vmatpush2.bf16.msra.mxu0 %v7899_v38  ;;  %v7805_v38 = vcombine.low %v153_v14, %v161_v15  ;;  %v8046_v42 = vcombine.high %v393_v35, %v401_v36  ;;  %v8045_v51 = vcombine.low %v393_v35, %v401_v36  ;;  %v337_v14 = vld [vmem:[#allocation5 + $0x868] sm:$0xff] }
 0x15f   :  { %3510 = vmatprep.subr.bf16.mxu0 %v7884_v40  ;;  %v8061_v40 = vcombine.low %v409_v16, %v417_v19  ;;  %v553_v35 = vld [vmem:[#allocation5 + $0xf28] sm:$0xff] }
 0x160   :  { %3552 = vmatpush2.bf16.msra.mxu1 %v8155_v39  ;;  %v561_v36 = vld [vmem:[#allocation5 + $0xf68] sm:$0xff] }
 0x161   :  { %3553 = vmatprep.subr.bf16.mxu1 %v8140_v44  ;;  %v129_v44 = vld [vmem:[#allocation5 + $0x1e8] sm:$0xff] }
 0x162   :  { %3511 = vmatpush2.bf16.msra.mxu0 %v7883_v46  ;;  %v7773_v59 = vcombine.low %v121_v43, %v129_v44 }
 0x163   :  { %3512 = vmatprep.subr.bf16.mxu0 %v7868_v48  ;;  %v385_v48 = vld [vmem:[#allocation5 + $0x9e8] sm:$0xff] }
 0x164   :  { %3554 = vmatpush2.bf16.msra.mxu1 %v8139_v47  ;;  %v377_v47 = vld [vmem:[#allocation5 + $0x9a8] sm:$0xff] }
 0x165   :  { %3555 = vmatprep.subr.bf16.mxu1 %v8124_v52  ;;  %v7774_v52 = vcombine.high %v121_v43, %v129_v44  ;;  %v8030_v53 = vcombine.high %v377_v47, %v385_v48  ;;  %v8029_v60 = vcombine.low %v377_v47, %v385_v48  ;;  %v537_v43 = vld [vmem:[#allocation5 + $0xea8] sm:$0xff] }
 0x166   :  { %3513 = vmatpush2.bf16.msra.mxu0 %v7867_v54  ;;  %v105_v54 = vld [vmem:[#allocation5 + $0x128] sm:$0xff] }
 0x167   :  { %3514 = vmatprep.subr.bf16.mxu0 %v7852_v56  ;;  %v361_v56 = vld [vmem:[#allocation5 + $0x928] sm:$0xff] }
 0x168   :  { %3556 = vmatpush2.bf16.msra.mxu1 %v8123_v55  ;;  %v113_v55 = vld [vmem:[#allocation5 + $0x168] sm:$0xff]  ;;  %v8014_v0 = vcombine.high %v361_v56, %v369_v57  ;;  %v8013_v7 = vcombine.low %v361_v56, %v369_v57 }
 0x169   :  { %3557 = vmatprep.subr.bf16.mxu1 %v8108_v62  ;;  %v7758_v62 = vcombine.high %v105_v54, %v113_v55  ;;  %v7757_v6 = vcombine.low %v105_v54, %v113_v55  ;;  %v545_v44 = vld [vmem:[#allocation5 + $0xee8] sm:$0xff] }
 0x16a   :  { %3515 = vmatpush2.bf16.msra.mxu0 %v7851_v1  ;;  %v89_v1 = vld [vmem:[#allocation5 + $0xa8] sm:$0xff]  ;;  %v8190_v48 = vcombine.high %v537_v43, %v545_v44  ;;  %v8189_v55 = vcombine.low %v537_v43, %v545_v44 }
 0x16b   :  { %3570 = vmatprep.subr.bf16.mxu0 %v7838_v3  ;;  %v345_v3 = vld [vmem:[#allocation5 + $0x8a8] sm:$0xff] }
 0x16c   :  { %3558 = vmatpush2.bf16.msra.mxu1 %v8107_v2  ;;  %v97_v2 = vld [vmem:[#allocation5 + $0xe8] sm:$0xff]  ;;  %v7998_v9 = vcombine.high %v345_v3, %v353_v5  ;;  %v7997_v16 = vcombine.low %v345_v3, %v353_v5 }
 0x16d   :  { %3613 = vmatprep.subr.bf16.mxu1 %v8094_v8  ;;  %v3260_v21 = vpop.f32.mrf.mxu0  ;;  %3517 = vmatmul.mubr.bf16.vlgmr.msra.gmra.mxu0 %v9663_v20  ;;  %v7742_v8 = vcombine.high %v89_v1, %v97_v2  ;;  %v7741_v15 = vcombine.low %v89_v1, %v97_v2 }
 0x16e   :  { %3571 = vmatpush1.bf16.msra.mxu0 %v7837_v10  ;;  %3602 = vmatprep.mubr.bf16.mxu0 %v9657_v58  ;;  %v73_v10 = vld [vmem:[#allocation5 + $0x28] sm:$0xff] }
 0x16f   :  { %v3303_v24 = vpop.f32.mrf.mxu1  ;;  %3560 = vmatmul.mubr.bf16.vlgmr.msra.gmra.mxu1 %v9665_v23  ;;  %v9695_v27 = vpop.f32.mrf.mxu0  ;;  %3572 = vmatprep.subr.bf16.mxu0 %v7822_v13  ;;  %v329_v13 = vld [vmem:[#allocation5 + $0x828] sm:$0xff] }
 0x170   :  { %v3304_v26 = vadd.f32 %v3303_v24, %v3260_v21  ;;  %3614 = vmatpush1.bf16.msra.mxu1 %v8093_v12  ;;  %3645 = vmatprep.mubr.bf16.mxu1 %v9659_v63  ;;  %v81_v12 = vld [vmem:[#allocation5 + $0x68] sm:$0xff]  ;;  %v7982_v19 = vcombine.high %v329_v13, %v337_v14 }
 0x171   :  { %v9697_v30 = vpop.f32.mrf.mxu1  ;;  %3615 = vmatprep.subr.bf16.mxu1 %v8078_v18  ;;  %v3264_v34 = vpop.f32.mrf.mxu0  ;;  %v7726_v18 = vcombine.high %v73_v10, %v81_v12  ;;  %v313_v21 = vld [vmem:[#allocation5 + $0x7a8] sm:$0xff] }
 0x172   :  { %3573 = vmatpush1.bf16.msra.mxu0 %v7821_v25  ;;  %v3830_v45 = vmax.f32 %v3304_v26, 0.0  ;;  %v321_v24 = vld [vmem:[#allocation5 + $0x7e8] sm:$0xff] }
 0x173   :  { %v3307_v37 = vpop.f32.mrf.mxu1  ;;  %3574 = vmatprep.subr.bf16.mxu0 %v7806_v29  ;;  %v569_v25 = vld [vmem:[#allocation5 + $0xfa8] sm:$0xff]  ;;  %v7981_v29 = vcombine.low %v329_v13, %v337_v14 }
 0x174   :  { %v3308_v39 = vadd.f32 %v3307_v37, %v3264_v34  ;;  %3616 = vmatpush1.bf16.msra.mxu1 %v8077_v28  ;;  %v577_v26 = vld [vmem:[#allocation5 + $0xfe8] sm:$0xff]  ;;  %v7725_v28 = vcombine.low %v73_v10, %v81_v12  ;;  %v7965_v37 = vcombine.low %v313_v21, %v321_v24 }
 0x175   :  { %3617 = vmatprep.subr.bf16.mxu1 %v8062_v31  ;;  %v7966_v31 = vcombine.high %v313_v21, %v321_v24  ;;  %v8222_v32 = vcombine.high %v569_v25, %v577_v26  ;;  %v305_v34 = vld [vmem:[#allocation5 + $0x768] sm:$0xff] }
 0x176   :  { %v3846_v46 = vmax.f32 %v3308_v39, 0.0  ;;  %3575 = vmatpush1.bf16.msra.mxu0 %v7805_v38  ;;  %v8221_v38 = vcombine.low %v569_v25, %v577_v26  ;;  %v7950_v39 = vcombine.high %v297_v33, %v305_v34 }
 0x177   :  { %3576 = vmatprep.subr.bf16.mxu0 %v7790_v41  ;;  %v281_v41 = vld [vmem:[#allocation5 + $0x6a8] sm:$0xff] }
 0x178   :  { %v9701_v50 = vpack.c.bf16 %v3846_v46, %v3830_v45  ;;  %3618 = vmatpush1.bf16.msra.mxu1 %v8061_v40  ;;  %v8206_v40 = vcombine.high %v553_v35, %v561_v36  ;;  %v7949_v45 = vcombine.low %v297_v33, %v305_v34  ;;  %v8205_v46 = vcombine.low %v553_v35, %v561_v36 }
 0x179   :  { %3619 = vmatprep.subr.bf16.mxu1 %v8046_v42  ;;  %v289_v42 = vld [vmem:[#allocation5 + $0x6e8] sm:$0xff] }
 0x17a   :  { %3577 = vmatpush1.bf16.msra.mxu0 %v7789_v49  ;;  %v7934_v47 = vcombine.high %v281_v41, %v289_v42  ;;  %v265_v49 = vld [vmem:[#allocation5 + $0x628] sm:$0xff]  ;;  %v7933_v54 = vcombine.low %v281_v41, %v289_v42 }
 0x17b   :  { %3578 = vmatprep.subr.bf16.mxu0 %v7774_v52  ;;  %v521_v52 = vld [vmem:[#allocation5 + $0xe28] sm:$0xff] }
 0x17c   :  { %3620 = vmatpush1.bf16.msra.mxu1 %v8045_v51  ;;  %v273_v51 = vld [vmem:[#allocation5 + $0x668] sm:$0xff] }
 0x17d   :  { %3621 = vmatprep.subr.bf16.mxu1 %v8030_v53  ;;  %v529_v53 = vld [vmem:[#allocation5 + $0xe68] sm:$0xff]  ;;  %v7918_v56 = vcombine.high %v265_v49, %v273_v51  ;;  %v7917_v1 = vcombine.low %v265_v49, %v273_v51  ;;  %v9703_v51 = vpop.f32.mrf.mxu0 }
 0x17e   :  { %3579 = vmatpush1.bf16.msra.mxu0 %v7773_v59  ;;  %v8174_v57 = vcombine.high %v521_v52, %v529_v53  ;;  %v249_v59 = vld [vmem:[#allocation5 + $0x5a8] sm:$0xff]  ;;  %v8173_v2 = vcombine.low %v521_v52, %v529_v53 }
 0x17f   :  { %3580 = vmatprep.subr.bf16.mxu0 %v7758_v62  ;;  %v505_v62 = vld [vmem:[#allocation5 + $0xda8] sm:$0xff] }
 0x180   :  { %3622 = vmatpush1.bf16.msra.mxu1 %v8029_v60  ;;  %v257_v60 = vld [vmem:[#allocation5 + $0x5e8] sm:$0xff] }
 0x181   :  { %3623 = vmatprep.subr.bf16.mxu1 %v8014_v0  ;;  %v513_v0 = vld [vmem:[#allocation5 + $0xde8] sm:$0xff]  ;;  %v7902_v3 = vcombine.high %v249_v59, %v257_v60  ;;  %v7901_v10 = vcombine.low %v249_v59, %v257_v60  ;;  %v410_v60 = vld [vmem:[#allocation5 + $0xab0] sm:$0xff] }
 0x182   :  { %3581 = vmatpush1.bf16.msra.mxu0 %v7757_v6  ;;  %v8158_v5 = vcombine.high %v505_v62, %v513_v0  ;;  %v233_v6 = vld [vmem:[#allocation5 + $0x528] sm:$0xff]  ;;  %v8157_v12 = vcombine.low %v505_v62, %v513_v0  ;;  %v418_v62 = vld [vmem:[#allocation5 + $0xaf0] sm:$0xff] }
 0x183   :  { %3582 = vmatprep.subr.bf16.mxu0 %v7742_v8  ;;  %v489_v8 = vld [vmem:[#allocation5 + $0xd28] sm:$0xff] }
 0x184   :  { %3624 = vmatpush1.bf16.msra.mxu1 %v8013_v7  ;;  %v241_v7 = vld [vmem:[#allocation5 + $0x568] sm:$0xff] }
 0x185   :  { %3625 = vmatprep.subr.bf16.mxu1 %v7998_v9  ;;  %v497_v9 = vld [vmem:[#allocation5 + $0xd68] sm:$0xff]  ;;  %v7886_v13 = vcombine.high %v233_v6, %v241_v7  ;;  %v7885_v21 = vcombine.low %v233_v6, %v241_v7 }
 0x186   :  { %3583 = vmatpush1.bf16.msra.mxu0 %v7741_v15  ;;  %v8142_v14 = vcombine.high %v489_v8, %v497_v9  ;;  %v217_v15 = vld [vmem:[#allocation5 + $0x4a8] sm:$0xff]  ;;  %v8141_v24 = vcombine.low %v489_v8, %v497_v9  ;;  %v8064_v8 = vcombine.high %v410_v60, %v418_v62  ;;  %v138_v9 = vld [vmem:[#allocation5 + $0x230] sm:$0xff] }
 0x187   :  { %3584 = vmatprep.subr.bf16.mxu0 %v7726_v18  ;;  %v473_v18 = vld [vmem:[#allocation5 + $0xca8] sm:$0xff] }
 0x188   :  { %3626 = vmatpush1.bf16.msra.mxu1 %v7997_v16  ;;  %v225_v16 = vld [vmem:[#allocation5 + $0x4e8] sm:$0xff] }
 0x189   :  { %3627 = vmatprep.subr.bf16.mxu1 %v7982_v19  ;;  %v481_v19 = vld [vmem:[#allocation5 + $0xce8] sm:$0xff]  ;;  %v7870_v25 = vcombine.high %v217_v15, %v225_v16  ;;  %v7869_v33 = vcombine.low %v217_v15, %v225_v16 }
 0x18a   :  { %3585 = vmatpush1.bf16.msra.mxu0 %v7725_v28  ;;  %v8126_v26 = vcombine.high %v473_v18, %v481_v19  ;;  %v201_v28 = vld [vmem:[#allocation5 + $0x428] sm:$0xff]  ;;  %v8125_v34 = vcombine.low %v473_v18, %v481_v19  ;;  %v8063_v19 = vcombine.low %v410_v60, %v418_v62  ;;  %v330_v60 = vld [vmem:[#allocation5 + $0x830] sm:$0xff] }
 0x18b   :  { %3586 = vmatprep.subr.bf16.mxu0 %v7966_v31  ;;  %v457_v31 = vld [vmem:[#allocation5 + $0xc28] sm:$0xff]  ;;  %v338_v62 = vld [vmem:[#allocation5 + $0x870] sm:$0xff] }
 0x18c   :  { %3628 = vmatpush1.bf16.msra.mxu1 %v7981_v29  ;;  %v209_v29 = vld [vmem:[#allocation5 + $0x468] sm:$0xff] }
 0x18d   :  { %3629 = vmatprep.subr.bf16.mxu1 %v8222_v32  ;;  %v465_v32 = vld [vmem:[#allocation5 + $0xc68] sm:$0xff]  ;;  %v7854_v35 = vcombine.high %v201_v28, %v209_v29  ;;  %v7853_v41 = vcombine.low %v201_v28, %v209_v29 }
 0x18e   :  { %3587 = vmatpush2.bf16.msra.mxu0 %v7965_v37  ;;  %v8110_v36 = vcombine.high %v457_v31, %v465_v32  ;;  %v186_v37 = vld [vmem:[#allocation5 + $0x3b0] sm:$0xff]  ;;  %v8109_v42 = vcombine.low %v457_v31, %v465_v32 }
 0x18f   :  { %3588 = vmatprep.subr.bf16.mxu0 %v7950_v39  ;;  %v442_v39 = vld [vmem:[#allocation5 + $0xbb0] sm:$0xff] }
 0x190   :  { %3630 = vmatpush2.bf16.msra.mxu1 %v8221_v38  ;;  %v194_v38 = vld [vmem:[#allocation5 + $0x3f0] sm:$0xff] }
 0x191   :  { %3631 = vmatprep.subr.bf16.mxu1 %v8206_v40  ;;  %v450_v40 = vld [vmem:[#allocation5 + $0xbf0] sm:$0xff]  ;;  %v7840_v43 = vcombine.high %v186_v37, %v194_v38  ;;  %v7839_v49 = vcombine.low %v186_v37, %v194_v38 }
 0x192   :  { %3589 = vmatpush2.bf16.msra.mxu0 %v7949_v45  ;;  %v8096_v44 = vcombine.high %v442_v39, %v450_v40  ;;  %v170_v45 = vld [vmem:[#allocation5 + $0x330] sm:$0xff]  ;;  %v8095_v52 = vcombine.low %v442_v39, %v450_v40 }
 0x193   :  { %3590 = vmatprep.subr.bf16.mxu0 %v7934_v47  ;;  %v426_v47 = vld [vmem:[#allocation5 + $0xb30] sm:$0xff] }
 0x194   :  { %3632 = vmatpush2.bf16.msra.mxu1 %v8205_v46  ;;  %v178_v46 = vld [vmem:[#allocation5 + $0x370] sm:$0xff] }
 0x195   :  { %3633 = vmatprep.subr.bf16.mxu1 %v8190_v48  ;;  %v434_v48 = vld [vmem:[#allocation5 + $0xb70] sm:$0xff]  ;;  %v7824_v53 = vcombine.high %v170_v45, %v178_v46 }
 0x196   :  { %3591 = vmatpush2.bf16.msra.mxu0 %v7933_v54  ;;  %v9705_v54 = vpop.f32.mrf.mxu1  ;;  %v378_v31 = vld [vmem:[#allocation5 + $0x9b0] sm:$0xff] }
 0x197   :  { %3592 = vmatprep.subr.bf16.mxu0 %v7918_v56  ;;  %v154_v56 = vld [vmem:[#allocation5 + $0x2b0] sm:$0xff] }
 0x198   :  { %3634 = vmatpush2.bf16.msra.mxu1 %v8189_v55  ;;  %v8080_v55 = vcombine.high %v426_v47, %v434_v48  ;;  %v386_v32 = vld [vmem:[#allocation5 + $0x9f0] sm:$0xff] }
 0x199   :  { %3635 = vmatprep.subr.bf16.mxu1 %v8174_v57  ;;  %v162_v57 = vld [vmem:[#allocation5 + $0x2f0] sm:$0xff]  ;;  %v8032_v37 = vcombine.high %v378_v31, %v386_v32 }
 0x19a   :  { %3593 = vmatpush2.bf16.msra.mxu0 %v7917_v1  ;;  %v7823_v1 = vcombine.low %v170_v45, %v178_v46  ;;  %v7808_v6 = vcombine.high %v154_v56, %v162_v57  ;;  %v7807_v16 = vcombine.low %v154_v56, %v162_v57  ;;  %v106_v38 = vld [vmem:[#allocation5 + $0x130] sm:$0xff] }
 0x19b   :  { %3594 = vmatprep.subr.bf16.mxu0 %v7902_v3  ;;  %v114_v39 = vld [vmem:[#allocation5 + $0x170] sm:$0xff] }
 0x19c   :  { %3636 = vmatpush2.bf16.msra.mxu1 %v8173_v2  ;;  %v362_v40 = vld [vmem:[#allocation5 + $0x930] sm:$0xff] }
 0x19d   :  { %3637 = vmatprep.subr.bf16.mxu1 %v8158_v5  ;;  %v8079_v5 = vcombine.low %v426_v47, %v434_v48  ;;  %v90_v46 = vld [vmem:[#allocation5 + $0xb0] sm:$0xff] }
 0x19e   :  { %3595 = vmatpush2.bf16.msra.mxu0 %v7901_v10  ;;  %v146_v10 = vld [vmem:[#allocation5 + $0x270] sm:$0xff] }
 0x19f   :  { %3596 = vmatprep.subr.bf16.mxu0 %v7886_v13  ;;  %v394_v13 = vld [vmem:[#allocation5 + $0xa30] sm:$0xff] }
 0x1a0   :  { %3638 = vmatpush2.bf16.msra.mxu1 %v8157_v12  ;;  %v98_v47 = vld [vmem:[#allocation5 + $0xf0] sm:$0xff] }
 0x1a1   :  { %3639 = vmatprep.subr.bf16.mxu1 %v8142_v14  ;;  %v402_v14 = vld [vmem:[#allocation5 + $0xa70] sm:$0xff] }
 0x1a2   :  { %3597 = vmatpush2.bf16.msra.mxu0 %v7885_v21  ;;  %v7792_v21 = vcombine.high %v138_v9, %v146_v10  ;;  %v346_v48 = vld [vmem:[#allocation5 + $0x8b0] sm:$0xff] }
 0x1a3   :  { %3598 = vmatprep.subr.bf16.mxu0 %v7870_v25  ;;  %v122_v25 = vld [vmem:[#allocation5 + $0x1b0] sm:$0xff] }
 0x1a4   :  { %3640 = vmatpush2.bf16.msra.mxu1 %v8141_v24  ;;  %v8048_v24 = vcombine.high %v394_v13, %v402_v14  ;;  %v74_v57 = vld [vmem:[#allocation5 + $0x30] sm:$0xff] }
 0x1a5   :  { %3641 = vmatprep.subr.bf16.mxu1 %v8126_v26  ;;  %v130_v26 = vld [vmem:[#allocation5 + $0x1f0] sm:$0xff] }
 0x1a6   :  { %3599 = vmatpush2.bf16.msra.mxu0 %v7869_v33  ;;  %v7791_v33 = vcombine.low %v138_v9, %v146_v10  ;;  %v570_v9 = vld [vmem:[#allocation5 + $0xfb0] sm:$0xff] }
 0x1a7   :  { %3600 = vmatprep.subr.bf16.mxu0 %v7854_v35  ;;  %v8047_v35 = vcombine.low %v394_v13, %v402_v14  ;;  %v578_v10 = vld [vmem:[#allocation5 + $0xff0] sm:$0xff]  ;;  %v7983_v13 = vcombine.low %v330_v60, %v338_v62 }
 0x1a8   :  { %3642 = vmatpush2.bf16.msra.mxu1 %v8125_v34 }
 0x1a9   :  { %3643 = vmatprep.subr.bf16.mxu1 %v8110_v36  ;;  %v7776_v36 = vcombine.high %v122_v25, %v130_v26 }
 0x1aa   :  { %3601 = vmatpush2.bf16.msra.mxu0 %v7853_v41  ;;  %v370_v41 = vld [vmem:[#allocation5 + $0x970] sm:$0xff] }
 0x1ab   :  { %3656 = vmatprep.subr.bf16.mxu0 %v7840_v43  ;;  %v8031_v43 = vcombine.low %v378_v31, %v386_v32  ;;  %v8016_v45 = vcombine.high %v362_v40, %v370_v41  ;;  %v290_v31 = vld [vmem:[#allocation5 + $0x6f0] sm:$0xff] }
 0x1ac   :  { %3644 = vmatpush2.bf16.msra.mxu1 %v8109_v42  ;;  %v7775_v42 = vcombine.low %v122_v25, %v130_v26  ;;  %v8223_v25 = vcombine.low %v570_v9, %v578_v10  ;;  %v538_v32 = vld [vmem:[#allocation5 + $0xeb0] sm:$0xff] }
 0x1ad   :  { %3699 = vmatprep.subr.bf16.mxu1 %v8096_v44  ;;  %v3346_v59 = vpop.f32.mrf.mxu0  ;;  %3603 = vmatmul.mubr.bf16.vlgmr.msra.gmra.mxu0 %v9663_v20  ;;  %v7760_v44 = vcombine.high %v106_v38, %v114_v39 }
 0x1ae   :  { %3657 = vmatpush1.bf16.msra.mxu0 %v7839_v49  ;;  %3688 = vmatprep.mubr.bf16.mxu0 %v9657_v58  ;;  %v354_v49 = vld [vmem:[#allocation5 + $0x8f0] sm:$0xff] }
 0x1af   :  { %v3389_v0 = vpop.f32.mrf.mxu1  ;;  %3646 = vmatmul.mubr.bf16.vlgmr.msra.gmra.mxu1 %v9665_v23  ;;  %v9709_v3 = vpop.f32.mrf.mxu0  ;;  %3658 = vmatprep.subr.bf16.mxu0 %v7824_v53  ;;  %v8015_v53 = vcombine.low %v362_v40, %v370_v41  ;;  %v8000_v56 = vcombine.high %v346_v48, %v354_v49  ;;  %v274_v40 = vld [vmem:[#allocation5 + $0x670] sm:$0xff] }
 0x1b0   :  { %v3390_v2 = vadd.f32 %v3389_v0, %v3346_v59  ;;  %3700 = vmatpush1.bf16.msra.mxu1 %v8095_v52  ;;  %3731 = vmatprep.mubr.bf16.mxu1 %v9659_v63  ;;  %v7759_v52 = vcombine.low %v106_v38, %v114_v39  ;;  %v82_v59 = vld [vmem:[#allocation5 + $0x70] sm:$0xff]  ;;  %v7743_v0 = vcombine.low %v90_v46, %v98_v47 }
 0x1b1   :  { %v9711_v7 = vpop.f32.mrf.mxu1  ;;  %3701 = vmatprep.subr.bf16.mxu1 %v8080_v55  ;;  %v3350_v12 = vpop.f32.mrf.mxu0  ;;  %v7744_v55 = vcombine.high %v90_v46, %v98_v47  ;;  %v266_v39 = vld [vmem:[#allocation5 + $0x630] sm:$0xff] }
 0x1b2   :  { %3659 = vmatpush1.bf16.msra.mxu0 %v7823_v1  ;;  %v3832_v28 = vmax.f32 %v3390_v2, 0.0  ;;  %v7999_v1 = vcombine.low %v346_v48, %v354_v49  ;;  %v7728_v2 = vcombine.high %v74_v57, %v82_v59  ;;  %v522_v41 = vld [vmem:[#allocation5 + $0xe30] sm:$0xff] }
 0x1b3   :  { %v3393_v15 = vpop.f32.mrf.mxu1  ;;  %3660 = vmatprep.subr.bf16.mxu0 %v7808_v6  ;;  %v314_v6 = vld [vmem:[#allocation5 + $0x7b0] sm:$0xff] }
 0x1b4   :  { %v3394_v18 = vadd.f32 %v3393_v15, %v3350_v12  ;;  %3702 = vmatpush1.bf16.msra.mxu1 %v8079_v5  ;;  %v7984_v5 = vcombine.high %v330_v60, %v338_v62  ;;  %v7727_v12 = vcombine.low %v74_v57, %v82_v59  ;;  %v8224_v15 = vcombine.high %v570_v9, %v578_v10  ;;  %v250_v47 = vld [vmem:[#allocation5 + $0x5b0] sm:$0xff] }
 0x1b5   :  { %3703 = vmatprep.subr.bf16.mxu1 %v8064_v8  ;;  %v322_v8 = vld [vmem:[#allocation5 + $0x7f0] sm:$0xff] }
 0x1b6   :  { %v3848_v29 = vmax.f32 %v3394_v18, 0.0  ;;  %3661 = vmatpush1.bf16.msra.mxu0 %v7807_v16  ;;  %v7968_v14 = vcombine.high %v314_v6, %v322_v8  ;;  %v298_v16 = vld [vmem:[#allocation5 + $0x730] sm:$0xff] }
 0x1b7   :  { %3662 = vmatprep.subr.bf16.mxu0 %v7792_v21  ;;  %v306_v18 = vld [vmem:[#allocation5 + $0x770] sm:$0xff] }
 0x1b8   :  { %v9715_v34 = vpack.c.bf16 %v3848_v29, %v3832_v28  ;;  %3704 = vmatpush1.bf16.msra.mxu1 %v8063_v19  ;;  %v554_v19 = vld [vmem:[#allocation5 + $0xf30] sm:$0xff]  ;;  %v7952_v26 = vcombine.high %v298_v16, %v306_v18 }
 0x1b9   :  { %3705 = vmatprep.subr.bf16.mxu1 %v8048_v24  ;;  %v562_v21 = vld [vmem:[#allocation5 + $0xf70] sm:$0xff]  ;;  %v7967_v24 = vcombine.low %v314_v6, %v322_v8 }
 0x1ba   :  { %3663 = vmatpush1.bf16.msra.mxu0 %v7791_v33  ;;  %v8208_v28 = vcombine.high %v554_v19, %v562_v21  ;;  %v282_v29 = vld [vmem:[#allocation5 + $0x6b0] sm:$0xff] }
 0x1bb   :  { %3664 = vmatprep.subr.bf16.mxu0 %v7776_v36  ;;  %v546_v33 = vld [vmem:[#allocation5 + $0xef0] sm:$0xff]  ;;  %v8207_v36 = vcombine.low %v554_v19, %v562_v21 }
 0x1bc   :  { %3706 = vmatpush1.bf16.msra.mxu1 %v8047_v35  ;;  %v7951_v35 = vcombine.low %v298_v16, %v306_v18  ;;  %v8192_v38 = vcombine.high %v538_v32, %v546_v33  ;;  %v258_v48 = vld [vmem:[#allocation5 + $0x5f0] sm:$0xff] }
 0x1bd   :  { %3707 = vmatprep.subr.bf16.mxu1 %v8032_v37  ;;  %v7936_v37 = vcombine.high %v282_v29, %v290_v31  ;;  %v506_v49 = vld [vmem:[#allocation5 + $0xdb0] sm:$0xff] }
 0x1be   :  { %3665 = vmatpush1.bf16.msra.mxu0 %v7775_v42  ;;  %v530_v42 = vld [vmem:[#allocation5 + $0xe70] sm:$0xff] }
 0x1bf   :  { %3666 = vmatprep.subr.bf16.mxu0 %v7760_v44  ;;  %v8191_v44 = vcombine.low %v538_v32, %v546_v33  ;;  %v8176_v46 = vcombine.high %v522_v41, %v530_v42  ;;  %v234_v59 = vld [vmem:[#allocation5 + $0x530] sm:$0xff]  ;;  %v195_v32 = vld [vmem:[#allocation5 + $0x3f8] sm:$0xff] }
 0x1c0   :  { %3708 = vmatpush1.bf16.msra.mxu1 %v8031_v43  ;;  %v7935_v43 = vcombine.low %v282_v29, %v290_v31  ;;  %v242_v60 = vld [vmem:[#allocation5 + $0x570] sm:$0xff]  ;;  %v187_v31 = vld [vmem:[#allocation5 + $0x3b8] sm:$0xff] }
 0x1c1   :  { %3709 = vmatprep.subr.bf16.mxu1 %v8016_v45  ;;  %v7920_v45 = vcombine.high %v266_v39, %v274_v40  ;;  %v490_v62 = vld [vmem:[#allocation5 + $0xd30] sm:$0xff]  ;;  %v443_v33 = vld [vmem:[#allocation5 + $0xbb8] sm:$0xff] }
 0x1c2   :  { %3667 = vmatpush1.bf16.msra.mxu0 %v7759_v52  ;;  %v514_v52 = vld [vmem:[#allocation5 + $0xdf0] sm:$0xff] }
 0x1c3   :  { %3668 = vmatprep.subr.bf16.mxu0 %v7744_v55  ;;  %v8175_v55 = vcombine.low %v522_v41, %v530_v42  ;;  %v8160_v57 = vcombine.high %v506_v49, %v514_v52  ;;  %v218_v8 = vld [vmem:[#allocation5 + $0x4b0] sm:$0xff]  ;;  %v179_v41 = vld [vmem:[#allocation5 + $0x378] sm:$0xff] }
 0x1c4   :  { %3710 = vmatpush1.bf16.msra.mxu1 %v8015_v53  ;;  %v7919_v53 = vcombine.low %v266_v39, %v274_v40  ;;  %v226_v9 = vld [vmem:[#allocation5 + $0x4f0] sm:$0xff]  ;;  %v171_v40 = vld [vmem:[#allocation5 + $0x338] sm:$0xff] }
 0x1c5   :  { %3711 = vmatprep.subr.bf16.mxu1 %v8000_v56  ;;  %v7904_v56 = vcombine.high %v250_v47, %v258_v48  ;;  %v474_v10 = vld [vmem:[#allocation5 + $0xcb0] sm:$0xff]  ;;  %v427_v42 = vld [vmem:[#allocation5 + $0xb38] sm:$0xff] }
 0x1c6   :  { %3669 = vmatpush1.bf16.msra.mxu0 %v7743_v0  ;;  %v498_v0 = vld [vmem:[#allocation5 + $0xd70] sm:$0xff] }
 0x1c7   :  { %3670 = vmatprep.subr.bf16.mxu0 %v7728_v2  ;;  %v8159_v2 = vcombine.low %v506_v49, %v514_v52  ;;  %v8144_v6 = vcombine.high %v490_v62, %v498_v0  ;;  %v202_v18 = vld [vmem:[#allocation5 + $0x430] sm:$0xff]  ;;  %v155_v52 = vld [vmem:[#allocation5 + $0x2b8] sm:$0xff] }
 0x1c8   :  { %3712 = vmatpush1.bf16.msra.mxu1 %v7999_v1  ;;  %v7903_v1 = vcombine.low %v250_v47, %v258_v48  ;;  %v210_v19 = vld [vmem:[#allocation5 + $0x470] sm:$0xff]  ;;  %v7826_v47 = vcombine.high %v171_v40, %v179_v41  ;;  %v9719_v48 = vpop.f32.mrf.mxu1 }
 0x1c9   :  { %3713 = vmatprep.subr.bf16.mxu1 %v7984_v5  ;;  %v7888_v5 = vcombine.high %v234_v59, %v242_v60  ;;  %v458_v21 = vld [vmem:[#allocation5 + $0xc30] sm:$0xff] }
 0x1ca   :  { %3671 = vmatpush1.bf16.msra.mxu0 %v7727_v12  ;;  %v482_v12 = vld [vmem:[#allocation5 + $0xcf0] sm:$0xff] }
 0x1cb   :  { %3672 = vmatprep.subr.bf16.mxu0 %v7968_v14  ;;  %v8143_v14 = vcombine.low %v490_v62, %v498_v0  ;;  %v8128_v16 = vcombine.high %v474_v10, %v482_v12 }
 0x1cc   :  { %3714 = vmatpush1.bf16.msra.mxu1 %v7983_v13  ;;  %v7887_v13 = vcombine.low %v234_v59, %v242_v60  ;;  %v7825_v60 = vcombine.low %v171_v40, %v179_v41 }
 0x1cd   :  { %3715 = vmatprep.subr.bf16.mxu1 %v8224_v15  ;;  %v7872_v15 = vcombine.high %v218_v8, %v226_v9 }
 0x1ce   :  { %3673 = vmatpush2.bf16.msra.mxu0 %v7967_v24  ;;  %v466_v24 = vld [vmem:[#allocation5 + $0xc70] sm:$0xff] }
 0x1cf   :  { %3674 = vmatprep.subr.bf16.mxu0 %v7952_v26  ;;  %v8127_v26 = vcombine.low %v474_v10, %v482_v12  ;;  %v8112_v29 = vcombine.high %v458_v21, %v466_v24  ;;  %v395_v12 = vld [vmem:[#allocation5 + $0xa38] sm:$0xff] }
 0x1d0   :  { %3716 = vmatpush2.bf16.msra.mxu1 %v8223_v25  ;;  %v7871_v25 = vcombine.low %v218_v8, %v226_v9  ;;  %v139_v8 = vld [vmem:[#allocation5 + $0x238] sm:$0xff] }
 0x1d1   :  { %3717 = vmatprep.subr.bf16.mxu1 %v8208_v28  ;;  %v7856_v28 = vcombine.high %v202_v18, %v210_v19  ;;  %v147_v9 = vld [vmem:[#allocation5 + $0x278] sm:$0xff] }
 0x1d2   :  { %3675 = vmatpush2.bf16.msra.mxu0 %v7951_v35  ;;  %v451_v35 = vld [vmem:[#allocation5 + $0xbf8] sm:$0xff] }
 0x1d3   :  { %3676 = vmatprep.subr.bf16.mxu0 %v7936_v37  ;;  %v8111_v37 = vcombine.low %v458_v21, %v466_v24  ;;  %v8098_v39 = vcombine.high %v443_v33, %v451_v35  ;;  %v123_v24 = vld [vmem:[#allocation5 + $0x1b8] sm:$0xff] }
 0x1d4   :  { %3718 = vmatpush2.bf16.msra.mxu1 %v8207_v36  ;;  %v7855_v36 = vcombine.low %v202_v18, %v210_v19  ;;  %v7794_v19 = vcombine.high %v139_v8, %v147_v9 }
 0x1d5   :  { %3719 = vmatprep.subr.bf16.mxu1 %v8192_v38  ;;  %v7842_v38 = vcombine.high %v187_v31, %v195_v32 }
 0x1d6   :  { %3677 = vmatpush2.bf16.msra.mxu0 %v7935_v43  ;;  %v435_v43 = vld [vmem:[#allocation5 + $0xb78] sm:$0xff] }
 0x1d7   :  { %3678 = vmatprep.subr.bf16.mxu0 %v7920_v45  ;;  %v9717_v45 = vpop.f32.mrf.mxu0  ;;  %v8082_v49 = vcombine.high %v427_v42, %v435_v43 }
 0x1d8   :  { %3720 = vmatpush2.bf16.msra.mxu1 %v8191_v44  ;;  %v7841_v44 = vcombine.low %v187_v31, %v195_v32  ;;  %v7793_v31 = vcombine.low %v139_v8, %v147_v9  ;;  %v315_v9 = vld [vmem:[#allocation5 + $0x7b8] sm:$0xff] }
 0x1d9   :  { %3721 = vmatprep.subr.bf16.mxu1 %v8176_v46  ;;  %v8097_v46 = vcombine.low %v443_v33, %v451_v35 }
 0x1da   :  { %3679 = vmatpush2.bf16.msra.mxu0 %v7919_v53  ;;  %v163_v53 = vld [vmem:[#allocation5 + $0x2f8] sm:$0xff] }
 0x1db   :  { %3680 = vmatprep.subr.bf16.mxu0 %v7904_v56  ;;  %v411_v56 = vld [vmem:[#allocation5 + $0xab8] sm:$0xff] }
 0x1dc   :  { %3722 = vmatpush2.bf16.msra.mxu1 %v8175_v55 }
 0x1dd   :  { %3723 = vmatprep.subr.bf16.mxu1 %v8160_v57  ;;  %v419_v57 = vld [vmem:[#allocation5 + $0xaf8] sm:$0xff] }
 0x1de   :  { %3681 = vmatpush2.bf16.msra.mxu0 %v7903_v1  ;;  %v8081_v1 = vcombine.low %v427_v42, %v435_v43  ;;  %v8065_v18 = vcombine.low %v411_v56, %v419_v57 }
 0x1df   :  { %3682 = vmatprep.subr.bf16.mxu0 %v7888_v5 }
 0x1e0   :  { %3724 = vmatpush2.bf16.msra.mxu1 %v8159_v2  ;;  %v7810_v2 = vcombine.high %v155_v52, %v163_v53 }
 0x1e1   :  { %3725 = vmatprep.subr.bf16.mxu1 %v8144_v6  ;;  %v8066_v6 = vcombine.high %v411_v56, %v419_v57  ;;  %v75_v57 = vld [vmem:[#allocation5 + $0x38] sm:$0xff] }
 0x1e2   :  { %3683 = vmatpush2.bf16.msra.mxu0 %v7887_v13  ;;  %v403_v13 = vld [vmem:[#allocation5 + $0xa78] sm:$0xff] }
 0x1e3   :  { %3684 = vmatprep.subr.bf16.mxu0 %v7872_v15  ;;  %v7809_v15 = vcombine.low %v155_v52, %v163_v53  ;;  %v8050_v21 = vcombine.high %v395_v12, %v403_v13 }
 0x1e4   :  { %3726 = vmatpush2.bf16.msra.mxu1 %v8143_v14 }
 0x1e5   :  { %3727 = vmatprep.subr.bf16.mxu1 %v8128_v16 }
 0x1e6   :  { %3685 = vmatpush2.bf16.msra.mxu0 %v7871_v25  ;;  %v131_v25 = vld [vmem:[#allocation5 + $0x1f8] sm:$0xff] }
 0x1e7   :  { %3686 = vmatprep.subr.bf16.mxu0 %v7856_v28  ;;  %v7778_v33 = vcombine.high %v123_v24, %v131_v25  ;;  %v7777_v40 = vcombine.low %v123_v24, %v131_v25  ;;  %v555_v24 = vld [vmem:[#allocation5 + $0xf38] sm:$0xff] }
 0x1e8   :  { %3728 = vmatpush2.bf16.msra.mxu1 %v8127_v26  ;;  %v563_v25 = vld [vmem:[#allocation5 + $0xf78] sm:$0xff] }
 0x1e9   :  { %3729 = vmatprep.subr.bf16.mxu1 %v8112_v29  ;;  %v387_v29 = vld [vmem:[#allocation5 + $0x9f8] sm:$0xff] }
 0x1ea   :  { %3687 = vmatpush2.bf16.msra.mxu0 %v7855_v36  ;;  %v107_v36 = vld [vmem:[#allocation5 + $0x138] sm:$0xff] }
 0x1eb   :  { %3742 = vmatprep.subr.bf16.mxu0 %v7842_v38  ;;  %v363_v38 = vld [vmem:[#allocation5 + $0x938] sm:$0xff] }
 0x1ec   :  { %3730 = vmatpush2.bf16.msra.mxu1 %v8111_v37  ;;  %v115_v37 = vld [vmem:[#allocation5 + $0x178] sm:$0xff] }
 0x1ed   :  { %3785 = vmatprep.subr.bf16.mxu1 %v8098_v39  ;;  %v3432_v55 = vpop.f32.mrf.mxu0  ;;  %3689 = vmatmul.mubr.bf16.vlgmr.msra.gmra.mxu0 %v9663_v20  ;;  %v371_v39 = vld [vmem:[#allocation5 + $0x978] sm:$0xff]  ;;  %v7762_v42 = vcombine.high %v107_v36, %v115_v37  ;;  %v7761_v52 = vcombine.low %v107_v36, %v115_v37  ;;  %v8209_v37 = vcombine.low %v555_v24, %v563_v25 }
 0x1ee   :  { %3743 = vmatpush1.bf16.msra.mxu0 %v7841_v44  ;;  %3774 = vmatprep.mubr.bf16.mxu0 %v9657_v58  ;;  %v379_v58 = vld [vmem:[#allocation5 + $0x9b8] sm:$0xff]  ;;  %v8018_v43 = vcombine.high %v363_v38, %v371_v39  ;;  %v8017_v53 = vcombine.low %v363_v38, %v371_v39 }
 0x1ef   :  { %v3475_v59 = vpop.f32.mrf.mxu1  ;;  %3732 = vmatmul.mubr.bf16.vlgmr.msra.gmra.mxu1 %v9665_v23  ;;  %v9723_v0 = vpop.f32.mrf.mxu0  ;;  %3744 = vmatprep.subr.bf16.mxu0 %v7826_v47  ;;  %v8034_v35 = vcombine.high %v379_v58, %v387_v29  ;;  %v8033_v41 = vcombine.low %v379_v58, %v387_v29  ;;  %v91_v44 = vld [vmem:[#allocation5 + $0xb8] sm:$0xff]  ;;  %v8210_v29 = vcombine.high %v555_v24, %v563_v25 }
 0x1f0   :  { %v3476_v62 = vadd.f32 %v3475_v59, %v3432_v55  ;;  %3786 = vmatpush1.bf16.msra.mxu1 %v8097_v46  ;;  %3817 = vmatprep.mubr.bf16.mxu1 %v9659_v63  ;;  %v8049_v63 = vcombine.low %v395_v12, %v403_v13  ;;  %v99_v46 = vld [vmem:[#allocation5 + $0xf8] sm:$0xff] }
 0x1f1   :  { %v9725_v5 = vpop.f32.mrf.mxu1  ;;  %3787 = vmatprep.subr.bf16.mxu1 %v8082_v49  ;;  %v3436_v10 = vpop.f32.mrf.mxu0  ;;  %v347_v47 = vld [vmem:[#allocation5 + $0x8b8] sm:$0xff]  ;;  %v7746_v55 = vcombine.high %v91_v44, %v99_v46 }
 0x1f2   :  { %3745 = vmatpush1.bf16.msra.mxu0 %v7825_v60  ;;  %v3834_v26 = vmax.f32 %v3476_v62, 0.0  ;;  %v355_v49 = vld [vmem:[#allocation5 + $0x8f8] sm:$0xff] }
 0x1f3   :  { %v3479_v14 = vpop.f32.mrf.mxu1  ;;  %3746 = vmatprep.subr.bf16.mxu0 %v7810_v2  ;;  %v8002_v56 = vcombine.high %v347_v47, %v355_v49  ;;  %v83_v59 = vld [vmem:[#allocation5 + $0x78] sm:$0xff]  ;;  %v8001_v2 = vcombine.low %v347_v47, %v355_v49 }
 0x1f4   :  { %v3480_v16 = vadd.f32 %v3479_v14, %v3436_v10  ;;  %3788 = vmatpush1.bf16.msra.mxu1 %v8081_v1  ;;  %v331_v60 = vld [vmem:[#allocation5 + $0x838] sm:$0xff]  ;;  %v7745_v1 = vcombine.low %v91_v44, %v99_v46  ;;  %v7729_v14 = vcombine.low %v75_v57, %v83_v59 }
 0x1f5   :  { %3789 = vmatprep.subr.bf16.mxu1 %v8066_v6  ;;  %v339_v62 = vld [vmem:[#allocation5 + $0x878] sm:$0xff]  ;;  %v7730_v6 = vcombine.high %v75_v57, %v83_v59 }
 0x1f6   :  { %v3850_v28 = vmax.f32 %v3480_v16, 0.0  ;;  %3747 = vmatpush1.bf16.msra.mxu0 %v7809_v15  ;;  %v7986_v8 = vcombine.high %v331_v60, %v339_v62  ;;  %v323_v10 = vld [vmem:[#allocation5 + $0x7f8] sm:$0xff]  ;;  %v7985_v15 = vcombine.low %v331_v60, %v339_v62 }
 0x1f7   :  { %3748 = vmatprep.subr.bf16.mxu0 %v7794_v19  ;;  %v571_v12 = vld [vmem:[#allocation5 + $0xfb8] sm:$0xff]  ;;  %v7970_v16 = vcombine.high %v315_v9, %v323_v10 }
 0x1f8   :  { %v9729_v32 = vpack.c.bf16 %v3850_v28, %v3834_v26  ;;  %3790 = vmatpush1.bf16.msra.mxu1 %v8065_v18  ;;  %v579_v13 = vld [vmem:[#allocation5 + $0xff8] sm:$0xff]  ;;  %v7969_v26 = vcombine.low %v315_v9, %v323_v10 }
 0x1f9   :  { %3791 = vmatprep.subr.bf16.mxu1 %v8050_v21  ;;  %v8226_v18 = vcombine.high %v571_v12, %v579_v13  ;;  %v299_v19 = vld [vmem:[#allocation5 + $0x738] sm:$0xff]  ;;  %v8225_v28 = vcombine.low %v571_v12, %v579_v13 }
 0x1fa   :  { %3749 = vmatpush1.bf16.msra.mxu0 %v7793_v31  ;;  %v307_v21 = vld [vmem:[#allocation5 + $0x778] sm:$0xff] }
 0x1fb   :  { %3750 = vmatprep.subr.bf16.mxu0 %v7778_v33  ;;  %v7954_v58 = vcombine.high %v299_v19, %v307_v21  ;;  %v283_v31 = vld [vmem:[#allocation5 + $0x6b8] sm:$0xff]  ;;  %v7953_v36 = vcombine.low %v299_v19, %v307_v21 }
 0x1fc   :  { %3792 = vmatpush1.bf16.msra.mxu1 %v8049_v63  ;;  %v291_v63 = vld [vmem:[#allocation5 + $0x6f8] sm:$0xff] }
 0x1fd   :  { %3793 = vmatprep.subr.bf16.mxu1 %v8034_v35  ;;  %v539_v33 = vld [vmem:[#allocation5 + $0xeb8] sm:$0xff]  ;;  %v7938_v38 = vcombine.high %v283_v31, %v291_v63  ;;  %v7937_v44 = vcombine.low %v283_v31, %v291_v63 }
 0x1fe   :  { %3751 = vmatpush1.bf16.msra.mxu0 %v7777_v40  ;;  %v547_v35 = vld [vmem:[#allocation5 + $0xef8] sm:$0xff] }
 0x1ff   :  { %3752 = vmatprep.subr.bf16.mxu0 %v7762_v42  ;;  %v8194_v39 = vcombine.high %v539_v33, %v547_v35  ;;  %v267_v40 = vld [vmem:[#allocation5 + $0x638] sm:$0xff]  ;;  %v8193_v46 = vcombine.low %v539_v33, %v547_v35 }
 0x200   :  { %3794 = vmatpush1.bf16.msra.mxu1 %v8033_v41  ;;  %v275_v41 = vld [vmem:[#allocation5 + $0x678] sm:$0xff] }
 0x201   :  { %3795 = vmatprep.subr.bf16.mxu1 %v8018_v43  ;;  %v523_v42 = vld [vmem:[#allocation5 + $0xe38] sm:$0xff]  ;;  %v7922_v47 = vcombine.high %v267_v40, %v275_v41  ;;  %v7921_v57 = vcombine.low %v267_v40, %v275_v41  ;;  %v8751_v41 = vld [vmem:[#allocation7 + $0xe4] ss:$16 sps:$4 sm:$0xff]  }
 0x202   :  { %3753 = vmatpush1.bf16.msra.mxu0 %v7761_v52  ;;  %v531_v43 = vld [vmem:[#allocation5 + $0xe78] sm:$0xff] }
 0x203   :  { %3754 = vmatprep.subr.bf16.mxu0 %v7746_v55  ;;  %v8178_v49 = vcombine.high %v523_v42, %v531_v43  ;;  %v251_v52 = vld [vmem:[#allocation5 + $0x5b8] sm:$0xff]  ;;  %v8177_v59 = vcombine.low %v523_v42, %v531_v43  ;;  %v3306_v42 = vadd.f32 %v9697_v30, %v9695_v27  ;;  %v8754_v43 = vld [vmem:[#allocation7 + $0x2e4] ss:$16 sps:$4 sm:$0xff]  }
 0x204   :  { %3796 = vmatpush1.bf16.msra.mxu1 %v8017_v53  ;;  %v259_v53 = vld [vmem:[#allocation5 + $0x5f8] sm:$0xff]  ;;  %v8760_v30 = vld [vmem:[#allocation7 + $0x2c4] ss:$16 sps:$4 sm:$0xff]  }
 0x205   :  { %3797 = vmatprep.subr.bf16.mxu1 %v8002_v56  ;;  %v507_v55 = vld [vmem:[#allocation5 + $0xdb8] sm:$0xff]  ;;  %v7906_v60 = vcombine.high %v251_v52, %v259_v53  ;;  %v7905_v9 = vcombine.low %v251_v52, %v259_v53 }
 0x206   :  { %3755 = vmatpush1.bf16.msra.mxu0 %v7745_v1  ;;  %v515_v56 = vld [vmem:[#allocation5 + $0xdf8] sm:$0xff] }
 0x207   :  { %3756 = vmatprep.subr.bf16.mxu0 %v7730_v6  ;;  %v8162_v62 = vcombine.high %v507_v55, %v515_v56  ;;  %v235_v1 = vld [vmem:[#allocation5 + $0x538] sm:$0xff]  ;;  %v8161_v10 = vcombine.low %v507_v55, %v515_v56  ;;  %v8755_v55 = vld [vmem:[#allocation7 + $0xc0] ss:$16 sps:$4 sm:$0xff]  }
 0x208   :  { %3798 = vmatpush1.bf16.msra.mxu1 %v8001_v2  ;;  %v243_v2 = vld [vmem:[#allocation5 + $0x578] sm:$0xff] }
 0x209   :  { %3799 = vmatprep.subr.bf16.mxu1 %v7986_v8  ;;  %v491_v6 = vld [vmem:[#allocation5 + $0xd38] sm:$0xff]  ;;  %v7890_v12 = vcombine.high %v235_v1, %v243_v2  ;;  %v7889_v19 = vcombine.low %v235_v1, %v243_v2 }
 0x20a   :  { %3757 = vmatpush1.bf16.msra.mxu0 %v7729_v14  ;;  %v499_v8 = vld [vmem:[#allocation5 + $0xd78] sm:$0xff] }
 0x20b   :  { %3758 = vmatprep.subr.bf16.mxu0 %v7970_v16  ;;  %v8146_v13 = vcombine.high %v491_v6, %v499_v8  ;;  %v219_v14 = vld [vmem:[#allocation5 + $0x4b8] sm:$0xff]  ;;  %v8145_v21 = vcombine.low %v491_v6, %v499_v8  ;;  %v8764_v8 = vld [vmem:[#allocation7 + $0x2a0] ss:$16 sps:$4 sm:$0xff]  }
 0x20c   :  { %3800 = vmatpush1.bf16.msra.mxu1 %v7985_v15  ;;  %v227_v15 = vld [vmem:[#allocation5 + $0x4f8] sm:$0xff] }
 0x20d   :  { %3801 = vmatprep.subr.bf16.mxu1 %v8226_v18  ;;  %v475_v16 = vld [vmem:[#allocation5 + $0xcb8] sm:$0xff]  ;;  %v7874_v24 = vcombine.high %v219_v14, %v227_v15  ;;  %v7873_v31 = vcombine.low %v219_v14, %v227_v15  ;;  %v8767_v14 = vld [vmem:[#allocation7 + $0x80] ss:$16 sps:$4 sm:$0xff]  }
 0x20e   :  { %3759 = vmatpush2.bf16.msra.mxu0 %v7969_v26  ;;  %v483_v18 = vld [vmem:[#allocation5 + $0xcf8] sm:$0xff] }
 0x20f   :  { %3760 = vmatprep.subr.bf16.mxu0 %v7954_v58  ;;  %v8130_v25 = vcombine.high %v475_v16, %v483_v18  ;;  %v203_v26 = vld [vmem:[#allocation5 + $0x438] sm:$0xff]  ;;  %v8129_v63 = vcombine.low %v475_v16, %v483_v18  ;;  %v8770_v16 = vld [vmem:[#allocation7 + $0x280] ss:$16 sps:$4 sm:$0xff]   ;;  %v8775_v18 = vld [vmem:[#allocation7 + $0x64] ss:$16 sps:$4 sm:$0xff]  }
 0x210   :  { %3802 = vmatpush2.bf16.msra.mxu1 %v8225_v28  ;;  %v211_v28 = vld [vmem:[#allocation5 + $0x478] sm:$0xff] }
 0x211   :  { %3803 = vmatprep.subr.bf16.mxu1 %v8210_v29  ;;  %v459_v58 = vld [vmem:[#allocation5 + $0xc38] sm:$0xff]  ;;  %v7858_v33 = vcombine.high %v203_v26, %v211_v28 }
 0x212   :  { %3761 = vmatpush2.bf16.msra.mxu0 %v7953_v36  ;;  %v467_v29 = vld [vmem:[#allocation5 + $0xc78] sm:$0xff]  ;;  %v3224_v36 = vadd.f32 %v9691_v17, %v9689_v11  ;;  %v8749_v11 = vld [vmem:[#allocation7 + $0xe0] ss:$16 sps:$4 sm:$0xff]  }
 0x213   :  { %3762 = vmatprep.subr.bf16.mxu0 %v7938_v38  ;;  %v8114_v35 = vcombine.high %v459_v58, %v467_v29  ;;  %v7857_v38 = vcombine.low %v203_v26, %v211_v28  ;;  %v8113_v40 = vcombine.low %v459_v58, %v467_v29  ;;  %v8784_v26 = vld [vmem:[#allocation7 + $0x244] ss:$16 sps:$4 sm:$0xff]   ;;  %v8779_v28 = vld [vmem:[#allocation7 + $0x40] ss:$16 sps:$4 sm:$0xff]  }
 0x214   :  { %3804 = vmatpush2.bf16.msra.mxu1 %v8209_v37  ;;  %v3310_v37 = vadd.f32 %v9705_v54, %v9703_v51  ;;  %v9739_v51 = vpop.f32.mrf.mxu0  ;;  %v8752_v54 = vld [vmem:[#allocation7 + $0x2e0] ss:$16 sps:$4 sm:$0xff]   ;;  %v8787_v29 = vld [vmem:[#allocation7 + $0x24] ss:$16 sps:$4 sm:$0xff]  }
 0x215   :  { %3805 = vmatprep.subr.bf16.mxu1 %v8194_v39  ;;  %v3220_v39 = vadd.f32 %v9683_v4, %v9681_v61  ;;  %v3831_v61 = vmax.f32 %v3306_v42, 0.0  ;;  %v9741_v4 = vpop.f32.mrf.mxu1  ;;  %v8782_v58 = vld [vmem:[#allocation7 + $0x240] ss:$16 sps:$4 sm:$0xff]  }
 0x216   :  { %3763 = vmatpush2.bf16.msra.mxu0 %v7937_v44  ;;  %v3845_v44 = vmax.f32 %v3224_v36, 0.0  ;;  %v8796_v36 = vld [vmem:[#allocation7 + $0x204] ss:$16 sps:$4 sm:$0xff]   ;;  %v8800_v42 = vld [vmem:[#allocation7 + $0x3e0] ss:$16 sps:$4 sm:$0xff]  }
 0x217   :  { %3764 = vmatprep.subr.bf16.mxu0 %v7922_v47  ;;  %v3829_v17 = vmax.f32 %v3220_v39, 0.0  ;;  %v8757_v47 = vld [vmem:[#allocation7 + $0xc4] ss:$16 sps:$4 sm:$0xff]  }
 0x218   :  { %3806 = vmatpush2.bf16.msra.mxu1 %v8193_v46  ;;  %v3847_v46 = vmax.f32 %v3310_v37, 0.0  ;;  %v8791_v37 = vld [vmem:[#allocation7] ss:$16 sps:$4 sm:$0xff]   ;;  %v8799_v39 = vld [vmem:[#allocation7 + $0x1e4] ss:$16 sps:$4 sm:$0xff]  }
 0x219   :  { %3807 = vmatprep.subr.bf16.mxu1 %v8178_v49  ;;  %v9743_v49 = vpack.c.bf16 %v3845_v44, %v3829_v17  ;;  %v8808_v44 = vld [vmem:[#allocation7 + $0x3c4] ss:$16 sps:$4 sm:$0xff]  }
 0x21a   :  { %3765 = vmatpush2.bf16.msra.mxu0 %v7921_v57  ;;  %v9746_v52 = vpack.c.bf16 %v3847_v46, %v3831_v61  ;;  %v8803_v46 = vld [vmem:[#allocation7 + $0x1c0] ss:$16 sps:$4 sm:$0xff]   ;;  %v8811_v17 = vld [vmem:[#allocation7 + $0x1a4] ss:$16 sps:$4 sm:$0xff]  }
 0x21b   :  { %3766 = vmatprep.subr.bf16.mxu0 %v7906_v60  ;;  %v8763_v60 = vld [vmem:[#allocation7 + $0xa4] ss:$16 sps:$4 sm:$0xff]   ;;  %v8809_v61 = vld [vmem:[#allocation7 + $0x1a0] ss:$16 sps:$4 sm:$0xff]  }
 0x21c   :  { %3808 = vmatpush2.bf16.msra.mxu1 %v8177_v59  ;;  %v8758_v59 = vld [vmem:[#allocation7 + $0x2c0] ss:$16 sps:$4 sm:$0xff]  }
 0x21d   :  { %3809 = vmatprep.subr.bf16.mxu1 %v8162_v62 }
 0x21e   :  { %3767 = vmatpush2.bf16.msra.mxu0 %v7905_v9  ;;  %v8769_v9 = vld [vmem:[#allocation7 + $0x84] ss:$16 sps:$4 sm:$0xff]  }
 0x21f   :  { %3768 = vmatprep.subr.bf16.mxu0 %v7890_v12 }
 0x220   :  { %3810 = vmatpush2.bf16.msra.mxu1 %v8161_v10  ;;  %v8772_v10 = vld [vmem:[#allocation7 + $0x284] ss:$16 sps:$4 sm:$0xff]  }
 0x221   :  { %3811 = vmatprep.subr.bf16.mxu1 %v8146_v13 }
 0x222   :  { %3769 = vmatpush2.bf16.msra.mxu0 %v7889_v19  ;;  %v8778_v19 = vld [vmem:[#allocation7 + $0x264] ss:$16 sps:$4 sm:$0xff]  }
 0x223   :  { %3770 = vmatprep.subr.bf16.mxu0 %v7874_v24  ;;  %v8776_v24 = vld [vmem:[#allocation7 + $0x260] ss:$16 sps:$4 sm:$0xff]  }
 0x224   :  { %3812 = vmatpush2.bf16.msra.mxu1 %v8145_v21  ;;  %v8773_v21 = vld [vmem:[#allocation7 + $0x60] ss:$16 sps:$4 sm:$0xff]  }
 0x225   :  { %3813 = vmatprep.subr.bf16.mxu1 %v8130_v25  ;;  %v8781_v25 = vld [vmem:[#allocation7 + $0x44] ss:$16 sps:$4 sm:$0xff]  }
 0x226   :  { %3771 = vmatpush2.bf16.msra.mxu0 %v7873_v31  ;;  %v8790_v31 = vld [vmem:[#allocation7 + $0x224] ss:$16 sps:$4 sm:$0xff]  }
 0x227   :  { %3772 = vmatprep.subr.bf16.mxu0 %v7858_v33  ;;  %v8788_v33 = vld [vmem:[#allocation7 + $0x220] ss:$16 sps:$4 sm:$0xff]  }
 0x228   :  { %3814 = vmatpush2.bf16.msra.mxu1 %v8129_v63  ;;  %v8785_v63 = vld [vmem:[#allocation7 + $0x20] ss:$16 sps:$4 sm:$0xff]  }
 0x229   :  { %3815 = vmatprep.subr.bf16.mxu1 %v8114_v35  ;;  %v8793_v35 = vld [vmem:[#allocation7 + $0x4] ss:$16 sps:$4 sm:$0xff]  }
 0x22a   :  { %3773 = vmatpush2.bf16.msra.mxu0 %v7857_v38  ;;  %v8794_v38 = vld [vmem:[#allocation7 + $0x200] ss:$16 sps:$4 sm:$0xff]  }
 0x22b   :  { %6948 = vmatprep.subr.bf16.mxu0 %v8751_v41  ;;  %v8797_v41 = vld [vmem:[#allocation7 + $0x1e0] ss:$16 sps:$4 sm:$0xff]  }
 0x22c   :  { %3816 = vmatpush2.bf16.msra.mxu1 %v8113_v40  ;;  %v8802_v40 = vld [vmem:[#allocation7 + $0x3e4] ss:$16 sps:$4 sm:$0xff]  }
 0x22d   :  { %6991 = vmatprep.subr.bf16.mxu1 %v8754_v43  ;;  %v3518_v27 = vpop.f32.mrf.mxu0  ;;  %3775 = vmatmul.mubr.bf16.vlgmr.msra.gmra.mxu0 %v9663_v20  ;;  %v8766_v20 = vld [vmem:[#allocation7 + $0x2a4] ss:$16 sps:$4 sm:$0xff]  }
 0x22e   :  { %6949 = vmatpush1.bf16.msra.mxu0 %v8749_v11  ;;  %6980 = vmatprep.mubr.bf16.mxu0 %v9743_v49  ;;  %v8805_v43 = vld [vmem:[#allocation7 + $0x1c4] ss:$16 sps:$4 sm:$0xff]   ;;  %v8806_v11 = vld [vmem:[#allocation7 + $0x3c0] ss:$16 sps:$4 sm:$0xff]  }
 0x22f   :  { %v3561_v53 = vpop.f32.mrf.mxu1  ;;  %3818 = vmatmul.mubr.bf16.vlgmr.msra.gmra.mxu1 %v9665_v23  ;;  %v9750_v57 = vpop.f32.mrf.mxu0  ;;  %6950 = vmatprep.subr.bf16.mxu0 %v8757_v47  ;;  %v8761_v23 = vld [vmem:[#allocation7 + $0xa0] ss:$16 sps:$4 sm:$0xff]  }
 0x230   :  { %v3562_v56 = vadd.f32 %v3561_v53, %v3518_v27  ;;  %6992 = vmatpush1.bf16.msra.mxu1 %v8752_v54  ;;  %7023 = vmatprep.mubr.bf16.mxu1 %v9746_v52  ;;  %v8814_v54 = vld [vmem:[#allocation7 + $0x3a4] ss:$16 sps:$4 sm:$0xff]   ;;  %v8812_v47 = vld [vmem:[#allocation7 + $0x3a0] ss:$16 sps:$4 sm:$0xff]  }
 0x231   :  { %v9753_v62 = vpop.f32.mrf.mxu1  ;;  %v3522_v1 = vpop.f32.mrf.mxu0  ;;  %6993 = vmatprep.subr.bf16.mxu1 %v8760_v30  ;;  %v8817_v27 = vld [vmem:[#allocation7 + $0x184] ss:$16 sps:$4 sm:$0xff]   ;;  %v8815_v53 = vld [vmem:[#allocation7 + $0x180] ss:$16 sps:$4 sm:$0xff]  }
 0x232   :  { %6951 = vmatpush1.bf16.msra.mxu0 %v8755_v55  ;;  %v3836_v12 = vmax.f32 %v3562_v56, 0.0  ;;  %v8820_v30 = vld [vmem:[#allocation7 + $0x384] ss:$16 sps:$4 sm:$0xff]   ;;  %v8818_v55 = vld [vmem:[#allocation7 + $0x380] ss:$16 sps:$4 sm:$0xff]  }
 0x233   :  { %v3565_v2 = vpop.f32.mrf.mxu1  ;;  %6952 = vmatprep.subr.bf16.mxu0 %v8763_v60  ;;  %v8823_v56 = vld [vmem:[#allocation7 + $0x164] ss:$16 sps:$4 sm:$0xff]   ;;  %v8821_v60 = vld [vmem:[#allocation7 + $0x160] ss:$16 sps:$4 sm:$0xff]  }
 0x234   :  { %v3566_v6 = vadd.f32 %v3565_v2, %v3522_v1  ;;  %6994 = vmatpush1.bf16.msra.mxu1 %v8758_v59  ;;  %v8826_v59 = vld [vmem:[#allocation7 + $0x364] ss:$16 sps:$4 sm:$0xff]  }
 0x235   :  { %6995 = vmatprep.subr.bf16.mxu1 %v8766_v20  ;;  %v8824_v20 = vld [vmem:[#allocation7 + $0x360] ss:$16 sps:$4 sm:$0xff]   ;;  %v8829_v1 = vld [vmem:[#allocation7 + $0x144] ss:$16 sps:$4 sm:$0xff]  }
 0x236   :  { %v3852_v13 = vmax.f32 %v3566_v6, 0.0  ;;  %6953 = vmatpush1.bf16.msra.mxu0 %v8761_v23  ;;  %v8832_v2 = vld [vmem:[#allocation7 + $0x344] ss:$16 sps:$4 sm:$0xff]   ;;  %v8827_v23 = vld [vmem:[#allocation7 + $0x140] ss:$16 sps:$4 sm:$0xff]  }
 0x237   :  { %6954 = vmatprep.subr.bf16.mxu0 %v8769_v9  ;;  %v8830_v6 = vld [vmem:[#allocation7 + $0x340] ss:$16 sps:$4 sm:$0xff]   ;;  %v8838_v9 = vld [vmem:[#allocation7 + $0x324] ss:$16 sps:$4 sm:$0xff]  }
 0x238   :  { %v9755_v15 = vpack.c.bf16 %v3852_v13, %v3836_v12  ;;  %6996 = vmatpush1.bf16.msra.mxu1 %v8764_v8  ;;  %v8835_v8 = vld [vmem:[#allocation7 + $0x124] ss:$16 sps:$4 sm:$0xff]   ;;  %v8836_v12 = vld [vmem:[#allocation7 + $0x320] ss:$16 sps:$4 sm:$0xff]  }
 0x239   :  { %6997 = vmatprep.subr.bf16.mxu1 %v8772_v10  ;;  %v8833_v10 = vld [vmem:[#allocation7 + $0x120] ss:$16 sps:$4 sm:$0xff]   ;;  %v8841_v13 = vld [vmem:[#allocation7 + $0x104] ss:$16 sps:$4 sm:$0xff]  }
 0x23a   :  { %6955 = vmatpush1.bf16.msra.mxu0 %v8767_v14  ;;  %v8844_v14 = vld [vmem:[#allocation7 + $0x304] ss:$16 sps:$4 sm:$0xff]  }
 0x23b   :  { %6956 = vmatprep.subr.bf16.mxu0 %v8775_v18  ;;  %v3482_v18 = vadd.f32 %v9741_v4, %v9739_v51  ;;  %v9765_v51 = vpop.f32.mrf.mxu0  ;;  %v8848_v4 = vld [vmem:[#allocation7 + $0x6e0] ss:$16 sps:$4 sm:$0xff]  }
 0x23c   :  { %6998 = vmatpush1.bf16.msra.mxu1 %v8770_v16  ;;  %v3396_v16 = vadd.f32 %v9719_v48, %v9717_v45  ;;  %v8845_v45 = vld [vmem:[#allocation7 + $0x4e0] ss:$16 sps:$4 sm:$0xff]  }
 0x23d   :  { %6999 = vmatprep.subr.bf16.mxu1 %v8778_v19  ;;  %v8839_v19 = vld [vmem:[#allocation7 + $0x100] ss:$16 sps:$4 sm:$0xff]  }
 0x23e   :  { %6957 = vmatpush1.bf16.msra.mxu0 %v8773_v21  ;;  %v3392_v21 = vadd.f32 %v9711_v7, %v9709_v3  ;;  %v9767_v7 = vpop.f32.mrf.mxu1 }
 0x23f   :  { %6958 = vmatprep.subr.bf16.mxu0 %v8781_v25  ;;  %v8847_v25 = vld [vmem:[#allocation7 + $0x4e4] ss:$16 sps:$4 sm:$0xff]  }
 0x240   :  { %7000 = vmatpush1.bf16.msra.mxu1 %v8776_v24  ;;  %v8842_v24 = vld [vmem:[#allocation7 + $0x300] ss:$16 sps:$4 sm:$0xff]   ;;  %v3833_v48 = vmax.f32 %v3392_v21, 0.0  ;;  %v8898_v21 = vld [vmem:[#allocation7 + $0x7e4] ss:$16 sps:$4 sm:$0xff]  }
 0x241   :  { %7001 = vmatprep.subr.bf16.mxu1 %v8784_v26  ;;  %v3478_v26 = vadd.f32 %v9725_v5, %v9723_v0  ;;  %v8856_v5 = vld [vmem:[#allocation7 + $0x6c4] ss:$16 sps:$4 sm:$0xff]  }
 0x242   :  { %6959 = vmatpush1.bf16.msra.mxu0 %v8779_v28  ;;  %v8850_v28 = vld [vmem:[#allocation7 + $0x6e4] ss:$16 sps:$4 sm:$0xff]  }
 0x243   :  { %6960 = vmatprep.subr.bf16.mxu0 %v8787_v29  ;;  %v3851_v29 = vmax.f32 %v3482_v18, 0.0  ;;  %v3835_v3 = vmax.f32 %v3478_v26, 0.0  ;;  %v8890_v18 = vld [vmem:[#allocation7 + $0x600] ss:$16 sps:$4 sm:$0xff]   ;;  %v8901_v26 = vld [vmem:[#allocation7 + $0x5c4] ss:$16 sps:$4 sm:$0xff]  }
 0x244   :  { %7002 = vmatpush1.bf16.msra.mxu1 %v8782_v58  ;;  %v3849_v58 = vmax.f32 %v3396_v16, 0.0  ;;  %v8887_v16 = vld [vmem:[#allocation7 + $0x400] ss:$16 sps:$4 sm:$0xff]  }
 0x245   :  { %7003 = vmatprep.subr.bf16.mxu1 %v8790_v31  ;;  %v8853_v31 = vld [vmem:[#allocation7 + $0x4c4] ss:$16 sps:$4 sm:$0xff]  }
 0x246   :  { %6961 = vmatpush1.bf16.msra.mxu0 %v8785_v63  ;;  %v9769_v63 = vpack.c.bf16 %v3849_v58, %v3833_v48  ;;  %v8899_v58 = vld [vmem:[#allocation7 + $0x5c0] ss:$16 sps:$4 sm:$0xff]   ;;  %v8910_v48 = vld [vmem:[#allocation7 + $0x7a4] ss:$16 sps:$4 sm:$0xff]  }
 0x247   :  { %6962 = vmatprep.subr.bf16.mxu0 %v8793_v35 }
 0x248   :  { %7004 = vmatpush1.bf16.msra.mxu1 %v8788_v33  ;;  %v9772_v33 = vpack.c.bf16 %v3851_v29, %v3835_v3  ;;  %v8902_v29 = vld [vmem:[#allocation7 + $0x7c0] ss:$16 sps:$4 sm:$0xff]  }
 0x249   :  { %7005 = vmatprep.subr.bf16.mxu1 %v8796_v36  ;;  %v8851_v36 = vld [vmem:[#allocation7 + $0x4c0] ss:$16 sps:$4 sm:$0xff]  }
 0x24a   :  { %6963 = vmatpush1.bf16.msra.mxu0 %v8791_v37  ;;  %v8908_v3 = vld [vmem:[#allocation7 + $0x7a0] ss:$16 sps:$4 sm:$0xff]  }
 0x24b   :  { %6964 = vmatprep.subr.bf16.mxu0 %v8799_v39  ;;  %v8854_v39 = vld [vmem:[#allocation7 + $0x6c0] ss:$16 sps:$4 sm:$0xff]  }
 0x24c   :  { %7006 = vmatpush1.bf16.msra.mxu1 %v8794_v38 }
 0x24d   :  { %7007 = vmatprep.subr.bf16.mxu1 %v8802_v40  ;;  %v8859_v40 = vld [vmem:[#allocation7 + $0x4a4] ss:$16 sps:$4 sm:$0xff]  }
 0x24e   :  { %6965 = vmatpush2.bf16.msra.mxu0 %v8797_v41 }
 0x24f   :  { %6966 = vmatprep.subr.bf16.mxu0 %v8805_v43 }
 0x250   :  { %7008 = vmatpush2.bf16.msra.mxu1 %v8800_v42  ;;  %v8862_v42 = vld [vmem:[#allocation7 + $0x6a4] ss:$16 sps:$4 sm:$0xff]  }
 0x251   :  { %7009 = vmatprep.subr.bf16.mxu1 %v8808_v44 }
 0x252   :  { %6967 = vmatpush2.bf16.msra.mxu0 %v8803_v46  ;;  %v8857_v46 = vld [vmem:[#allocation7 + $0x4a0] ss:$16 sps:$4 sm:$0xff]  }
 0x253   :  { %6968 = vmatprep.subr.bf16.mxu0 %v8811_v17  ;;  %v8860_v17 = vld [vmem:[#allocation7 + $0x6a0] ss:$16 sps:$4 sm:$0xff]  }
 0x254   :  { %7010 = vmatpush2.bf16.msra.mxu1 %v8806_v11 }
 0x255   :  { %7011 = vmatprep.subr.bf16.mxu1 %v8814_v54  ;;  %v8865_v54 = vld [vmem:[#allocation7 + $0x484] ss:$16 sps:$4 sm:$0xff]  }
 0x256   :  { %6969 = vmatpush2.bf16.msra.mxu0 %v8809_v61  ;;  %v8868_v61 = vld [vmem:[#allocation7 + $0x684] ss:$16 sps:$4 sm:$0xff]  }
 0x257   :  { %6970 = vmatprep.subr.bf16.mxu0 %v8817_v27 }
 0x258   :  { %7012 = vmatpush2.bf16.msra.mxu1 %v8812_v47 }
 0x259   :  { %7013 = vmatprep.subr.bf16.mxu1 %v8820_v30  ;;  %v8863_v30 = vld [vmem:[#allocation7 + $0x480] ss:$16 sps:$4 sm:$0xff]  }
 0x25a   :  { %6971 = vmatpush2.bf16.msra.mxu0 %v8815_v53 }
 0x25b   :  { %6972 = vmatprep.subr.bf16.mxu0 %v8823_v56  ;;  %v8871_v56 = vld [vmem:[#allocation7 + $0x464] ss:$16 sps:$4 sm:$0xff]  }
 0x25c   :  { %7014 = vmatpush2.bf16.msra.mxu1 %v8818_v55  ;;  %v8866_v55 = vld [vmem:[#allocation7 + $0x680] ss:$16 sps:$4 sm:$0xff]  }
 0x25d   :  { %7015 = vmatprep.subr.bf16.mxu1 %v8826_v59  ;;  %v8874_v59 = vld [vmem:[#allocation7 + $0x664] ss:$16 sps:$4 sm:$0xff]  }
 0x25e   :  { %6973 = vmatpush2.bf16.msra.mxu0 %v8821_v60  ;;  %v8869_v60 = vld [vmem:[#allocation7 + $0x460] ss:$16 sps:$4 sm:$0xff]  }
 0x25f   :  { %6974 = vmatprep.subr.bf16.mxu0 %v8829_v1  ;;  %v8877_v1 = vld [vmem:[#allocation7 + $0x444] ss:$16 sps:$4 sm:$0xff]  }
 0x260   :  { %7016 = vmatpush2.bf16.msra.mxu1 %v8824_v20  ;;  %v8872_v20 = vld [vmem:[#allocation7 + $0x660] ss:$16 sps:$4 sm:$0xff]  }
 0x261   :  { %7017 = vmatprep.subr.bf16.mxu1 %v8832_v2  ;;  %v8880_v2 = vld [vmem:[#allocation7 + $0x644] ss:$16 sps:$4 sm:$0xff]  }
 0x262   :  { %6975 = vmatpush2.bf16.msra.mxu0 %v8827_v23  ;;  %v8875_v23 = vld [vmem:[#allocation7 + $0x440] ss:$16 sps:$4 sm:$0xff]  }
 0x263   :  { %6976 = vmatprep.subr.bf16.mxu0 %v8835_v8  ;;  %v8883_v8 = vld [vmem:[#allocation7 + $0x424] ss:$16 sps:$4 sm:$0xff]  }
 0x264   :  { %7018 = vmatpush2.bf16.msra.mxu1 %v8830_v6  ;;  %v8878_v6 = vld [vmem:[#allocation7 + $0x640] ss:$16 sps:$4 sm:$0xff]  }
 0x265   :  { %7019 = vmatprep.subr.bf16.mxu1 %v8838_v9  ;;  %v8886_v9 = vld [vmem:[#allocation7 + $0x624] ss:$16 sps:$4 sm:$0xff]  }
 0x266   :  { %6977 = vmatpush2.bf16.msra.mxu0 %v8833_v10  ;;  %v8881_v10 = vld [vmem:[#allocation7 + $0x420] ss:$16 sps:$4 sm:$0xff]  }
 0x267   :  { %6978 = vmatprep.subr.bf16.mxu0 %v8841_v13  ;;  %v8889_v13 = vld [vmem:[#allocation7 + $0x404] ss:$16 sps:$4 sm:$0xff]  }
 0x268   :  { %7020 = vmatpush2.bf16.msra.mxu1 %v8836_v12  ;;  %v8884_v12 = vld [vmem:[#allocation7 + $0x620] ss:$16 sps:$4 sm:$0xff]  }
 0x269   :  { %7021 = vmatprep.subr.bf16.mxu1 %v8844_v14  ;;  %v8892_v14 = vld [vmem:[#allocation7 + $0x604] ss:$16 sps:$4 sm:$0xff]  }
 0x26a   :  { %6979 = vmatpush2.bf16.msra.mxu0 %v8839_v19  ;;  %v8895_v19 = vld [vmem:[#allocation7 + $0x5e4] ss:$16 sps:$4 sm:$0xff]  }
 0x26b   :  { %7034 = vmatprep.subr.bf16.mxu0 %v8847_v25  ;;  %v8896_v25 = vld [vmem:[#allocation7 + $0x7e0] ss:$16 sps:$4 sm:$0xff]  }
 0x26c   :  { %7022 = vmatpush2.bf16.msra.mxu1 %v8842_v24  ;;  %v8893_v24 = vld [vmem:[#allocation7 + $0x5e0] ss:$16 sps:$4 sm:$0xff]  }
 0x26d   :  { %7077 = vmatprep.subr.bf16.mxu1 %v8850_v28  ;;  %v3604_v0 = vpop.f32.mrf.mxu0  ;;  %6981 = vmatmul.mubr.bf16.vlgmr.msra.gmra.mxu0 %v9687_v22  ;;  %v8904_v28 = vld [vmem:[#allocation7 + $0x7c4] ss:$16 sps:$4 sm:$0xff]  }
 0x26e   :  { %7035 = vmatpush1.bf16.msra.mxu0 %v8845_v45  ;;  %7066 = vmatprep.mubr.bf16.mxu0 %v9769_v63  ;;  %v8907_v45 = vld [vmem:[#allocation7 + $0x5a4] ss:$16 sps:$4 sm:$0xff]  }
 0x26f   :  { %v3647_v35 = vpop.f32.mrf.mxu1  ;;  %7024 = vmatmul.mubr.bf16.vlgmr.msra.gmra.mxu1 %v9701_v50  ;;  %v9776_v38 = vpop.f32.mrf.mxu0  ;;  %7036 = vmatprep.subr.bf16.mxu0 %v8853_v31  ;;  %v8913_v31 = vld [vmem:[#allocation7 + $0x584] ss:$16 sps:$4 sm:$0xff]  }
 0x270   :  { %v3648_v37 = vadd.f32 %v3647_v35, %v3604_v0  ;;  %7078 = vmatpush1.bf16.msra.mxu1 %v8848_v4  ;;  %7109 = vmatprep.mubr.bf16.mxu1 %v9772_v33  ;;  %v8905_v4 = vld [vmem:[#allocation7 + $0x5a0] ss:$16 sps:$4 sm:$0xff]   ;;  %v8916_v0 = vld [vmem:[#allocation7 + $0x784] ss:$16 sps:$4 sm:$0xff]  }
 0x271   :  { %v9779_v41 = vpop.f32.mrf.mxu1  ;;  %v3608_v43 = vpop.f32.mrf.mxu0  ;;  %7079 = vmatprep.subr.bf16.mxu1 %v8856_v5  ;;  %v8911_v5 = vld [vmem:[#allocation7 + $0x580] ss:$16 sps:$4 sm:$0xff]  }
 0x272   :  { %7037 = vmatpush1.bf16.msra.mxu0 %v8851_v36  ;;  %v3838_v47 = vmax.f32 %v3648_v37, 0.0  ;;  %v8914_v35 = vld [vmem:[#allocation7 + $0x780] ss:$16 sps:$4 sm:$0xff]   ;;  %v8919_v36 = vld [vmem:[#allocation7 + $0x564] ss:$16 sps:$4 sm:$0xff]  }
 0x273   :  { %v3651_v44 = vpop.f32.mrf.mxu1  ;;  %7038 = vmatprep.subr.bf16.mxu0 %v8859_v40  ;;  %v8922_v37 = vld [vmem:[#allocation7 + $0x764] ss:$16 sps:$4 sm:$0xff]   ;;  %v8920_v40 = vld [vmem:[#allocation7 + $0x760] ss:$16 sps:$4 sm:$0xff]  }
 0x274   :  { %v3652_v11 = vadd.f32 %v3651_v44, %v3608_v43  ;;  %7080 = vmatpush1.bf16.msra.mxu1 %v8854_v39  ;;  %v8917_v39 = vld [vmem:[#allocation7 + $0x560] ss:$16 sps:$4 sm:$0xff]   ;;  %v8928_v43 = vld [vmem:[#allocation7 + $0x744] ss:$16 sps:$4 sm:$0xff]  }
 0x275   :  { %7081 = vmatprep.subr.bf16.mxu1 %v8862_v42  ;;  %v8925_v42 = vld [vmem:[#allocation7 + $0x544] ss:$16 sps:$4 sm:$0xff]   ;;  %v8923_v44 = vld [vmem:[#allocation7 + $0x540] ss:$16 sps:$4 sm:$0xff]  }
 0x276   :  { %v3854_v27 = vmax.f32 %v3652_v11, 0.0  ;;  %7039 = vmatpush1.bf16.msra.mxu0 %v8857_v46  ;;  %v8926_v46 = vld [vmem:[#allocation7 + $0x740] ss:$16 sps:$4 sm:$0xff]   ;;  %v8931_v11 = vld [vmem:[#allocation7 + $0x524] ss:$16 sps:$4 sm:$0xff]  }
 0x277   :  { %7040 = vmatprep.subr.bf16.mxu0 %v8865_v54  ;;  %v8929_v54 = vld [vmem:[#allocation7 + $0x520] ss:$16 sps:$4 sm:$0xff]  }
 0x278   :  { %v9781_v53 = vpack.c.bf16 %v3854_v27, %v3838_v47  ;;  %7082 = vmatpush1.bf16.msra.mxu1 %v8860_v17  ;;  %v8934_v17 = vld [vmem:[#allocation7 + $0x724] ss:$16 sps:$4 sm:$0xff]   ;;  %v3653_v47 = vpop.f32.mrf.mxu1  ;;  %v8932_v27 = vld [vmem:[#allocation7 + $0x720] ss:$16 sps:$4 sm:$0xff]  }
 0x279   :  { %7083 = vmatprep.subr.bf16.mxu1 %v8868_v61  ;;  %v3610_v61 = vpop.f32.mrf.mxu0 }
 0x27a   :  { %7041 = vmatpush1.bf16.msra.mxu0 %v8863_v30  ;;  %v8937_v30 = vld [vmem:[#allocation7 + $0x504] ss:$16 sps:$4 sm:$0xff]  }
 0x27b   :  { %7042 = vmatprep.subr.bf16.mxu0 %v8871_v56  ;;  %v3568_v56 = vadd.f32 %v9767_v7, %v9765_v51  ;;  %v8944_v7 = vld [vmem:[#allocation7 + $0xae0] ss:$16 sps:$4 sm:$0xff]  }
 0x27c   :  { %7084 = vmatpush1.bf16.msra.mxu1 %v8866_v55  ;;  %v8940_v55 = vld [vmem:[#allocation7 + $0x704] ss:$16 sps:$4 sm:$0xff]  }
 0x27d   :  { %7085 = vmatprep.subr.bf16.mxu1 %v8874_v59  ;;  %v3654_v59 = vadd.f32 %v3653_v47, %v3610_v61  ;;  %v8977_v61 = vld [vmem:[#allocation7 + $0x820] ss:$16 sps:$4 sm:$0xff]  }
 0x27e   :  { %7043 = vmatpush1.bf16.msra.mxu0 %v8869_v60  ;;  %v8935_v60 = vld [vmem:[#allocation7 + $0x500] ss:$16 sps:$4 sm:$0xff]  }
 0x27f   :  { %7044 = vmatprep.subr.bf16.mxu0 %v8877_v1  ;;  %v8938_v1 = vld [vmem:[#allocation7 + $0x700] ss:$16 sps:$4 sm:$0xff]  }
 0x280   :  { %7086 = vmatpush1.bf16.msra.mxu1 %v8872_v20  ;;  %v3564_v20 = vadd.f32 %v9753_v62, %v9750_v57  ;;  %v8949_v57 = vld [vmem:[#allocation7 + $0x8c4] ss:$16 sps:$4 sm:$0xff]   ;;  %v8980_v47 = vld [vmem:[#allocation7 + $0xa20] ss:$16 sps:$4 sm:$0xff]  }
 0x281   :  { %7087 = vmatprep.subr.bf16.mxu1 %v8880_v2  ;;  %v8943_v2 = vld [vmem:[#allocation7 + $0x8e4] ss:$16 sps:$4 sm:$0xff]  }
 0x282   :  { %7045 = vmatpush1.bf16.msra.mxu0 %v8875_v23  ;;  %v3650_v23 = vadd.f32 %v9779_v41, %v9776_v38  ;;  %v3837_v51 = vmax.f32 %v3564_v20, 0.0  ;;  %v8989_v20 = vld [vmem:[#allocation7 + $0x9e0] ss:$16 sps:$4 sm:$0xff]  }
 0x283   :  { %7046 = vmatprep.subr.bf16.mxu0 %v8883_v8  ;;  %v3853_v8 = vmax.f32 %v3568_v56, 0.0  ;;  %v8986_v56 = vld [vmem:[#allocation7 + $0xa00] ss:$16 sps:$4 sm:$0xff]  }
 0x284   :  { %7088 = vmatpush1.bf16.msra.mxu1 %v8878_v6  ;;  %v8946_v6 = vld [vmem:[#allocation7 + $0xae4] ss:$16 sps:$4 sm:$0xff]  }
 0x285   :  { %7089 = vmatprep.subr.bf16.mxu1 %v8886_v9  ;;  %v3855_v9 = vmax.f32 %v3654_v59, 0.0  ;;  %v9789_v62 = vpack.c.bf16 %v3853_v8, %v3837_v51  ;;  %v8991_v59 = vld [vmem:[#allocation7 + $0x9e4] ss:$16 sps:$4 sm:$0xff]   ;;  %v8998_v8 = vld [vmem:[#allocation7 + $0xbc0] ss:$16 sps:$4 sm:$0xff]  }
 0x286   :  { %7047 = vmatpush1.bf16.msra.mxu0 %v8881_v10  ;;  %v8941_v10 = vld [vmem:[#allocation7 + $0x8e0] ss:$16 sps:$4 sm:$0xff]  }
 0x287   :  { %7048 = vmatprep.subr.bf16.mxu0 %v8889_v13  ;;  %v9001_v51 = vld [vmem:[#allocation7 + $0x9a0] ss:$16 sps:$4 sm:$0xff]  }
 0x288   :  { %7090 = vmatpush1.bf16.msra.mxu1 %v8884_v12  ;;  %v3839_v12 = vmax.f32 %v3650_v23, 0.0  ;;  %v9000_v23 = vld [vmem:[#allocation7 + $0xbc4] ss:$16 sps:$4 sm:$0xff]  }
 0x289   :  { %7091 = vmatprep.subr.bf16.mxu1 %v8892_v14  ;;  %v8952_v14 = vld [vmem:[#allocation7 + $0xac4] ss:$16 sps:$4 sm:$0xff]  }
 0x28a   :  { %7049 = vmatpush1.bf16.msra.mxu0 %v8887_v16  ;;  %v9792_v38 = vpack.c.bf16 %v3855_v9, %v3839_v12  ;;  %v8947_v16 = vld [vmem:[#allocation7 + $0x8c0] ss:$16 sps:$4 sm:$0xff]   ;;  %v9003_v9 = vld [vmem:[#allocation7 + $0x9a4] ss:$16 sps:$4 sm:$0xff]  }
 0x28b   :  { %7050 = vmatprep.subr.bf16.mxu0 %v8895_v19  ;;  %v9009_v12 = vld [vmem:[#allocation7 + $0x984] ss:$16 sps:$4 sm:$0xff]  }
 0x28c   :  { %7092 = vmatpush1.bf16.msra.mxu1 %v8890_v18 }
 0x28d   :  { %7093 = vmatprep.subr.bf16.mxu1 %v8898_v21  ;;  %v8950_v21 = vld [vmem:[#allocation7 + $0xac0] ss:$16 sps:$4 sm:$0xff]  }
 0x28e   :  { %7051 = vmatpush2.bf16.msra.mxu0 %v8893_v24  ;;  %v8955_v24 = vld [vmem:[#allocation7 + $0x8a4] ss:$16 sps:$4 sm:$0xff]  }
 0x28f   :  { %7052 = vmatprep.subr.bf16.mxu0 %v8901_v26  ;;  %v8958_v26 = vld [vmem:[#allocation7 + $0xaa4] ss:$16 sps:$4 sm:$0xff]  }
 0x290   :  { %7094 = vmatpush2.bf16.msra.mxu1 %v8896_v25 }
 0x291   :  { %7095 = vmatprep.subr.bf16.mxu1 %v8904_v28 }
 0x292   :  { %7053 = vmatpush2.bf16.msra.mxu0 %v8899_v58 }
 0x293   :  { %7054 = vmatprep.subr.bf16.mxu0 %v8907_v45 }
 0x294   :  { %7096 = vmatpush2.bf16.msra.mxu1 %v8902_v29  ;;  %v8953_v29 = vld [vmem:[#allocation7 + $0x8a0] ss:$16 sps:$4 sm:$0xff]  }
 0x295   :  { %7097 = vmatprep.subr.bf16.mxu1 %v8910_v48  ;;  %v8956_v48 = vld [vmem:[#allocation7 + $0xaa0] ss:$16 sps:$4 sm:$0xff]  }
 0x296   :  { %7055 = vmatpush2.bf16.msra.mxu0 %v8905_v4  ;;  %v8961_v4 = vld [vmem:[#allocation7 + $0x884] ss:$16 sps:$4 sm:$0xff]  }
 0x297   :  { %7056 = vmatprep.subr.bf16.mxu0 %v8913_v31 }
 0x298   :  { %7098 = vmatpush2.bf16.msra.mxu1 %v8908_v3  ;;  %v8964_v3 = vld [vmem:[#allocation7 + $0xa84] ss:$16 sps:$4 sm:$0xff]  }
 0x299   :  { %7099 = vmatprep.subr.bf16.mxu1 %v8916_v0 }
 0x29a   :  { %7057 = vmatpush2.bf16.msra.mxu0 %v8911_v5  ;;  %v8959_v5 = vld [vmem:[#allocation7 + $0x880] ss:$16 sps:$4 sm:$0xff]  }
 0x29b   :  { %7058 = vmatprep.subr.bf16.mxu0 %v8919_v36  ;;  %v8962_v36 = vld [vmem:[#allocation7 + $0xa80] ss:$16 sps:$4 sm:$0xff]  }
 0x29c   :  { %7100 = vmatpush2.bf16.msra.mxu1 %v8914_v35 }
 0x29d   :  { %7101 = vmatprep.subr.bf16.mxu1 %v8922_v37  ;;  %v8967_v37 = vld [vmem:[#allocation7 + $0x864] ss:$16 sps:$4 sm:$0xff]  }
 0x29e   :  { %7059 = vmatpush2.bf16.msra.mxu0 %v8917_v39  ;;  %v8970_v39 = vld [vmem:[#allocation7 + $0xa64] ss:$16 sps:$4 sm:$0xff]  }
 0x29f   :  { %7060 = vmatprep.subr.bf16.mxu0 %v8925_v42  ;;  %v8968_v42 = vld [vmem:[#allocation7 + $0xa60] ss:$16 sps:$4 sm:$0xff]  }
 0x2a0   :  { %7102 = vmatpush2.bf16.msra.mxu1 %v8920_v40  ;;  %v8965_v40 = vld [vmem:[#allocation7 + $0x860] ss:$16 sps:$4 sm:$0xff]  }
 0x2a1   :  { %7103 = vmatprep.subr.bf16.mxu1 %v8928_v43  ;;  %v8973_v43 = vld [vmem:[#allocation7 + $0x844] ss:$16 sps:$4 sm:$0xff]  }
 0x2a2   :  { %7061 = vmatpush2.bf16.msra.mxu0 %v8923_v44  ;;  %v8976_v44 = vld [vmem:[#allocation7 + $0xa44] ss:$16 sps:$4 sm:$0xff]  }
 0x2a3   :  { %7062 = vmatprep.subr.bf16.mxu0 %v8931_v11  ;;  %v8974_v11 = vld [vmem:[#allocation7 + $0xa40] ss:$16 sps:$4 sm:$0xff]  }
 0x2a4   :  { %7104 = vmatpush2.bf16.msra.mxu1 %v8926_v46  ;;  %v8971_v46 = vld [vmem:[#allocation7 + $0x840] ss:$16 sps:$4 sm:$0xff]  }
 0x2a5   :  { %7105 = vmatprep.subr.bf16.mxu1 %v8934_v17  ;;  %v8979_v17 = vld [vmem:[#allocation7 + $0x824] ss:$16 sps:$4 sm:$0xff]  }
 0x2a6   :  { %7063 = vmatpush2.bf16.msra.mxu0 %v8929_v54  ;;  %v8982_v54 = vld [vmem:[#allocation7 + $0xa24] ss:$16 sps:$4 sm:$0xff]  }
 0x2a7   :  { %7064 = vmatprep.subr.bf16.mxu0 %v8937_v30  ;;  %v8988_v30 = vld [vmem:[#allocation7 + $0xa04] ss:$16 sps:$4 sm:$0xff]  }
 0x2a8   :  { %7106 = vmatpush2.bf16.msra.mxu1 %v8932_v27  ;;  %v8985_v27 = vld [vmem:[#allocation7 + $0x804] ss:$16 sps:$4 sm:$0xff]  }
 0x2a9   :  { %7107 = vmatprep.subr.bf16.mxu1 %v8940_v55  ;;  %v8983_v55 = vld [vmem:[#allocation7 + $0x800] ss:$16 sps:$4 sm:$0xff]  }
 0x2aa   :  { %7065 = vmatpush2.bf16.msra.mxu0 %v8935_v60  ;;  %v8994_v60 = vld [vmem:[#allocation7 + $0xbe4] ss:$16 sps:$4 sm:$0xff]  }
 0x2ab   :  { %7120 = vmatprep.subr.bf16.mxu0 %v8943_v2  ;;  %v8997_v2 = vld [vmem:[#allocation7 + $0x9c4] ss:$16 sps:$4 sm:$0xff]  }
 0x2ac   :  { %7108 = vmatpush2.bf16.msra.mxu1 %v8938_v1  ;;  %v8992_v1 = vld [vmem:[#allocation7 + $0xbe0] ss:$16 sps:$4 sm:$0xff]  }
 0x2ad   :  { %7163 = vmatprep.subr.bf16.mxu1 %v8946_v6  ;;  %v3690_v13 = vpop.f32.mrf.mxu0  ;;  %7067 = vmatmul.mubr.bf16.vlgmr.msra.gmra.mxu0 %v9715_v34  ;;  %v8995_v6 = vld [vmem:[#allocation7 + $0x9c0] ss:$16 sps:$4 sm:$0xff]  }
 0x2ae   :  { %7121 = vmatpush1.bf16.msra.mxu0 %v8941_v10  ;;  %7152 = vmatprep.mubr.bf16.mxu0 %v9789_v62  ;;  %v9006_v10 = vld [vmem:[#allocation7 + $0xba4] ss:$16 sps:$4 sm:$0xff]  }
 0x2af   :  { %v3733_v41 = vpop.f32.mrf.mxu1  ;;  %7110 = vmatmul.mubr.bf16.vlgmr.msra.gmra.mxu1 %v9729_v32  ;;  %v9796_v19 = vpop.f32.mrf.mxu0  ;;  %7122 = vmatprep.subr.bf16.mxu0 %v8949_v57  ;;  %v9012_v57 = vld [vmem:[#allocation7 + $0xb84] ss:$16 sps:$4 sm:$0xff]  }
 0x2b0   :  { %v3734_v18 = vadd.f32 %v3733_v41, %v3690_v13  ;;  %7164 = vmatpush1.bf16.msra.mxu1 %v8944_v7  ;;  %7195 = vmatprep.mubr.bf16.mxu1 %v9792_v38  ;;  %v9004_v7 = vld [vmem:[#allocation7 + $0xba0] ss:$16 sps:$4 sm:$0xff]   ;;  %v9015_v41 = vld [vmem:[#allocation7 + $0x964] ss:$16 sps:$4 sm:$0xff]  }
 0x2b1   :  { %v9799_v25 = vpop.f32.mrf.mxu1  ;;  %v3694_v28 = vpop.f32.mrf.mxu0  ;;  %7165 = vmatprep.subr.bf16.mxu1 %v8952_v14  ;;  %v9007_v13 = vld [vmem:[#allocation7 + $0x980] ss:$16 sps:$4 sm:$0xff]  }
 0x2b2   :  { %7123 = vmatpush1.bf16.msra.mxu0 %v8947_v16  ;;  %v3840_v31 = vmax.f32 %v3734_v18, 0.0  ;;  %v9010_v14 = vld [vmem:[#allocation7 + $0xb80] ss:$16 sps:$4 sm:$0xff]   ;;  %v9018_v16 = vld [vmem:[#allocation7 + $0xb64] ss:$16 sps:$4 sm:$0xff]  }
 0x2b3   :  { %v3737_v58 = vpop.f32.mrf.mxu1  ;;  %7124 = vmatprep.subr.bf16.mxu0 %v8955_v24  ;;  %v9013_v18 = vld [vmem:[#allocation7 + $0x960] ss:$16 sps:$4 sm:$0xff]   ;;  %v9021_v24 = vld [vmem:[#allocation7 + $0x944] ss:$16 sps:$4 sm:$0xff]  }
 0x2b4   :  { %v3738_v45 = vadd.f32 %v3737_v58, %v3694_v28  ;;  %7166 = vmatpush1.bf16.msra.mxu1 %v8950_v21  ;;  %v9016_v21 = vld [vmem:[#allocation7 + $0xb60] ss:$16 sps:$4 sm:$0xff]  }
 0x2b5   :  { %7167 = vmatprep.subr.bf16.mxu1 %v8958_v26  ;;  %v9024_v26 = vld [vmem:[#allocation7 + $0xb44] ss:$16 sps:$4 sm:$0xff]   ;;  %v9019_v28 = vld [vmem:[#allocation7 + $0x940] ss:$16 sps:$4 sm:$0xff]  }
 0x2b6   :  { %v3856_v0 = vmax.f32 %v3738_v45, 0.0  ;;  %7125 = vmatpush1.bf16.msra.mxu0 %v8953_v29  ;;  %v9022_v58 = vld [vmem:[#allocation7 + $0xb40] ss:$16 sps:$4 sm:$0xff]   ;;  %v9027_v29 = vld [vmem:[#allocation7 + $0x924] ss:$16 sps:$4 sm:$0xff]  }
 0x2b7   :  { %7126 = vmatprep.subr.bf16.mxu0 %v8961_v4  ;;  %v9030_v45 = vld [vmem:[#allocation7 + $0xb24] ss:$16 sps:$4 sm:$0xff]   ;;  %v3739_v4 = vpop.f32.mrf.mxu1 }
 0x2b8   :  { %v9801_v35 = vpack.c.bf16 %v3856_v0, %v3840_v31  ;;  %7168 = vmatpush1.bf16.msra.mxu1 %v8956_v48  ;;  %v3696_v48 = vpop.f32.mrf.mxu0  ;;  %v9028_v31 = vld [vmem:[#allocation7 + $0xb20] ss:$16 sps:$4 sm:$0xff]   ;;  %v9033_v0 = vld [vmem:[#allocation7 + $0x904] ss:$16 sps:$4 sm:$0xff]  }
 0x2b9   :  { %7169 = vmatprep.subr.bf16.mxu1 %v8964_v3  ;;  %v9025_v3 = vld [vmem:[#allocation7 + $0x920] ss:$16 sps:$4 sm:$0xff]  }
 0x2ba   :  { %7127 = vmatpush1.bf16.msra.mxu0 %v8959_v5  ;;  %v9036_v5 = vld [vmem:[#allocation7 + $0xb04] ss:$16 sps:$4 sm:$0xff]  }
 0x2bb   :  { %7128 = vmatprep.subr.bf16.mxu0 %v8967_v37  ;;  %v9031_v37 = vld [vmem:[#allocation7 + $0x900] ss:$16 sps:$4 sm:$0xff]  }
 0x2bc   :  { %7170 = vmatpush1.bf16.msra.mxu1 %v8962_v36  ;;  %v3740_v36 = vadd.f32 %v3739_v4, %v3696_v48  ;;  %v9078_v48 = vld [vmem:[#allocation7 + $0xe24] ss:$16 sps:$4 sm:$0xff]   ;;  %v9073_v4 = vld [vmem:[#allocation7 + $0xc20] ss:$16 sps:$4 sm:$0xff]  }
 0x2bd   :  { %7171 = vmatprep.subr.bf16.mxu1 %v8970_v39  ;;  %v3736_v39 = vadd.f32 %v9799_v25, %v9796_v19  ;;  %v9043_v25 = vld [vmem:[#allocation7 + $0xcc0] ss:$16 sps:$4 sm:$0xff]  }
 0x2be   :  { %7129 = vmatpush1.bf16.msra.mxu0 %v8965_v40  ;;  %v9034_v40 = vld [vmem:[#allocation7 + $0xb00] ss:$16 sps:$4 sm:$0xff]  }
 0x2bf   :  { %7130 = vmatprep.subr.bf16.mxu0 %v8973_v43  ;;  %v9042_v43 = vld [vmem:[#allocation7 + $0xee4] ss:$16 sps:$4 sm:$0xff]  }
 0x2c0   :  { %7172 = vmatpush1.bf16.msra.mxu1 %v8968_v42  ;;  %v9039_v42 = vld [vmem:[#allocation7 + $0xce4] ss:$16 sps:$4 sm:$0xff]  }
 0x2c1   :  { %7173 = vmatprep.subr.bf16.mxu1 %v8976_v44  ;;  %v3857_v44 = vmax.f32 %v3740_v36, 0.0  ;;  %v9082_v36 = vld [vmem:[#allocation7 + $0xe00] ss:$16 sps:$4 sm:$0xff]  }
 0x2c2   :  { %7131 = vmatpush1.bf16.msra.mxu0 %v8971_v46  ;;  %v9037_v46 = vld [vmem:[#allocation7 + $0xce0] ss:$16 sps:$4 sm:$0xff]  }
 0x2c3   :  { %7132 = vmatprep.subr.bf16.mxu0 %v8979_v17  ;;  %v9040_v17 = vld [vmem:[#allocation7 + $0xee0] ss:$16 sps:$4 sm:$0xff]  }
 0x2c4   :  { %7174 = vmatpush1.bf16.msra.mxu1 %v8974_v11  ;;  %v3841_v11 = vmax.f32 %v3736_v39, 0.0  ;;  %v9090_v39 = vld [vmem:[#allocation7 + $0xfe4] ss:$16 sps:$4 sm:$0xff]  }
 0x2c5   :  { %7175 = vmatprep.subr.bf16.mxu1 %v8982_v54  ;;  %v9045_v54 = vld [vmem:[#allocation7 + $0xcc4] ss:$16 sps:$4 sm:$0xff]  }
 0x2c6   :  { %7133 = vmatpush1.bf16.msra.mxu0 %v8977_v61  ;;  %v9048_v61 = vld [vmem:[#allocation7 + $0xec4] ss:$16 sps:$4 sm:$0xff]  }
 0x2c7   :  { %7134 = vmatprep.subr.bf16.mxu0 %v8985_v27 }
 0x2c8   :  { %7176 = vmatpush1.bf16.msra.mxu1 %v8980_v47  ;;  %v9805_v47 = vpack.c.bf16 %v3857_v44, %v3841_v11  ;;  %v9096_v44 = vld [vmem:[#allocation7 + $0xfc4] ss:$16 sps:$4 sm:$0xff]   ;;  %v9094_v11 = vld [vmem:[#allocation7 + $0xfc0] ss:$16 sps:$4 sm:$0xff]  }
 0x2c9   :  { %7177 = vmatprep.subr.bf16.mxu1 %v8988_v30 }
 0x2ca   :  { %7135 = vmatpush1.bf16.msra.mxu0 %v8983_v55  ;;  %v9046_v55 = vld [vmem:[#allocation7 + $0xec0] ss:$16 sps:$4 sm:$0xff]  }
 0x2cb   :  { %7136 = vmatprep.subr.bf16.mxu0 %v8991_v59 }
 0x2cc   :  { %7178 = vmatpush1.bf16.msra.mxu1 %v8986_v56  ;;  %v9051_v56 = vld [vmem:[#allocation7 + $0xca4] ss:$16 sps:$4 sm:$0xff]  }
 0x2cd   :  { %7179 = vmatprep.subr.bf16.mxu1 %v8994_v60  ;;  %v9054_v60 = vld [vmem:[#allocation7 + $0xea4] ss:$16 sps:$4 sm:$0xff]  }
 0x2ce   :  { %7137 = vmatpush2.bf16.msra.mxu0 %v8989_v20 }
 0x2cf   :  { %7138 = vmatprep.subr.bf16.mxu0 %v8997_v2  ;;  %v9049_v2 = vld [vmem:[#allocation7 + $0xca0] ss:$16 sps:$4 sm:$0xff]  }
 0x2d0   :  { %7180 = vmatpush2.bf16.msra.mxu1 %v8992_v1 }
 0x2d1   :  { %7181 = vmatprep.subr.bf16.mxu1 %v9000_v23 }
 0x2d2   :  { %7139 = vmatpush2.bf16.msra.mxu0 %v8995_v6 }
 0x2d3   :  { %7140 = vmatprep.subr.bf16.mxu0 %v9003_v9  ;;  %v9057_v9 = vld [vmem:[#allocation7 + $0xc84] ss:$16 sps:$4 sm:$0xff]  }
 0x2d4   :  { %7182 = vmatpush2.bf16.msra.mxu1 %v8998_v8  ;;  %v9052_v8 = vld [vmem:[#allocation7 + $0xea0] ss:$16 sps:$4 sm:$0xff]  }
 0x2d5   :  { %7183 = vmatprep.subr.bf16.mxu1 %v9006_v10 }
 0x2d6   :  { %7141 = vmatpush2.bf16.msra.mxu0 %v9001_v51  ;;  %v9060_v51 = vld [vmem:[#allocation7 + $0xe84] ss:$16 sps:$4 sm:$0xff]  }
 0x2d7   :  { %7142 = vmatprep.subr.bf16.mxu0 %v9009_v12  ;;  %v9055_v12 = vld [vmem:[#allocation7 + $0xc80] ss:$16 sps:$4 sm:$0xff]  }
 0x2d8   :  { %7184 = vmatpush2.bf16.msra.mxu1 %v9004_v7 }
 0x2d9   :  { %7185 = vmatprep.subr.bf16.mxu1 %v9012_v57 }
 0x2da   :  { %7143 = vmatpush2.bf16.msra.mxu0 %v9007_v13 }
 0x2db   :  { %7144 = vmatprep.subr.bf16.mxu0 %v9015_v41  ;;  %v9063_v41 = vld [vmem:[#allocation7 + $0xc64] ss:$16 sps:$4 sm:$0xff]  }
 0x2dc   :  { %7186 = vmatpush2.bf16.msra.mxu1 %v9010_v14  ;;  %v9058_v14 = vld [vmem:[#allocation7 + $0xe80] ss:$16 sps:$4 sm:$0xff]  }
 0x2dd   :  { %7187 = vmatprep.subr.bf16.mxu1 %v9018_v16  ;;  %v9066_v16 = vld [vmem:[#allocation7 + $0xe64] ss:$16 sps:$4 sm:$0xff]  }
 0x2de   :  { %7145 = vmatpush2.bf16.msra.mxu0 %v9013_v18 }
 0x2df   :  { %7146 = vmatprep.subr.bf16.mxu0 %v9021_v24  ;;  %v9064_v24 = vld [vmem:[#allocation7 + $0xe60] ss:$16 sps:$4 sm:$0xff]  }
 0x2e0   :  { %7188 = vmatpush2.bf16.msra.mxu1 %v9016_v21  ;;  %v9061_v21 = vld [vmem:[#allocation7 + $0xc60] ss:$16 sps:$4 sm:$0xff]  }
 0x2e1   :  { %7189 = vmatprep.subr.bf16.mxu1 %v9024_v26  ;;  %v9069_v26 = vld [vmem:[#allocation7 + $0xc44] ss:$16 sps:$4 sm:$0xff]  }
 0x2e2   :  { %7147 = vmatpush2.bf16.msra.mxu0 %v9019_v28  ;;  %v9072_v28 = vld [vmem:[#allocation7 + $0xe44] ss:$16 sps:$4 sm:$0xff]  }
 0x2e3   :  { %7148 = vmatprep.subr.bf16.mxu0 %v9027_v29  ;;  %v9070_v29 = vld [vmem:[#allocation7 + $0xe40] ss:$16 sps:$4 sm:$0xff]  }
 0x2e4   :  { %7190 = vmatpush2.bf16.msra.mxu1 %v9022_v58  ;;  %v9067_v58 = vld [vmem:[#allocation7 + $0xc40] ss:$16 sps:$4 sm:$0xff]  }
 0x2e5   :  { %7191 = vmatprep.subr.bf16.mxu1 %v9030_v45  ;;  %v9075_v45 = vld [vmem:[#allocation7 + $0xc24] ss:$16 sps:$4 sm:$0xff]  }
 0x2e6   :  { %7149 = vmatpush2.bf16.msra.mxu0 %v9025_v3  ;;  %v9076_v3 = vld [vmem:[#allocation7 + $0xe20] ss:$16 sps:$4 sm:$0xff]  }
 0x2e7   :  { %7150 = vmatprep.subr.bf16.mxu0 %v9033_v0  ;;  %v9084_v0 = vld [vmem:[#allocation7 + $0xe04] ss:$16 sps:$4 sm:$0xff]  }
 0x2e8   :  { %7192 = vmatpush2.bf16.msra.mxu1 %v9028_v31  ;;  %v9081_v31 = vld [vmem:[#allocation7 + $0xc04] ss:$16 sps:$4 sm:$0xff]  }
 0x2e9   :  { %7193 = vmatprep.subr.bf16.mxu1 %v9036_v5  ;;  %v9079_v5 = vld [vmem:[#allocation7 + $0xc00] ss:$16 sps:$4 sm:$0xff]  }
 0x2ea   :  { %7151 = vmatpush2.bf16.msra.mxu0 %v9031_v37  ;;  %v9087_v37 = vld [vmem:[#allocation7 + $0xde4] ss:$16 sps:$4 sm:$0xff]  }
 0x2eb   :  { %7206 = vmatprep.subr.bf16.mxu0 %v9039_v42  ;;  %v9088_v42 = vld [vmem:[#allocation7 + $0xfe0] ss:$16 sps:$4 sm:$0xff]  }
 0x2ec   :  { %7194 = vmatpush2.bf16.msra.mxu1 %v9034_v40  ;;  %v9085_v40 = vld [vmem:[#allocation7 + $0xde0] ss:$16 sps:$4 sm:$0xff]  }
 0x2ed   :  { %7249 = vmatprep.subr.bf16.mxu1 %v9042_v43  ;;  %v9807_v27 = vpop.f32.mrf.mxu0  ;;  %7153 = vmatmul.mubr.bf16.vlgmr.msra.gmra.mxu0 %v9755_v15  ;;  %v9093_v43 = vld [vmem:[#allocation7 + $0xdc4] ss:$16 sps:$4 sm:$0xff]  }
 0x2ee   :  { %7207 = vmatpush1.bf16.msra.mxu0 %v9037_v46  ;;  %7238 = vmatprep.mubr.bf16.mxu0 %v9805_v47  ;;  %v9091_v46 = vld [vmem:[#allocation7 + $0xdc0] ss:$16 sps:$4 sm:$0xff]  }
 0x2ef   :  { %v9810_v19 = vpop.f32.mrf.mxu1  ;;  %7196 = vmatmul.mubr.bf16.vlgmr.msra.gmra.mxu1 %v9781_v53  ;;  %v3778_v30 = vpop.f32.mrf.mxu0  ;;  %7208 = vmatprep.subr.bf16.mxu0 %v9045_v54  ;;  %v9102_v54 = vld [vmem:[#allocation7 + $0xfa4] ss:$16 sps:$4 sm:$0xff]  }
 0x2f0   :  { %7250 = vmatpush1.bf16.msra.mxu1 %v9040_v17  ;;  %v9099_v17 = vld [vmem:[#allocation7 + $0xda4] ss:$16 sps:$4 sm:$0xff]  }
 0x2f1   :  { %v3821_v59 = vpop.f32.mrf.mxu1  ;;  %7251 = vmatprep.subr.bf16.mxu1 %v9048_v61  ;;  %v9814_v20 = vpop.f32.mrf.mxu0  ;;  %v9097_v61 = vld [vmem:[#allocation7 + $0xda0] ss:$16 sps:$4 sm:$0xff]  }
 0x2f2   :  { %7209 = vmatpush1.bf16.msra.mxu0 %v9043_v25  ;;  %v3822_v23 = vadd.f32 %v3821_v59, %v3778_v30  ;;  %v9100_v25 = vld [vmem:[#allocation7 + $0xfa0] ss:$16 sps:$4 sm:$0xff]   ;;  %v9105_v30 = vld [vmem:[#allocation7 + $0xd84] ss:$16 sps:$4 sm:$0xff]  }
 0x2f3   :  { %v9816_v1 = vpop.f32.mrf.mxu1  ;;  %v3782_v6 = vpop.f32.mrf.mxu0  ;;  %7210 = vmatprep.subr.bf16.mxu0 %v9051_v56  ;;  %v9103_v56 = vld [vmem:[#allocation7 + $0xd80] ss:$16 sps:$4 sm:$0xff]  }
 0x2f4   :  { %7252 = vmatpush1.bf16.msra.mxu1 %v9046_v55  ;;  %v3843_v57 = vmax.f32 %v3822_v23, 0.0  ;;  %v9108_v55 = vld [vmem:[#allocation7 + $0xf84] ss:$16 sps:$4 sm:$0xff]   ;;  %v9106_v59 = vld [vmem:[#allocation7 + $0xf80] ss:$16 sps:$4 sm:$0xff]  }
 0x2f5   :  { %v3825_v10 = vpop.f32.mrf.mxu1  ;;  %7253 = vmatprep.subr.bf16.mxu1 %v9054_v60  ;;  %v9111_v60 = vld [vmem:[#allocation7 + $0xd64] ss:$16 sps:$4 sm:$0xff]   ;;  %v9109_v23 = vld [vmem:[#allocation7 + $0xd60] ss:$16 sps:$4 sm:$0xff]  }
 0x2f6   :  { %v3826_v7 = vadd.f32 %v3825_v10, %v3782_v6  ;;  %7211 = vmatpush1.bf16.msra.mxu0 %v9049_v2  ;;  %v9114_v2 = vld [vmem:[#allocation7 + $0xf64] ss:$16 sps:$4 sm:$0xff]   ;;  %v9112_v6 = vld [vmem:[#allocation7 + $0xf60] ss:$16 sps:$4 sm:$0xff]  }
 0x2f7   :  { %7212 = vmatprep.subr.bf16.mxu0 %v9057_v9  ;;  %v9120_v9 = vld [vmem:[#allocation7 + $0xf44] ss:$16 sps:$4 sm:$0xff]   ;;  %v9115_v10 = vld [vmem:[#allocation7 + $0xd40] ss:$16 sps:$4 sm:$0xff]  }
 0x2f8   :  { %v3859_v13 = vmax.f32 %v3826_v7, 0.0  ;;  %7254 = vmatpush1.bf16.msra.mxu1 %v9052_v8  ;;  %v9117_v8 = vld [vmem:[#allocation7 + $0xd44] ss:$16 sps:$4 sm:$0xff]  }
 0x2f9   :  { %7255 = vmatprep.subr.bf16.mxu1 %v9060_v51  ;;  %v9118_v51 = vld [vmem:[#allocation7 + $0xf40] ss:$16 sps:$4 sm:$0xff]   ;;  %v9123_v7 = vld [vmem:[#allocation7 + $0xd24] ss:$16 sps:$4 sm:$0xff]  }
 0x2fa   :  { %v9818_v18 = vpack.c.bf16 %v3859_v13, %v3843_v57  ;;  %7213 = vmatpush1.bf16.msra.mxu0 %v9055_v12  ;;  %v9126_v12 = vld [vmem:[#allocation7 + $0xf24] ss:$16 sps:$4 sm:$0xff]   ;;  %v9121_v57 = vld [vmem:[#allocation7 + $0xd20] ss:$16 sps:$4 sm:$0xff]  }
 0x2fb   :  { %7214 = vmatprep.subr.bf16.mxu0 %v9063_v41  ;;  %v9124_v13 = vld [vmem:[#allocation7 + $0xf20] ss:$16 sps:$4 sm:$0xff]   ;;  %v3824_v41 = vadd.f32 %v9816_v1, %v9814_v20  ;;  %v9136_v20 = vld [vmem:[#allocation7 + $0x2e8] ss:$16 sps:$4 sm:$0xff]  }
 0x2fc   :  { %7256 = vmatpush1.bf16.msra.mxu1 %v9058_v14  ;;  %7281 = vmatprep.mubr.bf16.mxu1 %v9818_v18  ;;  %v9129_v14 = vld [vmem:[#allocation7 + $0xd04] ss:$16 sps:$4 sm:$0xff]  }
 0x2fd   :  { %7257 = vmatprep.subr.bf16.mxu1 %v9066_v16  ;;  %v9132_v16 = vld [vmem:[#allocation7 + $0xf04] ss:$16 sps:$4 sm:$0xff]  }
 0x2fe   :  { %7215 = vmatpush1.bf16.msra.mxu0 %v9061_v21  ;;  %v3820_v21 = vadd.f32 %v9810_v19, %v9807_v27  ;;  %v9144_v27 = vld [vmem:[#allocation7 + $0x2cc] ss:$16 sps:$4 sm:$0xff]   ;;  %v9139_v19 = vld [vmem:[#allocation7 + $0xc8] ss:$16 sps:$4 sm:$0xff]  }
 0x2ff   :  { %7216 = vmatprep.subr.bf16.mxu0 %v9069_v26  ;;  %v9130_v26 = vld [vmem:[#allocation7 + $0xf00] ss:$16 sps:$4 sm:$0xff]  }
 0x300   :  { %7258 = vmatpush1.bf16.msra.mxu1 %v9064_v24  ;;  %v9127_v24 = vld [vmem:[#allocation7 + $0xd00] ss:$16 sps:$4 sm:$0xff]  }
 0x301   :  { %7259 = vmatprep.subr.bf16.mxu1 %v9072_v28  ;;  %v9135_v28 = vld [vmem:[#allocation7 + $0xec] ss:$16 sps:$4 sm:$0xff]  }
 0x302   :  { %7217 = vmatpush1.bf16.msra.mxu0 %v9067_v58  ;;  %v3858_v58 = vmax.f32 %v3824_v41, 0.0  ;;  %v9196_v41 = vld [vmem:[#allocation7 + $0x3a8] ss:$16 sps:$4 sm:$0xff]  }
 0x303   :  { %7218 = vmatprep.subr.bf16.mxu0 %v9075_v45  ;;  %v3842_v45 = vmax.f32 %v3820_v21, 0.0  ;;  %v9204_v21 = vld [vmem:[#allocation7 + $0x38c] ss:$16 sps:$4 sm:$0xff]  }
 0x304   :  { %7260 = vmatpush1.bf16.msra.mxu1 %v9070_v29  ;;  %v9138_v29 = vld [vmem:[#allocation7 + $0x2ec] ss:$16 sps:$4 sm:$0xff]  }
 0x305   :  { %7261 = vmatprep.subr.bf16.mxu1 %v9078_v48  ;;  %v9133_v48 = vld [vmem:[#allocation7 + $0xe8] ss:$16 sps:$4 sm:$0xff]   ;;  %v9825_v1 = vpack.c.bf16 %v3858_v58, %v3842_v45  ;;  %v9210_v58 = vld [vmem:[#allocation7 + $0x36c] ss:$16 sps:$4 sm:$0xff]  }
 0x306   :  { %7219 = vmatpush1.bf16.msra.mxu0 %v9073_v4  ;;  %v9141_v4 = vld [vmem:[#allocation7 + $0xcc] ss:$16 sps:$4 sm:$0xff]   ;;  %v9208_v45 = vld [vmem:[#allocation7 + $0x368] ss:$16 sps:$4 sm:$0xff]  }
 0x307   :  { %7220 = vmatprep.subr.bf16.mxu0 %v9081_v31  ;;  %v9147_v31 = vld [vmem:[#allocation7 + $0xac] ss:$16 sps:$4 sm:$0xff]  }
 0x308   :  { %7262 = vmatpush1.bf16.msra.mxu1 %v9076_v3  ;;  %v9142_v3 = vld [vmem:[#allocation7 + $0x2c8] ss:$16 sps:$4 sm:$0xff]  }
 0x309   :  { %7263 = vmatprep.subr.bf16.mxu1 %v9084_v0  ;;  %v9150_v0 = vld [vmem:[#allocation7 + $0x2ac] ss:$16 sps:$4 sm:$0xff]  }
 0x30a   :  { %7221 = vmatpush1.bf16.msra.mxu0 %v9079_v5  ;;  %v9145_v5 = vld [vmem:[#allocation7 + $0xa8] ss:$16 sps:$4 sm:$0xff]  }
 0x30b   :  { %7222 = vmatprep.subr.bf16.mxu0 %v9087_v37  ;;  %v9153_v37 = vld [vmem:[#allocation7 + $0x8c] ss:$16 sps:$4 sm:$0xff]  }
 0x30c   :  { %7264 = vmatpush1.bf16.msra.mxu1 %v9082_v36  ;;  %v9148_v36 = vld [vmem:[#allocation7 + $0x2a8] ss:$16 sps:$4 sm:$0xff]  }
 0x30d   :  { %7265 = vmatprep.subr.bf16.mxu1 %v9090_v39  ;;  %v9156_v39 = vld [vmem:[#allocation7 + $0x28c] ss:$16 sps:$4 sm:$0xff]  }
 0x30e   :  { %7223 = vmatpush2.bf16.msra.mxu0 %v9085_v40  ;;  %v9151_v40 = vld [vmem:[#allocation7 + $0x88] ss:$16 sps:$4 sm:$0xff]  }
 0x30f   :  { %7224 = vmatprep.subr.bf16.mxu0 %v9093_v43  ;;  %v9162_v43 = vld [vmem:[#allocation7 + $0x26c] ss:$16 sps:$4 sm:$0xff]  }
 0x310   :  { %7266 = vmatpush2.bf16.msra.mxu1 %v9088_v42  ;;  %v9159_v42 = vld [vmem:[#allocation7 + $0x6c] ss:$16 sps:$4 sm:$0xff]  }
 0x311   :  { %7267 = vmatprep.subr.bf16.mxu1 %v9096_v44  ;;  %v9160_v44 = vld [vmem:[#allocation7 + $0x268] ss:$16 sps:$4 sm:$0xff]  }
 0x312   :  { %7225 = vmatpush2.bf16.msra.mxu0 %v9091_v46  ;;  %v9165_v46 = vld [vmem:[#allocation7 + $0x4c] ss:$16 sps:$4 sm:$0xff]  }
 0x313   :  { %7226 = vmatprep.subr.bf16.mxu0 %v9099_v17  ;;  %v9163_v17 = vld [vmem:[#allocation7 + $0x48] ss:$16 sps:$4 sm:$0xff]  }
 0x314   :  { %7268 = vmatpush2.bf16.msra.mxu1 %v9094_v11  ;;  %v9168_v11 = vld [vmem:[#allocation7 + $0x24c] ss:$16 sps:$4 sm:$0xff]  }
 0x315   :  { %7269 = vmatprep.subr.bf16.mxu1 %v9102_v54  ;;  %v9166_v54 = vld [vmem:[#allocation7 + $0x248] ss:$16 sps:$4 sm:$0xff]  }
 0x316   :  { %7227 = vmatpush2.bf16.msra.mxu0 %v9097_v61  ;;  %v9171_v61 = vld [vmem:[#allocation7 + $0x2c] ss:$16 sps:$4 sm:$0xff]  }
 0x317   :  { %7228 = vmatprep.subr.bf16.mxu0 %v9105_v30  ;;  %v9169_v30 = vld [vmem:[#allocation7 + $0x28] ss:$16 sps:$4 sm:$0xff]  }
 0x318   :  { %7270 = vmatpush2.bf16.msra.mxu1 %v9100_v25  ;;  %v9174_v25 = vld [vmem:[#allocation7 + $0x22c] ss:$16 sps:$4 sm:$0xff]  }
 0x319   :  { %7271 = vmatprep.subr.bf16.mxu1 %v9108_v55  ;;  %v9172_v55 = vld [vmem:[#allocation7 + $0x228] ss:$16 sps:$4 sm:$0xff]  }
 0x31a   :  { %7229 = vmatpush2.bf16.msra.mxu0 %v9103_v56  ;;  %v9177_v56 = vld [vmem:[#allocation7 + $0xc] ss:$16 sps:$4 sm:$0xff]  }
 0x31b   :  { %7230 = vmatprep.subr.bf16.mxu0 %v9111_v60  ;;  %v9175_v60 = vld [vmem:[#allocation7 + $0x8] ss:$16 sps:$4 sm:$0xff]  }
 0x31c   :  { %7272 = vmatpush2.bf16.msra.mxu1 %v9106_v59  ;;  %v9180_v59 = vld [vmem:[#allocation7 + $0x20c] ss:$16 sps:$4 sm:$0xff]  }
 0x31d   :  { %7273 = vmatprep.subr.bf16.mxu1 %v9114_v2  ;;  %v9178_v2 = vld [vmem:[#allocation7 + $0x208] ss:$16 sps:$4 sm:$0xff]  }
 0x31e   :  { %7231 = vmatpush2.bf16.msra.mxu0 %v9109_v23  ;;  %v9183_v23 = vld [vmem:[#allocation7 + $0x1ec] ss:$16 sps:$4 sm:$0xff]  }
 0x31f   :  { %7232 = vmatprep.subr.bf16.mxu0 %v9117_v8  ;;  %v9181_v8 = vld [vmem:[#allocation7 + $0x1e8] ss:$16 sps:$4 sm:$0xff]  }
 0x320   :  { %7274 = vmatpush2.bf16.msra.mxu1 %v9112_v6  ;;  %v9186_v6 = vld [vmem:[#allocation7 + $0x3ec] ss:$16 sps:$4 sm:$0xff]  }
 0x321   :  { %7275 = vmatprep.subr.bf16.mxu1 %v9120_v9  ;;  %v9184_v9 = vld [vmem:[#allocation7 + $0x3e8] ss:$16 sps:$4 sm:$0xff]  }
 0x322   :  { %7233 = vmatpush2.bf16.msra.mxu0 %v9115_v10  ;;  %v9189_v10 = vld [vmem:[#allocation7 + $0x1cc] ss:$16 sps:$4 sm:$0xff]  }
 0x323   :  { %7234 = vmatprep.subr.bf16.mxu0 %v9123_v7  ;;  %v9187_v7 = vld [vmem:[#allocation7 + $0x1c8] ss:$16 sps:$4 sm:$0xff]  }
 0x324   :  { %7276 = vmatpush2.bf16.msra.mxu1 %v9118_v51  ;;  %v9192_v51 = vld [vmem:[#allocation7 + $0x3cc] ss:$16 sps:$4 sm:$0xff]  }
 0x325   :  { %7277 = vmatprep.subr.bf16.mxu1 %v9126_v12  ;;  %v9190_v12 = vld [vmem:[#allocation7 + $0x3c8] ss:$16 sps:$4 sm:$0xff]  }
 0x326   :  { %7235 = vmatpush2.bf16.msra.mxu0 %v9121_v57  ;;  %v9195_v57 = vld [vmem:[#allocation7 + $0x1ac] ss:$16 sps:$4 sm:$0xff]  }
 0x327   :  { %7236 = vmatprep.subr.bf16.mxu0 %v9129_v14  ;;  %v9193_v14 = vld [vmem:[#allocation7 + $0x1a8] ss:$16 sps:$4 sm:$0xff]  }
 0x328   :  { %7278 = vmatpush2.bf16.msra.mxu1 %v9124_v13  ;;  %v9198_v13 = vld [vmem:[#allocation7 + $0x3ac] ss:$16 sps:$4 sm:$0xff]  }
 0x329   :  { %7279 = vmatprep.subr.bf16.mxu1 %v9132_v16  ;;  %v9201_v16 = vld [vmem:[#allocation7 + $0x18c] ss:$16 sps:$4 sm:$0xff]  }
 0x32a   :  { %7237 = vmatpush2.bf16.msra.mxu0 %v9127_v24  ;;  %v9199_v24 = vld [vmem:[#allocation7 + $0x188] ss:$16 sps:$4 sm:$0xff]  }
 0x32b   :  { %7292 = vmatprep.subr.bf16.mxu0 %v9135_v28  ;;  %v9207_v28 = vld [vmem:[#allocation7 + $0x16c] ss:$16 sps:$4 sm:$0xff]  }
 0x32c   :  { %7280 = vmatpush2.bf16.msra.mxu1 %v9130_v26  ;;  %v9202_v26 = vld [vmem:[#allocation7 + $0x388] ss:$16 sps:$4 sm:$0xff]  }
 0x32d   :  { %7335 = vmatprep.subr.bf16.mxu1 %v9138_v29  ;;  %7239 = vmatmul.mubr.bf16.vlgmr.msra.gmra.mxu0 %v9801_v35  ;;  %v9205_v29 = vld [vmem:[#allocation7 + $0x168] ss:$16 sps:$4 sm:$0xff]  }
 0x32e   :  { %7293 = vmatpush1.bf16.msra.mxu0 %v9133_v48  ;;  %7324 = vmatprep.mubr.bf16.mxu0 %v9743_v49  ;;  %v9154_v49 = vld [vmem:[#allocation7 + $0x288] ss:$16 sps:$4 sm:$0xff]   ;;  %v9213_v48 = vld [vmem:[#allocation7 + $0x14c] ss:$16 sps:$4 sm:$0xff]  }
 0x32f   :  { %7282 = vmatmul.mubr.bf16.vlgmr.msra.gmra.mxu1 %v9825_v1  ;;  %7294 = vmatprep.subr.bf16.mxu0 %v9141_v4  ;;  %v9211_v4 = vld [vmem:[#allocation7 + $0x148] ss:$16 sps:$4 sm:$0xff]  }
 0x330   :  { %7336 = vmatpush1.bf16.msra.mxu1 %v9136_v20  ;;  %7367 = vmatprep.mubr.bf16.mxu1 %v9746_v52  ;;  %v9157_v52 = vld [vmem:[#allocation7 + $0x68] ss:$16 sps:$4 sm:$0xff]   ;;  %v9216_v20 = vld [vmem:[#allocation7 + $0x34c] ss:$16 sps:$4 sm:$0xff]  }
 0x331   :  { %7337 = vmatprep.subr.bf16.mxu1 %v9144_v27  ;;  %v9214_v27 = vld [vmem:[#allocation7 + $0x348] ss:$16 sps:$4 sm:$0xff]  }
 0x332   :  { %7295 = vmatpush1.bf16.msra.mxu0 %v9139_v19  ;;  %v9219_v19 = vld [vmem:[#allocation7 + $0x12c] ss:$16 sps:$4 sm:$0xff]  }
 0x333   :  { %7296 = vmatprep.subr.bf16.mxu0 %v9147_v31  ;;  %v9217_v31 = vld [vmem:[#allocation7 + $0x128] ss:$16 sps:$4 sm:$0xff]  }
 0x334   :  { %7338 = vmatpush1.bf16.msra.mxu1 %v9142_v3  ;;  %v9222_v3 = vld [vmem:[#allocation7 + $0x32c] ss:$16 sps:$4 sm:$0xff]  }
 0x335   :  { %7339 = vmatprep.subr.bf16.mxu1 %v9150_v0  ;;  %v9220_v0 = vld [vmem:[#allocation7 + $0x328] ss:$16 sps:$4 sm:$0xff]  }
 0x336   :  { %7297 = vmatpush1.bf16.msra.mxu0 %v9145_v5  ;;  %v9225_v5 = vld [vmem:[#allocation7 + $0x10c] ss:$16 sps:$4 sm:$0xff]  }
 0x337   :  { %7298 = vmatprep.subr.bf16.mxu0 %v9153_v37  ;;  %v9223_v37 = vld [vmem:[#allocation7 + $0x108] ss:$16 sps:$4 sm:$0xff]  }
 0x338   :  { %7340 = vmatpush1.bf16.msra.mxu1 %v9148_v36  ;;  %v9228_v36 = vld [vmem:[#allocation7 + $0x30c] ss:$16 sps:$4 sm:$0xff]  }
 0x339   :  { %7341 = vmatprep.subr.bf16.mxu1 %v9156_v39  ;;  %v9226_v39 = vld [vmem:[#allocation7 + $0x308] ss:$16 sps:$4 sm:$0xff]  }
 0x33a   :  { %7299 = vmatpush1.bf16.msra.mxu0 %v9151_v40  ;;  %v9231_v40 = vld [vmem:[#allocation7 + $0x4ec] ss:$16 sps:$4 sm:$0xff]  }
 0x33b   :  { %7300 = vmatprep.subr.bf16.mxu0 %v9159_v42  ;;  %v9229_v42 = vld [vmem:[#allocation7 + $0x4e8] ss:$16 sps:$4 sm:$0xff]  }
 0x33c   :  { %7342 = vmatpush1.bf16.msra.mxu1 %v9154_v49  ;;  %v9234_v49 = vld [vmem:[#allocation7 + $0x6ec] ss:$16 sps:$4 sm:$0xff]  }
 0x33d   :  { %7343 = vmatprep.subr.bf16.mxu1 %v9162_v43  ;;  %v9232_v43 = vld [vmem:[#allocation7 + $0x6e8] ss:$16 sps:$4 sm:$0xff]  }
 0x33e   :  { %7301 = vmatpush1.bf16.msra.mxu0 %v9157_v52  ;;  %v9237_v52 = vld [vmem:[#allocation7 + $0x4cc] ss:$16 sps:$4 sm:$0xff]  }
 0x33f   :  { %7302 = vmatprep.subr.bf16.mxu0 %v9165_v46  ;;  %v9235_v46 = vld [vmem:[#allocation7 + $0x4c8] ss:$16 sps:$4 sm:$0xff]  }
 0x340   :  { %7344 = vmatpush1.bf16.msra.mxu1 %v9160_v44  ;;  %v9240_v44 = vld [vmem:[#allocation7 + $0x6cc] ss:$16 sps:$4 sm:$0xff]  }
 0x341   :  { %7345 = vmatprep.subr.bf16.mxu1 %v9168_v11  ;;  %v9238_v11 = vld [vmem:[#allocation7 + $0x6c8] ss:$16 sps:$4 sm:$0xff]  }
 0x342   :  { %7303 = vmatpush1.bf16.msra.mxu0 %v9163_v17  ;;  %v9243_v17 = vld [vmem:[#allocation7 + $0x4ac] ss:$16 sps:$4 sm:$0xff]  }
 0x343   :  { %7304 = vmatprep.subr.bf16.mxu0 %v9171_v61  ;;  %v9241_v61 = vld [vmem:[#allocation7 + $0x4a8] ss:$16 sps:$4 sm:$0xff]  }
 0x344   :  { %7346 = vmatpush1.bf16.msra.mxu1 %v9166_v54  ;;  %v9246_v54 = vld [vmem:[#allocation7 + $0x6ac] ss:$16 sps:$4 sm:$0xff]  }
 0x345   :  { %7347 = vmatprep.subr.bf16.mxu1 %v9174_v25  ;;  %v9249_v25 = vld [vmem:[#allocation7 + $0x48c] ss:$16 sps:$4 sm:$0xff]  }
 0x346   :  { %7305 = vmatpush1.bf16.msra.mxu0 %v9169_v30  ;;  %v9247_v30 = vld [vmem:[#allocation7 + $0x488] ss:$16 sps:$4 sm:$0xff]  }
 0x347   :  { %7306 = vmatprep.subr.bf16.mxu0 %v9177_v56  ;;  %v9258_v56 = vld [vmem:[#allocation7 + $0x66c] ss:$16 sps:$4 sm:$0xff]  }
 0x348   :  { %7348 = vmatpush1.bf16.msra.mxu1 %v9172_v55  ;;  %v9255_v55 = vld [vmem:[#allocation7 + $0x46c] ss:$16 sps:$4 sm:$0xff]  }
 0x349   :  { %7349 = vmatprep.subr.bf16.mxu1 %v9180_v59  ;;  %v9256_v59 = vld [vmem:[#allocation7 + $0x668] ss:$16 sps:$4 sm:$0xff]  }
 0x34a   :  { %7307 = vmatpush1.bf16.msra.mxu0 %v9175_v60  ;;  %v9261_v60 = vld [vmem:[#allocation7 + $0x44c] ss:$16 sps:$4 sm:$0xff]  }
 0x34b   :  { %7308 = vmatprep.subr.bf16.mxu0 %v9183_v23  ;;  %v9259_v23 = vld [vmem:[#allocation7 + $0x448] ss:$16 sps:$4 sm:$0xff]  }
 0x34c   :  { %7350 = vmatpush1.bf16.msra.mxu1 %v9178_v2  ;;  %v9264_v2 = vld [vmem:[#allocation7 + $0x64c] ss:$16 sps:$4 sm:$0xff]  }
 0x34d   :  { %7351 = vmatprep.subr.bf16.mxu1 %v9186_v6  ;;  %v9262_v6 = vld [vmem:[#allocation7 + $0x648] ss:$16 sps:$4 sm:$0xff]  }
 0x34e   :  { %7309 = vmatpush2.bf16.msra.mxu0 %v9181_v8  ;;  %v9267_v8 = vld [vmem:[#allocation7 + $0x42c] ss:$16 sps:$4 sm:$0xff]  }
 0x34f   :  { %7310 = vmatprep.subr.bf16.mxu0 %v9189_v10  ;;  %v9265_v10 = vld [vmem:[#allocation7 + $0x428] ss:$16 sps:$4 sm:$0xff]  }
 0x350   :  { %7352 = vmatpush2.bf16.msra.mxu1 %v9184_v9  ;;  %v9270_v9 = vld [vmem:[#allocation7 + $0x62c] ss:$16 sps:$4 sm:$0xff]  }
 0x351   :  { %7353 = vmatprep.subr.bf16.mxu1 %v9192_v51  ;;  %v9268_v51 = vld [vmem:[#allocation7 + $0x628] ss:$16 sps:$4 sm:$0xff]  }
 0x352   :  { %7311 = vmatpush2.bf16.msra.mxu0 %v9187_v7  ;;  %v9273_v7 = vld [vmem:[#allocation7 + $0x40c] ss:$16 sps:$4 sm:$0xff]  }
 0x353   :  { %7312 = vmatprep.subr.bf16.mxu0 %v9195_v57  ;;  %v9271_v57 = vld [vmem:[#allocation7 + $0x408] ss:$16 sps:$4 sm:$0xff]  }
 0x354   :  { %7354 = vmatpush2.bf16.msra.mxu1 %v9190_v12  ;;  %v9276_v12 = vld [vmem:[#allocation7 + $0x60c] ss:$16 sps:$4 sm:$0xff]  }
 0x355   :  { %7355 = vmatprep.subr.bf16.mxu1 %v9198_v13  ;;  %v9274_v13 = vld [vmem:[#allocation7 + $0x608] ss:$16 sps:$4 sm:$0xff]  }
 0x356   :  { %7313 = vmatpush2.bf16.msra.mxu0 %v9193_v14  ;;  %v9279_v14 = vld [vmem:[#allocation7 + $0x5ec] ss:$16 sps:$4 sm:$0xff]  }
 0x357   :  { %7314 = vmatprep.subr.bf16.mxu0 %v9201_v16  ;;  %v9277_v16 = vld [vmem:[#allocation7 + $0x5e8] ss:$16 sps:$4 sm:$0xff]  }
 0x358   :  { %7356 = vmatpush2.bf16.msra.mxu1 %v9196_v41  ;;  %v9282_v41 = vld [vmem:[#allocation7 + $0x7ec] ss:$16 sps:$4 sm:$0xff]  }
 0x359   :  { %7357 = vmatprep.subr.bf16.mxu1 %v9204_v21  ;;  %v9280_v21 = vld [vmem:[#allocation7 + $0x7e8] ss:$16 sps:$4 sm:$0xff]  }
 0x35a   :  { %7315 = vmatpush2.bf16.msra.mxu0 %v9199_v24  ;;  %v9285_v24 = vld [vmem:[#allocation7 + $0x5cc] ss:$16 sps:$4 sm:$0xff]  }
 0x35b   :  { %7316 = vmatprep.subr.bf16.mxu0 %v9207_v28  ;;  %v9283_v28 = vld [vmem:[#allocation7 + $0x5c8] ss:$16 sps:$4 sm:$0xff]  }
 0x35c   :  { %7358 = vmatpush2.bf16.msra.mxu1 %v9202_v26  ;;  %v9288_v26 = vld [vmem:[#allocation7 + $0x7cc] ss:$16 sps:$4 sm:$0xff]  }
 0x35d   :  { %7359 = vmatprep.subr.bf16.mxu1 %v9210_v58  ;;  %v9286_v58 = vld [vmem:[#allocation7 + $0x7c8] ss:$16 sps:$4 sm:$0xff]  }
 0x35e   :  { %7317 = vmatpush2.bf16.msra.mxu0 %v9205_v29  ;;  %v9291_v29 = vld [vmem:[#allocation7 + $0x5ac] ss:$16 sps:$4 sm:$0xff]  }
 0x35f   :  { %7318 = vmatprep.subr.bf16.mxu0 %v9213_v48  ;;  %v9289_v48 = vld [vmem:[#allocation7 + $0x5a8] ss:$16 sps:$4 sm:$0xff]  }
 0x360   :  { %7360 = vmatpush2.bf16.msra.mxu1 %v9208_v45  ;;  %v9294_v45 = vld [vmem:[#allocation7 + $0x7ac] ss:$16 sps:$4 sm:$0xff]  }
 0x361   :  { %7361 = vmatprep.subr.bf16.mxu1 %v9216_v20  ;;  %v9292_v20 = vld [vmem:[#allocation7 + $0x7a8] ss:$16 sps:$4 sm:$0xff]  }
 0x362   :  { %7319 = vmatpush2.bf16.msra.mxu0 %v9211_v4  ;;  %v9297_v4 = vld [vmem:[#allocation7 + $0x58c] ss:$16 sps:$4 sm:$0xff]  }
 0x363   :  { %7320 = vmatprep.subr.bf16.mxu0 %v9219_v19  ;;  %v9295_v19 = vld [vmem:[#allocation7 + $0x588] ss:$16 sps:$4 sm:$0xff]  }
 0x364   :  { %7362 = vmatpush2.bf16.msra.mxu1 %v9214_v27  ;;  %v9300_v27 = vld [vmem:[#allocation7 + $0x78c] ss:$16 sps:$4 sm:$0xff]  }
 0x365   :  { %7363 = vmatprep.subr.bf16.mxu1 %v9222_v3  ;;  %v9298_v3 = vld [vmem:[#allocation7 + $0x788] ss:$16 sps:$4 sm:$0xff]  }
 0x366   :  { %7321 = vmatpush2.bf16.msra.mxu0 %v9217_v31  ;;  %v9303_v31 = vld [vmem:[#allocation7 + $0x56c] ss:$16 sps:$4 sm:$0xff]  }
 0x367   :  { %7322 = vmatprep.subr.bf16.mxu0 %v9225_v5  ;;  %v9301_v5 = vld [vmem:[#allocation7 + $0x568] ss:$16 sps:$4 sm:$0xff]  }
 0x368   :  { %7364 = vmatpush2.bf16.msra.mxu1 %v9220_v0  ;;  %v9306_v0 = vld [vmem:[#allocation7 + $0x76c] ss:$16 sps:$4 sm:$0xff]  }
 0x369   :  { %7365 = vmatprep.subr.bf16.mxu1 %v9228_v36  ;;  %v9304_v36 = vld [vmem:[#allocation7 + $0x768] ss:$16 sps:$4 sm:$0xff]  }
 0x36a   :  { %7323 = vmatpush2.bf16.msra.mxu0 %v9223_v37  ;;  %v9309_v37 = vld [vmem:[#allocation7 + $0x54c] ss:$16 sps:$4 sm:$0xff]  }
 0x36b   :  { %7378 = vmatprep.subr.bf16.mxu0 %v9231_v40  ;;  %v9307_v40 = vld [vmem:[#allocation7 + $0x548] ss:$16 sps:$4 sm:$0xff]  }
 0x36c   :  { %7366 = vmatpush2.bf16.msra.mxu1 %v9226_v39  ;;  %v9312_v39 = vld [vmem:[#allocation7 + $0x74c] ss:$16 sps:$4 sm:$0xff]  }
 0x36d   :  { %7421 = vmatprep.subr.bf16.mxu1 %v9234_v49  ;;  %7325 = vmatmul.mubr.bf16.vlgmr.msra.gmra.mxu0 %v9687_v22  ;;  %v9244_v22 = vld [vmem:[#allocation7 + $0x6a8] ss:$16 sps:$4 sm:$0xff]  }
 0x36e   :  { %7379 = vmatpush1.bf16.msra.mxu0 %v9229_v42  ;;  %7410 = vmatprep.mubr.bf16.mxu0 %v9769_v63  ;;  %v9250_v63 = vld [vmem:[#allocation7 + $0x688] ss:$16 sps:$4 sm:$0xff]   ;;  %v9315_v42 = vld [vmem:[#allocation7 + $0x52c] ss:$16 sps:$4 sm:$0xff]  }
 0x36f   :  { %7368 = vmatmul.mubr.bf16.vlgmr.msra.gmra.mxu1 %v9701_v50  ;;  %7380 = vmatprep.subr.bf16.mxu0 %v9237_v52  ;;  %v9252_v50 = vld [vmem:[#allocation7 + $0x68c] ss:$16 sps:$4 sm:$0xff]   ;;  %v9310_v49 = vld [vmem:[#allocation7 + $0x748] ss:$16 sps:$4 sm:$0xff]  }
 0x370   :  { %7422 = vmatpush1.bf16.msra.mxu1 %v9232_v43  ;;  %7453 = vmatprep.mubr.bf16.mxu1 %v9772_v33  ;;  %v9253_v33 = vld [vmem:[#allocation7 + $0x468] ss:$16 sps:$4 sm:$0xff]   ;;  %v9318_v43 = vld [vmem:[#allocation7 + $0x72c] ss:$16 sps:$4 sm:$0xff]  }
 0x371   :  { %7423 = vmatprep.subr.bf16.mxu1 %v9240_v44  ;;  %v9313_v52 = vld [vmem:[#allocation7 + $0x528] ss:$16 sps:$4 sm:$0xff]  }
 0x372   :  { %7381 = vmatpush1.bf16.msra.mxu0 %v9235_v46  ;;  %v9316_v44 = vld [vmem:[#allocation7 + $0x728] ss:$16 sps:$4 sm:$0xff]   ;;  %v9321_v46 = vld [vmem:[#allocation7 + $0x50c] ss:$16 sps:$4 sm:$0xff]  }
 0x373   :  { %7382 = vmatprep.subr.bf16.mxu0 %v9243_v17  ;;  %v9319_v17 = vld [vmem:[#allocation7 + $0x508] ss:$16 sps:$4 sm:$0xff]  }
 0x374   :  { %7424 = vmatpush1.bf16.msra.mxu1 %v9238_v11  ;;  %v9324_v11 = vld [vmem:[#allocation7 + $0x70c] ss:$16 sps:$4 sm:$0xff]  }
 0x375   :  { %7425 = vmatprep.subr.bf16.mxu1 %v9246_v54  ;;  %v9322_v54 = vld [vmem:[#allocation7 + $0x708] ss:$16 sps:$4 sm:$0xff]  }
 0x376   :  { %7383 = vmatpush1.bf16.msra.mxu0 %v9241_v61  ;;  %v9327_v61 = vld [vmem:[#allocation7 + $0x8ec] ss:$16 sps:$4 sm:$0xff]  }
 0x377   :  { %7384 = vmatprep.subr.bf16.mxu0 %v9249_v25  ;;  %v9325_v25 = vld [vmem:[#allocation7 + $0x8e8] ss:$16 sps:$4 sm:$0xff]  }
 0x378   :  { %7426 = vmatpush1.bf16.msra.mxu1 %v9244_v22  ;;  %v9330_v22 = vld [vmem:[#allocation7 + $0xaec] ss:$16 sps:$4 sm:$0xff]  }
 0x379   :  { %7427 = vmatprep.subr.bf16.mxu1 %v9252_v50  ;;  %v9328_v50 = vld [vmem:[#allocation7 + $0xae8] ss:$16 sps:$4 sm:$0xff]  }
 0x37a   :  { %7385 = vmatpush1.bf16.msra.mxu0 %v9247_v30  ;;  %v9333_v30 = vld [vmem:[#allocation7 + $0x8cc] ss:$16 sps:$4 sm:$0xff]  }
 0x37b   :  { %7386 = vmatprep.subr.bf16.mxu0 %v9255_v55  ;;  %v9331_v55 = vld [vmem:[#allocation7 + $0x8c8] ss:$16 sps:$4 sm:$0xff]  }
 0x37c   :  { %7428 = vmatpush1.bf16.msra.mxu1 %v9250_v63  ;;  %v9336_v63 = vld [vmem:[#allocation7 + $0xacc] ss:$16 sps:$4 sm:$0xff]  }
 0x37d   :  { %7429 = vmatprep.subr.bf16.mxu1 %v9258_v56  ;;  %v9334_v56 = vld [vmem:[#allocation7 + $0xac8] ss:$16 sps:$4 sm:$0xff]  }
 0x37e   :  { %7387 = vmatpush1.bf16.msra.mxu0 %v9253_v33  ;;  %v9339_v33 = vld [vmem:[#allocation7 + $0x8ac] ss:$16 sps:$4 sm:$0xff]  }
 0x37f   :  { %7388 = vmatprep.subr.bf16.mxu0 %v9261_v60  ;;  %v9337_v60 = vld [vmem:[#allocation7 + $0x8a8] ss:$16 sps:$4 sm:$0xff]  }
 0x380   :  { %7430 = vmatpush1.bf16.msra.mxu1 %v9256_v59  ;;  %v9342_v59 = vld [vmem:[#allocation7 + $0xaac] ss:$16 sps:$4 sm:$0xff]  }
 0x381   :  { %7431 = vmatprep.subr.bf16.mxu1 %v9264_v2  ;;  %v9345_v2 = vld [vmem:[#allocation7 + $0x88c] ss:$16 sps:$4 sm:$0xff]  }
 0x382   :  { %7389 = vmatpush1.bf16.msra.mxu0 %v9259_v23  ;;  %v9343_v23 = vld [vmem:[#allocation7 + $0x888] ss:$16 sps:$4 sm:$0xff]  }
 0x383   :  { %7390 = vmatprep.subr.bf16.mxu0 %v9267_v8  ;;  %v9354_v8 = vld [vmem:[#allocation7 + $0xa6c] ss:$16 sps:$4 sm:$0xff]  }
 0x384   :  { %7432 = vmatpush1.bf16.msra.mxu1 %v9262_v6  ;;  %v9351_v6 = vld [vmem:[#allocation7 + $0x86c] ss:$16 sps:$4 sm:$0xff]  }
 0x385   :  { %7433 = vmatprep.subr.bf16.mxu1 %v9270_v9  ;;  %v9352_v9 = vld [vmem:[#allocation7 + $0xa68] ss:$16 sps:$4 sm:$0xff]  }
 0x386   :  { %7391 = vmatpush1.bf16.msra.mxu0 %v9265_v10  ;;  %v9357_v10 = vld [vmem:[#allocation7 + $0x84c] ss:$16 sps:$4 sm:$0xff]  }
 0x387   :  { %7392 = vmatprep.subr.bf16.mxu0 %v9273_v7  ;;  %v9355_v7 = vld [vmem:[#allocation7 + $0x848] ss:$16 sps:$4 sm:$0xff]  }
 0x388   :  { %7434 = vmatpush1.bf16.msra.mxu1 %v9268_v51  ;;  %v9360_v51 = vld [vmem:[#allocation7 + $0xa4c] ss:$16 sps:$4 sm:$0xff]  }
 0x389   :  { %7435 = vmatprep.subr.bf16.mxu1 %v9276_v12  ;;  %v9358_v12 = vld [vmem:[#allocation7 + $0xa48] ss:$16 sps:$4 sm:$0xff]  }
 0x38a   :  { %7393 = vmatpush1.bf16.msra.mxu0 %v9271_v57  ;;  %v9363_v57 = vld [vmem:[#allocation7 + $0x82c] ss:$16 sps:$4 sm:$0xff]  }
 0x38b   :  { %7394 = vmatprep.subr.bf16.mxu0 %v9279_v14  ;;  %v9361_v14 = vld [vmem:[#allocation7 + $0x828] ss:$16 sps:$4 sm:$0xff]  }
 0x38c   :  { %7436 = vmatpush1.bf16.msra.mxu1 %v9274_v13  ;;  %v9366_v13 = vld [vmem:[#allocation7 + $0xa2c] ss:$16 sps:$4 sm:$0xff]  }
 0x38d   :  { %7437 = vmatprep.subr.bf16.mxu1 %v9282_v41  ;;  %v9364_v41 = vld [vmem:[#allocation7 + $0xa28] ss:$16 sps:$4 sm:$0xff]  }
 0x38e   :  { %7395 = vmatpush2.bf16.msra.mxu0 %v9277_v16  ;;  %v9369_v16 = vld [vmem:[#allocation7 + $0x80c] ss:$16 sps:$4 sm:$0xff]  }
 0x38f   :  { %7396 = vmatprep.subr.bf16.mxu0 %v9285_v24  ;;  %v9367_v24 = vld [vmem:[#allocation7 + $0x808] ss:$16 sps:$4 sm:$0xff]  }
 0x390   :  { %7438 = vmatpush2.bf16.msra.mxu1 %v9280_v21  ;;  %v9372_v21 = vld [vmem:[#allocation7 + $0xa0c] ss:$16 sps:$4 sm:$0xff]  }
 0x391   :  { %7439 = vmatprep.subr.bf16.mxu1 %v9288_v26  ;;  %v9370_v26 = vld [vmem:[#allocation7 + $0xa08] ss:$16 sps:$4 sm:$0xff]  }
 0x392   :  { %7397 = vmatpush2.bf16.msra.mxu0 %v9283_v28  ;;  %v9375_v28 = vld [vmem:[#allocation7 + $0x9ec] ss:$16 sps:$4 sm:$0xff]  }
 0x393   :  { %7398 = vmatprep.subr.bf16.mxu0 %v9291_v29  ;;  %v9373_v29 = vld [vmem:[#allocation7 + $0x9e8] ss:$16 sps:$4 sm:$0xff]  }
 0x394   :  { %7440 = vmatpush2.bf16.msra.mxu1 %v9286_v58  ;;  %v9378_v58 = vld [vmem:[#allocation7 + $0xbec] ss:$16 sps:$4 sm:$0xff]  }
 0x395   :  { %7441 = vmatprep.subr.bf16.mxu1 %v9294_v45  ;;  %v9376_v45 = vld [vmem:[#allocation7 + $0xbe8] ss:$16 sps:$4 sm:$0xff]  }
 0x396   :  { %7399 = vmatpush2.bf16.msra.mxu0 %v9289_v48  ;;  %v9381_v48 = vld [vmem:[#allocation7 + $0x9cc] ss:$16 sps:$4 sm:$0xff]  }
 0x397   :  { %7400 = vmatprep.subr.bf16.mxu0 %v9297_v4  ;;  %v9379_v4 = vld [vmem:[#allocation7 + $0x9c8] ss:$16 sps:$4 sm:$0xff]  }
 0x398   :  { %7442 = vmatpush2.bf16.msra.mxu1 %v9292_v20  ;;  %v9384_v20 = vld [vmem:[#allocation7 + $0xbcc] ss:$16 sps:$4 sm:$0xff]  }
 0x399   :  { %7443 = vmatprep.subr.bf16.mxu1 %v9300_v27  ;;  %v9382_v27 = vld [vmem:[#allocation7 + $0xbc8] ss:$16 sps:$4 sm:$0xff]  }
 0x39a   :  { %7401 = vmatpush2.bf16.msra.mxu0 %v9295_v19  ;;  %v9387_v19 = vld [vmem:[#allocation7 + $0x9ac] ss:$16 sps:$4 sm:$0xff]  }
 0x39b   :  { %7402 = vmatprep.subr.bf16.mxu0 %v9303_v31  ;;  %v9385_v31 = vld [vmem:[#allocation7 + $0x9a8] ss:$16 sps:$4 sm:$0xff]  }
 0x39c   :  { %7444 = vmatpush2.bf16.msra.mxu1 %v9298_v3  ;;  %v9390_v3 = vld [vmem:[#allocation7 + $0xbac] ss:$16 sps:$4 sm:$0xff]  }
 0x39d   :  { %7445 = vmatprep.subr.bf16.mxu1 %v9306_v0  ;;  %v9388_v0 = vld [vmem:[#allocation7 + $0xba8] ss:$16 sps:$4 sm:$0xff]  }
 0x39e   :  { %7403 = vmatpush2.bf16.msra.mxu0 %v9301_v5  ;;  %v9393_v5 = vld [vmem:[#allocation7 + $0x98c] ss:$16 sps:$4 sm:$0xff]  }
 0x39f   :  { %7404 = vmatprep.subr.bf16.mxu0 %v9309_v37  ;;  %v9391_v37 = vld [vmem:[#allocation7 + $0x988] ss:$16 sps:$4 sm:$0xff]  }
 0x3a0   :  { %7446 = vmatpush2.bf16.msra.mxu1 %v9304_v36  ;;  %v9396_v36 = vld [vmem:[#allocation7 + $0xb8c] ss:$16 sps:$4 sm:$0xff]  }
 0x3a1   :  { %7447 = vmatprep.subr.bf16.mxu1 %v9312_v39  ;;  %v9394_v39 = vld [vmem:[#allocation7 + $0xb88] ss:$16 sps:$4 sm:$0xff]  }
 0x3a2   :  { %7405 = vmatpush2.bf16.msra.mxu0 %v9307_v40  ;;  %v9399_v40 = vld [vmem:[#allocation7 + $0x96c] ss:$16 sps:$4 sm:$0xff]  }
 0x3a3   :  { %7406 = vmatprep.subr.bf16.mxu0 %v9315_v42  ;;  %v9397_v42 = vld [vmem:[#allocation7 + $0x968] ss:$16 sps:$4 sm:$0xff]  }
 0x3a4   :  { %7448 = vmatpush2.bf16.msra.mxu1 %v9310_v49  ;;  %v9402_v49 = vld [vmem:[#allocation7 + $0xb6c] ss:$16 sps:$4 sm:$0xff]  }
 0x3a5   :  { %7449 = vmatprep.subr.bf16.mxu1 %v9318_v43  ;;  %v9400_v43 = vld [vmem:[#allocation7 + $0xb68] ss:$16 sps:$4 sm:$0xff]  }
 0x3a6   :  { %7407 = vmatpush2.bf16.msra.mxu0 %v9313_v52  ;;  %v9405_v52 = vld [vmem:[#allocation7 + $0x94c] ss:$16 sps:$4 sm:$0xff]  }
 0x3a7   :  { %7408 = vmatprep.subr.bf16.mxu0 %v9321_v46  ;;  %v9403_v46 = vld [vmem:[#allocation7 + $0x948] ss:$16 sps:$4 sm:$0xff]  }
 0x3a8   :  { %7450 = vmatpush2.bf16.msra.mxu1 %v9316_v44  ;;  %v9408_v44 = vld [vmem:[#allocation7 + $0xb4c] ss:$16 sps:$4 sm:$0xff]  }
 0x3a9   :  { %7451 = vmatprep.subr.bf16.mxu1 %v9324_v11  ;;  %v9406_v11 = vld [vmem:[#allocation7 + $0xb48] ss:$16 sps:$4 sm:$0xff]  }
 0x3aa   :  { %7409 = vmatpush2.bf16.msra.mxu0 %v9319_v17  ;;  %v9411_v17 = vld [vmem:[#allocation7 + $0x92c] ss:$16 sps:$4 sm:$0xff]  }
 0x3ab   :  { %7464 = vmatprep.subr.bf16.mxu0 %v9327_v61  ;;  %v9409_v61 = vld [vmem:[#allocation7 + $0x928] ss:$16 sps:$4 sm:$0xff]  }
 0x3ac   :  { %7452 = vmatpush2.bf16.msra.mxu1 %v9322_v54  ;;  %v9414_v54 = vld [vmem:[#allocation7 + $0xb2c] ss:$16 sps:$4 sm:$0xff]  }
 0x3ad   :  { %7507 = vmatprep.subr.bf16.mxu1 %v9330_v22  ;;  %7411 = vmatmul.mubr.bf16.vlgmr.msra.gmra.mxu0 %v9715_v34  ;;  %v9340_v34 = vld [vmem:[#allocation7 + $0xaa8] ss:$16 sps:$4 sm:$0xff]  }
 0x3ae   :  { %7465 = vmatpush1.bf16.msra.mxu0 %v9325_v25  ;;  %7496 = vmatprep.mubr.bf16.mxu0 %v9789_v62  ;;  %v9346_v62 = vld [vmem:[#allocation7 + $0xa88] ss:$16 sps:$4 sm:$0xff]   ;;  %v9417_v25 = vld [vmem:[#allocation7 + $0x90c] ss:$16 sps:$4 sm:$0xff]  }
 0x3af   :  { %7454 = vmatmul.mubr.bf16.vlgmr.msra.gmra.mxu1 %v9729_v32  ;;  %7466 = vmatprep.subr.bf16.mxu0 %v9333_v30  ;;  %v9348_v32 = vld [vmem:[#allocation7 + $0xa8c] ss:$16 sps:$4 sm:$0xff]   ;;  %v9412_v22 = vld [vmem:[#allocation7 + $0xb28] ss:$16 sps:$4 sm:$0xff]  }
 0x3b0   :  { %7508 = vmatpush1.bf16.msra.mxu1 %v9328_v50  ;;  %7539 = vmatprep.mubr.bf16.mxu1 %v9792_v38  ;;  %v9349_v38 = vld [vmem:[#allocation7 + $0x868] ss:$16 sps:$4 sm:$0xff]   ;;  %v9420_v50 = vld [vmem:[#allocation7 + $0xb0c] ss:$16 sps:$4 sm:$0xff]  }
 0x3b1   :  { %7509 = vmatprep.subr.bf16.mxu1 %v9336_v63  ;;  %v9415_v30 = vld [vmem:[#allocation7 + $0x908] ss:$16 sps:$4 sm:$0xff]  }
 0x3b2   :  { %7467 = vmatpush1.bf16.msra.mxu0 %v9331_v55  ;;  %v9418_v63 = vld [vmem:[#allocation7 + $0xb08] ss:$16 sps:$4 sm:$0xff]   ;;  %v9423_v55 = vld [vmem:[#allocation7 + $0xcec] ss:$16 sps:$4 sm:$0xff]  }
 0x3b3   :  { %7468 = vmatprep.subr.bf16.mxu0 %v9339_v33  ;;  %v9421_v33 = vld [vmem:[#allocation7 + $0xce8] ss:$16 sps:$4 sm:$0xff]  }
 0x3b4   :  { %7510 = vmatpush1.bf16.msra.mxu1 %v9334_v56  ;;  %v9426_v56 = vld [vmem:[#allocation7 + $0xeec] ss:$16 sps:$4 sm:$0xff]  }
 0x3b5   :  { %7511 = vmatprep.subr.bf16.mxu1 %v9342_v59  ;;  %v9424_v59 = vld [vmem:[#allocation7 + $0xee8] ss:$16 sps:$4 sm:$0xff]  }
 0x3b6   :  { %7469 = vmatpush1.bf16.msra.mxu0 %v9337_v60  ;;  %v9429_v60 = vld [vmem:[#allocation7 + $0xccc] ss:$16 sps:$4 sm:$0xff]  }
 0x3b7   :  { %7470 = vmatprep.subr.bf16.mxu0 %v9345_v2  ;;  %v9427_v2 = vld [vmem:[#allocation7 + $0xcc8] ss:$16 sps:$4 sm:$0xff]  }
 0x3b8   :  { %7512 = vmatpush1.bf16.msra.mxu1 %v9340_v34  ;;  %v9432_v34 = vld [vmem:[#allocation7 + $0xecc] ss:$16 sps:$4 sm:$0xff]  }
 0x3b9   :  { %7513 = vmatprep.subr.bf16.mxu1 %v9348_v32  ;;  %v9430_v32 = vld [vmem:[#allocation7 + $0xec8] ss:$16 sps:$4 sm:$0xff]  }
 0x3ba   :  { %7471 = vmatpush1.bf16.msra.mxu0 %v9343_v23  ;;  %v9435_v23 = vld [vmem:[#allocation7 + $0xcac] ss:$16 sps:$4 sm:$0xff]  }
 0x3bb   :  { %7472 = vmatprep.subr.bf16.mxu0 %v9351_v6  ;;  %v9433_v6 = vld [vmem:[#allocation7 + $0xca8] ss:$16 sps:$4 sm:$0xff]  }
 0x3bc   :  { %7514 = vmatpush1.bf16.msra.mxu1 %v9346_v62  ;;  %v9438_v62 = vld [vmem:[#allocation7 + $0xeac] ss:$16 sps:$4 sm:$0xff]  }
 0x3bd   :  { %7515 = vmatprep.subr.bf16.mxu1 %v9354_v8  ;;  %v9441_v8 = vld [vmem:[#allocation7 + $0xc8c] ss:$16 sps:$4 sm:$0xff]  }
 0x3be   :  { %7473 = vmatpush1.bf16.msra.mxu0 %v9349_v38  ;;  %v9439_v38 = vld [vmem:[#allocation7 + $0xc88] ss:$16 sps:$4 sm:$0xff]  }
 0x3bf   :  { %7474 = vmatprep.subr.bf16.mxu0 %v9357_v10  ;;  %v9450_v10 = vld [vmem:[#allocation7 + $0xe6c] ss:$16 sps:$4 sm:$0xff]  }
 0x3c0   :  { %7516 = vmatpush1.bf16.msra.mxu1 %v9352_v9  ;;  %v9447_v9 = vld [vmem:[#allocation7 + $0xc6c] ss:$16 sps:$4 sm:$0xff]  }
 0x3c1   :  { %7517 = vmatprep.subr.bf16.mxu1 %v9360_v51  ;;  %v9448_v51 = vld [vmem:[#allocation7 + $0xe68] ss:$16 sps:$4 sm:$0xff]  }
 0x3c2   :  { %7475 = vmatpush1.bf16.msra.mxu0 %v9355_v7  ;;  %v9453_v7 = vld [vmem:[#allocation7 + $0xc4c] ss:$16 sps:$4 sm:$0xff]  }
 0x3c3   :  { %7476 = vmatprep.subr.bf16.mxu0 %v9363_v57  ;;  %v9451_v57 = vld [vmem:[#allocation7 + $0xc48] ss:$16 sps:$4 sm:$0xff]  }
 0x3c4   :  { %7518 = vmatpush1.bf16.msra.mxu1 %v9358_v12  ;;  %v9456_v12 = vld [vmem:[#allocation7 + $0xe4c] ss:$16 sps:$4 sm:$0xff]  }
 0x3c5   :  { %7519 = vmatprep.subr.bf16.mxu1 %v9366_v13  ;;  %v9454_v13 = vld [vmem:[#allocation7 + $0xe48] ss:$16 sps:$4 sm:$0xff]  }
 0x3c6   :  { %7477 = vmatpush1.bf16.msra.mxu0 %v9361_v14  ;;  %v9459_v14 = vld [vmem:[#allocation7 + $0xc2c] ss:$16 sps:$4 sm:$0xff]  }
 0x3c7   :  { %7478 = vmatprep.subr.bf16.mxu0 %v9369_v16  ;;  %v9457_v16 = vld [vmem:[#allocation7 + $0xc28] ss:$16 sps:$4 sm:$0xff]  }
 0x3c8   :  { %7520 = vmatpush1.bf16.msra.mxu1 %v9364_v41  ;;  %v9462_v41 = vld [vmem:[#allocation7 + $0xe2c] ss:$16 sps:$4 sm:$0xff]  }
 0x3c9   :  { %7521 = vmatprep.subr.bf16.mxu1 %v9372_v21  ;;  %v9460_v21 = vld [vmem:[#allocation7 + $0xe28] ss:$16 sps:$4 sm:$0xff]  }
 0x3ca   :  { %7479 = vmatpush1.bf16.msra.mxu0 %v9367_v24  ;;  %v9465_v24 = vld [vmem:[#allocation7 + $0xc0c] ss:$16 sps:$4 sm:$0xff]  }
 0x3cb   :  { %7480 = vmatprep.subr.bf16.mxu0 %v9375_v28  ;;  %v9463_v28 = vld [vmem:[#allocation7 + $0xc08] ss:$16 sps:$4 sm:$0xff]  }
 0x3cc   :  { %7522 = vmatpush1.bf16.msra.mxu1 %v9370_v26  ;;  %v9468_v26 = vld [vmem:[#allocation7 + $0xe0c] ss:$16 sps:$4 sm:$0xff]  }
 0x3cd   :  { %7523 = vmatprep.subr.bf16.mxu1 %v9378_v58  ;;  %v9466_v58 = vld [vmem:[#allocation7 + $0xe08] ss:$16 sps:$4 sm:$0xff]  }
 0x3ce   :  { %7481 = vmatpush2.bf16.msra.mxu0 %v9373_v29  ;;  %v9471_v29 = vld [vmem:[#allocation7 + $0xdec] ss:$16 sps:$4 sm:$0xff]  }
 0x3cf   :  { %7482 = vmatprep.subr.bf16.mxu0 %v9381_v48  ;;  %v9469_v48 = vld [vmem:[#allocation7 + $0xde8] ss:$16 sps:$4 sm:$0xff]  }
 0x3d0   :  { %7524 = vmatpush2.bf16.msra.mxu1 %v9376_v45  ;;  %v9474_v45 = vld [vmem:[#allocation7 + $0xfec] ss:$16 sps:$4 sm:$0xff]  }
 0x3d1   :  { %7525 = vmatprep.subr.bf16.mxu1 %v9384_v20  ;;  %v9472_v20 = vld [vmem:[#allocation7 + $0xfe8] ss:$16 sps:$4 sm:$0xff]  }
 0x3d2   :  { %7483 = vmatpush2.bf16.msra.mxu0 %v9379_v4  ;;  %v9477_v4 = vld [vmem:[#allocation7 + $0xdcc] ss:$16 sps:$4 sm:$0xff]  }
 0x3d3   :  { %7484 = vmatprep.subr.bf16.mxu0 %v9387_v19  ;;  %v9475_v19 = vld [vmem:[#allocation7 + $0xdc8] ss:$16 sps:$4 sm:$0xff]  }
 0x3d4   :  { %7526 = vmatpush2.bf16.msra.mxu1 %v9382_v27  ;;  %v9480_v27 = vld [vmem:[#allocation7 + $0xfcc] ss:$16 sps:$4 sm:$0xff]  }
 0x3d5   :  { %7527 = vmatprep.subr.bf16.mxu1 %v9390_v3  ;;  %v9478_v3 = vld [vmem:[#allocation7 + $0xfc8] ss:$16 sps:$4 sm:$0xff]  }
 0x3d6   :  { %7485 = vmatpush2.bf16.msra.mxu0 %v9385_v31  ;;  %v9483_v31 = vld [vmem:[#allocation7 + $0xdac] ss:$16 sps:$4 sm:$0xff]  }
 0x3d7   :  { %7486 = vmatprep.subr.bf16.mxu0 %v9393_v5  ;;  %v9481_v5 = vld [vmem:[#allocation7 + $0xda8] ss:$16 sps:$4 sm:$0xff]  }
 0x3d8   :  { %7528 = vmatpush2.bf16.msra.mxu1 %v9388_v0  ;;  %v9486_v0 = vld [vmem:[#allocation7 + $0xfac] ss:$16 sps:$4 sm:$0xff]  }
 0x3d9   :  { %7529 = vmatprep.subr.bf16.mxu1 %v9396_v36  ;;  %v9484_v36 = vld [vmem:[#allocation7 + $0xfa8] ss:$16 sps:$4 sm:$0xff]  }
 0x3da   :  { %7487 = vmatpush2.bf16.msra.mxu0 %v9391_v37  ;;  %v9489_v37 = vld [vmem:[#allocation7 + $0xd8c] ss:$16 sps:$4 sm:$0xff]  }
 0x3db   :  { %7488 = vmatprep.subr.bf16.mxu0 %v9399_v40  ;;  %v9487_v40 = vld [vmem:[#allocation7 + $0xd88] ss:$16 sps:$4 sm:$0xff]  }
 0x3dc   :  { %7530 = vmatpush2.bf16.msra.mxu1 %v9394_v39  ;;  %v9492_v39 = vld [vmem:[#allocation7 + $0xf8c] ss:$16 sps:$4 sm:$0xff]  }
 0x3dd   :  { %7531 = vmatprep.subr.bf16.mxu1 %v9402_v49  ;;  %v9490_v49 = vld [vmem:[#allocation7 + $0xf88] ss:$16 sps:$4 sm:$0xff]  }
 0x3de   :  { %7489 = vmatpush2.bf16.msra.mxu0 %v9397_v42  ;;  %v9495_v42 = vld [vmem:[#allocation7 + $0xd6c] ss:$16 sps:$4 sm:$0xff]  }
 0x3df   :  { %7490 = vmatprep.subr.bf16.mxu0 %v9405_v52  ;;  %v9493_v52 = vld [vmem:[#allocation7 + $0xd68] ss:$16 sps:$4 sm:$0xff]  }
 0x3e0   :  { %7532 = vmatpush2.bf16.msra.mxu1 %v9400_v43  ;;  %v9498_v43 = vld [vmem:[#allocation7 + $0xf6c] ss:$16 sps:$4 sm:$0xff]  }
 0x3e1   :  { %7533 = vmatprep.subr.bf16.mxu1 %v9408_v44  ;;  %v9496_v44 = vld [vmem:[#allocation7 + $0xf68] ss:$16 sps:$4 sm:$0xff]  }
 0x3e2   :  { %7491 = vmatpush2.bf16.msra.mxu0 %v9403_v46  ;;  %v9501_v46 = vld [vmem:[#allocation7 + $0xd4c] ss:$16 sps:$4 sm:$0xff]  }
 0x3e3   :  { %7492 = vmatprep.subr.bf16.mxu0 %v9411_v17  ;;  %v9499_v17 = vld [vmem:[#allocation7 + $0xd48] ss:$16 sps:$4 sm:$0xff]  }
 0x3e4   :  { %7534 = vmatpush2.bf16.msra.mxu1 %v9406_v11  ;;  %v9504_v11 = vld [vmem:[#allocation7 + $0xf4c] ss:$16 sps:$4 sm:$0xff]  }
 0x3e5   :  { %7535 = vmatprep.subr.bf16.mxu1 %v9414_v54  ;;  %v9502_v54 = vld [vmem:[#allocation7 + $0xf48] ss:$16 sps:$4 sm:$0xff]  }
 0x3e6   :  { %7493 = vmatpush2.bf16.msra.mxu0 %v9409_v61  ;;  %v9507_v61 = vld [vmem:[#allocation7 + $0xd2c] ss:$16 sps:$4 sm:$0xff]  }
 0x3e7   :  { %7494 = vmatprep.subr.bf16.mxu0 %v9417_v25  ;;  %v9505_v25 = vld [vmem:[#allocation7 + $0xd28] ss:$16 sps:$4 sm:$0xff]  }
 0x3e8   :  { %7536 = vmatpush2.bf16.msra.mxu1 %v9412_v22  ;;  %v9510_v22 = vld [vmem:[#allocation7 + $0xf2c] ss:$16 sps:$4 sm:$0xff]  }
 0x3e9   :  { %7537 = vmatprep.subr.bf16.mxu1 %v9420_v50  ;;  %v9508_v50 = vld [vmem:[#allocation7 + $0xf28] ss:$16 sps:$4 sm:$0xff]  }
 0x3ea   :  { %7495 = vmatpush2.bf16.msra.mxu0 %v9415_v30  ;;  %v9513_v30 = vld [vmem:[#allocation7 + $0xd0c] ss:$16 sps:$4 sm:$0xff]  }
 0x3eb   :  { %7550 = vmatprep.subr.bf16.mxu0 %v9423_v55  ;;  %v9511_v55 = vld [vmem:[#allocation7 + $0xd08] ss:$16 sps:$4 sm:$0xff]  }
 0x3ec   :  { %7538 = vmatpush2.bf16.msra.mxu1 %v9418_v63  ;;  %v9516_v63 = vld [vmem:[#allocation7 + $0xf0c] ss:$16 sps:$4 sm:$0xff]  }
 0x3ed   :  { %7593 = vmatprep.subr.bf16.mxu1 %v9426_v56  ;;  %7497 = vmatmul.mubr.bf16.vlgmr.msra.gmra.mxu0 %v9755_v15  ;;  %v9436_v15 = vld [vmem:[#allocation7 + $0xea8] ss:$16 sps:$4 sm:$0xff]  }
 0x3ee   :  { %7551 = vmatpush1.bf16.msra.mxu0 %v9421_v33  ;;  %7582 = vmatprep.mubr.bf16.mxu0 %v9805_v47  ;;  %v9442_v47 = vld [vmem:[#allocation7 + $0xe88] ss:$16 sps:$4 sm:$0xff]   ;;  %v6982_v33 = vpop.f32.mrf.mxu0 }
 0x3ef   :  { %7540 = vmatmul.mubr.bf16.vlgmr.msra.gmra.mxu1 %v9781_v53  ;;  %7552 = vmatprep.subr.bf16.mxu0 %v9429_v60  ;;  %v9444_v53 = vld [vmem:[#allocation7 + $0xe8c] ss:$16 sps:$4 sm:$0xff]   ;;  %v9514_v56 = vld [vmem:[#allocation7 + $0xf08] ss:$16 sps:$4 sm:$0xff]  }
 0x3f0   :  { %7594 = vmatpush1.bf16.msra.mxu1 %v9424_v59  ;;  %7625 = vmatprep.mubr.bf16.mxu1 %v9818_v18  ;;  %v9445_v18 = vld [vmem:[#allocation7 + $0xc68] ss:$16 sps:$4 sm:$0xff]   ;;  %v7025_v59 = vpop.f32.mrf.mxu1  ;;  %v6984_v60 = vpop.f32.mrf.mxu0 }
 0x3f1   :  { %7595 = vmatprep.subr.bf16.mxu1 %v9432_v34 }
 0x3f2   :  { %7553 = vmatpush1.bf16.msra.mxu0 %v9427_v2  ;;  %v7027_v34 = vpop.f32.mrf.mxu1  ;;  %v6986_v2 = vpop.f32.mrf.mxu0 }
 0x3f3   :  { %7554 = vmatprep.subr.bf16.mxu0 %v9435_v23 }
 0x3f4   :  { %7596 = vmatpush1.bf16.msra.mxu1 %v9430_v32  ;;  %v7029_v32 = vpop.f32.mrf.mxu1  ;;  %v6988_v23 = vpop.f32.mrf.mxu0 }
 0x3f5   :  { %7597 = vmatprep.subr.bf16.mxu1 %v9438_v62 }
 0x3f6   :  { %7555 = vmatpush1.bf16.msra.mxu0 %v9433_v6  ;;  %v7031_v62 = vpop.f32.mrf.mxu1  ;;  %v7068_v6 = vpop.f32.mrf.mxu0 }
 0x3f7   :  { %7556 = vmatprep.subr.bf16.mxu0 %v9441_v8 }
 0x3f8   :  { %7598 = vmatpush1.bf16.msra.mxu1 %v9436_v15  ;;  %v9845_v15 = vpop.f32.mrf.mxu1  ;;  %v7070_v8 = vpop.f32.mrf.mxu0 }
 0x3f9   :  { %7599 = vmatprep.subr.bf16.mxu1 %v9444_v53 }
 0x3fa   :  { %7557 = vmatpush1.bf16.msra.mxu0 %v9439_v38  ;;  %v7113_v53 = vpop.f32.mrf.mxu1  ;;  %v7072_v38 = vpop.f32.mrf.mxu0 }
 0x3fb   :  { %7558 = vmatprep.subr.bf16.mxu0 %v9447_v9 }
 0x3fc   :  { %7600 = vmatpush1.bf16.msra.mxu1 %v9442_v47  ;;  %v9847_v47 = vpop.f32.mrf.mxu1  ;;  %v7074_v9 = vpop.f32.mrf.mxu0 }
 0x3fd   :  { %7601 = vmatprep.subr.bf16.mxu1 %v9450_v10 }
 0x3fe   :  { %7559 = vmatpush1.bf16.msra.mxu0 %v9445_v18 }
 0x3ff   :  { %7560 = vmatprep.subr.bf16.mxu0 %v9453_v7 }
 0x400   :  { %7602 = vmatpush1.bf16.msra.mxu1 %v9448_v51 }
 0x401   :  { %7603 = vmatprep.subr.bf16.mxu1 %v9456_v12 }
 0x402   :  { %7561 = vmatpush1.bf16.msra.mxu0 %v9451_v57 }
 0x403   :  { %7562 = vmatprep.subr.bf16.mxu0 %v9459_v14 }
 0x404   :  { %7604 = vmatpush1.bf16.msra.mxu1 %v9454_v13 }
 0x405   :  { %7605 = vmatprep.subr.bf16.mxu1 %v9462_v41 }
 0x406   :  { %7563 = vmatpush1.bf16.msra.mxu0 %v9457_v16 }
 0x407   :  { %7564 = vmatprep.subr.bf16.mxu0 %v9465_v24 }
 0x408   :  { %7606 = vmatpush1.bf16.msra.mxu1 %v9460_v21 }
 0x409   :  { %7607 = vmatprep.subr.bf16.mxu1 %v9468_v26 }
 0x40a   :  { %7565 = vmatpush1.bf16.msra.mxu0 %v9463_v28 }
 0x40b   :  { %7566 = vmatprep.subr.bf16.mxu0 %v9471_v29 }
 0x40c   :  { %7608 = vmatpush1.bf16.msra.mxu1 %v9466_v58 }
 0x40d   :  { %7609 = vmatprep.subr.bf16.mxu1 %v9474_v45 }
 0x40e   :  { %7567 = vmatpush2.bf16.msra.mxu0 %v9469_v48 }
 0x40f   :  { %7568 = vmatprep.subr.bf16.mxu0 %v9477_v4 }
 0x410   :  { %7610 = vmatpush2.bf16.msra.mxu1 %v9472_v20 }
 0x411   :  { %7611 = vmatprep.subr.bf16.mxu1 %v9480_v27 }
 0x412   :  { %7569 = vmatpush2.bf16.msra.mxu0 %v9475_v19 }
 0x413   :  { %7570 = vmatprep.subr.bf16.mxu0 %v9483_v31 }
 0x414   :  { %7612 = vmatpush2.bf16.msra.mxu1 %v9478_v3 }
 0x415   :  { %7613 = vmatprep.subr.bf16.mxu1 %v9486_v0 }
 0x416   :  { %7571 = vmatpush2.bf16.msra.mxu0 %v9481_v5  ;;  %v9521_v5 = vld [vmem:[#allocation2 + $0x8] sm:$0xff] }
 0x417   :  { %7572 = vmatprep.subr.bf16.mxu0 %v9489_v37 }
 0x418   :  { %7614 = vmatpush2.bf16.msra.mxu1 %v9484_v36  ;;  %v6985_v36 = vadd.f32 %v9521_v5, %v6984_v60 }
 0x419   :  { %7615 = vmatprep.subr.bf16.mxu1 %v9492_v39 }
 0x41a   :  { %7573 = vmatpush2.bf16.msra.mxu0 %v9487_v40  ;;  %v9522_v40 = vld [vmem:[#allocation2] sm:$0xff] }
 0x41b   :  { %7574 = vmatprep.subr.bf16.mxu0 %v9495_v42  ;;  %v7028_v42 = vadd.f32 %v7027_v34, %v6985_v36 }
 0x41c   :  { %7616 = vmatpush2.bf16.msra.mxu1 %v9490_v49  ;;  %v6983_v49 = vadd.f32 %v9522_v40, %v6982_v33  ;;  %v9527_v40 = vld [vmem:[#allocation2 + $0x30] sm:$0xff] }
 0x41d   :  { %7617 = vmatprep.subr.bf16.mxu1 %v9498_v43 }
 0x41e   :  { %7575 = vmatpush2.bf16.msra.mxu0 %v9493_v52  ;;  %v9523_v52 = vld [vmem:[#allocation2 + $0x28] sm:$0xff] }
 0x41f   :  { %7576 = vmatprep.subr.bf16.mxu0 %v9501_v46 }
 0x420   :  { %7618 = vmatpush2.bf16.msra.mxu1 %v9496_v44  ;;  %v6989_v44 = vadd.f32 %v9523_v52, %v6988_v23 }
 0x421   :  { %7619 = vmatprep.subr.bf16.mxu1 %v9504_v11  ;;  %v7026_v11 = vadd.f32 %v7025_v59, %v6983_v49 }
 0x422   :  { %7577 = vmatpush2.bf16.msra.mxu0 %v9499_v17  ;;  %v9524_v17 = vld [vmem:[#allocation2 + $0x20] sm:$0xff] }
 0x423   :  { %7578 = vmatprep.subr.bf16.mxu0 %v9507_v61  ;;  %v7071_v61 = vadd.f32 %v7070_v8, %v7028_v42 }
 0x424   :  { %7620 = vmatpush2.bf16.msra.mxu1 %v9502_v54  ;;  %v6987_v54 = vadd.f32 %v9524_v17, %v6986_v2 }
 0x425   :  { %7621 = vmatprep.subr.bf16.mxu1 %v9510_v22  ;;  %v9525_v22 = vld [vmem:[#allocation2 + $0x10] sm:$0xff] }
 0x426   :  { %7579 = vmatpush2.bf16.msra.mxu0 %v9505_v25  ;;  %v7030_v5 = vadd.f32 %v7029_v32, %v6987_v54 }
 0x427   :  { %7580 = vmatprep.subr.bf16.mxu0 %v9513_v30 }
 0x428   :  { %7622 = vmatpush2.bf16.msra.mxu1 %v9508_v50  ;;  %v7069_v50 = vadd.f32 %v7068_v6, %v7026_v11  ;;  %v7073_v2 = vadd.f32 %v7072_v38, %v7030_v5 }
 0x429   :  { %7623 = vmatprep.subr.bf16.mxu1 %v9516_v63  ;;  %v7032_v63 = vadd.f32 %v7031_v62, %v6989_v44 }
 0x42a   :  { %7581 = vmatpush2.bf16.msra.mxu0 %v9511_v55  ;;  %v9526_v55 = vld [vmem:[#allocation2 + $0x18] sm:$0xff]  ;;  %v7112_v59 = vadd.f32 %v9845_v15, %v7069_v50 }
 0x42b   :  { %v7075_v34 = vadd.f32 %v7074_v9, %v7032_v63 }
 0x42c   :  { %7624 = vmatpush2.bf16.msra.mxu1 %v9514_v56 }
 0x42d   :  { %7583 = vmatmul.mubr.bf16.vlgmr.msra.gmra.mxu0 %v9801_v35  ;;  %v9849_v35 = vpop.f32.mrf.mxu1 }
 0x42e   :  { %v7118_v32 = vadd.f32 %v9849_v35, %v7075_v34 }
 0x42f   :  { %7626 = vmatmul.mubr.bf16.vlgmr.msra.gmra.mxu1 %v9825_v1  ;;  %v9851_v1 = vpop.f32.mrf.mxu0  ;;  %v9853_v10 = vpop.f32.mrf.mxu1 }
 0x430   :  { %v7155_v62 = vadd.f32 %v9851_v1, %v7112_v59 }
 0x431   :  { %v7156_v18 = vpop.f32.mrf.mxu0  ;;  %v9855_v51 = vpop.f32.mrf.mxu1 }
 0x433   :  { %v9857_v7 = vpop.f32.mrf.mxu0  ;;  %v9859_v12 = vpop.f32.mrf.mxu1 }
 0x435   :  { %v9861_v57 = vpop.f32.mrf.mxu0  ;;  %v9863_v13 = vpop.f32.mrf.mxu1 }
 0x436   :  { %v7161_v15 = vadd.f32 %v9861_v57, %v7118_v32 }
 0x437   :  { %v9865_v14 = vpop.f32.mrf.mxu0  ;;  %v9867_v41 = vpop.f32.mrf.mxu1 }
 0x439   :  { %v9869_v16 = vpop.f32.mrf.mxu0  ;;  %v9871_v21 = vpop.f32.mrf.mxu1 }
 0x43b   :  { %v9873_v24 = vpop.f32.mrf.mxu0  ;;  %v9875_v26 = vpop.f32.mrf.mxu1 }
 0x43c   :  { %9909 = vst [vmem:[#allocation12_spill] sm:$0xff] %v9875_v26  ;;  %v7114_v26 = vadd.f32 %v7113_v53, %v7071_v61 }
 0x43d   :  { %v9877_v28 = vpop.f32.mrf.mxu0  ;;  %v9879_v58 = vpop.f32.mrf.mxu1 }
 0x43e   :  { %v7157_v8 = vadd.f32 %v7156_v18, %v7114_v26 }
 0x43f   :  { %v7326_v29 = vpop.f32.mrf.mxu0  ;;  %v7369_v45 = vpop.f32.mrf.mxu1 }
 0x440   :  { %v7327_v25 = vadd.f32 %v9525_v22, %v7326_v29  ;;  %v9528_v29 = vld [vmem:[#allocation2 + $0x38] sm:$0xff] }
 0x441   :  { %v7328_v48 = vpop.f32.mrf.mxu0  ;;  %v7371_v20 = vpop.f32.mrf.mxu1 }
 0x442   :  { %v7329_v56 = vadd.f32 %v9526_v55, %v7328_v48  ;;  %v7370_v36 = vadd.f32 %v7369_v45, %v7327_v25  ;;  %v7116_v45 = vadd.f32 %v9847_v47, %v7073_v2 }
 0x443   :  { %v7330_v4 = vpop.f32.mrf.mxu0  ;;  %v7373_v27 = vpop.f32.mrf.mxu1 }
 0x444   :  { %v7331_v23 = vadd.f32 %v9527_v40, %v7330_v4  ;;  %v7372_v49 = vadd.f32 %v7371_v20, %v7329_v56  ;;  %v7200_v4 = vadd.f32 %v9855_v51, %v7157_v8  ;;  %v7198_v20 = vadd.f32 %v9853_v10, %v7155_v62 }
 0x445   :  { %v7332_v19 = vpop.f32.mrf.mxu0  ;;  %v7375_v3 = vpop.f32.mrf.mxu1  ;;  %v7204_v51 = vadd.f32 %v9863_v13, %v7161_v15 }
 0x446   :  { %v7333_v6 = vadd.f32 %v9528_v29, %v7332_v19  ;;  %v7374_v53 = vadd.f32 %v7373_v27, %v7331_v23  ;;  %v7159_v19 = vadd.f32 %v9857_v7, %v7116_v45  ;;  %v7243_v1 = vadd.f32 %v9869_v16, %v7200_v4 }
 0x447   :  { %v7241_v47 = vadd.f32 %v9865_v14, %v7198_v20  ;;  %v7247_v7 = vadd.f32 %v9877_v28, %v7204_v51 }
 0x448   :  { %v7376_v38 = vadd.f32 %v7375_v3, %v7333_v6  ;;  %v7202_v3 = vadd.f32 %v9859_v12, %v7159_v19 }
 0x449   :  { %v7284_v61 = vadd.f32 %v9867_v41, %v7241_v47 }
 0x44a   :  { %v7245_v22 = vadd.f32 %v9873_v24, %v7202_v3 }
 0x46d   :  { %v7412_v31 = vpop.f32.mrf.mxu0 }
 0x46e   :  { %v7413_v42 = vadd.f32 %v7412_v31, %v7370_v36 }
 0x46f   :  { %v7455_v0 = vpop.f32.mrf.mxu1  ;;  %v7414_v37 = vpop.f32.mrf.mxu0 }
 0x470   :  { %v7415_v44 = vadd.f32 %v7414_v37, %v7372_v49  ;;  %v7456_v18 = vadd.f32 %v7455_v0, %v7413_v42  ;;  %v7286_v0 = vadd.f32 %v9871_v21, %v7243_v1  ;;  %v7290_v21 = vadd.f32 %v9879_v58, %v7247_v7 }
 0x471   :  { %v7457_v39 = vpop.f32.mrf.mxu1  ;;  %v7416_v43 = vpop.f32.mrf.mxu0 }
 0x472   :  { %v7417_v26 = vadd.f32 %v7416_v43, %v7374_v53  ;;  %v7458_v35 = vadd.f32 %v7457_v39, %v7415_v44 }
 0x473   :  { %v7459_v46 = vpop.f32.mrf.mxu1  ;;  %v7418_v30 = vpop.f32.mrf.mxu0 }
 0x474   :  { %v7419_v27 = vadd.f32 %v7418_v30, %v7376_v38  ;;  %v7460_v17 = vadd.f32 %v7459_v46, %v7417_v26  ;;  %v7636_v30 = vadd.f32 %v7286_v0, %v7284_v61 }
 0x475   :  { %v7461_v60 = vpop.f32.mrf.mxu1 }
 0x476   :  { %v7462_v43 = vadd.f32 %v7461_v60, %v7419_v27  ;;  %v9910_v60 = vld [vmem:[#allocation12_spill] sm:$0xff] }
 0x477   :  { %v7288_v5 = vadd.f32 %v9910_v60, %v7245_v22 }
 0x4ad   :  { %v7498_v33 = vpop.f32.mrf.mxu0 }
 0x4ae   :  { %v7499_v37 = vadd.f32 %v7498_v33, %v7456_v18 }
 0x4af   :  { %v7541_v52 = vpop.f32.mrf.mxu1  ;;  %v7500_v48 = vpop.f32.mrf.mxu0 }
 0x4b0   :  { %v7501_v57 = vadd.f32 %v7500_v48, %v7458_v35  ;;  %v7542_v16 = vadd.f32 %v7541_v52, %v7499_v37  ;;  %v7641_v52 = vadd.f32 %v7290_v21, %v7288_v5 }
 0x4b1   :  { %v7543_v9 = vpop.f32.mrf.mxu1  ;;  %v7502_v31 = vpop.f32.mrf.mxu0 }
 0x4b2   :  { %v7503_v54 = vadd.f32 %v7502_v31, %v7460_v17  ;;  %v7544_v25 = vadd.f32 %v7543_v9, %v7501_v57 }
 0x4b3   :  { %v7545_v11 = vpop.f32.mrf.mxu1  ;;  %v7504_v10 = vpop.f32.mrf.mxu0 }
 0x4b4   :  { %v7505_v13 = vadd.f32 %v7504_v10, %v7462_v43  ;;  %v7546_v63 = vadd.f32 %v7545_v11, %v7503_v54 }
 0x4b5   :  { %v7547_v39 = vpop.f32.mrf.mxu1 }
 0x4b6   :  { %v7548_v34 = vadd.f32 %v7547_v39, %v7505_v13 }
 0x4ed   :  { %v7584_v14 = vpop.f32.mrf.mxu0 }
 0x4ee   :  { %v7585_v46 = vadd.f32 %v7584_v14, %v7542_v16 }
 0x4ef   :  { %v7627_v50 = vpop.f32.mrf.mxu1  ;;  %v7586_v12 = vpop.f32.mrf.mxu0 }
 0x4f0   :  { %v7628_v55 = vadd.f32 %v7627_v50, %v7585_v46  ;;  %v7587_v28 = vadd.f32 %v7586_v12, %v7544_v25 }
 0x4f1   :  { %v7629_v56 = vpop.f32.mrf.mxu1  ;;  %v7588_v33 = vpop.f32.mrf.mxu0 }
 0x4f2   :  { %v7630_v41 = vadd.f32 %v7629_v56, %v7587_v28  ;;  %v7589_v36 = vadd.f32 %v7588_v33, %v7546_v63  ;;  %v7637_v40 = vadd.f32 %v7636_v30, %v7628_v55 }
 0x4f3   :  { %v7631_v24 = vpop.f32.mrf.mxu1  ;;  %v7590_v23 = vpop.f32.mrf.mxu0 }
 0x4f4   :  { %v7632_v59 = vadd.f32 %v7631_v24, %v7589_v36  ;;  %v7591_v2 = vadd.f32 %v7590_v23, %v7548_v34  ;;  %v7638_v8 = vadd.f32 %v7637_v40, %v7630_v41 }
 0x4f5   :  { %v7633_v49 = vpop.f32.mrf.mxu1 }
 0x4f6   :  { %v7642_v29 = vadd.f32 %v7641_v52, %v7632_v59  ;;  %v7634_v58 = vadd.f32 %v7633_v49, %v7591_v2  ;;  %7639 = vadd.xlane.f32.xlu0 %v7638_v8 }
 0x4f8   :  { %v7643_v6 = vadd.f32 %v7642_v29, %v7634_v58 }
 0x4fa   :  { %7644 = vadd.xlane.f32.xlu0 %v7643_v6 }
 0x57f   :  { %v7640_v42 = vpop.xlane.xlu0 %7639 }
 0x580   :  { %v7647_v62 = vmul.f32 0.001953125, %v7640_v42 }
 0x582   :  { %v7649_v48 = vsub.f32 %v7284_v61, %v7647_v62  ;;  %v7650_v32 = vsub.f32 %v7286_v0, %v7647_v62  ;;  %v7651_v53 = vsub.f32 %v7628_v55, %v7647_v62  ;;  %v7652_v9 = vsub.f32 %v7630_v41, %v7647_v62 }
 0x583   :  { %v7645_v44 = vpop.xlane.xlu0 %7644 }
 0x584   :  { %v7648_v45 = vmul.f32 0.001953125, %v7645_v44  ;;  %v7657_v4 = vmul.f32 %v7649_v48, %v7649_v48  ;;  %v7658_v15 = vmul.f32 %v7650_v32, %v7650_v32  ;;  %v7659_v38 = vmul.f32 %v7651_v53, %v7651_v53 }
 0x585   :  { %v7660_v1 = vmul.f32 %v7652_v9, %v7652_v9 }
 0x586   :  { %v7653_v18 = vsub.f32 %v7288_v5, %v7648_v45  ;;  %v7654_v26 = vsub.f32 %v7290_v21, %v7648_v45  ;;  %v7665_v20 = vadd.f32 %v7658_v15, %v7657_v4  ;;  %v7655_v19 = vsub.f32 %v7632_v59, %v7648_v45 }
 0x587   :  { %v7656_v35 = vsub.f32 %v7634_v58, %v7648_v45 }
 0x588   :  { %v7666_v31 = vadd.f32 %v7665_v20, %v7659_v38  ;;  %v7661_v27 = vmul.f32 %v7653_v18, %v7653_v18  ;;  %v7662_v37 = vmul.f32 %v7654_v26, %v7654_v26  ;;  %v7663_v47 = vmul.f32 %v7655_v19, %v7655_v19 }
 0x589   :  { %v7664_v17 = vmul.f32 %v7656_v35, %v7656_v35 }
 0x58a   :  { %v7667_v11 = vadd.f32 %v7666_v31, %v7660_v1  ;;  %v7670_v51 = vadd.f32 %v7662_v37, %v7661_v27 }
 0x58c   :  { %7668 = vadd.xlane.f32.xlu1 %v7667_v11  ;;  %v7671_v57 = vadd.f32 %v7670_v51, %v7663_v47 }
 0x58e   :  { %v7672_v3 = vadd.f32 %v7671_v57, %v7664_v17 }
 0x590   :  { %7673 = vadd.xlane.f32.xlu1 %v7672_v3 }
 0x615   :  { %v7669_v0 = vpop.xlane.xlu1 %7668 }
 0x616   :  { %v7675_v10 = vmul.f32 0.001953125, %v7669_v0 }
 0x618   :  { %v7677_v7 = vadd.f32 1e-05, %v7675_v10 }
 0x619   :  { %v7674_v43 = vpop.xlane.xlu1 %7673 }
 0x61a   :  { %9517 = vrsqrt.f32 %v7677_v7  ;;  %v7676_v16 = vmul.f32 0.001953125, %v7674_v43 }
 0x61c   :  { %v7678_v54 = vadd.f32 1e-05, %v7676_v16 }
 0x61e   :  { %9519 = vrsqrt.f32 %v7678_v54 }
 0x627   :  { %v9518_v39 = vpop.eup %9517 }
 0x628   :  { %v7681_v61 = vmul.f32 %v9518_v39, %v7649_v48  ;;  %v7682_v22 = vmul.f32 %v9518_v39, %v7650_v32  ;;  %v7683_v14 = vmul.f32 %v9518_v39, %v7651_v53  ;;  %v7684_v25 = vmul.f32 %v9518_v39, %v7652_v9 }
 0x62a   :  { %7689 = vst [vmem:[#allocation8] sm:$0xff] %v7681_v61  ;;  %7690 = vst [vmem:[#allocation8 + $0x8] sm:$0xff] %v7682_v22 }
 0x62b   :  { %7691 = vst [vmem:[#allocation8 + $0x10] sm:$0xff] %v7683_v14  ;;  %7692 = vst [vmem:[#allocation8 + $0x18] sm:$0xff] %v7684_v25  ;;  %v9520_v13 = vpop.eup %9519 }
 0x62c   :  { %v7685_v46 = vmul.f32 %v9520_v13, %v7653_v18  ;;  %v7686_v50 = vmul.f32 %v9520_v13, %v7654_v26  ;;  %v7687_v30 = vmul.f32 %v9520_v13, %v7655_v19  ;;  %v7688_v12 = vmul.f32 %v9520_v13, %v7656_v35 }
 0x62e   :  { %7693 = vst [vmem:[#allocation8 + $0x20] sm:$0xff] %v7685_v46  ;;  %7694 = vst [vmem:[#allocation8 + $0x28] sm:$0xff] %v7686_v50 }
 0x62f   :  { %7695 = vst [vmem:[#allocation8 + $0x30] sm:$0xff] %v7687_v30  ;;  %7696 = vst [vmem:[#allocation8 + $0x38] sm:$0xff] %v7688_v12 }
 0x630   :  { %9600 = shalt.err (!%p9597_p5)
}
 0x631   :  { %7708 = dma.vmem_to_hbm [thread:$0]  %s7703_s2, 1024, %s9908_s3, [#allocation4], %s9619_s22, %s9619_s22, %s9620_s23  }
 0x632   :  { %9613 = dma.done.wait [#allocation4], 1024  }
 0x633   :  { %9614 = vsyncadd [#allocation4], 4294966272 }
 0x634   :  { %7712 = vsyncpa [#allocation3], 1 }
 0x635   :  { %7713 = vsyncpa [#allocation6], 1 }
 0x636   :  { %7714 = vsyncpa [#allocation4], 1 }

</bundles_post_ra>
